<compile_context>
chip_gen: v7x
topology: tpu7x:2x2x1
jax: 0.10.0
libtpu: 0.0.40
codegen_flags: <defaults>
</compile_context>

<pallas_src>
import jax
import jax.numpy as jnp
from jax.experimental import pallas as pl
from jax.experimental.pallas import tpu as pltpu

HID1, HID2 = 1024, 128


def _round_up(x, m):
    return (x + m - 1) // m * m


# ---------------------------------------------------------------------------
# Kernel: fused 3-layer MLP.  Matmuls in bf16 on the MXU with f32 accumulation;
# bias-add / ReLU / sigmoid stay in f32 (valid on v5e, which has no bf16 VPU).
# ---------------------------------------------------------------------------
def bpnn_kernel(x_ref, w1_ref, b1_ref, w2_ref, b2_ref, w3_ref, b3_ref, o_ref):
    x = x_ref[...].astype(jnp.bfloat16)

    h1 = jnp.dot(x, w1_ref[...], preferred_element_type=jnp.float32) + b1_ref[...]
    h1 = jnp.maximum(h1, 0.0)                                   # ReLU (f32, VPU)

    h2 = jnp.dot(h1.astype(jnp.bfloat16), w2_ref[...],
                 preferred_element_type=jnp.float32) + b2_ref[...]
    h2 = jnp.maximum(h2, 0.0)                                   # ReLU

    h3 = jnp.dot(h2.astype(jnp.bfloat16), w3_ref[...],
                 preferred_element_type=jnp.float32) + b3_ref[...]

    # Exact sigmoid: exp routes to the EUP slot; the divide is negligible at
    # (tb x 128) and keeps outputs strictly inside [0, 1].
    o_ref[...] = (1.0 / (1.0 + jnp.exp(-h3))).astype(o_ref.dtype)


# ---------------------------------------------------------------------------
# One-time parameter prep (hoisted out of the forward path).
# ---------------------------------------------------------------------------
def prepare_params(params):
    """Cast matmul weights to bf16 and pad the last layer to a lane-dense
    multiple of 128.  Call once per parameter update and reuse the result."""
    w1, b1 = params["w1"], params["b1"]           # (d, 1024), (1, 1024)
    w2, b2 = params["w2"], params["b2"]           # (1024, 128), (1, 128)
    w3, b3 = params["w3"], params["b3"]           # (128, q),   (1, q)
    q = w3.shape[1]
    q_pad = _round_up(q, 128)
    if q_pad != q:
        w3 = jnp.pad(w3, ((0, 0), (0, q_pad - q)))
        b3 = jnp.pad(b3, ((0, 0), (0, q_pad - q)))
    return {
        "w1": w1.astype(jnp.bfloat16), "b1": b1.astype(jnp.float32),
        "w2": w2.astype(jnp.bfloat16), "b2": b2.astype(jnp.float32),
        "w3": w3.astype(jnp.bfloat16), "b3": b3.astype(jnp.float32),
    }
    # TODO(synk): optional fp8 (e4m3) weight path on v7x if the accuracy budget allows.


# ---------------------------------------------------------------------------
# Wrapper
# ---------------------------------------------------------------------------
def _choose_tb(B, tb_max=512):
    """Largest multiple-of-8 batch tile that keeps >= 2 grid blocks when
    possible (v7x megacore sharding) and minimizes last-block waste."""
    if B <= 8:
        return 8
    n_blocks = max(2, pl.cdiv(B, tb_max))
    return _round_up(pl.cdiv(B, n_blocks), 8)


def _vmem_limit_bytes(tb, d, q_pad, weight_buffers):
    wb = 2 if weight_buffers is None else weight_buffers
    weights = 2 * (d * HID1 + HID1 * HID2 + HID2 * q_pad) * wb        # bf16
    biases = 4 * (HID1 + HID2 + q_pad) * wb                           # f32
    io = 2 * tb * d * 4 + 2 * tb * q_pad * 2                          # x / out tiles (dbl-buf)
    interm = tb * (2 * d + 6 * HID1 + 6 * HID2 + 4 * q_pad)           # f32 + bf16 intermediates
    need = weights + biases + io + interm
    try:
        cap = pltpu.get_tpu_info().vmem_capacity_bytes                # per-generation physical VMEM
    except Exception:
        cap = 64 << 20                                                # v7x worst case
    return int(min(max(2 * need, 16 << 20), int(cap * 0.8)))


def _bpnn_call(x, p, q_pad, tb, weight_buffers):
    B, d = x.shape
    grid = (pl.cdiv(B, tb),)          # ragged last block: OOB reads padded, OOB writes masked
    wkw = {} if weight_buffers is None else {"pipeline_mode": pl.Buffered(weight_buffers)}

    def batch_map(i):
        return (i, 0)

    def full_map(i):
        return (0, 0)

    return pl.pallas_call(
        bpnn_kernel,
        out_shape=jax.ShapeDtypeStruct((B, q_pad), jnp.bfloat16),
        grid_spec=pltpu.PrefetchScalarGridSpec(
            num_scalar_prefetch=0,
            grid=grid,
            in_specs=[
                pl.BlockSpec((tb, d), batch_map),                 # x tile (f32)
                pl.BlockSpec(p["w1"].shape, full_map, **wkw),     # w1 (bf16, invariant)
                pl.BlockSpec(p["b1"].shape, full_map, **wkw),     # b1 (f32)
                pl.BlockSpec(p["w2"].shape, full_map, **wkw),     # w2 (bf16)
                pl.BlockSpec(p["b2"].shape, full_map, **wkw),     # b2 (f32)
                pl.BlockSpec(p["w3"].shape, full_map, **wkw),     # w3 (bf16, q padded)
                pl.BlockSpec(p["b3"].shape, full_map, **wkw),     # b3 (f32, q padded)
            ],
            out_specs=pl.BlockSpec((tb, q_pad), batch_map),       # lane-dense bf16 writeback
        ),
        compiler_params=pltpu.CompilerParams(
            dimension_semantics=("parallel",),                    # megacore-shardable on v7x
            vmem_limit_bytes=_vmem_limit_bytes(tb, d, q_pad, weight_buffers),
        ),
    )(x, p["w1"], p["b1"], p["w2"], p["b2"], p["w3"], p["b3"])


# Cache whether this JAX build accepts single-buffered invariant inputs.
_SINGLE_BUFFER_OK = [True]


def bpnn_forward(x, prepared, q, *, tb_max=512):
    """x: (B, d) float32.  prepared: output of prepare_params().  Returns (B, q) f32.

    Call eagerly (the pallas_call is already its own compiled kernel); the
    Buffered(1) fallback below catches lowering errors only in eager mode.
    """
    B, d = x.shape
    q_pad = prepared["w3"].shape[1]
    tb = _choose_tb(B, tb_max)

    if _SINGLE_BUFFER_OK[0]:
        try:
            out = _bpnn_call(x, prepared, q_pad, tb, 1)
        except Exception:
            # pl.Buffered(1) rejected by this build: fall back to the default
            # double-buffered invariant weights (only costs extra VMEM).
            _SINGLE_BUFFER_OK[0] = False
            out = _bpnn_call(x, prepared, q_pad, tb, None)
    else:
        out = _bpnn_call(x, prepared, q_pad, tb, None)

    # Slice off lane padding and restore the module's f32 output dtype.
    return out[:, :q].astype(jnp.float32)


# ---------------------------------------------------------------------------
# Reference + init + self-test
# ---------------------------------------------------------------------------
def init_params(key, d, q):
    """Deterministic init mimicking nn.Linear defaults (U(-1/sqrt(fan_in), +))."""
    def linear(key, fan_in, fan_out):
        kw, kb = jax.random.split(key)
        bound = 1.0 / jnp.sqrt(fan_in)
        w = jax.random.uniform(kw, (fan_in, fan_out), jnp.float32, -bound, bound)
        b = jax.random.uniform(kb, (1, fan_out), jnp.float32, -bound, bound)
        return w, b

    k1, k2, k3 = jax.random.split(key, 3)
    w1, b1 = linear(k1, d, HID1)
    w2, b2 = linear(k2, HID1, HID2)
    w3, b3 = linear(k3, HID2, q)
    return {"w1": w1, "b1": b1, "w2": w2, "b2": b2, "w3": w3, "b3": b3}


def bpnn_reference(x, p):
    h1 = jnp.maximum(x @ p["w1"] + p["b1"], 0.0)
    h2 = jnp.maximum(h1 @ p["w2"] + p["b2"], 0.0)
    return jax.nn.sigmoid(h2 @ p["w3"] + p["b3"])


if __name__ == "__main__":
    d, q = 32, 16
    key = jax.random.PRNGKey(0)
    kx1, kx2, kp = jax.random.split(key, 3)

    params = init_params(kp, d, q)
    prepared = prepare_params(params)      # one-time weight cast/pad (hoisted)

    # Case 1: B=512 -> two clean 256-row blocks (exercises the megacore-shardable path).
    x1 = jax.random.normal(kx1, (512, d), jnp.float32)
    out1 = jax.block_until_ready(bpnn_forward(x1, prepared, q))
    ref1 = bpnn_reference(x1, params)
    assert out1.shape == (512, q)
    assert jnp.allclose(out1, ref1, atol=2e-2, rtol=2e-2), "mismatch vs reference (B=512)"

    # Case 2: ragged batch B=300 -> last grid block is partial (masked OOB rows).
    x2 = jax.random.normal(kx2, (300, d), jnp.float32)
    out2 = jax.block_until_ready(bpnn_forward(x2, prepared, q))
    ref2 = bpnn_reference(x2, params)
    assert out2.shape == (300, q)
    assert jnp.allclose(out2, ref2, atol=2e-2, rtol=2e-2), "mismatch vs reference (B=300)"

    print("KERNEL_OK")
</pallas_src>

<mosaic_0001>
module attributes {stable_mosaic.version = 11 : i64} {
  func.func @bpnn_kernel(%arg0: i32, %arg1: memref<256x32xf32, #tpu.memory_space<vmem>>, %arg2: memref<32x1024xbf16, #tpu.memory_space<vmem>>, %arg3: memref<1x1024xf32, #tpu.memory_space<vmem>>, %arg4: memref<1024x128xbf16, #tpu.memory_space<vmem>>, %arg5: memref<1x128xf32, #tpu.memory_space<vmem>>, %arg6: memref<128x128xbf16, #tpu.memory_space<vmem>>, %arg7: memref<1x128xf32, #tpu.memory_space<vmem>>, %arg8: memref<256x128xbf16, #tpu.memory_space<vmem>>) attributes {dimension_semantics = [#tpu.dimension_semantics<parallel>], iteration_bounds = array<i64: 2>, scalar_prefetch = 0 : i64, scratch_operands = 0 : i64, tpu.core_type = #tpu.core_type<tc>, window_params = [{transform_indices = @transform_0, window_bounds = array<i64: 256, 32>}, {pipeline_mode = #tpu.pipeline_mode<synchronous>, transform_indices = @transform_1, window_bounds = array<i64: 32, 1024>}, {pipeline_mode = #tpu.pipeline_mode<synchronous>, transform_indices = @transform_2, window_bounds = array<i64: 1, 1024>}, {pipeline_mode = #tpu.pipeline_mode<synchronous>, transform_indices = @transform_3, window_bounds = array<i64: 1024, 128>}, {pipeline_mode = #tpu.pipeline_mode<synchronous>, transform_indices = @transform_4, window_bounds = array<i64: 1, 128>}, {pipeline_mode = #tpu.pipeline_mode<synchronous>, transform_indices = @transform_5, window_bounds = array<i64: 128, 128>}, {pipeline_mode = #tpu.pipeline_mode<synchronous>, transform_indices = @transform_6, window_bounds = array<i64: 1, 128>}, {transform_indices = @transform_7, window_bounds = array<i64: 256, 128>}]} {
    %c0 = arith.constant 0 : index
    %c0_0 = arith.constant 0 : index
    %0 = vector.load %arg1[%c0, %c0_0] : memref<256x32xf32, #tpu.memory_space<vmem>>, vector<256x32xf32>
    %1 = arith.truncf %0 : vector<256x32xf32> to vector<256x32xbf16>
    %c0_1 = arith.constant 0 : index
    %c0_2 = arith.constant 0 : index
    %2 = vector.load %arg2[%c0_1, %c0_2] : memref<32x1024xbf16, #tpu.memory_space<vmem>>, vector<32x1024xbf16>
    %cst = arith.constant dense<0.000000e+00> : vector<256x1024xf32>
    %3 = tpu.matmul %1, %2, %cst {dimension_numbers = #tpu.dot_dimension_numbers<[1], [0], [0], [1], [0, 0, 1, 1], [], []>} : vector<256x32xbf16>, vector<32x1024xbf16>, vector<256x1024xf32> -> vector<256x1024xf32>
    %c0_3 = arith.constant 0 : index
    %c0_4 = arith.constant 0 : index
    %4 = vector.load %arg3[%c0_3, %c0_4] : memref<1x1024xf32, #tpu.memory_space<vmem>>, vector<1x1024xf32>
    %5 = vector.broadcast %4 : vector<1x1024xf32> to vector<256x1024xf32>
    %6 = arith.addf %3, %5 : vector<256x1024xf32>
    %cst_5 = arith.constant 0.000000e+00 : f32
    %7 = vector.broadcast %cst_5 : f32 to vector<256x1024xf32>
    %8 = arith.maximumf %6, %7 : vector<256x1024xf32>
    %9 = arith.truncf %8 : vector<256x1024xf32> to vector<256x1024xbf16>
    %c0_6 = arith.constant 0 : index
    %c0_7 = arith.constant 0 : index
    %10 = vector.load %arg4[%c0_6, %c0_7] : memref<1024x128xbf16, #tpu.memory_space<vmem>>, vector<1024x128xbf16>
    %cst_8 = arith.constant dense<0.000000e+00> : vector<256x128xf32>
    %11 = tpu.matmul %9, %10, %cst_8 {dimension_numbers = #tpu.dot_dimension_numbers<[1], [0], [0], [1], [0, 0, 1, 1], [], []>} : vector<256x1024xbf16>, vector<1024x128xbf16>, vector<256x128xf32> -> vector<256x128xf32>
    %c0_9 = arith.constant 0 : index
    %c0_10 = arith.constant 0 : index
    %12 = vector.load %arg5[%c0_9, %c0_10] : memref<1x128xf32, #tpu.memory_space<vmem>>, vector<1x128xf32>
    %13 = vector.broadcast %12 : vector<1x128xf32> to vector<256x128xf32>
    %14 = arith.addf %11, %13 : vector<256x128xf32>
    %cst_11 = arith.constant 0.000000e+00 : f32
    %15 = vector.broadcast %cst_11 : f32 to vector<256x128xf32>
    %16 = arith.maximumf %14, %15 : vector<256x128xf32>
    %17 = arith.truncf %16 : vector<256x128xf32> to vector<256x128xbf16>
    %c0_12 = arith.constant 0 : index
    %c0_13 = arith.constant 0 : index
    %18 = vector.load %arg6[%c0_12, %c0_13] : memref<128x128xbf16, #tpu.memory_space<vmem>>, vector<128x128xbf16>
    %cst_14 = arith.constant dense<0.000000e+00> : vector<256x128xf32>
    %19 = tpu.matmul %17, %18, %cst_14 {dimension_numbers = #tpu.dot_dimension_numbers<[1], [0], [0], [1], [0, 0, 1, 1], [], []>} : vector<256x128xbf16>, vector<128x128xbf16>, vector<256x128xf32> -> vector<256x128xf32>
    %c0_15 = arith.constant 0 : index
    %c0_16 = arith.constant 0 : index
    %20 = vector.load %arg7[%c0_15, %c0_16] : memref<1x128xf32, #tpu.memory_space<vmem>>, vector<1x128xf32>
    %21 = vector.broadcast %20 : vector<1x128xf32> to vector<256x128xf32>
    %22 = arith.addf %19, %21 : vector<256x128xf32>
    %cst_17 = arith.constant 0.000000e+00 : f32
    %23 = vector.broadcast %cst_17 : f32 to vector<256x128xf32>
    %24 = arith.subf %23, %22 : vector<256x128xf32>
    %25 = math.exp %24 : vector<256x128xf32>
    %cst_18 = arith.constant 1.000000e+00 : f32
    %26 = vector.broadcast %cst_18 : f32 to vector<256x128xf32>
    %27 = arith.addf %26, %25 : vector<256x128xf32>
    %cst_19 = arith.constant 1.000000e+00 : f32
    %28 = vector.broadcast %cst_19 : f32 to vector<256x128xf32>
    %29 = arith.divf %28, %27 : vector<256x128xf32>
    %30 = arith.truncf %29 : vector<256x128xf32> to vector<256x128xbf16>
    %c0_20 = arith.constant 0 : index
    %c0_21 = arith.constant 0 : index
    %31 = vector.load %arg8[%c0_20, %c0_21] : memref<256x128xbf16, #tpu.memory_space<vmem>>, vector<256x128xbf16>
    tpu.vector_store %arg8[%c0_20, %c0_21], %30 {strides = array<i32>} : memref<256x128xbf16, #tpu.memory_space<vmem>>, vector<256x128xbf16>,
    return
  }
  func.func @transform_0(%arg0: i32) -> (i32, i32) {
    %c0_i32 = arith.constant 0 : i32
    %c0_i32_0 = arith.constant 0 : i32
    return %arg0, %c0_i32 : i32, i32
  }
  func.func @transform_1(%arg0: i32) -> (i32, i32) {
    %c0_i32 = arith.constant 0 : i32
    %c0_i32_0 = arith.constant 0 : i32
    %c0_i32_1 = arith.constant 0 : i32
    return %c0_i32, %c0_i32_0 : i32, i32
  }
  func.func @transform_2(%arg0: i32) -> (i32, i32) {
    %c0_i32 = arith.constant 0 : i32
    %c0_i32_0 = arith.constant 0 : i32
    %c0_i32_1 = arith.constant 0 : i32
    return %c0_i32, %c0_i32_0 : i32, i32
  }
  func.func @transform_3(%arg0: i32) -> (i32, i32) {
    %c0_i32 = arith.constant 0 : i32
    %c0_i32_0 = arith.constant 0 : i32
    %c0_i32_1 = arith.constant 0 : i32
    return %c0_i32, %c0_i32_0 : i32, i32
  }
  func.func @transform_4(%arg0: i32) -> (i32, i32) {
    %c0_i32 = arith.constant 0 : i32
    %c0_i32_0 = arith.constant 0 : i32
    %c0_i32_1 = arith.constant 0 : i32
    return %c0_i32, %c0_i32_0 : i32, i32
  }
  func.func @transform_5(%arg0: i32) -> (i32, i32) {
    %c0_i32 = arith.constant 0 : i32
    %c0_i32_0 = arith.constant 0 : i32
    %c0_i32_1 = arith.constant 0 : i32
    return %c0_i32, %c0_i32_0 : i32, i32
  }
  func.func @transform_6(%arg0: i32) -> (i32, i32) {
    %c0_i32 = arith.constant 0 : i32
    %c0_i32_0 = arith.constant 0 : i32
    %c0_i32_1 = arith.constant 0 : i32
    return %c0_i32, %c0_i32_0 : i32, i32
  }
  func.func @transform_7(%arg0: i32) -> (i32, i32) {
    %c0_i32 = arith.constant 0 : i32
    %c0_i32_0 = arith.constant 0 : i32
    return %arg0, %c0_i32 : i32, i32
  }
}

module attributes {stable_mosaic.version = 11 : i64} {
  func.func @bpnn_kernel(%arg0: i32, %arg1: memref<256x32xf32, #tpu.memory_space<vmem>>, %arg2: memref<32x1024xbf16, #tpu.memory_space<vmem>>, %arg3: memref<1x1024xf32, #tpu.memory_space<vmem>>, %arg4: memref<1024x128xbf16, #tpu.memory_space<vmem>>, %arg5: memref<1x128xf32, #tpu.memory_space<vmem>>, %arg6: memref<128x128xbf16, #tpu.memory_space<vmem>>, %arg7: memref<1x128xf32, #tpu.memory_space<vmem>>, %arg8: memref<256x128xbf16, #tpu.memory_space<vmem>>) attributes {dimension_semantics = [#tpu.dimension_semantics<parallel>], iteration_bounds = array<i64: 2>, scalar_prefetch = 0 : i64, scratch_operands = 0 : i64, tpu.core_type = #tpu.core_type<tc>, window_params = [{transform_indices = @transform_0, window_bounds = array<i64: 256, 32>}, {pipeline_mode = #tpu.pipeline_mode<synchronous>, transform_indices = @transform_1, window_bounds = array<i64: 32, 1024>}, {pipeline_mode = #tpu.pipeline_mode<synchronous>, transform_indices = @transform_2, window_bounds = array<i64: 1, 1024>}, {pipeline_mode = #tpu.pipeline_mode<synchronous>, transform_indices = @transform_3, window_bounds = array<i64: 1024, 128>}, {pipeline_mode = #tpu.pipeline_mode<synchronous>, transform_indices = @transform_4, window_bounds = array<i64: 1, 128>}, {pipeline_mode = #tpu.pipeline_mode<synchronous>, transform_indices = @transform_5, window_bounds = array<i64: 128, 128>}, {pipeline_mode = #tpu.pipeline_mode<synchronous>, transform_indices = @transform_6, window_bounds = array<i64: 1, 128>}, {transform_indices = @transform_7, window_bounds = array<i64: 256, 128>}]} {
    %c0 = arith.constant 0 : index
    %c0_0 = arith.constant 0 : index
    %0 = vector.load %arg1[%c0, %c0_0] : memref<256x32xf32, #tpu.memory_space<vmem>>, vector<256x32xf32>
    %1 = arith.truncf %0 : vector<256x32xf32> to vector<256x32xbf16>
    %c0_1 = arith.constant 0 : index
    %c0_2 = arith.constant 0 : index
    %2 = vector.load %arg2[%c0_1, %c0_2] : memref<32x1024xbf16, #tpu.memory_space<vmem>>, vector<32x1024xbf16>
    %cst = arith.constant dense<0.000000e+00> : vector<256x1024xf32>
    %3 = tpu.matmul %1, %2, %cst {dimension_numbers = #tpu.dot_dimension_numbers<[1], [0], [0], [1], [0, 0, 1, 1], [], []>} : vector<256x32xbf16>, vector<32x1024xbf16>, vector<256x1024xf32> -> vector<256x1024xf32>
    %c0_3 = arith.constant 0 : index
    %c0_4 = arith.constant 0 : index
    %4 = vector.load %arg3[%c0_3, %c0_4] : memref<1x1024xf32, #tpu.memory_space<vmem>>, vector<1x1024xf32>
    %5 = vector.broadcast %4 : vector<1x1024xf32> to vector<256x1024xf32>
    %6 = arith.addf %3, %5 : vector<256x1024xf32>
    %cst_5 = arith.constant 0.000000e+00 : f32
    %7 = vector.broadcast %cst_5 : f32 to vector<256x1024xf32>
    %8 = arith.maximumf %6, %7 : vector<256x1024xf32>
    %9 = arith.truncf %8 : vector<256x1024xf32> to vector<256x1024xbf16>
    %c0_6 = arith.constant 0 : index
    %c0_7 = arith.constant 0 : index
    %10 = vector.load %arg4[%c0_6, %c0_7] : memref<1024x128xbf16, #tpu.memory_space<vmem>>, vector<1024x128xbf16>
    %cst_8 = arith.constant dense<0.000000e+00> : vector<256x128xf32>
    %11 = tpu.matmul %9, %10, %cst_8 {dimension_numbers = #tpu.dot_dimension_numbers<[1], [0], [0], [1], [0, 0, 1, 1], [], []>} : vector<256x1024xbf16>, vector<1024x128xbf16>, vector<256x128xf32> -> vector<256x128xf32>
    %c0_9 = arith.constant 0 : index
    %c0_10 = arith.constant 0 : index
    %12 = vector.load %arg5[%c0_9, %c0_10] : memref<1x128xf32, #tpu.memory_space<vmem>>, vector<1x128xf32>
    %13 = vector.broadcast %12 : vector<1x128xf32> to vector<256x128xf32>
    %14 = arith.addf %11, %13 : vector<256x128xf32>
    %cst_11 = arith.constant 0.000000e+00 : f32
    %15 = vector.broadcast %cst_11 : f32 to vector<256x128xf32>
    %16 = arith.maximumf %14, %15 : vector<256x128xf32>
    %17 = arith.truncf %16 : vector<256x128xf32> to vector<256x128xbf16>
    %c0_12 = arith.constant 0 : index
    %c0_13 = arith.constant 0 : index
    %18 = vector.load %arg6[%c0_12, %c0_13] : memref<128x128xbf16, #tpu.memory_space<vmem>>, vector<128x128xbf16>
    %cst_14 = arith.constant dense<0.000000e+00> : vector<256x128xf32>
    %19 = tpu.matmul %17, %18, %cst_14 {dimension_numbers = #tpu.dot_dimension_numbers<[1], [0], [0], [1], [0, 0, 1, 1], [], []>} : vector<256x128xbf16>, vector<128x128xbf16>, vector<256x128xf32> -> vector<256x128xf32>
    %c0_15 = arith.constant 0 : index
    %c0_16 = arith.constant 0 : index
    %20 = vector.load %arg7[%c0_15, %c0_16] : memref<1x128xf32, #tpu.memory_space<vmem>>, vector<1x128xf32>
    %21 = vector.broadcast %20 : vector<1x128xf32> to vector<256x128xf32>
    %22 = arith.addf %19, %21 : vector<256x128xf32>
    %cst_17 = arith.constant 0.000000e+00 : f32
    %23 = vector.broadcast %cst_17 : f32 to vector<256x128xf32>
    %24 = arith.subf %23, %22 : vector<256x128xf32>
    %25 = math.exp %24 : vector<256x128xf32>
    %cst_18 = arith.constant 1.000000e+00 : f32
    %26 = vector.broadcast %cst_18 : f32 to vector<256x128xf32>
    %27 = arith.addf %26, %25 : vector<256x128xf32>
    %cst_19 = arith.constant 1.000000e+00 : f32
    %28 = vector.broadcast %cst_19 : f32 to vector<256x128xf32>
    %29 = arith.divf %28, %27 : vector<256x128xf32>
    %30 = arith.truncf %29 : vector<256x128xf32> to vector<256x128xbf16>
    %c0_20 = arith.constant 0 : index
    %c0_21 = arith.constant 0 : index
    %31 = vector.load %arg8[%c0_20, %c0_21] : memref<256x128xbf16, #tpu.memory_space<vmem>>, vector<256x128xbf16>
    tpu.vector_store %arg8[%c0_20, %c0_21], %30 {strides = array<i32>} : memref<256x128xbf16, #tpu.memory_space<vmem>>, vector<256x128xbf16>,
    return
  }
  func.func @transform_0(%arg0: i32) -> (i32, i32) {
    %c0_i32 = arith.constant 0 : i32
    %c0_i32_0 = arith.constant 0 : i32
    return %arg0, %c0_i32 : i32, i32
  }
  func.func @transform_1(%arg0: i32) -> (i32, i32) {
    %c0_i32 = arith.constant 0 : i32
    %c0_i32_0 = arith.constant 0 : i32
    %c0_i32_1 = arith.constant 0 : i32
    return %c0_i32, %c0_i32_0 : i32, i32
  }
  func.func @transform_2(%arg0: i32) -> (i32, i32) {
    %c0_i32 = arith.constant 0 : i32
    %c0_i32_0 = arith.constant 0 : i32
    %c0_i32_1 = arith.constant 0 : i32
    return %c0_i32, %c0_i32_0 : i32, i32
  }
  func.func @transform_3(%arg0: i32) -> (i32, i32) {
    %c0_i32 = arith.constant 0 : i32
    %c0_i32_0 = arith.constant 0 : i32
    %c0_i32_1 = arith.constant 0 : i32
    return %c0_i32, %c0_i32_0 : i32, i32
  }
  func.func @transform_4(%arg0: i32) -> (i32, i32) {
    %c0_i32 = arith.constant 0 : i32
    %c0_i32_0 = arith.constant 0 : i32
    %c0_i32_1 = arith.constant 0 : i32
    return %c0_i32, %c0_i32_0 : i32, i32
  }
  func.func @transform_5(%arg0: i32) -> (i32, i32) {
    %c0_i32 = arith.constant 0 : i32
    %c0_i32_0 = arith.constant 0 : i32
    %c0_i32_1 = arith.constant 0 : i32
    return %c0_i32, %c0_i32_0 : i32, i32
  }
  func.func @transform_6(%arg0: i32) -> (i32, i32) {
    %c0_i32 = arith.constant 0 : i32
    %c0_i32_0 = arith.constant 0 : i32
    %c0_i32_1 = arith.constant 0 : i32
    return %c0_i32, %c0_i32_0 : i32, i32
  }
  func.func @transform_7(%arg0: i32) -> (i32, i32) {
    %c0_i32 = arith.constant 0 : i32
    %c0_i32_0 = arith.constant 0 : i32
    return %arg0, %c0_i32 : i32, i32
  }
}

</mosaic_0001>

<bundles_post_ra>
// kernel: tpu_custom_call.1
= control target key start
LH: loop header
LB: loop body
LE: loop exit
PB: predicated region body
PF: predicated region fallthrough
CT: control target
= control target key end

     0   :  { %12 = vsyncpa [#allocation3], 0  ;;  %s6457_s0 = inlined_call_operand.vmem [shape: f32[512,32], index: 0, kind: input, shape index: {}]   ;;  %s6458_s1 = inlined_call_operand.vmem [shape: bf16[32,1024], index: 1, kind: input, shape index: {}]   ;;  %s6459_s2 = inlined_call_operand.vmem [shape: f32[1,1024], index: 2, kind: input, shape index: {}]   ;;  %s6460_s3 = inlined_call_operand.vmem [shape: bf16[1024,128], index: 3, kind: input, shape index: {}]   ;;  %s6461_s4 = inlined_call_operand.vmem [shape: f32[1,128], index: 4, kind: input, shape index: {}]   ;;  %s6462_s5 = inlined_call_operand.hbm [shape: bf16[128,128], index: 5, kind: input, shape index: {}]   ;;  %s6463_s6 = inlined_call_operand.vmem [shape: f32[1,128], index: 6, kind: input, shape index: {}]   ;;  %s6464_s7 = inlined_call_operand.hbm [shape: bf16[512,128], index: 7, kind: output, shape index: {}]  }
   0x1   :  { %13 = vsyncpa [#allocation4], 0 }
   0x2   :  { %15 = vsyncpa [#allocation4 + $0x1], 0  ;;  %s4821_s24 = smov 0   ;;  %s4823_s25 = smov 0  }
   0x3   :  { %s4825_s26 = smov 0   ;;  %s4827_s27 = smov 0  }
   0x4 LB: > { %s4842_s28 = sadd.s32 4294967295, %s4772_s27   ;;  %s3570_s29 = sadd.s32 4294967294, %s4772_s27   ;;  %s4772_s27 = sphi %s4827_s27, %s6480_s27   ;;  %s4768_s26 = sphi %s4825_s26, %s6479_s26   ;;  %s4764_s25 = sphi %s4823_s25, %s6478_s25   ;;  %s4760_s24 = sphi %s4821_s24, %s6477_s24  }
   0x5   : > { %s4846_s30 = sadd.s32 1, %s4772_s27   ;;  %s180_s8 = sadd.s32 1, %s4768_s26 }
   0x6   : > { %s177_s9 = ssub.s32 %s4772_s27, %s4846_s30  ;;  %p190_p0 = scmp.ne.s32.totalorder %s4768_s26, %s4764_s25 }
   0x7   : > { %p178_p1 = scmp.eq.s32.totalorder %s177_s9, 0  ;;  %p191_p2 = scmp.eq.s32.totalorder %s4842_s28, 1 }
   0x8   : > { %p196_p3 = scmp.ne.s32.totalorder %s4764_s25, %s4760_s24  ;;  %p197_p4 = scmp.eq.s32.totalorder %s3570_s29, 1 }
   0x9   : > { %s4857_s10 = scalar_select %p178_p1, %s4768_s26, %s180_s8  }
   0xa   : > { %p4859_p5 = por %p191_p2, %p190_p0  ;;  %p4863_p6 = por %p197_p4, %p196_p3 }
   0xb   : > { %p3571_p7 = scmp.ge.s32.totalorder %s4772_s27, 1  ;;  %p204_p8 = scmp.lt.s32.totalorder %s4772_s27, 3 }
   0xc   : > { %s6468_s11 = scalar_select %p4859_p5, 1, 0 }
   0xd   : > { %s6469_s12 = scalar_select %p4863_p6, 1, 0 }
   0xe   : > { %p6465_p9 = scmp.eq.s32.totalorder %s4842_s28, 0  ;;  %p4870_p10 = pnand %p3571_p7, %p204_p8 }
   0xf   : > { %s4774_s14 = smov [#allocation2]   ;;  %s4678_s19 = scalar_lea.hbm %s6462_s5, 1024 }
  0x10   : > { %s6470_s13 = scalar_select %p4870_p10, 1, 0 }
  0x11   : > { %s228_s15 = sshll.u32 %s4774_s14, 4  ;;  %p4428_p11 = pneg %p4870_p10  ;;  %s229_s15 = int_to_ptr.vmem [resolvable:$true] %s228_s15 }
  0x12   : > { %p4679_p13 = scmp.ne.s32.totalorder %s6462_s5, %s4678_s19  ;;  %p4685_p3 = scmp.lt.u32.totalorder %s4678_s19, %s6462_s5 }
  0x13   : > { %p4878_p12 = pnand %p6465_p9, %p4428_p11 }
  0x15   : > { %p4680_p0 = pneg %p4878_p12 }
  0x17   : > { %p4681_p1 = pnand %p4680_p0, %p4679_p13 }
  0x19   : > { %p4682_p2 = pneg %p4681_p1 }
  0x1b   : > { %p4687_p4 = pnand %p4685_p3, %p4682_p2 }
  0x1d   : > { %4690 = shalt.err (!%p4687_p4)
}
  0x1e   : > { %s4691_s29 = scalar_lea.vmem %s229_s15, 1024  ;;  %p4699_p9 = scmp.lt.s32.totalorder %s229_s15, %s229_s15 }
  0x1f   : > { %p4692_p7 = scmp.ne.s32.totalorder %s229_s15, %s4691_s29  ;;  %p4700_p6 = scmp.lt.s32.totalorder %s4691_s29, %s4691_s29 }
  0x21   : > { %p4694_p8 = pnand %p4692_p7, %p4680_p0  ;;  %p4701_p5 = por %p4700_p6, %p4699_p9 }
  0x23   : > { %p4695_p11 = pneg %p4694_p8 }
  0x25   : > { %p4702_p10 = pnand %p4701_p5, %p4695_p11 }
  0x27   : > { %4705 = shalt.err (!%p4702_p10)
}
  0x28   : > { %s4775_s8 = smov 64   ;;  %s4776_s9 = smov 4  }
  0x29   : > { %4431 = dma.hbm_to_vmem [thread:$0]  (!%p4878_p12), %s6462_s5, 1024, %s229_s15, [#allocation3], %s4775_s8, %s4775_s8, %s4776_s9  }
  0x2a   : > { %p6472_p13 = scmp.ne.s32.totalorder %s6470_s13, 0 }
  0x2b   : > { %p6473_p1 = scmp.eq.s32.totalorder (!%p6472_p13), %s4842_s28, 0 }
  0x2c   : > { %256 = sbr.rel (%p6472_p13) target bundleno = 1087 (0x43f), region = 48 }
  0x33   : > { %4751 = dma.done.wait (%p6473_p1), [#allocation3], 1024   ;;  %p6474_p0 = pmov %p6473_p1 }
  0x34   : > { %s3577_s18 = sshll.u32 %s4842_s28, 5  ;;  %v4777_v0 = vmov 0   ;;  %v344_v1 = vld [vmem:[%s6458_s1] sm:$0xff]  ;;  %v345_v8 = vld [vmem:[%s6458_s1 + $0x8] sm:$0xff]  ;;  %vm482_vm0 = vcmask 261120   ;;  %v4947_v22 = vld [vmem:[%s6458_s1 + $0x18] sm:$0xff] }
  0x35   : > { %4753 = vsyncadd (%p6474_p0), [#allocation3], 4294966272  ;;  %563 = vmatprep.mubr.bf16.mxu0 %v4777_v0  ;;  %683 = vmatprep.mubr.bf16.mxu1 %v4777_v0  ;;  %p289_p5 = scmp.lt.s32.totalorder %s3577_s18, 63  ;;  %v348_v2 = vld [vmem:[%s6458_s1 + $0x20] sm:$0xff]  ;;  %v349_v10 = vld [vmem:[%s6458_s1 + $0x28] sm:$0xff]  ;;  %s285_s21 = sand.u32 1, %s4764_s25  }
  0x36   : > { %v352_v3 = vld [vmem:[%s6458_s1 + $0x40] sm:$0xff]  ;;  %v3580_v4 = vcombine.high %v344_v1, %v348_v2  ;;  %v3579_v5 = vcombine.low %v344_v1, %v348_v2  ;;  %v3582_v15 = vcombine.high %v345_v8, %v349_v10  ;;  %v353_v16 = vld [vmem:[%s6458_s1 + $0x48] sm:$0xff]  ;;  %v3581_v20 = vcombine.low %v345_v8, %v349_v10  ;;  %v4952_v23 = vld [vmem:[%s6458_s1 + $0x38] sm:$0xff]  ;;  %s3576_s22 = sshll.u32 %s285_s21, 7  ;;  %s3802_s29 = sshll.u32 %s4842_s28, 11 }
  0x37   : > { %s6482_s18 = smov (!%p289_p5, %s3577_s18), 63  ;;  %v356_v6 = vld [vmem:[%s6458_s1 + $0x60] sm:$0xff]  ;;  %v357_v17 = vld [vmem:[%s6458_s1 + $0x68] sm:$0xff]  ;;  %v346_v25 = vld [vmem:[%s6458_s1 + $0x10] sm:$0xff]  ;;  %v3586_v33 = vcombine.high %v4947_v22, %v4952_v23  ;;  %v3585_v58 = vcombine.low %v4947_v22, %v4952_v23  ;;  %s6365_s23 = scalar_lea.vmem [#allocation5], %s3576_s22 }
  0x38   : > { %s3578_s16 = sshll.u32 %s6482_s18, 3  ;;  %v3588_v7 = vcombine.high %v352_v3, %v356_v6  ;;  %531 = vmatprep.subr.bf16.mxu0 %v3580_v4  ;;  %4418 = vmatprep.subr.bf16.mxu1 %v3580_v4  ;;  %v3587_v11 = vcombine.low %v352_v3, %v356_v6  ;;  %v3590_v21 = vcombine.high %v353_v16, %v357_v17  ;;  %v350_v26 = vld [vmem:[%s6458_s1 + $0x30] sm:$0xff]  ;;  %v4477_v54 = vld [vmem:[%s6460_s3 + $0x40] sm:$0xff]   ;;  %v355_v55 = vld [vmem:[%s6458_s1 + $0x58] sm:$0xff]  ;;  %s3496_s9 = sshll.u32 %s6365_s23, 4  ;;  %s6410_s9 = int_to_ptr.vmem [resolvable:$true] %s3496_s9 }
  0x39   : > { %s4919_s8 = scalar_lea.vmem %s6457_s0, %s3578_s16  ;;  %532 = vmatpush1.bf16.msra.mxu0 %v3579_v5  ;;  %4420 = vmatpush1.bf16.msra.mxu1 %v3579_v5  ;;  %v3589_v30 = vcombine.low %v353_v16, %v357_v17  ;;  %v3583_v31 = vcombine.low %v346_v25, %v350_v26  ;;  %v3584_v32 = vcombine.high %v346_v25, %v350_v26  ;;  %v354_v34 = vld [vmem:[%s6458_s1 + $0x50] sm:$0xff]  ;;  %v359_v56 = vld [vmem:[%s6458_s1 + $0x78] sm:$0xff]  ;;  %v4479_v62 = vld [vmem:[%s6460_s3 + $0xc0] sm:$0xff]   ;;  %s6408_s18 = scalar_lea.hbm %s6464_s7, %s3802_s29 }
  0x3a   : > { %v296_v9 = vld [vmem:[%s4919_s8] sm:$0xff]  ;;  %v297_v12 = vld [vmem:[%s4919_s8 + $0x8] sm:$0xff]  ;;  %533 = vmatprep.subr.bf16.mxu0 %v3588_v7  ;;  %4419 = vmatprep.subr.bf16.mxu1 %v3588_v7  ;;  %v298_v24 = vld [vmem:[%s4919_s8 + $0x10] sm:$0xff]  ;;  %v3594_v59 = vcombine.high %v355_v55, %v359_v56  ;;  %v3593_v63 = vcombine.low %v355_v55, %v359_v56  ;;  %s6416_s28 = scalar_lea.sflag [#allocation4], %s285_s21  ;;  %s4706_s16 = scalar_lea.vmem %s6410_s9, 2048 }
  0x3b   : > { %v320_v13 = vld [vmem:[%s4919_s8 + $0xc0] sm:$0xff]  ;;  %v321_v14 = vld [vmem:[%s4919_s8 + $0xc8] sm:$0xff]  ;;  %v4940_v18 = vpack.c.bf16 %v297_v12, %v296_v9  ;;  %v299_v27 = vld [vmem:[%s4919_s8 + $0x18] sm:$0xff]  ;;  %p4707_p6 = scmp.ne.s32.totalorder %s6410_s9, %s4706_s16  ;;  %p6475_p9 = scmp.ne.s32.totalorder %s6468_s11, 0 }
  0x3c   : > { %v4942_v19 = vpack.c.bf16 %v321_v14, %v320_v13  ;;  %v322_v28 = vld [vmem:[%s4919_s8 + $0xd0] sm:$0xff]  ;;  %v323_v29 = vld [vmem:[%s4919_s8 + $0xd8] sm:$0xff]  ;;  %v4975_v35 = vpack.c.bf16 %v299_v27, %v298_v24  ;;  %v300_v40 = vld [vmem:[%s4919_s8 + $0x20] sm:$0xff]  ;;  %s4778_s15 = smov [#allocation5]  }
  0x3d   : > { %534 = vmatpush1.bf16.msra.mxu0 %v3587_v11  ;;  %4421 = vmatpush1.bf16.msra.mxu1 %v3587_v11  ;;  %v4977_v36 = vpack.c.bf16 %v323_v29, %v322_v28  ;;  %v358_v37 = vld [vmem:[%s6458_s1 + $0x70] sm:$0xff]  ;;  %v301_v41 = vld [vmem:[%s4919_s8 + $0x28] sm:$0xff]  ;;  %v324_v42 = vld [vmem:[%s4919_s8 + $0xe0] sm:$0xff]  ;;  %p4708_p10 = pnand %p4707_p6, %p6475_p9  ;;  %s4710_s19 = sshll.u32 %s4778_s15, 4  ;;  %s4711_s19 = int_to_ptr.vmem [resolvable:$false] %s4710_s19 }
  0x3e   : > { %724 = vmatprep.subr.bf16.mxu1 %v3582_v15  ;;  %917 = vmatprep.subr.bf16.mxu0 %v3584_v32  ;;  %v3592_v38 = vcombine.high %v354_v34, %v358_v37  ;;  %v3591_v39 = vcombine.low %v354_v34, %v358_v37  ;;  %v325_v43 = vld [vmem:[%s4919_s8 + $0xe8] sm:$0xff]  ;;  %v4992_v44 = vpack.c.bf16 %v301_v41, %v300_v40  ;;  %v302_v46 = vld [vmem:[%s4919_s8 + $0x30] sm:$0xff]  ;;  %v303_v47 = vld [vmem:[%s4919_s8 + $0x38] sm:$0xff]  ;;  %s4712_s13 = scalar_lea.vmem %s4711_s19, 4096  ;;  %p4713_p2 = scmp.lt.s32.totalorder %s6410_s9, %s4711_s19 }
  0x3f   : > { %v4994_v45 = vpack.c.bf16 %v325_v43, %v324_v42  ;;  %v326_v48 = vld [vmem:[%s4919_s8 + $0xf0] sm:$0xff]  ;;  %v327_v49 = vld [vmem:[%s4919_s8 + $0xf8] sm:$0xff]  ;;  %v5006_v50 = vpack.c.bf16 %v303_v47, %v302_v46  ;;  %v304_v52 = vld [vmem:[%s4919_s8 + $0x40] sm:$0xff]  ;;  %p4709_p12 = pneg %p4708_p10  ;;  %p4714_p3 = scmp.lt.s32.totalorder %s4712_s13, %s4706_s16 }
  0x40   : > { %3595 = vmatmul.mubr.msk.bf16.vlgmr.msra.gmra.mrb[0].mxu0 %vm482_vm0, %v4940_v18  ;;  %3607 = vmatmul.mubr.msk.bf16.vlgmr.msra.gmra.mrb[0].mxu1 %vm482_vm0, %v4942_v19  ;;  %v5008_v51 = vpack.c.bf16 %v327_v49, %v326_v48  ;;  %v305_v53 = vld [vmem:[%s4919_s8 + $0x48] sm:$0xff]  ;;  %v306_v60 = vld [vmem:[%s4919_s8 + $0x50] sm:$0xff]  ;;  %v307_v61 = vld [vmem:[%s4919_s8 + $0x58] sm:$0xff] }
  0x41   : > { %725 = vmatpush1.bf16.msra.mxu1 %v3581_v20  ;;  %573 = vmatprep.mubr.bf16.mxu0 %v4777_v0  ;;  %v5027_v57 = vpack.c.bf16 %v305_v53, %v304_v52  ;;  %v5042_v1 = vpack.c.bf16 %v307_v61, %v306_v60  ;;  %v308_v2 = vld [vmem:[%s4919_s8 + $0x60] sm:$0xff]  ;;  %v309_v3 = vld [vmem:[%s4919_s8 + $0x68] sm:$0xff]  ;;  %v310_v5 = vld [vmem:[%s4919_s8 + $0x70] sm:$0xff]  ;;  %p4715_p4 = por %p4714_p3, %p4713_p2 }
  0x42   : > { %693 = vmatprep.mubr.bf16.mxu1 %v4777_v0  ;;  %726 = vmatprep.subr.bf16.mxu1 %v3590_v21  ;;  %v5052_v4 = vpack.c.bf16 %v309_v3, %v308_v2  ;;  %v311_v6 = vld [vmem:[%s4919_s8 + $0x78] sm:$0xff]  ;;  %v312_v8 = vld [vmem:[%s4919_s8 + $0x80] sm:$0xff]  ;;  %v313_v9 = vld [vmem:[%s4919_s8 + $0x88] sm:$0xff] }
  0x43   : > { %918 = vmatpush1.bf16.msra.mxu0 %v3583_v31  ;;  %v5062_v7 = vpack.c.bf16 %v311_v6, %v310_v5  ;;  %v5072_v10 = vpack.c.bf16 %v313_v9, %v312_v8  ;;  %v314_v11 = vld [vmem:[%s4919_s8 + $0x90] sm:$0xff]  ;;  %v315_v12 = vld [vmem:[%s4919_s8 + $0x98] sm:$0xff]  ;;  %v316_v14 = vld [vmem:[%s4919_s8 + $0xa0] sm:$0xff]  ;;  %p4716_p7 = pnand %p4715_p4, %p4709_p12 }
  0x44   : > { %919 = vmatprep.subr.bf16.mxu0 %v3592_v38  ;;  %v5082_v13 = vpack.c.bf16 %v315_v12, %v314_v11  ;;  %v317_v15 = vld [vmem:[%s4919_s8 + $0xa8] sm:$0xff]  ;;  %v318_v17 = vld [vmem:[%s4919_s8 + $0xb0] sm:$0xff]  ;;  %v319_v20 = vld [vmem:[%s4919_s8 + $0xb8] sm:$0xff] }
  0x45   : > { %727 = vmatpush1.bf16.msra.mxu1 %v3589_v30  ;;  %v5092_v16 = vpack.c.bf16 %v317_v15, %v316_v14  ;;  %v5102_v21 = vpack.c.bf16 %v319_v20, %v318_v17  ;;  %v4478_v22 = vld [vmem:[%s6460_s3] sm:$0xff]   ;;  %v4481_v23 = vld [vmem:[%s6460_s3 + $0x48] sm:$0xff]   ;;  %v4485_v25 = vld [vmem:[%s6460_s3 + $0x50] sm:$0xff]  }
  0x46   : > { %1110 = vmatprep.subr.bf16.mxu1 %v3586_v33  ;;  %v4482_v24 = vld [vmem:[%s6460_s3 + $0x8] sm:$0xff]   ;;  %v4486_v26 = vld [vmem:[%s6460_s3 + $0x10] sm:$0xff]   ;;  %v4489_v27 = vld [vmem:[%s6460_s3 + $0x58] sm:$0xff]  }
  0x47   : > { %920 = vmatpush1.bf16.msra.mxu0 %v3591_v39  ;;  %v4490_v28 = vld [vmem:[%s6460_s3 + $0x18] sm:$0xff]   ;;  %v4491_v29 = vld [vmem:[%s6460_s3 + $0x60] sm:$0xff]   ;;  %v4495_v31 = vld [vmem:[%s6460_s3 + $0x68] sm:$0xff]  }
  0x48   : > { %3596 = vmatmul.mubr.msk.bf16.gmra.mrb[4].mxu0 %vm482_vm0, %v4975_v35  ;;  %3608 = vmatmul.mubr.msk.bf16.gmra.mrb[4].mxu1 %vm482_vm0, %v4977_v36  ;;  %v4493_v30 = vld [vmem:[%s6460_s3 + $0x20] sm:$0xff]   ;;  %v4496_v32 = vld [vmem:[%s6460_s3 + $0x28] sm:$0xff]   ;;  %v4497_v33 = vld [vmem:[%s6460_s3 + $0x70] sm:$0xff]  }
  0x49   : > { %583 = vmatprep.mubr.bf16.mxu0 %v4777_v0  ;;  %703 = vmatprep.mubr.bf16.mxu1 %v4777_v0  ;;  %v4498_v34 = vld [vmem:[%s6460_s3 + $0x30] sm:$0xff]   ;;  %v4499_v37 = vld [vmem:[%s6460_s3 + $0x78] sm:$0xff]   ;;  %v4480_v39 = vld [vmem:[%s6460_s3 + $0x80] sm:$0xff]  }
  0x4a   : > { %3898 = vmatprep.subr.bf16.mxu0 %v4477_v54  ;;  %v4500_v38 = vld [vmem:[%s6460_s3 + $0x38] sm:$0xff]   ;;  %v4483_v40 = vld [vmem:[%s6460_s3 + $0xc8] sm:$0xff]   ;;  %v4487_v42 = vld [vmem:[%s6460_s3 + $0xd0] sm:$0xff]  }
  0x4b   : > { %v4484_v41 = vld [vmem:[%s6460_s3 + $0x88] sm:$0xff]   ;;  %v4509_v43 = vld [vmem:[%s6460_s3 + $0x140] sm:$0xff]   ;;  %v4492_v46 = vld [vmem:[%s6460_s3 + $0xd8] sm:$0xff]  }
  0x4c   : > { %v4494_v47 = vld [vmem:[%s6460_s3 + $0x98] sm:$0xff]   ;;  %v4501_v48 = vld [vmem:[%s6460_s3 + $0xe0] sm:$0xff]   ;;  %v4504_v52 = vld [vmem:[%s6460_s3 + $0xa8] sm:$0xff]  }
  0x4d   : > { %v4502_v49 = vld [vmem:[%s6460_s3 + $0xa0] sm:$0xff]   ;;  %v4505_v53 = vld [vmem:[%s6460_s3 + $0xf0] sm:$0xff]   ;;  %v4508_v55 = vld [vmem:[%s6460_s3 + $0xb8] sm:$0xff]  }
  0x4e   : > { %v4506_v54 = vld [vmem:[%s6460_s3 + $0xb0] sm:$0xff]   ;;  %v4511_v56 = vld [vmem:[%s6460_s3 + $0x1c0] sm:$0xff]  }
  0x50   : > { %3597 = vmatmul.mubr.msk.bf16.gmra.mrb[8].mxu0 %vm482_vm0, %v4992_v44  ;;  %3609 = vmatmul.mubr.msk.bf16.gmra.mrb[8].mxu1 %vm482_vm0, %v4994_v45 }
  0x51   : > { %593 = vmatprep.mubr.bf16.mxu0 %v4777_v0  ;;  %713 = vmatprep.mubr.bf16.mxu1 %v4777_v0 }
  0x58   : > { %3598 = vmatmul.mubr.msk.bf16.gmra.mrb[12].mxu0 %vm482_vm0, %v5006_v50  ;;  %3610 = vmatmul.mubr.msk.bf16.gmra.mrb[12].mxu1 %vm482_vm0, %v5008_v51 }
  0x59   : > { %603 = vmatprep.mubr.bf16.mxu0 %v4777_v0  ;;  %756 = vmatprep.mubr.bf16.mxu1 %v4777_v0 }
  0x60   : > { %3599 = vmatmul.mubr.msk.bf16.gmra.mrb[16].mxu0 %vm482_vm0, %v5027_v57  ;;  %3611 = vmatmul.mubr.msk.bf16.vlgmr.msra.gmra.mrb[16].mxu1 %vm482_vm0, %v4940_v18 }
  0x61   : > { %1111 = vmatpush1.bf16.msra.mxu1 %v3585_v58  ;;  %613 = vmatprep.mubr.bf16.mxu0 %v4777_v0 }
  0x62   : > { %766 = vmatprep.mubr.bf16.mxu1 %v4777_v0  ;;  %1112 = vmatprep.subr.bf16.mxu1 %v3594_v59 }
  0x65   : > { %1113 = vmatpush1.bf16.msra.mxu1 %v3593_v63 }
  0x66   : > { %4010 = vmatprep.subr.bf16.mxu1 %v4479_v62 }
  0x68   : > { %3600 = vmatmul.mubr.msk.bf16.gmra.mrb[20].mxu0 %vm482_vm0, %v5042_v1  ;;  %3612 = vmatmul.mubr.msk.bf16.gmra.mrb[20].mxu1 %vm482_vm0, %v4975_v35 }
  0x69   : > { %623 = vmatprep.mubr.bf16.mxu0 %v4777_v0  ;;  %776 = vmatprep.mubr.bf16.mxu1 %v4777_v0 }
  0x70   : > { %3601 = vmatmul.mubr.msk.bf16.gmra.mrb[24].mxu0 %vm482_vm0, %v5052_v4  ;;  %3613 = vmatmul.mubr.msk.bf16.gmra.mrb[24].mxu1 %vm482_vm0, %v4992_v44 }
  0x71   : > { %633 = vmatprep.mubr.bf16.mxu0 %v4777_v0  ;;  %786 = vmatprep.mubr.bf16.mxu1 %v4777_v0 }
  0x78   : > { %3602 = vmatmul.mubr.msk.bf16.gmra.mrb[28].mxu0 %vm482_vm0, %v5062_v7  ;;  %3614 = vmatmul.mubr.msk.bf16.gmra.mrb[28].mxu1 %vm482_vm0, %v5006_v50 }
  0x79   : > { %643 = vmatprep.mubr.bf16.mxu0 %v4777_v0  ;;  %796 = vmatprep.mubr.bf16.mxu1 %v4777_v0 }
  0x80   : > { %3603 = vmatmul.mubr.msk.bf16.gmra.mrb[32].mxu0 %vm482_vm0, %v5072_v10  ;;  %3615 = vmatmul.mubr.msk.bf16.gmra.mrb[32].mxu1 %vm482_vm0, %v5027_v57 }
  0x81   : > { %653 = vmatprep.mubr.bf16.mxu0 %v4777_v0  ;;  %806 = vmatprep.mubr.bf16.mxu1 %v4777_v0 }
  0x88   : > { %3604 = vmatmul.mubr.msk.bf16.gmra.mrb[36].mxu0 %vm482_vm0, %v5082_v13  ;;  %3616 = vmatmul.mubr.msk.bf16.gmra.mrb[36].mxu1 %vm482_vm0, %v5042_v1 }
  0x89   : > { %663 = vmatprep.mubr.bf16.mxu0 %v4777_v0  ;;  %816 = vmatprep.mubr.bf16.mxu1 %v4777_v0 }
  0x90   : > { %3605 = vmatmul.mubr.msk.bf16.gmra.mrb[40].mxu0 %vm482_vm0, %v5092_v16  ;;  %3617 = vmatmul.mubr.msk.bf16.gmra.mrb[40].mxu1 %vm482_vm0, %v5052_v4 }
  0x91   : > { %673 = vmatprep.mubr.bf16.mxu0 %v4777_v0  ;;  %826 = vmatprep.mubr.bf16.mxu1 %v4777_v0 }
  0x98   : > { %3606 = vmatmul.mubr.msk.bf16.gmra.mrb[44].mxu0 %vm482_vm0, %v5102_v21  ;;  %3618 = vmatmul.mubr.msk.bf16.gmra.mrb[44].mxu1 %vm482_vm0, %v5062_v7 }
  0x99   : > { %836 = vmatprep.mubr.bf16.mxu1 %v4777_v0  ;;  %949 = vmatprep.mubr.bf16.mxu0 %v4777_v0 }
  0xa0   : > { %3619 = vmatmul.mubr.msk.bf16.gmra.mrb[48].mxu1 %vm482_vm0, %v5072_v10  ;;  %3627 = vmatmul.mubr.msk.bf16.vlgmr.msra.gmra.mrb[48].mxu0 %vm482_vm0, %v4940_v18 }
  0xa1   : > { %846 = vmatprep.mubr.bf16.mxu1 %v4777_v0  ;;  %959 = vmatprep.mubr.bf16.mxu0 %v4777_v0 }
  0xa2   : > { %3899 = vmatpush3.bf16.msra.mxu0 %v4478_v22 }
  0xa3   : > { %3900 = vmatprep.subr.bf16.mxu0 %v4481_v23 }
  0xa6   : > { %3901 = vmatpush3.bf16.msra.mxu0 %v4482_v24 }
  0xa7   : > { %3902 = vmatprep.subr.bf16.mxu0 %v4485_v25 }
  0xa8   : > { %3620 = vmatmul.mubr.msk.bf16.gmra.mrb[52].mxu1 %vm482_vm0, %v5082_v13  ;;  %3628 = vmatmul.mubr.msk.bf16.gmra.mrb[52].mxu0 %vm482_vm0, %v4975_v35 }
  0xa9   : > { %856 = vmatprep.mubr.bf16.mxu1 %v4777_v0  ;;  %969 = vmatprep.mubr.bf16.mxu0 %v4777_v0 }
  0xaa   : > { %3903 = vmatpush3.bf16.msra.mxu0 %v4486_v26 }
  0xab   : > { %3904 = vmatprep.subr.bf16.mxu0 %v4489_v27 }
  0xae   : > { %3905 = vmatpush3.bf16.msra.mxu0 %v4490_v28 }
  0xaf   : > { %3906 = vmatprep.subr.bf16.mxu0 %v4491_v29 }
  0xb0   : > { %3621 = vmatmul.mubr.msk.bf16.gmra.mrb[56].mxu1 %vm482_vm0, %v5092_v16  ;;  %3629 = vmatmul.mubr.msk.bf16.gmra.mrb[56].mxu0 %vm482_vm0, %v4992_v44 }
  0xb1   : > { %866 = vmatprep.mubr.bf16.mxu1 %v4777_v0  ;;  %979 = vmatprep.mubr.bf16.mxu0 %v4777_v0 }
  0xb2   : > { %3907 = vmatpush3.bf16.msra.mxu0 %v4493_v30 }
  0xb3   : > { %3908 = vmatprep.subr.bf16.mxu0 %v4495_v31 }
  0xb6   : > { %3909 = vmatpush3.bf16.msra.mxu0 %v4496_v32 }
  0xb7   : > { %3910 = vmatprep.subr.bf16.mxu0 %v4497_v33 }
  0xb8   : > { %3622 = vmatmul.mubr.msk.bf16.gmra.mrb[60].mxu1 %vm482_vm0, %v5102_v21  ;;  %3630 = vmatmul.mubr.msk.bf16.gmra.mrb[60].mxu0 %vm482_vm0, %v5006_v50 }
  0xb9   : > { %876 = vmatprep.mubr.bf16.mxu1 %v4777_v0  ;;  %989 = vmatprep.mubr.bf16.mxu0 %v4777_v0 }
  0xba   : > { %3911 = vmatpush3.bf16.msra.mxu0 %v4498_v34 }
  0xbb   : > { %3912 = vmatprep.subr.bf16.mxu0 %v4499_v37 }
  0xbe   : > { %3913 = vmatpush3.bf16.msra.mxu0 %v4500_v38 }
  0xbf   : > { %4122 = vmatprep.subr.bf16.mxu0 %v4509_v43 }
  0xc0   : > { %3623 = vmatmul.mubr.msk.bf16.gmra.mrb[64].mxu1 %vm482_vm0, %v4942_v19  ;;  %3631 = vmatmul.mubr.msk.bf16.gmra.mrb[64].mxu0 %vm482_vm0, %v5027_v57 }
  0xc1   : > { %886 = vmatprep.mubr.bf16.mxu1 %v4777_v0  ;;  %999 = vmatprep.mubr.bf16.mxu0 %v4777_v0 }
  0xc8   : > { %3624 = vmatmul.mubr.msk.bf16.gmra.mrb[68].mxu1 %vm482_vm0, %v4977_v36  ;;  %3632 = vmatmul.mubr.msk.bf16.gmra.mrb[68].mxu0 %vm482_vm0, %v5042_v1 }
  0xc9   : > { %896 = vmatprep.mubr.bf16.mxu1 %v4777_v0  ;;  %1009 = vmatprep.mubr.bf16.mxu0 %v4777_v0 }
  0xd0   : > { %3625 = vmatmul.mubr.msk.bf16.gmra.mrb[72].mxu1 %vm482_vm0, %v4994_v45  ;;  %3633 = vmatmul.mubr.msk.bf16.gmra.mrb[72].mxu0 %vm482_vm0, %v5052_v4 }
  0xd1   : > { %906 = vmatprep.mubr.bf16.mxu1 %v4777_v0  ;;  %1019 = vmatprep.mubr.bf16.mxu0 %v4777_v0 }
  0xd8   : > { %3626 = vmatmul.mubr.msk.bf16.gmra.mrb[76].mxu1 %vm482_vm0, %v5008_v51  ;;  %3634 = vmatmul.mubr.msk.bf16.gmra.mrb[76].mxu0 %vm482_vm0, %v5062_v7 }
  0xd9   : > { %1029 = vmatprep.mubr.bf16.mxu0 %v4777_v0  ;;  %1142 = vmatprep.mubr.bf16.mxu1 %v4777_v0 }
  0xe0   : > { %3635 = vmatmul.mubr.msk.bf16.gmra.mrb[80].mxu0 %vm482_vm0, %v5072_v10  ;;  %3643 = vmatmul.mubr.msk.bf16.vlgmr.msra.gmra.mrb[80].mxu1 %vm482_vm0, %v4940_v18  ;;  %v4488_v18 = vld [vmem:[%s6460_s3 + $0x90] sm:$0xff]  }
  0xe1   : > { %4011 = vmatpush3.bf16.msra.mxu1 %v4480_v39  ;;  %1039 = vmatprep.mubr.bf16.mxu0 %v4777_v0 }
  0xe2   : > { %1152 = vmatprep.mubr.bf16.mxu1 %v4777_v0  ;;  %4012 = vmatprep.subr.bf16.mxu1 %v4483_v40 }
  0xe5   : > { %4013 = vmatpush3.bf16.msra.mxu1 %v4484_v41 }
  0xe6   : > { %4014 = vmatprep.subr.bf16.mxu1 %v4487_v42 }
  0xe8   : > { %3636 = vmatmul.mubr.msk.bf16.gmra.mrb[84].mxu0 %vm482_vm0, %v5082_v13  ;;  %3644 = vmatmul.mubr.msk.bf16.gmra.mrb[84].mxu1 %vm482_vm0, %v4975_v35  ;;  %v4503_v35 = vld [vmem:[%s6460_s3 + $0xe8] sm:$0xff]  }
  0xe9   : > { %1049 = vmatprep.mubr.bf16.mxu0 %v4777_v0  ;;  %1162 = vmatprep.mubr.bf16.mxu1 %v4777_v0 }
  0xea   : > { %4015 = vmatpush3.bf16.msra.mxu1 %v4488_v18 }
  0xeb   : > { %4016 = vmatprep.subr.bf16.mxu1 %v4492_v46 }
  0xee   : > { %4017 = vmatpush3.bf16.msra.mxu1 %v4494_v47  ;;  %v4510_v47 = vld [vmem:[%s6460_s3 + $0x100] sm:$0xff]  }
  0xef   : > { %4018 = vmatprep.subr.bf16.mxu1 %v4501_v48 }
  0xf0   : > { %3637 = vmatmul.mubr.msk.bf16.gmra.mrb[88].mxu0 %vm482_vm0, %v5092_v16  ;;  %3645 = vmatmul.mubr.msk.bf16.gmra.mrb[88].mxu1 %vm482_vm0, %v4992_v44  ;;  %v4507_v44 = vld [vmem:[%s6460_s3 + $0xf8] sm:$0xff]  }
  0xf1   : > { %1059 = vmatprep.mubr.bf16.mxu0 %v4777_v0  ;;  %1172 = vmatprep.mubr.bf16.mxu1 %v4777_v0 }
  0xf2   : > { %4019 = vmatpush3.bf16.msra.mxu1 %v4502_v49 }
  0xf3   : > { %4020 = vmatprep.subr.bf16.mxu1 %v4503_v35 }
  0xf6   : > { %4021 = vmatpush3.bf16.msra.mxu1 %v4504_v52 }
  0xf7   : > { %4022 = vmatprep.subr.bf16.mxu1 %v4505_v53 }
  0xf8   : > { %3638 = vmatmul.mubr.msk.bf16.gmra.mrb[92].mxu0 %vm482_vm0, %v5102_v21  ;;  %3646 = vmatmul.mubr.msk.bf16.gmra.mrb[92].mxu1 %vm482_vm0, %v5006_v50  ;;  %v362_v50 = vlaneseq }
  0xf9   : > { %1069 = vmatprep.mubr.bf16.mxu0 %v4777_v0  ;;  %1182 = vmatprep.mubr.bf16.mxu1 %v4777_v0 }
  0xfa   : > { %4023 = vmatpush3.bf16.msra.mxu1 %v4506_v54  ;;  %v5288_v58 = vshrl.u32 %v362_v50, 7  ;;  %v4513_v54 = vld [vmem:[%s6460_s3 + $0x148] sm:$0xff]  }
  0xfb   : > { %4024 = vmatprep.subr.bf16.mxu1 %v4507_v44 }
  0xfc   : > { %v364_v59 = vsub.s32 0, %v5288_v58  ;;  %v368_v60 = vsub.s32 1, %v5288_v58 }
  0xfe   : > { %4025 = vmatpush3.bf16.msra.mxu1 %v4508_v55 }
  0xff   : > { %4234 = vmatprep.subr.bf16.mxu1 %v4511_v56 }
 0x100   : > { %3639 = vmatmul.mubr.msk.bf16.gmra.mrb[96].mxu0 %vm482_vm0, %v4942_v19  ;;  %3647 = vmatmul.mubr.msk.bf16.gmra.mrb[96].mxu1 %vm482_vm0, %v5027_v57  ;;  %v5296_v57 = vld [vmem:[%s6459_s2] sm:$0xff] }
 0x101   : > { %1079 = vmatprep.mubr.bf16.mxu0 %v4777_v0  ;;  %1192 = vmatprep.mubr.bf16.mxu1 %v4777_v0  ;;  %v5304_v61 = vrot.slane %v5296_v57, %v364_v59  ;;  %v5307_v62 = vrot.slane %v5296_v57, %v368_v60 }
 0x108   : > { %3640 = vmatmul.mubr.msk.bf16.gmra.mrb[100].mxu0 %vm482_vm0, %v4977_v36  ;;  %3648 = vmatmul.mubr.msk.bf16.gmra.mrb[100].mxu1 %vm482_vm0, %v5042_v1 }
 0x109   : > { %1089 = vmatprep.mubr.bf16.mxu0 %v4777_v0  ;;  %1202 = vmatprep.mubr.bf16.mxu1 %v4777_v0 }
 0x110   : > { %3641 = vmatmul.mubr.msk.bf16.gmra.mrb[104].mxu0 %vm482_vm0, %v4994_v45  ;;  %3649 = vmatmul.mubr.msk.bf16.gmra.mrb[104].mxu1 %vm482_vm0, %v5052_v4 }
 0x111   : > { %1099 = vmatprep.mubr.bf16.mxu0 %v4777_v0  ;;  %1212 = vmatprep.mubr.bf16.mxu1 %v4777_v0 }
 0x113   : > { %v685_v63 = vpop.f32.mrb[0].mxu1  ;;  %v565_v1 = vpop.f32.mrb[0].mxu0 }
 0x114   : > { %v686_v2 = vadd.f32 %v685_v63, %v5304_v61  ;;  %v687_v3 = vpop.f32.mrb[1].mxu1  ;;  %v566_v5 = vadd.f32 %v565_v1, %v5304_v61  ;;  %v567_v6 = vpop.f32.mrb[1].mxu0 }
 0x115   : > { %v688_v4 = vadd.f32 %v687_v3, %v5307_v62  ;;  %v689_v8 = vpop.f32.mrb[2].mxu1  ;;  %v568_v9 = vadd.f32 %v567_v6, %v5307_v62  ;;  %v569_v11 = vpop.f32.mrb[2].mxu0  ;;  %v4514_v3 = vld [vmem:[%s6460_s3 + $0x108] sm:$0xff]   ;;  %v4517_v6 = vld [vmem:[%s6460_s3 + $0x150] sm:$0xff]  }
 0x116   : > { %v1303_v12 = vmax.f32 %v566_v5, 0.0  ;;  %v690_v14 = vadd.f32 %v689_v8, %v5304_v61  ;;  %v691_v15 = vpop.f32.mrb[3].mxu1  ;;  %v570_v17 = vadd.f32 %v569_v11, %v5304_v61  ;;  %v571_v20 = vpop.f32.mrb[3].mxu0  ;;  %v1495_v25 = vmax.f32 %v686_v2, 0.0 }
 0x117   : > { %v1304_v22 = vmax.f32 %v568_v9, 0.0  ;;  %v692_v23 = vadd.f32 %v691_v15, %v5307_v62  ;;  %v572_v24 = vadd.f32 %v571_v20, %v5307_v62  ;;  %v1496_v28 = vmax.f32 %v688_v4, 0.0 }
 0x118   : > { %v1503_v26 = vmax.f32 %v690_v14, 0.0  ;;  %v1311_v27 = vmax.f32 %v570_v17, 0.0  ;;  %3642 = vmatmul.mubr.msk.bf16.gmra.mrb[108].mxu0 %vm482_vm0, %v5008_v51  ;;  %3650 = vmatmul.mubr.msk.bf16.gmra.mrb[108].mxu1 %vm482_vm0, %v5062_v7 }
 0x119   : > { %v1504_v29 = vmax.f32 %v692_v23, 0.0  ;;  %v1312_v30 = vmax.f32 %v572_v24, 0.0  ;;  %1222 = vmatprep.mubr.bf16.mxu1 %v4777_v0 }
 0x11a   : > { %v1559_v31 = vpack.c.bf16 %v1311_v27, %v1303_v12  ;;  %v5324_v32 = vpack.c.bf16 %v1503_v26, %v1495_v25  ;;  %v4518_v25 = vld [vmem:[%s6460_s3 + $0x110] sm:$0xff]  }
 0x11b   : > { %v695_v33 = vpop.f32.mrb[4].mxu1  ;;  %v575_v34 = vpop.f32.mrb[4].mxu0  ;;  %v1560_v37 = vpack.c.bf16 %v1312_v30, %v1304_v22  ;;  %v5326_v38 = vpack.c.bf16 %v1504_v29, %v1496_v28 }
 0x11c   : > { %v696_v39 = vadd.f32 %v695_v33, %v5304_v61  ;;  %v697_v40 = vpop.f32.mrb[5].mxu1  ;;  %v576_v41 = vadd.f32 %v575_v34, %v5304_v61  ;;  %v577_v42 = vpop.f32.mrb[5].mxu0 }
 0x11d   : > { %v698_v7 = vadd.f32 %v697_v40, %v5307_v62  ;;  %v699_v43 = vpop.f32.mrb[6].mxu1  ;;  %v578_v18 = vadd.f32 %v577_v42, %v5307_v62  ;;  %v579_v46 = vpop.f32.mrb[6].mxu0  ;;  %2238 = vmatprep.mubr.bf16.mxu0 %v1560_v37 }
 0x11e   : > { %v1319_v48 = vmax.f32 %v576_v41, 0.0  ;;  %v700_v49 = vadd.f32 %v699_v43, %v5304_v61  ;;  %v701_v35 = vpop.f32.mrb[7].mxu1  ;;  %v580_v52 = vadd.f32 %v579_v46, %v5304_v61  ;;  %v581_v53 = vpop.f32.mrb[7].mxu0  ;;  %v1511_v50 = vmax.f32 %v696_v39, 0.0 }
 0x11f   : > { %v1320_v44 = vmax.f32 %v578_v18, 0.0  ;;  %v702_v55 = vadd.f32 %v701_v35, %v5307_v62  ;;  %v582_v56 = vadd.f32 %v581_v53, %v5307_v62  ;;  %v1512_v63 = vmax.f32 %v698_v7, 0.0  ;;  %v4522_v18 = vld [vmem:[%s6460_s3 + $0x118] sm:$0xff]  }
 0x120   : > { %v1519_v59 = vmax.f32 %v700_v49, 0.0  ;;  %v1327_v60 = vmax.f32 %v580_v52, 0.0  ;;  %3651 = vmatmul.mubr.msk.bf16.gmra.mrb[112].mxu1 %vm482_vm0, %v5072_v10  ;;  %2239 = vmatmul.mubr.bf16.vlgmr.msra.gmra.mrb[112].mxu0 %v1559_v31  ;;  %v4521_v31 = vld [vmem:[%s6460_s3 + $0x158] sm:$0xff]  }
 0x121   : > { %v1520_v1 = vmax.f32 %v702_v55, 0.0  ;;  %v1328_v2 = vmax.f32 %v582_v56, 0.0  ;;  %1232 = vmatprep.mubr.bf16.mxu1 %v4777_v0  ;;  %4123 = vmatpush3.bf16.msra.mxu0 %v4510_v47  ;;  %v372_v56 = vsub.s32 2, %v5288_v58 }
 0x122   : > { %v1567_v5 = vpack.c.bf16 %v1327_v60, %v1319_v48  ;;  %4124 = vmatprep.subr.bf16.mxu0 %v4513_v54  ;;  %v5351_v4 = vpack.c.bf16 %v1519_v59, %v1511_v50  ;;  %v4523_v48 = vld [vmem:[%s6460_s3 + $0x160] sm:$0xff]  }
 0x123   : > { %v705_v10 = vpop.f32.mrb[8].mxu1  ;;  %v585_v8 = vpop.f32.mrb[8].mxu0  ;;  %v1568_v9 = vpack.c.bf16 %v1328_v2, %v1320_v44  ;;  %v5353_v11 = vpack.c.bf16 %v1520_v1, %v1512_v63  ;;  %v376_v1 = vsub.s32 3, %v5288_v58  ;;  %v4525_v2 = vld [vmem:[%s6460_s3 + $0x120] sm:$0xff]  }
 0x124   : > { %v706_v12 = vadd.f32 %v705_v10, %v5304_v61  ;;  %v707_v14 = vpop.f32.mrb[9].mxu1  ;;  %v586_v15 = vadd.f32 %v585_v8, %v5304_v61  ;;  %v587_v17 = vpop.f32.mrb[9].mxu0 }
 0x125   : > { %v708_v20 = vadd.f32 %v707_v14, %v5307_v62  ;;  %v709_v22 = vpop.f32.mrb[10].mxu1  ;;  %v588_v23 = vadd.f32 %v587_v17, %v5307_v62  ;;  %v589_v24 = vpop.f32.mrb[10].mxu0  ;;  %2246 = vmatprep.mubr.bf16.mxu0 %v1568_v9  ;;  %4125 = vmatpush3.bf16.msra.mxu0 %v4514_v3  ;;  %v4527_v9 = vld [vmem:[%s6460_s3 + $0x168] sm:$0xff]  }
 0x126   : > { %v1335_v26 = vmax.f32 %v586_v15, 0.0  ;;  %v710_v27 = vadd.f32 %v709_v22, %v5304_v61  ;;  %v711_v28 = vpop.f32.mrb[11].mxu1  ;;  %v590_v29 = vadd.f32 %v589_v24, %v5304_v61  ;;  %v591_v30 = vpop.f32.mrb[11].mxu0  ;;  %4126 = vmatprep.subr.bf16.mxu0 %v4517_v6  ;;  %v1527_v39 = vmax.f32 %v706_v12, 0.0 }
 0x127   : > { %v1336_v33 = vmax.f32 %v588_v23, 0.0  ;;  %v712_v34 = vadd.f32 %v711_v28, %v5307_v62  ;;  %v592_v37 = vadd.f32 %v591_v30, %v5307_v62  ;;  %v1528_v42 = vmax.f32 %v708_v20, 0.0  ;;  %v4528_v28 = vld [vmem:[%s6460_s3 + $0x128] sm:$0xff]   ;;  %v4529_v30 = vld [vmem:[%s6460_s3 + $0x170] sm:$0xff]  }
 0x128   : > { %v1535_v40 = vmax.f32 %v710_v27, 0.0  ;;  %v1343_v41 = vmax.f32 %v590_v29, 0.0  ;;  %3652 = vmatmul.mubr.msk.bf16.gmra.mrb[116].mxu1 %vm482_vm0, %v5082_v13  ;;  %2247 = vmatmul.mubr.bf16.gmra.mrb[116].mxu0 %v1567_v5  ;;  %v5401_v23 = vrot.slane %v5296_v57, %v372_v56  ;;  %v5404_v27 = vrot.slane %v5296_v57, %v376_v1 }
 0x129   : > { %v1536_v7 = vmax.f32 %v712_v34, 0.0  ;;  %v1344_v43 = vmax.f32 %v592_v37, 0.0  ;;  %1242 = vmatprep.mubr.bf16.mxu1 %v4777_v0  ;;  %4127 = vmatpush3.bf16.msra.mxu0 %v4518_v25 }
 0x12a   : > { %v1575_v46 = vpack.c.bf16 %v1343_v41, %v1335_v26  ;;  %4128 = vmatprep.subr.bf16.mxu0 %v4521_v31  ;;  %v5375_v47 = vpack.c.bf16 %v1535_v40, %v1527_v39 }
 0x12b   : > { %v715_v13 = vpop.f32.mrb[12].mxu1  ;;  %v595_v49 = vpop.f32.mrb[12].mxu0  ;;  %v1576_v35 = vpack.c.bf16 %v1344_v43, %v1336_v33  ;;  %v5380_v52 = vpack.c.bf16 %v1536_v7, %v1528_v42 }
 0x12c   : > { %v716_v53 = vadd.f32 %v715_v13, %v5304_v61  ;;  %v717_v54 = vpop.f32.mrb[13].mxu1  ;;  %v596_v44 = vadd.f32 %v595_v49, %v5304_v61  ;;  %v597_v55 = vpop.f32.mrb[13].mxu0 }
 0x12d   : > { %v718_v50 = vadd.f32 %v717_v54, %v5307_v62  ;;  %v719_v59 = vpop.f32.mrb[14].mxu1  ;;  %v598_v60 = vadd.f32 %v597_v55, %v5307_v62  ;;  %v599_v63 = vpop.f32.mrb[14].mxu0  ;;  %2254 = vmatprep.mubr.bf16.mxu0 %v1576_v35  ;;  %4129 = vmatpush3.bf16.msra.mxu0 %v4522_v18 }
 0x12e   : > { %v1351_v3 = vmax.f32 %v596_v44, 0.0  ;;  %v720_v5 = vadd.f32 %v719_v59, %v5304_v61  ;;  %v721_v6 = vpop.f32.mrb[15].mxu1  ;;  %v600_v10 = vadd.f32 %v599_v63, %v5304_v61  ;;  %v601_v8 = vpop.f32.mrb[15].mxu0  ;;  %4130 = vmatprep.subr.bf16.mxu0 %v4523_v48  ;;  %v1543_v17 = vmax.f32 %v716_v53, 0.0  ;;  %v4530_v48 = vld [vmem:[%s6460_s3 + $0x130] sm:$0xff]   ;;  %v4531_v44 = vld [vmem:[%s6460_s3 + $0x178] sm:$0xff]  }
 0x12f   : > { %v1352_v12 = vmax.f32 %v598_v60, 0.0  ;;  %v722_v14 = vadd.f32 %v721_v6, %v5307_v62  ;;  %v602_v15 = vadd.f32 %v601_v8, %v5307_v62  ;;  %v1544_v24 = vmax.f32 %v718_v50, 0.0 }
 0x130   : > { %v1551_v20 = vmax.f32 %v720_v5, 0.0  ;;  %v1359_v22 = vmax.f32 %v600_v10, 0.0  ;;  %3653 = vmatmul.mubr.msk.bf16.gmra.mrb[120].mxu1 %vm482_vm0, %v5092_v16  ;;  %2255 = vmatmul.mubr.bf16.gmra.mrb[120].mxu0 %v1575_v46  ;;  %v4532_v5 = vld [vmem:[%s6460_s3 + $0x138] sm:$0xff]  }
 0x131   : > { %v1552_v25 = vmax.f32 %v722_v14, 0.0  ;;  %v1360_v26 = vmax.f32 %v602_v15, 0.0  ;;  %1252 = vmatprep.mubr.bf16.mxu1 %v4777_v0  ;;  %4131 = vmatpush3.bf16.msra.mxu0 %v4525_v2 }
 0x132   : > { %v1583_v29 = vpack.c.bf16 %v1359_v22, %v1351_v3  ;;  %4132 = vmatprep.subr.bf16.mxu0 %v4527_v9  ;;  %v5410_v16 = vpack.c.bf16 %v1551_v20, %v1543_v17 }
 0x133   : > { %v758_v31 = vpop.f32.mrb[16].mxu1  ;;  %v605_v33 = vpop.f32.mrb[16].mxu0  ;;  %v1584_v34 = vpack.c.bf16 %v1360_v26, %v1352_v12  ;;  %v5415_v37 = vpack.c.bf16 %v1552_v25, %v1544_v24 }
 0x134   : > { %v759_v39 = vadd.f32 %v758_v31, %v5401_v23  ;;  %v760_v40 = vpop.f32.mrb[17].mxu1  ;;  %v606_v41 = vadd.f32 %v605_v33, %v5304_v61  ;;  %v607_v42 = vpop.f32.mrb[17].mxu0 }
 0x135   : > { %v761_v7 = vadd.f32 %v760_v40, %v5404_v27  ;;  %v762_v43 = vpop.f32.mrb[18].mxu1  ;;  %v608_v18 = vadd.f32 %v607_v42, %v5307_v62  ;;  %v609_v46 = vpop.f32.mrb[18].mxu0  ;;  %2262 = vmatprep.mubr.bf16.mxu0 %v1584_v34  ;;  %4133 = vmatpush3.bf16.msra.mxu0 %v4528_v28 }
 0x136   : > { %v1367_v13 = vmax.f32 %v606_v41, 0.0  ;;  %v763_v49 = vadd.f32 %v762_v43, %v5401_v23  ;;  %v764_v35 = vpop.f32.mrb[19].mxu1  ;;  %v610_v53 = vadd.f32 %v609_v46, %v5304_v61  ;;  %v611_v54 = vpop.f32.mrb[19].mxu0  ;;  %4134 = vmatprep.subr.bf16.mxu0 %v4529_v30  ;;  %v1305_v59 = vmax.f32 %v759_v39, 0.0 }
 0x137   : > { %v1368_v55 = vmax.f32 %v608_v18, 0.0  ;;  %v765_v56 = vadd.f32 %v764_v35, %v5404_v27  ;;  %v612_v50 = vadd.f32 %v611_v54, %v5307_v62  ;;  %v1306_v1 = vmax.f32 %v761_v7, 0.0 }
 0x138   : > { %v1313_v60 = vmax.f32 %v763_v49, 0.0  ;;  %v1375_v63 = vmax.f32 %v610_v53, 0.0  ;;  %3654 = vmatmul.mubr.msk.bf16.gmra.mrb[124].mxu1 %vm482_vm0, %v5102_v21  ;;  %2263 = vmatmul.mubr.bf16.gmra.mrb[124].mxu0 %v1583_v29 }
 0x139   : > { %v1314_v2 = vmax.f32 %v765_v56, 0.0  ;;  %v1376_v3 = vmax.f32 %v612_v50, 0.0  ;;  %1262 = vmatprep.mubr.bf16.mxu1 %v4777_v0  ;;  %4135 = vmatpush3.bf16.msra.mxu0 %v4530_v48 }
 0x13a   : > { %v5437_v6 = vpack.c.bf16 %v1313_v60, %v1305_v59  ;;  %v1591_v10 = vpack.c.bf16 %v1375_v63, %v1367_v13  ;;  %4136 = vmatprep.subr.bf16.mxu0 %v4531_v44 }
 0x13b   : > { %v5439_v8 = vpack.c.bf16 %v1314_v2, %v1306_v1  ;;  %v1592_v9 = vpack.c.bf16 %v1376_v3, %v1368_v55  ;;  %v768_v12 = vpop.f32.mrb[20].mxu1  ;;  %v615_v21 = vpop.f32.mrb[20].mxu0 }
 0x13c   : > { %v769_v14 = vadd.f32 %v768_v12, %v5401_v23  ;;  %v770_v15 = vpop.f32.mrb[21].mxu1  ;;  %v616_v17 = vadd.f32 %v615_v21, %v5304_v61  ;;  %v617_v20 = vpop.f32.mrb[21].mxu0 }
 0x13d   : > { %v771_v22 = vadd.f32 %v770_v15, %v5404_v27  ;;  %v772_v24 = vpop.f32.mrb[22].mxu1  ;;  %v618_v25 = vadd.f32 %v617_v20, %v5307_v62  ;;  %v619_v26 = vpop.f32.mrb[22].mxu0  ;;  %2270 = vmatprep.mubr.bf16.mxu0 %v1592_v9  ;;  %4137 = vmatpush3.bf16.msra.mxu0 %v4532_v5 }
 0x13e   : > { %v1383_v28 = vmax.f32 %v616_v17, 0.0  ;;  %v773_v29 = vadd.f32 %v772_v24, %v5401_v23  ;;  %v774_v30 = vpop.f32.mrb[23].mxu1  ;;  %v620_v31 = vadd.f32 %v619_v26, %v5304_v61  ;;  %v621_v33 = vpop.f32.mrb[23].mxu0  ;;  %v1321_v41 = vmax.f32 %v769_v14, 0.0 }
 0x13f   : > { %v1384_v34 = vmax.f32 %v618_v25, 0.0  ;;  %v775_v39 = vadd.f32 %v774_v30, %v5404_v27  ;;  %v622_v40 = vadd.f32 %v621_v33, %v5307_v62  ;;  %v1322_v43 = vmax.f32 %v771_v22, 0.0 }
 0x140   : > { %v1329_v42 = vmax.f32 %v773_v29, 0.0  ;;  %v1391_v7 = vmax.f32 %v620_v31, 0.0  ;;  %3655 = vmatmul.mubr.msk.bf16.gmra.mrb[128].mxu1 %vm482_vm0, %v4942_v19  ;;  %2271 = vmatmul.mubr.bf16.gmra.mrb[128].mxu0 %v1591_v10 }
 0x141   : > { %v1330_v18 = vmax.f32 %v775_v39, 0.0  ;;  %v1392_v46 = vmax.f32 %v622_v40, 0.0  ;;  %1272 = vmatprep.mubr.bf16.mxu1 %v4777_v0 }
 0x142   : > { %v5452_v48 = vpack.c.bf16 %v1329_v42, %v1321_v41  ;;  %v1599_v13 = vpack.c.bf16 %v1391_v7, %v1383_v28 }
 0x143   : > { %v5454_v49 = vpack.c.bf16 %v1330_v18, %v1322_v43  ;;  %v1600_v35 = vpack.c.bf16 %v1392_v46, %v1384_v34  ;;  %v778_v53 = vpop.f32.mrb[24].mxu1  ;;  %v625_v54 = vpop.f32.mrb[24].mxu0 }
 0x144   : > { %v779_v44 = vadd.f32 %v778_v53, %v5401_v23  ;;  %v780_v55 = vpop.f32.mrb[25].mxu1  ;;  %v626_v56 = vadd.f32 %v625_v54, %v5304_v61  ;;  %v627_v19 = vpop.f32.mrb[25].mxu0 }
 0x145   : > { %v781_v50 = vadd.f32 %v780_v55, %v5404_v27  ;;  %v782_v59 = vpop.f32.mrb[26].mxu1  ;;  %v628_v60 = vadd.f32 %v627_v19, %v5307_v62  ;;  %v629_v63 = vpop.f32.mrb[26].mxu0  ;;  %2278 = vmatprep.mubr.bf16.mxu0 %v1600_v35 }
 0x146   : > { %v1399_v1 = vmax.f32 %v626_v56, 0.0  ;;  %v783_v2 = vadd.f32 %v782_v59, %v5401_v23  ;;  %v784_v3 = vpop.f32.mrb[27].mxu1  ;;  %v630_v5 = vadd.f32 %v629_v63, %v5304_v61  ;;  %v631_v10 = vpop.f32.mrb[27].mxu0  ;;  %v1337_v14 = vmax.f32 %v779_v44, 0.0 }
 0x147   : > { %v1400_v9 = vmax.f32 %v628_v60, 0.0  ;;  %v785_v12 = vadd.f32 %v784_v3, %v5404_v27  ;;  %v632_v21 = vadd.f32 %v631_v10, %v5307_v62  ;;  %v1338_v20 = vmax.f32 %v781_v50, 0.0 }
 0x148   : > { %v1345_v15 = vmax.f32 %v783_v2, 0.0  ;;  %v1407_v17 = vmax.f32 %v630_v5, 0.0  ;;  %3656 = vmatmul.mubr.msk.bf16.gmra.mrb[132].mxu1 %vm482_vm0, %v4977_v36  ;;  %2279 = vmatmul.mubr.bf16.gmra.mrb[132].mxu0 %v1599_v13 }
 0x149   : > { %v1346_v22 = vmax.f32 %v785_v12, 0.0  ;;  %v1408_v24 = vmax.f32 %v632_v21, 0.0  ;;  %1282 = vmatprep.mubr.bf16.mxu1 %v4777_v0 }
 0x14a   : > { %v5467_v25 = vpack.c.bf16 %v1345_v15, %v1337_v14  ;;  %v1607_v26 = vpack.c.bf16 %v1407_v17, %v1399_v1 }
 0x14b   : > { %v5469_v28 = vpack.c.bf16 %v1346_v22, %v1338_v20  ;;  %v1608_v29 = vpack.c.bf16 %v1408_v24, %v1400_v9  ;;  %v788_v30 = vpop.f32.mrb[28].mxu1  ;;  %v635_v31 = vpop.f32.mrb[28].mxu0 }
 0x14c   : > { %v789_v33 = vadd.f32 %v788_v30, %v5401_v23  ;;  %v790_v34 = vpop.f32.mrb[29].mxu1  ;;  %v636_v39 = vadd.f32 %v635_v31, %v5304_v61  ;;  %v637_v36 = vpop.f32.mrb[29].mxu0 }
 0x14d   : > { %v791_v40 = vadd.f32 %v790_v34, %v5404_v27  ;;  %v792_v41 = vpop.f32.mrb[30].mxu1  ;;  %v638_v42 = vadd.f32 %v637_v36, %v5307_v62  ;;  %v639_v7 = vpop.f32.mrb[30].mxu0  ;;  %2286 = vmatprep.mubr.bf16.mxu0 %v1608_v29 }
 0x14e   : > { %v1415_v43 = vmax.f32 %v636_v39, 0.0  ;;  %v793_v18 = vadd.f32 %v792_v41, %v5401_v23  ;;  %v794_v46 = vpop.f32.mrb[31].mxu1  ;;  %v640_v13 = vadd.f32 %v639_v7, %v5304_v61  ;;  %v641_v35 = vpop.f32.mrb[31].mxu0  ;;  %v1353_v55 = vmax.f32 %v789_v33, 0.0 }
 0x14f   : > { %v1416_v53 = vmax.f32 %v638_v42, 0.0  ;;  %v795_v54 = vadd.f32 %v794_v46, %v5404_v27  ;;  %v642_v44 = vadd.f32 %v641_v35, %v5307_v62  ;;  %v1354_v50 = vmax.f32 %v791_v40, 0.0 }
 0x150   : > { %v1361_v56 = vmax.f32 %v793_v18, 0.0  ;;  %v1423_v19 = vmax.f32 %v640_v13, 0.0  ;;  %3657 = vmatmul.mubr.msk.bf16.gmra.mrb[136].mxu1 %vm482_vm0, %v4994_v45  ;;  %2287 = vmatmul.mubr.bf16.gmra.mrb[136].mxu0 %v1607_v26 }
 0x151   : > { %v1362_v59 = vmax.f32 %v795_v54, 0.0  ;;  %v1424_v60 = vmax.f32 %v642_v44, 0.0  ;;  %1292 = vmatprep.mubr.bf16.mxu1 %v4777_v0 }
 0x152   : > { %v5482_v63 = vpack.c.bf16 %v1361_v56, %v1353_v55  ;;  %v1615_v1 = vpack.c.bf16 %v1423_v19, %v1415_v43 }
 0x153   : > { %v5484_v2 = vpack.c.bf16 %v1362_v59, %v1354_v50  ;;  %v1616_v3 = vpack.c.bf16 %v1424_v60, %v1416_v53  ;;  %v798_v5 = vpop.f32.mrb[32].mxu1  ;;  %v645_v10 = vpop.f32.mrb[32].mxu0  ;;  %v4512_v50 = vld [vmem:[%s6460_s3 + $0x180] sm:$0xff]  }
 0x154   : > { %v799_v9 = vadd.f32 %v798_v5, %v5401_v23  ;;  %v800_v12 = vpop.f32.mrb[33].mxu1  ;;  %v646_v21 = vadd.f32 %v645_v10, %v5304_v61  ;;  %v647_v45 = vpop.f32.mrb[33].mxu0  ;;  %v4515_v10 = vld [vmem:[%s6460_s3 + $0x1c8] sm:$0xff]  }
 0x155   : > { %v801_v14 = vadd.f32 %v800_v12, %v5404_v27  ;;  %v802_v15 = vpop.f32.mrb[34].mxu1  ;;  %v648_v17 = vadd.f32 %v647_v45, %v5307_v62  ;;  %v649_v0 = vpop.f32.mrb[34].mxu0  ;;  %2294 = vmatprep.mubr.bf16.mxu0 %v1616_v3 }
 0x156   : > { %v1431_v20 = vmax.f32 %v646_v21, 0.0  ;;  %v803_v22 = vadd.f32 %v802_v15, %v5401_v23  ;;  %v804_v24 = vpop.f32.mrb[35].mxu1  ;;  %v650_v26 = vadd.f32 %v649_v0, %v5304_v61  ;;  %v651_v29 = vpop.f32.mrb[35].mxu0  ;;  %v1369_v34 = vmax.f32 %v799_v9, 0.0 }
 0x157   : > { %v1432_v30 = vmax.f32 %v648_v17, 0.0  ;;  %v805_v31 = vadd.f32 %v804_v24, %v5404_v27  ;;  %v652_v33 = vadd.f32 %v651_v29, %v5307_v62  ;;  %v1370_v40 = vmax.f32 %v801_v14, 0.0  ;;  %v4519_v29 = vld [vmem:[%s6460_s3 + $0x1d0] sm:$0xff]  }
 0x158   : > { %v1377_v39 = vmax.f32 %v803_v22, 0.0  ;;  %v1439_v36 = vmax.f32 %v650_v26, 0.0  ;;  %3658 = vmatmul.mubr.msk.bf16.gmra.mrb[140].mxu1 %vm482_vm0, %v5008_v51  ;;  %2295 = vmatmul.mubr.bf16.gmra.mrb[140].mxu0 %v1615_v1  ;;  %v4516_v22 = vld [vmem:[%s6460_s3 + $0x188] sm:$0xff]  }
 0x159   : > { %v1378_v41 = vmax.f32 %v805_v31, 0.0  ;;  %v1440_v42 = vmax.f32 %v652_v33, 0.0  ;;  %2399 = vmatprep.mubr.bf16.mxu1 %v5439_v8 }
 0x15a   : > { %v5497_v7 = vpack.c.bf16 %v1377_v39, %v1369_v34  ;;  %v1623_v43 = vpack.c.bf16 %v1439_v36, %v1431_v20 }
 0x15b   : > { %v5499_v18 = vpack.c.bf16 %v1378_v41, %v1370_v40  ;;  %v1624_v46 = vpack.c.bf16 %v1440_v42, %v1432_v30  ;;  %v808_v13 = vpop.f32.mrb[36].mxu1  ;;  %v655_v35 = vpop.f32.mrb[36].mxu0 }
 0x15c   : > { %v809_v53 = vadd.f32 %v808_v13, %v5401_v23  ;;  %v810_v54 = vpop.f32.mrb[37].mxu1  ;;  %v656_v44 = vadd.f32 %v655_v35, %v5304_v61  ;;  %v657_v51 = vpop.f32.mrb[37].mxu0 }
 0x15d   : > { %v811_v55 = vadd.f32 %v810_v54, %v5404_v27  ;;  %v812_v56 = vpop.f32.mrb[38].mxu1  ;;  %v658_v19 = vadd.f32 %v657_v51, %v5307_v62  ;;  %v659_v8 = vpop.f32.mrb[38].mxu0  ;;  %2302 = vmatprep.mubr.bf16.mxu0 %v1624_v46  ;;  %v4520_v46 = vld [vmem:[%s6460_s3 + $0x190] sm:$0xff]   ;;  %v4524_v51 = vld [vmem:[%s6460_s3 + $0x1d8] sm:$0xff]  }
 0x15e   : > { %v1447_v59 = vmax.f32 %v656_v44, 0.0  ;;  %v813_v60 = vadd.f32 %v812_v56, %v5401_v23  ;;  %v814_v1 = vpop.f32.mrb[39].mxu1  ;;  %v660_v3 = vadd.f32 %v659_v8, %v5304_v61  ;;  %v661_v5 = vpop.f32.mrb[39].mxu0  ;;  %v1385_v45 = vmax.f32 %v809_v53, 0.0 }
 0x15f   : > { %v1448_v9 = vmax.f32 %v658_v19, 0.0  ;;  %v815_v12 = vadd.f32 %v814_v1, %v5404_v27  ;;  %v662_v21 = vadd.f32 %v661_v5, %v5307_v62  ;;  %v1386_v17 = vmax.f32 %v811_v55, 0.0  ;;  %v4526_v5 = vld [vmem:[%s6460_s3 + $0x198] sm:$0xff]  }
 0x160   : > { %v1393_v14 = vmax.f32 %v813_v60, 0.0  ;;  %v1455_v15 = vmax.f32 %v660_v3, 0.0  ;;  %2303 = vmatmul.mubr.bf16.gmra.mrb[144].mxu0 %v1623_v43  ;;  %2400 = vmatmul.mubr.bf16.vlgmr.msra.gmra.mrb[144].mxu1 %v5437_v6 }
 0x161   : > { %v1394_v0 = vmax.f32 %v815_v12, 0.0  ;;  %v1456_v20 = vmax.f32 %v662_v21, 0.0  ;;  %2407 = vmatprep.mubr.bf16.mxu1 %v5454_v49  ;;  %4235 = vmatpush3.bf16.msra.mxu1 %v4512_v50  ;;  %v4533_v12 = vld [vmem:[%s6460_s3 + $0x1e0] sm:$0xff]  }
 0x162   : > { %v5520_v24 = vpack.c.bf16 %v1393_v14, %v1385_v45  ;;  %v1631_v26 = vpack.c.bf16 %v1455_v15, %v1447_v59  ;;  %4236 = vmatprep.subr.bf16.mxu1 %v4515_v10 }
 0x163   : > { %v5525_v30 = vpack.c.bf16 %v1394_v0, %v1386_v17  ;;  %v1632_v6 = vpack.c.bf16 %v1456_v20, %v1448_v9  ;;  %v818_v31 = vpop.f32.mrb[40].mxu1  ;;  %v665_v33 = vpop.f32.mrb[40].mxu0  ;;  %v380_v20 = vsub.s32 4, %v5288_v58 }
 0x164   : > { %v819_v49 = vadd.f32 %v818_v31, %v5401_v23  ;;  %v820_v34 = vpop.f32.mrb[41].mxu1  ;;  %v666_v39 = vadd.f32 %v665_v33, %v5304_v61  ;;  %v667_v36 = vpop.f32.mrb[41].mxu0  ;;  %v384_v31 = vsub.s32 5, %v5288_v58  ;;  %v4534_v33 = vld [vmem:[%s6460_s3 + $0x1a0] sm:$0xff]  }
 0x165   : > { %v821_v40 = vadd.f32 %v820_v34, %v5404_v27  ;;  %v822_v41 = vpop.f32.mrb[42].mxu1  ;;  %v668_v42 = vadd.f32 %v667_v36, %v5307_v62  ;;  %v669_v43 = vpop.f32.mrb[42].mxu0  ;;  %2310 = vmatprep.mubr.bf16.mxu0 %v1632_v6  ;;  %4237 = vmatpush3.bf16.msra.mxu1 %v4516_v22 }
 0x166   : > { %v1463_v13 = vmax.f32 %v666_v39, 0.0  ;;  %v823_v35 = vadd.f32 %v822_v41, %v5401_v23  ;;  %v824_v53 = vpop.f32.mrb[43].mxu1  ;;  %v670_v54 = vadd.f32 %v669_v43, %v5304_v61  ;;  %v671_v44 = vpop.f32.mrb[43].mxu0  ;;  %4238 = vmatprep.subr.bf16.mxu1 %v4519_v29  ;;  %v1401_v8 = vmax.f32 %v819_v49, 0.0  ;;  %v4535_v41 = vld [vmem:[%s6460_s3 + $0x1e8] sm:$0xff]  }
 0x167   : > { %v1464_v55 = vmax.f32 %v668_v42, 0.0  ;;  %v825_v56 = vadd.f32 %v824_v53, %v5404_v27  ;;  %v672_v19 = vadd.f32 %v671_v44, %v5307_v62  ;;  %v1402_v60 = vmax.f32 %v821_v40, 0.0 }
 0x168   : > { %v1409_v50 = vmax.f32 %v823_v35, 0.0  ;;  %v1471_v59 = vmax.f32 %v670_v54, 0.0  ;;  %2311 = vmatmul.mubr.bf16.gmra.mrb[148].mxu0 %v1631_v26  ;;  %2408 = vmatmul.mubr.bf16.gmra.mrb[148].mxu1 %v5452_v48  ;;  %v5571_v54 = vrot.slane %v5296_v57, %v380_v20 }
 0x169   : > { %v1410_v1 = vmax.f32 %v825_v56, 0.0  ;;  %v1472_v3 = vmax.f32 %v672_v19, 0.0  ;;  %2415 = vmatprep.mubr.bf16.mxu1 %v5469_v28  ;;  %4239 = vmatpush3.bf16.msra.mxu1 %v4520_v46 }
 0x16a   : > { %v5546_v10 = vpack.c.bf16 %v1409_v50, %v1401_v8  ;;  %v1639_v9 = vpack.c.bf16 %v1471_v59, %v1463_v13  ;;  %4240 = vmatprep.subr.bf16.mxu1 %v4524_v51 }
 0x16b   : > { %v5551_v21 = vpack.c.bf16 %v1410_v1, %v1402_v60  ;;  %v1640_v48 = vpack.c.bf16 %v1472_v3, %v1464_v55  ;;  %v828_v45 = vpop.f32.mrb[44].mxu1  ;;  %v675_v14 = vpop.f32.mrb[44].mxu0  ;;  %v5575_v55 = vrot.slane %v5296_v57, %v384_v31 }
 0x16c   : > { %v829_v28 = vadd.f32 %v828_v45, %v5401_v23  ;;  %v830_v15 = vpop.f32.mrb[45].mxu1  ;;  %v676_v17 = vadd.f32 %v675_v14, %v5304_v61  ;;  %v677_v0 = vpop.f32.mrb[45].mxu0 }
 0x16d   : > { %v831_v22 = vadd.f32 %v830_v15, %v5404_v27  ;;  %v832_v26 = vpop.f32.mrb[46].mxu1  ;;  %v678_v29 = vadd.f32 %v677_v0, %v5307_v62  ;;  %v679_v6 = vpop.f32.mrb[46].mxu0  ;;  %2318 = vmatprep.mubr.bf16.mxu0 %v1640_v48  ;;  %4241 = vmatpush3.bf16.msra.mxu1 %v4526_v5  ;;  %v4538_v0 = vld [vmem:[%s6460_s3 + $0x1b0] sm:$0xff]  }
 0x16e   : > { %v1479_v49 = vmax.f32 %v676_v17, 0.0  ;;  %v833_v34 = vadd.f32 %v832_v26, %v5401_v23  ;;  %v834_v39 = vpop.f32.mrb[47].mxu1  ;;  %v680_v36 = vadd.f32 %v679_v6, %v5304_v61  ;;  %v681_v40 = vpop.f32.mrb[47].mxu0  ;;  %4242 = vmatprep.subr.bf16.mxu1 %v4533_v12  ;;  %v1417_v13 = vmax.f32 %v829_v28, 0.0 }
 0x16f   : > { %v1480_v42 = vmax.f32 %v678_v29, 0.0  ;;  %v835_v43 = vadd.f32 %v834_v39, %v5404_v27  ;;  %v682_v46 = vadd.f32 %v681_v40, %v5307_v62  ;;  %v1418_v61 = vmax.f32 %v831_v22, 0.0  ;;  %v4536_v62 = vld [vmem:[%s6460_s3 + $0x1a8] sm:$0xff]   ;;  %v4539_v29 = vld [vmem:[%s6460_s3 + $0x1f8] sm:$0xff]  }
 0x170   : > { %v1425_v35 = vmax.f32 %v833_v34, 0.0  ;;  %v1487_v53 = vmax.f32 %v680_v36, 0.0  ;;  %2319 = vmatmul.mubr.bf16.gmra.mrb[152].mxu0 %v1639_v9  ;;  %2416 = vmatmul.mubr.bf16.gmra.mrb[152].mxu1 %v5467_v25  ;;  %v4537_v25 = vld [vmem:[%s6460_s3 + $0x1f0] sm:$0xff]  }
 0x171   : > { %v1426_v44 = vmax.f32 %v835_v43, 0.0  ;;  %v1488_v51 = vmax.f32 %v682_v46, 0.0  ;;  %2423 = vmatprep.mubr.bf16.mxu1 %v5484_v2  ;;  %4243 = vmatpush3.bf16.msra.mxu1 %v4534_v33 }
 0x172   : > { %v5580_v56 = vpack.c.bf16 %v1425_v35, %v1417_v13  ;;  %v1647_v19 = vpack.c.bf16 %v1487_v53, %v1479_v49  ;;  %4244 = vmatprep.subr.bf16.mxu1 %v4535_v41  ;;  %v4540_v41 = vld [vmem:[%s6460_s3 + $0x1b8] sm:$0xff]  }
 0x173   : > { %v5585_v8 = vpack.c.bf16 %v1426_v44, %v1418_v61  ;;  %v1648_v50 = vpack.c.bf16 %v1488_v51, %v1480_v42  ;;  %v838_v2 = vpop.f32.mrb[48].mxu1  ;;  %v951_v59 = vpop.f32.mrb[48].mxu0 }
 0x174   : > { %v839_v57 = vadd.f32 %v838_v2, %v5401_v23  ;;  %v840_v60 = vpop.f32.mrb[49].mxu1  ;;  %v952_v1 = vadd.f32 %v951_v59, %v5571_v54  ;;  %v953_v3 = vpop.f32.mrb[49].mxu0 }
 0x175   : > { %v841_v5 = vadd.f32 %v840_v60, %v5404_v27  ;;  %v842_v9 = vpop.f32.mrb[50].mxu1  ;;  %2326 = vmatprep.mubr.bf16.mxu0 %v1648_v50  ;;  %v954_v12 = vadd.f32 %v953_v3, %v5575_v55  ;;  %v955_v48 = vpop.f32.mrb[50].mxu0  ;;  %4245 = vmatpush3.bf16.msra.mxu1 %v4536_v62 }
 0x176   : > { %v843_v45 = vadd.f32 %v842_v9, %v5401_v23  ;;  %v844_v14 = vpop.f32.mrb[51].mxu1  ;;  %v1307_v28 = vmax.f32 %v952_v1, 0.0  ;;  %v956_v15 = vadd.f32 %v955_v48, %v5571_v54  ;;  %v957_v17 = vpop.f32.mrb[51].mxu0  ;;  %4246 = vmatprep.subr.bf16.mxu1 %v4537_v25  ;;  %v1433_v6 = vmax.f32 %v839_v57, 0.0 }
 0x177   : > { %v845_v20 = vadd.f32 %v844_v14, %v5404_v27  ;;  %v1308_v22 = vmax.f32 %v954_v12, 0.0  ;;  %v958_v26 = vadd.f32 %v957_v17, %v5575_v55  ;;  %v1434_v49 = vmax.f32 %v841_v5, 0.0 }
 0x178   : > { %v1441_v31 = vmax.f32 %v843_v45, 0.0  ;;  %2327 = vmatmul.mubr.bf16.gmra.mrb[156].mxu0 %v1647_v19  ;;  %2424 = vmatmul.mubr.bf16.gmra.mrb[156].mxu1 %v5482_v63  ;;  %v1315_v33 = vmax.f32 %v956_v15, 0.0 }
 0x179   : > { %v1442_v34 = vmax.f32 %v845_v20, 0.0  ;;  %2334 = vmatprep.mubr.bf16.mxu0 %v5326_v38  ;;  %2431 = vmatprep.mubr.bf16.mxu1 %v5499_v18  ;;  %v1316_v39 = vmax.f32 %v958_v26, 0.0 }
 0x17a   : > { %v5604_v36 = vpack.c.bf16 %v1441_v31, %v1433_v6  ;;  %v5606_v40 = vpack.c.bf16 %v1315_v33, %v1307_v28  ;;  %4247 = vmatpush3.bf16.msra.mxu1 %v4538_v0 }
 0x17b   : > { %v5611_v42 = vpack.c.bf16 %v1442_v34, %v1434_v49  ;;  %v848_v63 = vpop.f32.mrb[52].mxu1  ;;  %v5613_v43 = vpack.c.bf16 %v1316_v39, %v1308_v22  ;;  %v961_v46 = vpop.f32.mrb[52].mxu0  ;;  %4248 = vmatprep.subr.bf16.mxu1 %v4539_v29 }
 0x17c   : > { %v849_v38 = vadd.f32 %v848_v63, %v5401_v23  ;;  %v850_v18 = vpop.f32.mrb[53].mxu1  ;;  %v962_v13 = vadd.f32 %v961_v46, %v5571_v54  ;;  %v963_v35 = vpop.f32.mrb[53].mxu0 }
 0x17d   : > { %v851_v53 = vadd.f32 %v850_v18, %v5404_v27  ;;  %v852_v61 = vpop.f32.mrb[54].mxu1  ;;  %v964_v44 = vadd.f32 %v963_v35, %v5575_v55  ;;  %v965_v51 = vpop.f32.mrb[54].mxu0 }
 0x17e   : > { %v853_v62 = vadd.f32 %v852_v61, %v5401_v23  ;;  %v854_v19 = vpop.f32.mrb[55].mxu1  ;;  %v1323_v25 = vmax.f32 %v962_v13, 0.0  ;;  %v966_v50 = vadd.f32 %v965_v51, %v5571_v54  ;;  %v967_v2 = vpop.f32.mrb[55].mxu0  ;;  %4249 = vmatpush3.bf16.msra.mxu1 %v4540_v41  ;;  %v1449_v1 = vmax.f32 %v849_v38, 0.0 }
 0x17f   : > { %v855_v59 = vadd.f32 %v854_v19, %v5404_v27  ;;  %v1324_v57 = vmax.f32 %v964_v44, 0.0  ;;  %v968_v60 = vadd.f32 %v967_v2, %v5575_v55  ;;  %v1450_v9 = vmax.f32 %v851_v53, 0.0 }
 0x180   : > { %v1457_v3 = vmax.f32 %v853_v62, 0.0  ;;  %2335 = vmatmul.mubr.bf16.gmra.mrb[160].mxu0 %v5324_v32  ;;  %2432 = vmatmul.mubr.bf16.gmra.mrb[160].mxu1 %v5497_v7  ;;  %v1331_v5 = vmax.f32 %v966_v50, 0.0 }
 0x181   : > { %v1458_v12 = vmax.f32 %v855_v59, 0.0  ;;  %2342 = vmatprep.mubr.bf16.mxu0 %v5353_v11  ;;  %2439 = vmatprep.mubr.bf16.mxu1 %v5525_v30  ;;  %v1332_v48 = vmax.f32 %v968_v60, 0.0 }
 0x182   : > { %v5627_v45 = vpack.c.bf16 %v1457_v3, %v1449_v1  ;;  %v5629_v14 = vpack.c.bf16 %v1331_v5, %v1323_v25 }
 0x183   : > { %v5631_v28 = vpack.c.bf16 %v1458_v12, %v1450_v9  ;;  %v858_v15 = vpop.f32.mrb[56].mxu1  ;;  %v5633_v17 = vpack.c.bf16 %v1332_v48, %v1324_v57  ;;  %v971_v32 = vpop.f32.mrb[56].mxu0 }
 0x184   : > { %v859_v7 = vadd.f32 %v858_v15, %v5401_v23  ;;  %v860_v0 = vpop.f32.mrb[57].mxu1  ;;  %v972_v20 = vadd.f32 %v971_v32, %v5571_v54  ;;  %v973_v22 = vpop.f32.mrb[57].mxu0 }
 0x185   : > { %v861_v11 = vadd.f32 %v860_v0, %v5404_v27  ;;  %v862_v30 = vpop.f32.mrb[58].mxu1  ;;  %v974_v26 = vadd.f32 %v973_v22, %v5575_v55  ;;  %v975_v29 = vpop.f32.mrb[58].mxu0 }
 0x186   : > { %v863_v6 = vadd.f32 %v862_v30, %v5401_v23  ;;  %v864_v31 = vpop.f32.mrb[59].mxu1  ;;  %v1339_v33 = vmax.f32 %v972_v20, 0.0  ;;  %v976_v49 = vadd.f32 %v975_v29, %v5571_v54  ;;  %v977_v34 = vpop.f32.mrb[59].mxu0  ;;  %v1465_v46 = vmax.f32 %v859_v7, 0.0 }
 0x187   : > { %v865_v39 = vadd.f32 %v864_v31, %v5404_v27  ;;  %v1340_v41 = vmax.f32 %v974_v26, 0.0  ;;  %v978_v63 = vadd.f32 %v977_v34, %v5575_v55  ;;  %v1466_v13 = vmax.f32 %v861_v11, 0.0 }
 0x188   : > { %v1473_v38 = vmax.f32 %v863_v6, 0.0  ;;  %2343 = vmatmul.mubr.bf16.gmra.mrb[164].mxu0 %v5351_v4  ;;  %2440 = vmatmul.mubr.bf16.gmra.mrb[164].mxu1 %v5520_v24  ;;  %v1347_v18 = vmax.f32 %v976_v49, 0.0 }
 0x189   : > { %v1474_v35 = vmax.f32 %v865_v39, 0.0  ;;  %2350 = vmatprep.mubr.bf16.mxu0 %v5380_v52  ;;  %2447 = vmatprep.mubr.bf16.mxu1 %v5551_v21  ;;  %v1348_v53 = vmax.f32 %v978_v63, 0.0 }
 0x18a   : > { %v5647_v61 = vpack.c.bf16 %v1473_v38, %v1465_v46  ;;  %v5649_v44 = vpack.c.bf16 %v1347_v18, %v1339_v33 }
 0x18b   : > { %v5651_v51 = vpack.c.bf16 %v1474_v35, %v1466_v13  ;;  %v868_v62 = vpop.f32.mrb[60].mxu1  ;;  %v5653_v19 = vpack.c.bf16 %v1348_v53, %v1340_v41  ;;  %v981_v4 = vpop.f32.mrb[60].mxu0 }
 0x18c   : > { %v869_v24 = vadd.f32 %v868_v62, %v5401_v23  ;;  %v870_v25 = vpop.f32.mrb[61].mxu1  ;;  %v982_v50 = vadd.f32 %v981_v4, %v5571_v54  ;;  %v983_v2 = vpop.f32.mrb[61].mxu0 }
 0x18d   : > { %v871_v52 = vadd.f32 %v870_v25, %v5404_v27  ;;  %v872_v21 = vpop.f32.mrb[62].mxu1  ;;  %v984_v59 = vadd.f32 %v983_v2, %v5575_v55  ;;  %v985_v57 = vpop.f32.mrb[62].mxu0 }
 0x18e   : > { %v873_v60 = vadd.f32 %v872_v21, %v5401_v23  ;;  %v874_v1 = vpop.f32.mrb[63].mxu1  ;;  %v1355_v3 = vmax.f32 %v982_v50, 0.0  ;;  %v986_v5 = vadd.f32 %v985_v57, %v5571_v54  ;;  %v987_v9 = vpop.f32.mrb[63].mxu0  ;;  %v1481_v32 = vmax.f32 %v869_v24, 0.0 }
 0x18f   : > { %v875_v12 = vadd.f32 %v874_v1, %v5404_v27  ;;  %v1356_v48 = vmax.f32 %v984_v59, 0.0  ;;  %v988_v15 = vadd.f32 %v987_v9, %v5575_v55  ;;  %v1482_v20 = vmax.f32 %v871_v52, 0.0 }
 0x190   : > { %v1489_v7 = vmax.f32 %v873_v60, 0.0  ;;  %2351 = vmatmul.mubr.bf16.gmra.mrb[168].mxu0 %v5375_v47  ;;  %2448 = vmatmul.mubr.bf16.gmra.mrb[168].mxu1 %v5546_v10  ;;  %v1363_v0 = vmax.f32 %v986_v5, 0.0 }
 0x191   : > { %v1490_v22 = vmax.f32 %v875_v12, 0.0  ;;  %2358 = vmatprep.mubr.bf16.mxu0 %v5415_v37  ;;  %2455 = vmatprep.mubr.bf16.mxu1 %v5585_v8  ;;  %v1364_v11 = vmax.f32 %v988_v15, 0.0 }
 0x192   : > { %v5667_v30 = vpack.c.bf16 %v1489_v7, %v1481_v32  ;;  %v5669_v26 = vpack.c.bf16 %v1363_v0, %v1355_v3 }
 0x193   : > { %v5671_v29 = vpack.c.bf16 %v1490_v22, %v1482_v20  ;;  %v878_v6 = vpop.f32.mrb[64].mxu1  ;;  %v5673_v31 = vpack.c.bf16 %v1364_v11, %v1356_v48  ;;  %v991_v47 = vpop.f32.mrb[64].mxu0 }
 0x194   : > { %v879_v10 = vadd.f32 %v878_v6, %v5401_v23  ;;  %v880_v33 = vpop.f32.mrb[65].mxu1  ;;  %v992_v49 = vadd.f32 %v991_v47, %v5571_v54  ;;  %v993_v34 = vpop.f32.mrb[65].mxu0 }
 0x195   : > { %v881_v37 = vadd.f32 %v880_v33, %v5404_v27  ;;  %v882_v8 = vpop.f32.mrb[66].mxu1  ;;  %v994_v39 = vadd.f32 %v993_v34, %v5575_v55  ;;  %v995_v41 = vpop.f32.mrb[66].mxu0 }
 0x196   : > { %v883_v63 = vadd.f32 %v882_v8, %v5401_v23  ;;  %v884_v46 = vpop.f32.mrb[67].mxu1  ;;  %v1371_v38 = vmax.f32 %v992_v49, 0.0  ;;  %v996_v18 = vadd.f32 %v995_v41, %v5571_v54  ;;  %v997_v13 = vpop.f32.mrb[67].mxu0  ;;  %v1497_v4 = vmax.f32 %v879_v10, 0.0 }
 0x197   : > { %v885_v35 = vadd.f32 %v884_v46, %v5404_v27  ;;  %v1372_v53 = vmax.f32 %v994_v39, 0.0  ;;  %v998_v62 = vadd.f32 %v997_v13, %v5575_v55  ;;  %v1498_v50 = vmax.f32 %v881_v37, 0.0 }
 0x198   : > { %v1505_v24 = vmax.f32 %v883_v63, 0.0  ;;  %2359 = vmatmul.mubr.bf16.gmra.mrb[172].mxu0 %v5410_v16  ;;  %2456 = vmatmul.mubr.bf16.gmra.mrb[172].mxu1 %v5580_v56  ;;  %v1379_v25 = vmax.f32 %v996_v18, 0.0 }
 0x199   : > { %v1506_v2 = vmax.f32 %v885_v35, 0.0  ;;  %2463 = vmatprep.mubr.bf16.mxu1 %v5611_v42  ;;  %2560 = vmatprep.mubr.bf16.mxu0 %v5613_v43  ;;  %v1380_v52 = vmax.f32 %v998_v62, 0.0 }
 0x19a   : > { %v5687_v21 = vpack.c.bf16 %v1505_v24, %v1497_v4  ;;  %v5689_v59 = vpack.c.bf16 %v1379_v25, %v1371_v38 }
 0x19b   : > { %v5691_v57 = vpack.c.bf16 %v1506_v2, %v1498_v50  ;;  %v888_v60 = vpop.f32.mrb[68].mxu1  ;;  %v5693_v1 = vpack.c.bf16 %v1380_v52, %v1372_v53  ;;  %v1001_v16 = vpop.f32.mrb[68].mxu0 }
 0x19c   : > { %v889_v56 = vadd.f32 %v888_v60, %v5401_v23  ;;  %v890_v3 = vpop.f32.mrb[69].mxu1  ;;  %v1002_v5 = vadd.f32 %v1001_v16, %v5571_v54  ;;  %v1003_v9 = vpop.f32.mrb[69].mxu0 }
 0x19d   : > { %v891_v42 = vadd.f32 %v890_v3, %v5404_v27  ;;  %v892_v43 = vpop.f32.mrb[70].mxu1  ;;  %v1004_v12 = vadd.f32 %v1003_v9, %v5575_v55  ;;  %v1005_v48 = vpop.f32.mrb[70].mxu0 }
 0x19e   : > { %v893_v15 = vadd.f32 %v892_v43, %v5401_v23  ;;  %v894_v32 = vpop.f32.mrb[71].mxu1  ;;  %v1387_v7 = vmax.f32 %v1002_v5, 0.0  ;;  %v1006_v0 = vadd.f32 %v1005_v48, %v5571_v54  ;;  %v1007_v20 = vpop.f32.mrb[71].mxu0  ;;  %v1513_v47 = vmax.f32 %v889_v56, 0.0 }
 0x19f   : > { %v895_v22 = vadd.f32 %v894_v32, %v5404_v27  ;;  %v1388_v11 = vmax.f32 %v1004_v12, 0.0  ;;  %v1008_v6 = vadd.f32 %v1007_v20, %v5575_v55  ;;  %v1514_v49 = vmax.f32 %v891_v42, 0.0 }
 0x1a0   : > { %v1521_v10 = vmax.f32 %v893_v15, 0.0  ;;  %2464 = vmatmul.mubr.bf16.gmra.mrb[176].mxu1 %v5604_v36  ;;  %2561 = vmatmul.mubr.bf16.vlgmr.msra.gmra.mrb[176].mxu0 %v5606_v40  ;;  %v1395_v33 = vmax.f32 %v1006_v0, 0.0  ;;  %v388_v0 = vsub.s32 6, %v5288_v58 }
 0x1a1   : > { %v1522_v34 = vmax.f32 %v895_v22, 0.0  ;;  %2471 = vmatprep.mubr.bf16.mxu1 %v5631_v28  ;;  %2568 = vmatprep.mubr.bf16.mxu0 %v5633_v17  ;;  %v1396_v37 = vmax.f32 %v1008_v6, 0.0 }
 0x1a2   : > { %v5707_v8 = vpack.c.bf16 %v1521_v10, %v1513_v47  ;;  %v5709_v39 = vpack.c.bf16 %v1395_v33, %v1387_v7 }
 0x1a3   : > { %v5711_v41 = vpack.c.bf16 %v1522_v34, %v1514_v49  ;;  %v898_v63 = vpop.f32.mrb[72].mxu1  ;;  %v5713_v46 = vpack.c.bf16 %v1396_v37, %v1388_v11  ;;  %v1011_v36 = vpop.f32.mrb[72].mxu0  ;;  %v392_v11 = vsub.s32 7, %v5288_v58  ;;  %v4677_v58 = vld [vmem:[%s6459_s2] sm:$0xff] }
 0x1a4   : > { %v899_v40 = vadd.f32 %v898_v63, %v5401_v23  ;;  %v900_v38 = vpop.f32.mrb[73].mxu1  ;;  %v1012_v18 = vadd.f32 %v1011_v36, %v5571_v54  ;;  %v1013_v13 = vpop.f32.mrb[73].mxu0 }
 0x1a5   : > { %v901_v28 = vadd.f32 %v900_v38, %v5404_v27  ;;  %v902_v17 = vpop.f32.mrb[74].mxu1  ;;  %v1014_v35 = vadd.f32 %v1013_v13, %v5575_v55  ;;  %v1015_v53 = vpop.f32.mrb[74].mxu0 }
 0x1a6   : > { %v903_v62 = vadd.f32 %v902_v17, %v5401_v23  ;;  %v904_v4 = vpop.f32.mrb[75].mxu1  ;;  %v1403_v24 = vmax.f32 %v1012_v18, 0.0  ;;  %v1016_v25 = vadd.f32 %v1015_v53, %v5571_v54  ;;  %v1017_v50 = vpop.f32.mrb[75].mxu0  ;;  %v1529_v16 = vmax.f32 %v899_v40, 0.0 }
 0x1a7   : > { %v905_v2 = vadd.f32 %v904_v4, %v5404_v27  ;;  %v1404_v52 = vmax.f32 %v1014_v35, 0.0  ;;  %v1018_v60 = vadd.f32 %v1017_v50, %v5575_v55  ;;  %v1530_v5 = vmax.f32 %v901_v28, 0.0 }
 0x1a8   : > { %v1537_v56 = vmax.f32 %v903_v62, 0.0  ;;  %2472 = vmatmul.mubr.bf16.gmra.mrb[180].mxu1 %v5627_v45  ;;  %2569 = vmatmul.mubr.bf16.gmra.mrb[180].mxu0 %v5629_v14  ;;  %v1411_v3 = vmax.f32 %v1016_v25, 0.0 }
 0x1a9   : > { %v1538_v9 = vmax.f32 %v905_v2, 0.0  ;;  %2479 = vmatprep.mubr.bf16.mxu1 %v5651_v51  ;;  %2576 = vmatprep.mubr.bf16.mxu0 %v5653_v19  ;;  %v1412_v42 = vmax.f32 %v1018_v60, 0.0 }
 0x1aa   : > { %v5727_v43 = vpack.c.bf16 %v1537_v56, %v1529_v16  ;;  %v5729_v12 = vpack.c.bf16 %v1411_v3, %v1403_v24 }
 0x1ab   : > { %v5731_v48 = vpack.c.bf16 %v1538_v9, %v1530_v5  ;;  %v908_v15 = vpop.f32.mrb[76].mxu1  ;;  %v5733_v32 = vpack.c.bf16 %v1412_v42, %v1404_v52  ;;  %v1021_v45 = vpop.f32.mrb[76].mxu0 }
 0x1ac   : > { %v909_v14 = vadd.f32 %v908_v15, %v5401_v23  ;;  %v910_v7 = vpop.f32.mrb[77].mxu1  ;;  %v1022_v51 = vadd.f32 %v1021_v45, %v5571_v54  ;;  %v1023_v20 = vpop.f32.mrb[77].mxu0 }
 0x1ad   : > { %v911_v19 = vadd.f32 %v910_v7, %v5404_v27  ;;  %v912_v22 = vpop.f32.mrb[78].mxu1  ;;  %v1024_v6 = vadd.f32 %v1023_v20, %v5575_v55  ;;  %v1025_v47 = vpop.f32.mrb[78].mxu0 }
 0x1ae   : > { %v913_v10 = vadd.f32 %v912_v22, %v5401_v23  ;;  %v914_v33 = vpop.f32.mrb[79].mxu1  ;;  %v1419_v49 = vmax.f32 %v1022_v51, 0.0  ;;  %v1026_v34 = vadd.f32 %v1025_v47, %v5571_v54  ;;  %v1027_v37 = vpop.f32.mrb[79].mxu0  ;;  %v1545_v38 = vmax.f32 %v909_v14, 0.0 }
 0x1af   : > { %v915_v63 = vadd.f32 %v914_v33, %v5404_v27  ;;  %v1420_v36 = vmax.f32 %v1024_v6, 0.0  ;;  %v1028_v40 = vadd.f32 %v1027_v37, %v5575_v55  ;;  %v5750_v23 = vrot.slane %v4677_v58, %v388_v0 }
 0x1b0   : > { %v1553_v18 = vmax.f32 %v913_v10, 0.0  ;;  %2480 = vmatmul.mubr.bf16.gmra.mrb[184].mxu1 %v5647_v61  ;;  %2577 = vmatmul.mubr.bf16.gmra.mrb[184].mxu0 %v5649_v44  ;;  %v1427_v13 = vmax.f32 %v1026_v34, 0.0  ;;  %v1546_v28 = vmax.f32 %v911_v19, 0.0  ;;  %v5753_v27 = vrot.slane %v4677_v58, %v392_v11 }
 0x1b1   : > { %v1554_v17 = vmax.f32 %v915_v63, 0.0  ;;  %2487 = vmatprep.mubr.bf16.mxu1 %v5671_v29  ;;  %2584 = vmatprep.mubr.bf16.mxu0 %v5673_v31  ;;  %v1428_v35 = vmax.f32 %v1028_v40, 0.0 }
 0x1b2   : > { %v5756_v53 = vpack.c.bf16 %v1553_v18, %v1545_v38  ;;  %v5758_v61 = vpack.c.bf16 %v1427_v13, %v1419_v49 }
 0x1b3   : > { %v5760_v44 = vpack.c.bf16 %v1554_v17, %v1546_v28  ;;  %v1144_v62 = vpop.f32.mrb[80].mxu1  ;;  %v5762_v4 = vpack.c.bf16 %v1428_v35, %v1420_v36  ;;  %v1031_v24 = vpop.f32.mrb[80].mxu0 }
 0x1b4   : > { %v1145_v25 = vadd.f32 %v1144_v62, %v5750_v23  ;;  %v1146_v50 = vpop.f32.mrb[81].mxu1  ;;  %v1032_v29 = vadd.f32 %v1031_v24, %v5571_v54  ;;  %v1033_v2 = vpop.f32.mrb[81].mxu0 }
 0x1b5   : > { %v1147_v52 = vadd.f32 %v1146_v50, %v5753_v27  ;;  %v1148_v31 = vpop.f32.mrb[82].mxu1  ;;  %v1034_v60 = vadd.f32 %v1033_v2, %v5575_v55  ;;  %v1035_v16 = vpop.f32.mrb[82].mxu0 }
 0x1b6   : > { %v1149_v56 = vadd.f32 %v1148_v31, %v5750_v23  ;;  %v1150_v3 = vpop.f32.mrb[83].mxu1  ;;  %v1435_v5 = vmax.f32 %v1032_v29, 0.0  ;;  %v1036_v9 = vadd.f32 %v1035_v16, %v5571_v54  ;;  %v1037_v42 = vpop.f32.mrb[83].mxu0  ;;  %v1309_v7 = vmax.f32 %v1145_v25, 0.0 }
 0x1b7   : > { %v1151_v15 = vadd.f32 %v1150_v3, %v5753_v27  ;;  %v1436_v45 = vmax.f32 %v1034_v60, 0.0  ;;  %v1038_v14 = vadd.f32 %v1037_v42, %v5575_v55  ;;  %v1310_v20 = vmax.f32 %v1147_v52, 0.0 }
 0x1b8   : > { %v1317_v0 = vmax.f32 %v1149_v56, 0.0  ;;  %2488 = vmatmul.mubr.bf16.gmra.mrb[188].mxu1 %v5667_v30  ;;  %2585 = vmatmul.mubr.bf16.gmra.mrb[188].mxu0 %v5669_v26  ;;  %v1443_v51 = vmax.f32 %v1036_v9, 0.0 }
 0x1b9   : > { %v1318_v19 = vmax.f32 %v1151_v15, 0.0  ;;  %2495 = vmatprep.mubr.bf16.mxu1 %v5691_v57  ;;  %2592 = vmatprep.mubr.bf16.mxu0 %v5693_v1  ;;  %v1444_v22 = vmax.f32 %v1038_v14, 0.0 }
 0x1ba   : > { %v5776_v11 = vpack.c.bf16 %v1317_v0, %v1309_v7  ;;  %v5778_v6 = vpack.c.bf16 %v1443_v51, %v1435_v5 }
 0x1bb   : > { %v5780_v47 = vpack.c.bf16 %v1318_v19, %v1310_v20  ;;  %v1154_v10 = vpop.f32.mrb[84].mxu1  ;;  %v5782_v33 = vpack.c.bf16 %v1444_v22, %v1436_v45  ;;  %v1041_v30 = vpop.f32.mrb[84].mxu0 }
 0x1bc   : > { %v1155_v26 = vadd.f32 %v1154_v10, %v5750_v23  ;;  %v1156_v49 = vpop.f32.mrb[85].mxu1  ;;  %v1042_v34 = vadd.f32 %v1041_v30, %v5571_v54  ;;  %v1043_v37 = vpop.f32.mrb[85].mxu0 }
 0x1bd   : > { %v1157_v57 = vadd.f32 %v1156_v49, %v5753_v27  ;;  %v1158_v1 = vpop.f32.mrb[86].mxu1  ;;  %v1044_v63 = vadd.f32 %v1043_v37, %v5575_v55  ;;  %v1045_v36 = vpop.f32.mrb[86].mxu0 }
 0x1be   : > { %v1159_v40 = vadd.f32 %v1158_v1, %v5750_v23  ;;  %v1160_v38 = vpop.f32.mrb[87].mxu1  ;;  %v1451_v18 = vmax.f32 %v1042_v34, 0.0  ;;  %v1046_v58 = vadd.f32 %v1045_v36, %v5571_v54  ;;  %v1047_v13 = vpop.f32.mrb[87].mxu0  ;;  %v1325_v62 = vmax.f32 %v1155_v26, 0.0 }
 0x1bf   : > { %v1161_v28 = vadd.f32 %v1160_v38, %v5753_v27  ;;  %v1452_v17 = vmax.f32 %v1044_v63, 0.0  ;;  %v1048_v35 = vadd.f32 %v1047_v13, %v5575_v55  ;;  %v1326_v50 = vmax.f32 %v1157_v57, 0.0 }
 0x1c0   : > { %v1333_v24 = vmax.f32 %v1159_v40, 0.0  ;;  %2496 = vmatmul.mubr.bf16.gmra.mrb[192].mxu1 %v5687_v21  ;;  %2593 = vmatmul.mubr.bf16.gmra.mrb[192].mxu0 %v5689_v59  ;;  %v1459_v25 = vmax.f32 %v1046_v58, 0.0 }
 0x1c1   : > { %v1334_v29 = vmax.f32 %v1161_v28, 0.0  ;;  %2503 = vmatprep.mubr.bf16.mxu1 %v5711_v41  ;;  %2600 = vmatprep.mubr.bf16.mxu0 %v5713_v46  ;;  %v1460_v2 = vmax.f32 %v1048_v35, 0.0 }
 0x1c2   : > { %v5796_v52 = vpack.c.bf16 %v1333_v24, %v1325_v62  ;;  %v5798_v31 = vpack.c.bf16 %v1459_v25, %v1451_v18 }
 0x1c3   : > { %v5800_v60 = vpack.c.bf16 %v1334_v29, %v1326_v50  ;;  %v1164_v16 = vpop.f32.mrb[88].mxu1  ;;  %v5802_v56 = vpack.c.bf16 %v1460_v2, %v1452_v17  ;;  %v1051_v21 = vpop.f32.mrb[88].mxu0 }
 0x1c4   : > { %v1165_v59 = vadd.f32 %v1164_v16, %v5750_v23  ;;  %v1166_v3 = vpop.f32.mrb[89].mxu1  ;;  %v1052_v5 = vadd.f32 %v1051_v21, %v5571_v54  ;;  %v1053_v9 = vpop.f32.mrb[89].mxu0 }
 0x1c5   : > { %v1167_v41 = vadd.f32 %v1166_v3, %v5753_v27  ;;  %v1168_v46 = vpop.f32.mrb[90].mxu1  ;;  %v1054_v42 = vadd.f32 %v1053_v9, %v5575_v55  ;;  %v1055_v15 = vpop.f32.mrb[90].mxu0 }
 0x1c6   : > { %v1169_v45 = vadd.f32 %v1168_v46, %v5750_v23  ;;  %v1170_v14 = vpop.f32.mrb[91].mxu1  ;;  %v1467_v7 = vmax.f32 %v1052_v5, 0.0  ;;  %v1056_v0 = vadd.f32 %v1055_v15, %v5571_v54  ;;  %v1057_v51 = vpop.f32.mrb[91].mxu0  ;;  %v1341_v10 = vmax.f32 %v1165_v59, 0.0 }
 0x1c7   : > { %v1171_v20 = vadd.f32 %v1170_v14, %v5753_v27  ;;  %v1468_v19 = vmax.f32 %v1054_v42, 0.0  ;;  %v1058_v22 = vadd.f32 %v1057_v51, %v5575_v55  ;;  %v1342_v49 = vmax.f32 %v1167_v41, 0.0 }
 0x1c8   : > { %v1349_v30 = vmax.f32 %v1169_v45, 0.0  ;;  %2504 = vmatmul.mubr.bf16.gmra.mrb[196].mxu1 %v5707_v8  ;;  %2601 = vmatmul.mubr.bf16.gmra.mrb[196].mxu0 %v5709_v39  ;;  %v1475_v26 = vmax.f32 %v1056_v0, 0.0 }
 0x1c9   : > { %v1350_v34 = vmax.f32 %v1171_v20, 0.0  ;;  %2511 = vmatprep.mubr.bf16.mxu1 %v5731_v48  ;;  %2608 = vmatprep.mubr.bf16.mxu0 %v5733_v32  ;;  %v1476_v37 = vmax.f32 %v1058_v22, 0.0 }
 0x1ca   : > { %v5816_v57 = vpack.c.bf16 %v1349_v30, %v1341_v10  ;;  %v5818_v1 = vpack.c.bf16 %v1475_v26, %v1467_v7 }
 0x1cb   : > { %v5820_v63 = vpack.c.bf16 %v1350_v34, %v1342_v49  ;;  %v1174_v36 = vpop.f32.mrb[92].mxu1  ;;  %v5822_v40 = vpack.c.bf16 %v1476_v37, %v1468_v19  ;;  %v1061_v8 = vpop.f32.mrb[92].mxu0 }
 0x1cc   : > { %v1175_v39 = vadd.f32 %v1174_v36, %v5750_v23  ;;  %v1176_v38 = vpop.f32.mrb[93].mxu1  ;;  %v1062_v18 = vadd.f32 %v1061_v8, %v5571_v54  ;;  %v1063_v58 = vpop.f32.mrb[93].mxu0 }
 0x1cd   : > { %v1177_v48 = vadd.f32 %v1176_v38, %v5753_v27  ;;  %v1178_v32 = vpop.f32.mrb[94].mxu1  ;;  %v1064_v13 = vadd.f32 %v1063_v58, %v5575_v55  ;;  %v1065_v28 = vpop.f32.mrb[94].mxu0 }
 0x1ce   : > { %v1179_v17 = vadd.f32 %v1178_v32, %v5750_v23  ;;  %v1180_v35 = vpop.f32.mrb[95].mxu1  ;;  %v1483_v62 = vmax.f32 %v1062_v18, 0.0  ;;  %v1066_v24 = vadd.f32 %v1065_v28, %v5571_v54  ;;  %v1067_v25 = vpop.f32.mrb[95].mxu0  ;;  %v1357_v16 = vmax.f32 %v1175_v39, 0.0 }
 0x1cf   : > { %v1181_v50 = vadd.f32 %v1180_v35, %v5753_v27  ;;  %v1484_v29 = vmax.f32 %v1064_v13, 0.0  ;;  %v1068_v2 = vadd.f32 %v1067_v25, %v5575_v55  ;;  %v1358_v3 = vmax.f32 %v1177_v48, 0.0 }
 0x1d0   : > { %v1365_v21 = vmax.f32 %v1179_v17, 0.0  ;;  %2512 = vmatmul.mubr.bf16.gmra.mrb[200].mxu1 %v5727_v43  ;;  %2609 = vmatmul.mubr.bf16.gmra.mrb[200].mxu0 %v5729_v12  ;;  %v1491_v59 = vmax.f32 %v1066_v24, 0.0 }
 0x1d1   : > { %v1366_v5 = vmax.f32 %v1181_v50, 0.0  ;;  %2519 = vmatprep.mubr.bf16.mxu1 %v5760_v44  ;;  %2616 = vmatprep.mubr.bf16.mxu0 %v5762_v4  ;;  %v1492_v9 = vmax.f32 %v1068_v2, 0.0 }
 0x1d2   : > { %v5836_v41 = vpack.c.bf16 %v1365_v21, %v1357_v16  ;;  %v5838_v46 = vpack.c.bf16 %v1491_v59, %v1483_v62 }
 0x1d3   : > { %v5840_v42 = vpack.c.bf16 %v1366_v5, %v1358_v3  ;;  %v1184_v15 = vpop.f32.mrb[96].mxu1  ;;  %v5842_v45 = vpack.c.bf16 %v1492_v9, %v1484_v29  ;;  %v1071_v43 = vpop.f32.mrb[96].mxu0 }
 0x1d4   : > { %v1185_v12 = vadd.f32 %v1184_v15, %v5750_v23  ;;  %v1186_v14 = vpop.f32.mrb[97].mxu1  ;;  %v1072_v7 = vadd.f32 %v1071_v43, %v5571_v54  ;;  %v1073_v0 = vpop.f32.mrb[97].mxu0 }
 0x1d5   : > { %v1187_v44 = vadd.f32 %v1186_v14, %v5753_v27  ;;  %v1188_v4 = vpop.f32.mrb[98].mxu1  ;;  %v1074_v51 = vadd.f32 %v1073_v0, %v5575_v55  ;;  %v1075_v20 = vpop.f32.mrb[98].mxu0 }
 0x1d6   : > { %v1189_v19 = vadd.f32 %v1188_v4, %v5750_v23  ;;  %v1190_v22 = vpop.f32.mrb[99].mxu1  ;;  %v1499_v10 = vmax.f32 %v1072_v7, 0.0  ;;  %v1076_v30 = vadd.f32 %v1075_v20, %v5571_v54  ;;  %v1077_v26 = vpop.f32.mrb[99].mxu0  ;;  %v1373_v36 = vmax.f32 %v1185_v12, 0.0 }
 0x1d7   : > { %v1191_v49 = vadd.f32 %v1190_v22, %v5753_v27  ;;  %v1500_v34 = vmax.f32 %v1074_v51, 0.0  ;;  %v1078_v37 = vadd.f32 %v1077_v26, %v5575_v55  ;;  %v1374_v38 = vmax.f32 %v1187_v44, 0.0 }
 0x1d8   : > { %v1381_v8 = vmax.f32 %v1189_v19, 0.0  ;;  %2520 = vmatmul.mubr.bf16.gmra.mrb[204].mxu1 %v5756_v53  ;;  %2617 = vmatmul.mubr.bf16.gmra.mrb[204].mxu0 %v5758_v61  ;;  %v1507_v39 = vmax.f32 %v1076_v30, 0.0 }
 0x1d9   : > { %v1382_v18 = vmax.f32 %v1191_v49, 0.0  ;;  %2721 = vmatprep.mubr.bf16.mxu1 %v5780_v47  ;;  %2624 = vmatprep.mubr.bf16.mxu0 %v5782_v33  ;;  %v1508_v58 = vmax.f32 %v1078_v37, 0.0 }
 0x1da   : > { %v5856_v48 = vpack.c.bf16 %v1381_v8, %v1373_v36  ;;  %v5858_v32 = vpack.c.bf16 %v1507_v39, %v1499_v10 }
 0x1db   : > { %v5860_v13 = vpack.c.bf16 %v1382_v18, %v1374_v38  ;;  %v1194_v28 = vpop.f32.mrb[100].mxu1  ;;  %v5862_v17 = vpack.c.bf16 %v1508_v58, %v1500_v34  ;;  %v1081_v53 = vpop.f32.mrb[100].mxu0 }
 0x1dc   : > { %v1195_v61 = vadd.f32 %v1194_v28, %v5750_v23  ;;  %v1196_v35 = vpop.f32.mrb[101].mxu1  ;;  %v1082_v62 = vadd.f32 %v1081_v53, %v5571_v54  ;;  %v1083_v24 = vpop.f32.mrb[101].mxu0 }
 0x1dd   : > { %v1197_v47 = vadd.f32 %v1196_v35, %v5753_v27  ;;  %v1198_v33 = vpop.f32.mrb[102].mxu1  ;;  %v1084_v25 = vadd.f32 %v1083_v24, %v5575_v55  ;;  %v1085_v50 = vpop.f32.mrb[102].mxu0 }
 0x1de   : > { %v1199_v29 = vadd.f32 %v1198_v33, %v5750_v23  ;;  %v1200_v2 = vpop.f32.mrb[103].mxu1  ;;  %v1515_v16 = vmax.f32 %v1082_v62, 0.0  ;;  %v1086_v21 = vadd.f32 %v1085_v50, %v5571_v54  ;;  %v1087_v59 = vpop.f32.mrb[103].mxu0  ;;  %v1389_v15 = vmax.f32 %v1195_v61, 0.0 }
 0x1df   : > { %v1201_v3 = vadd.f32 %v1200_v2, %v5753_v27  ;;  %v1516_v5 = vmax.f32 %v1084_v25, 0.0  ;;  %v1088_v9 = vadd.f32 %v1087_v59, %v5575_v55  ;;  %v1390_v14 = vmax.f32 %v1197_v47, 0.0 }
 0x1e0   : > { %v1397_v43 = vmax.f32 %v1199_v29, 0.0  ;;  %2625 = vmatmul.mubr.bf16.gmra.mrb[208].mxu0 %v5778_v6  ;;  %2722 = vmatmul.mubr.bf16.vlgmr.msra.gmra.mrb[208].mxu1 %v5776_v11  ;;  %v1523_v12 = vmax.f32 %v1086_v21, 0.0 }
 0x1e1   : > { %v1398_v7 = vmax.f32 %v1201_v3, 0.0  ;;  %2729 = vmatprep.mubr.bf16.mxu1 %v5800_v60  ;;  %2632 = vmatprep.mubr.bf16.mxu0 %v5802_v56  ;;  %v1524_v0 = vmax.f32 %v1088_v9, 0.0 }
 0x1e2   : > { %v5876_v44 = vpack.c.bf16 %v1397_v43, %v1389_v15  ;;  %v5878_v4 = vpack.c.bf16 %v1523_v12, %v1515_v16 }
 0x1e3   : > { %v5880_v51 = vpack.c.bf16 %v1398_v7, %v1390_v14  ;;  %v1204_v20 = vpop.f32.mrb[104].mxu1  ;;  %v5882_v19 = vpack.c.bf16 %v1524_v0, %v1516_v5  ;;  %v1091_v6 = vpop.f32.mrb[104].mxu0 }
 0x1e4   : > { %v1205_v11 = vadd.f32 %v1204_v20, %v5750_v23  ;;  %v1206_v22 = vpop.f32.mrb[105].mxu1  ;;  %v1092_v10 = vadd.f32 %v1091_v6, %v5571_v54  ;;  %v1093_v30 = vpop.f32.mrb[105].mxu0 }
 0x1e5   : > { %v1207_v60 = vadd.f32 %v1206_v22, %v5753_v27  ;;  %v1208_v56 = vpop.f32.mrb[106].mxu1  ;;  %v1094_v26 = vadd.f32 %v1093_v30, %v5575_v55  ;;  %v1095_v49 = vpop.f32.mrb[106].mxu0 }
 0x1e6   : > { %v1209_v34 = vadd.f32 %v1208_v56, %v5750_v23  ;;  %v1210_v37 = vpop.f32.mrb[107].mxu1  ;;  %v1531_v36 = vmax.f32 %v1092_v10, 0.0  ;;  %v1096_v8 = vadd.f32 %v1095_v49, %v5571_v54  ;;  %v1097_v39 = vpop.f32.mrb[107].mxu0  ;;  %v1405_v28 = vmax.f32 %v1205_v11, 0.0 }
 0x1e7   : > { %v1211_v38 = vadd.f32 %v1210_v37, %v5753_v27  ;;  %v1532_v18 = vmax.f32 %v1094_v26, 0.0  ;;  %v1098_v58 = vadd.f32 %v1097_v39, %v5575_v55  ;;  %v1406_v35 = vmax.f32 %v1207_v60, 0.0 }
 0x1e8   : > { %v1413_v53 = vmax.f32 %v1209_v34, 0.0  ;;  %2633 = vmatmul.mubr.bf16.gmra.mrb[212].mxu0 %v5798_v31  ;;  %2730 = vmatmul.mubr.bf16.gmra.mrb[212].mxu1 %v5796_v52  ;;  %v1539_v61 = vmax.f32 %v1096_v8, 0.0 }
 0x1e9   : > { %v1414_v62 = vmax.f32 %v1211_v38, 0.0  ;;  %2737 = vmatprep.mubr.bf16.mxu1 %v5820_v63  ;;  %2640 = vmatprep.mubr.bf16.mxu0 %v5822_v40  ;;  %v1540_v24 = vmax.f32 %v1098_v58, 0.0 }
 0x1ea   : > { %v5896_v47 = vpack.c.bf16 %v1413_v53, %v1405_v28  ;;  %v5898_v33 = vpack.c.bf16 %v1539_v61, %v1531_v36 }
 0x1eb   : > { %v5900_v25 = vpack.c.bf16 %v1414_v62, %v1406_v35  ;;  %v1214_v50 = vpop.f32.mrb[108].mxu1  ;;  %v5902_v29 = vpack.c.bf16 %v1540_v24, %v1532_v18  ;;  %v1101_v31 = vpop.f32.mrb[108].mxu0 }
 0x1ec   : > { %v1215_v52 = vadd.f32 %v1214_v50, %v5750_v23  ;;  %v1216_v2 = vpop.f32.mrb[109].mxu1  ;;  %v1102_v16 = vadd.f32 %v1101_v31, %v5571_v54  ;;  %v1103_v21 = vpop.f32.mrb[109].mxu0 }
 0x1ed   : > { %v1217_v63 = vadd.f32 %v1216_v2, %v5753_v27  ;;  %v1218_v40 = vpop.f32.mrb[110].mxu1  ;;  %v1104_v59 = vadd.f32 %v1103_v21, %v5575_v55  ;;  %v1105_v3 = vpop.f32.mrb[110].mxu0 }
 0x1ee   : > { %v1219_v5 = vadd.f32 %v1218_v40, %v5750_v23  ;;  %v1220_v9 = vpop.f32.mrb[111].mxu1  ;;  %v1547_v15 = vmax.f32 %v1102_v16, 0.0  ;;  %v1106_v43 = vadd.f32 %v1105_v3, %v5571_v54  ;;  %v1107_v12 = vpop.f32.mrb[111].mxu0  ;;  %v1421_v20 = vmax.f32 %v1215_v52, 0.0 }
 0x1ef   : > { %v1221_v14 = vadd.f32 %v1220_v9, %v5753_v27  ;;  %v1548_v7 = vmax.f32 %v1104_v59, 0.0  ;;  %v1108_v0 = vadd.f32 %v1107_v12, %v5575_v55  ;;  %v1422_v22 = vmax.f32 %v1217_v63, 0.0  ;;  %v4541_v12 = vld [vmem:[#allocation2] sm:$0xff]  }
 0x1f0   : > { %v1429_v6 = vmax.f32 %v1219_v5, 0.0  ;;  %2641 = vmatmul.mubr.bf16.gmra.mrb[216].mxu0 %v5818_v1  ;;  %2738 = vmatmul.mubr.bf16.gmra.mrb[216].mxu1 %v5816_v57  ;;  %v1555_v11 = vmax.f32 %v1106_v43, 0.0 }
 0x1f1   : > { %v1430_v10 = vmax.f32 %v1221_v14, 0.0  ;;  %2745 = vmatprep.mubr.bf16.mxu1 %v5840_v42  ;;  %2648 = vmatprep.mubr.bf16.mxu0 %v5842_v45  ;;  %v1556_v54 = vmax.f32 %v1108_v0, 0.0 }
 0x1f2   : > { %v5916_v30 = vpack.c.bf16 %v1429_v6, %v1421_v20  ;;  %v5918_v60 = vpack.c.bf16 %v1555_v11, %v1547_v15  ;;  %4370 = vmatprep.subr.bf16.mxu0 %v4541_v12 }
 0x1f3   : > { %v5920_v56 = vpack.c.bf16 %v1430_v10, %v1422_v22  ;;  %v1224_v55 = vpop.f32.mrb[112].mxu1  ;;  %v5922_v26 = vpack.c.bf16 %v1556_v54, %v1548_v7  ;;  %v3914_v1 = vpop.f32.mrb[112].mxu0  ;;  %4371 = vmatpush3.bf16.msra.mxu0 %v4541_v12 }
 0x1f4   : > { %v1225_v57 = vadd.f32 %v1224_v55, %v5750_v23  ;;  %v1226_v49 = vpop.f32.mrb[113].mxu1  ;;  %v3915_v34 = vpop.f32.mrb[113].mxu0 }
 0x1f5   : > { %v1227_v37 = vadd.f32 %v1226_v49, %v5753_v27  ;;  %v1228_v42 = vpop.f32.mrb[114].mxu1  ;;  %v5926_v36 = vadd.f32 %v3915_v34, %v3914_v1  ;;  %v3917_v45 = vpop.f32.mrb[114].mxu0 }
 0x1f6   : > { %v1229_v8 = vadd.f32 %v1228_v42, %v5750_v23  ;;  %v1230_v39 = vpop.f32.mrb[115].mxu1  ;;  %v3918_v38 = vpop.f32.mrb[115].mxu0  ;;  %v1437_v28 = vmax.f32 %v1225_v57, 0.0 }
 0x1f7   : > { %v1231_v18 = vadd.f32 %v1230_v39, %v5753_v27  ;;  %v5930_v58 = vadd.f32 %v3918_v38, %v3917_v45  ;;  %v1438_v61 = vmax.f32 %v1227_v37, 0.0 }
 0x1f8   : > { %v1445_v53 = vmax.f32 %v1229_v8, 0.0  ;;  %2649 = vmatmul.mubr.bf16.gmra.mrb[220].mxu0 %v5838_v46  ;;  %2746 = vmatmul.mubr.bf16.gmra.mrb[220].mxu1 %v5836_v41 }
 0x1f9   : > { %v1446_v35 = vmax.f32 %v1231_v18, 0.0  ;;  %2753 = vmatprep.mubr.bf16.mxu1 %v5860_v13  ;;  %2656 = vmatprep.mubr.bf16.mxu0 %v5862_v17 }
 0x1fa   : > { %v5936_v62 = vpack.c.bf16 %v1445_v53, %v1437_v28 }
 0x1fb   : > { %v5938_v24 = vpack.c.bf16 %v1446_v35, %v1438_v61  ;;  %v1234_v50 = vpop.f32.mrb[116].mxu1  ;;  %v3920_v31 = vpop.f32.mrb[116].mxu0 }
 0x1fc   : > { %v1235_v52 = vadd.f32 %v1234_v50, %v5750_v23  ;;  %v1236_v2 = vpop.f32.mrb[117].mxu1  ;;  %v3921_v16 = vpop.f32.mrb[117].mxu0 }
 0x1fd   : > { %v1237_v46 = vadd.f32 %v1236_v2, %v5753_v27  ;;  %v1238_v21 = vpop.f32.mrb[118].mxu1  ;;  %v5942_v41 = vadd.f32 %v3921_v16, %v3920_v31  ;;  %v3923_v63 = vpop.f32.mrb[118].mxu0 }
 0x1fe   : > { %v1239_v13 = vadd.f32 %v1238_v21, %v5750_v23  ;;  %v1240_v40 = vpop.f32.mrb[119].mxu1  ;;  %v3924_v17 = vpop.f32.mrb[119].mxu0  ;;  %v1453_v5 = vmax.f32 %v1235_v52, 0.0 }
 0x1ff   : > { %v1241_v59 = vadd.f32 %v1240_v40, %v5753_v27  ;;  %v5946_v3 = vadd.f32 %v3924_v17, %v3923_v63  ;;  %v1454_v15 = vmax.f32 %v1237_v46, 0.0  ;;  %v4542_v63 = vld [vmem:[#allocation2 + $0x8] sm:$0xff]  }
 0x200   : > { %v1461_v9 = vmax.f32 %v1239_v13, 0.0  ;;  %2657 = vmatmul.mubr.bf16.gmra.mrb[224].mxu0 %v5858_v32  ;;  %2754 = vmatmul.mubr.bf16.gmra.mrb[224].mxu1 %v5856_v48 }
 0x201   : > { %v1462_v43 = vmax.f32 %v1241_v59, 0.0  ;;  %2761 = vmatprep.mubr.bf16.mxu1 %v5880_v51  ;;  %2664 = vmatprep.mubr.bf16.mxu0 %v5882_v19 }
 0x202   : > { %v5952_v14 = vpack.c.bf16 %v1461_v9, %v1453_v5  ;;  %4372 = vmatprep.subr.bf16.mxu0 %v4542_v63 }
 0x203   : > { %v5954_v7 = vpack.c.bf16 %v1462_v43, %v1454_v15  ;;  %v1244_v0 = vpop.f32.mrb[120].mxu1  ;;  %v3926_v20 = vpop.f32.mrb[120].mxu0  ;;  %4373 = vmatpush3.bf16.msra.mxu0 %v4542_v63 }
 0x204   : > { %v1245_v6 = vadd.f32 %v1244_v0, %v5750_v23  ;;  %v1246_v11 = vpop.f32.mrb[121].mxu1  ;;  %v3927_v32 = vpop.f32.mrb[121].mxu0 }
 0x205   : > { %v1247_v48 = vadd.f32 %v1246_v11, %v5753_v27  ;;  %v1248_v22 = vpop.f32.mrb[122].mxu1  ;;  %v5958_v10 = vadd.f32 %v3927_v32, %v3926_v20  ;;  %v3929_v51 = vpop.f32.mrb[122].mxu0 }
 0x206   : > { %v1249_v19 = vadd.f32 %v1248_v22, %v5750_v23  ;;  %v1250_v54 = vpop.f32.mrb[123].mxu1  ;;  %v3930_v55 = vpop.f32.mrb[123].mxu0  ;;  %v1469_v49 = vmax.f32 %v1245_v6, 0.0 }
 0x207   : > { %v1251_v1 = vadd.f32 %v1250_v54, %v5753_v27  ;;  %v5962_v57 = vadd.f32 %v3930_v55, %v3929_v51  ;;  %v1470_v37 = vmax.f32 %v1247_v48, 0.0 }
 0x208   : > { %v1477_v34 = vmax.f32 %v1249_v19, 0.0  ;;  %2665 = vmatmul.mubr.bf16.gmra.mrb[228].mxu0 %v5878_v4  ;;  %2762 = vmatmul.mubr.bf16.gmra.mrb[228].mxu1 %v5876_v44 }
 0x209   : > { %v1478_v42 = vmax.f32 %v1251_v1, 0.0  ;;  %2769 = vmatprep.mubr.bf16.mxu1 %v5900_v25  ;;  %2672 = vmatprep.mubr.bf16.mxu0 %v5902_v29 }
 0x20a   : > { %v5968_v45 = vpack.c.bf16 %v1477_v34, %v1469_v49 }
 0x20b   : > { %v5970_v8 = vpack.c.bf16 %v1478_v42, %v1470_v37  ;;  %v1254_v39 = vpop.f32.mrb[124].mxu1  ;;  %v3932_v38 = vpop.f32.mrb[124].mxu0 }
 0x20c   : > { %v1255_v18 = vadd.f32 %v1254_v39, %v5750_v23  ;;  %v1256_v28 = vpop.f32.mrb[125].mxu1  ;;  %v3933_v53 = vpop.f32.mrb[125].mxu0 }
 0x20d   : > { %v1257_v4 = vadd.f32 %v1256_v28, %v5753_v27  ;;  %v1258_v61 = vpop.f32.mrb[126].mxu1  ;;  %v5974_v44 = vadd.f32 %v3933_v53, %v3932_v38  ;;  %v3935_v35 = vpop.f32.mrb[126].mxu0 }
 0x20e   : > { %v1259_v25 = vadd.f32 %v1258_v61, %v5750_v23  ;;  %v1260_v50 = vpop.f32.mrb[127].mxu1  ;;  %v3936_v29 = vpop.f32.mrb[127].mxu0  ;;  %v1485_v2 = vmax.f32 %v1255_v18, 0.0 }
 0x20f   : > { %v1261_v31 = vadd.f32 %v1260_v50, %v5753_v27  ;;  %v5978_v52 = vadd.f32 %v3936_v29, %v3935_v35  ;;  %v1486_v46 = vmax.f32 %v1257_v4, 0.0 }
 0x210   : > { %v1493_v16 = vmax.f32 %v1259_v25, 0.0  ;;  %2673 = vmatmul.mubr.bf16.gmra.mrb[232].mxu0 %v5898_v33  ;;  %2770 = vmatmul.mubr.bf16.gmra.mrb[232].mxu1 %v5896_v47  ;;  %v4543_v25 = vld [vmem:[#allocation2 + $0x10] sm:$0xff]  }
 0x211   : > { %v1494_v21 = vmax.f32 %v1261_v31, 0.0  ;;  %2777 = vmatprep.mubr.bf16.mxu1 %v5920_v56  ;;  %2680 = vmatprep.mubr.bf16.mxu0 %v5922_v26 }
 0x212   : > { %v5984_v13 = vpack.c.bf16 %v1493_v16, %v1485_v2  ;;  %4374 = vmatprep.subr.bf16.mxu0 %v4543_v25 }
 0x213   : > { %v5986_v40 = vpack.c.bf16 %v1494_v21, %v1486_v46  ;;  %v1264_v17 = vpop.f32.mrb[128].mxu1  ;;  %v3938_v59 = vpop.f32.mrb[128].mxu0  ;;  %4375 = vmatpush3.bf16.msra.mxu0 %v4543_v25 }
 0x214   : > { %v1265_v5 = vadd.f32 %v1264_v17, %v5750_v23  ;;  %v1266_v9 = vpop.f32.mrb[129].mxu1  ;;  %v3939_v33 = vpop.f32.mrb[129].mxu0 }
 0x215   : > { %v1267_v47 = vadd.f32 %v1266_v9, %v5753_v27  ;;  %v1268_v15 = vpop.f32.mrb[130].mxu1  ;;  %v5990_v43 = vadd.f32 %v3939_v33, %v3938_v59  ;;  %v3941_v56 = vpop.f32.mrb[130].mxu0 }
 0x216   : > { %v1269_v26 = vadd.f32 %v1268_v15, %v5750_v23  ;;  %v1270_v12 = vpop.f32.mrb[131].mxu1  ;;  %v3942_v0 = vpop.f32.mrb[131].mxu0  ;;  %v1501_v11 = vmax.f32 %v1265_v5, 0.0 }
 0x217   : > { %v1271_v20 = vadd.f32 %v1270_v12, %v5753_v27  ;;  %v5994_v6 = vadd.f32 %v3942_v0, %v3941_v56  ;;  %v1502_v48 = vmax.f32 %v1267_v47, 0.0 }
 0x218   : > { %v1509_v32 = vmax.f32 %v1269_v26, 0.0  ;;  %2681 = vmatmul.mubr.bf16.gmra.mrb[236].mxu0 %v5918_v60  ;;  %2778 = vmatmul.mubr.bf16.gmra.mrb[236].mxu1 %v5916_v30 }
 0x219   : > { %v1510_v22 = vmax.f32 %v1271_v20, 0.0  ;;  %2785 = vmatprep.mubr.bf16.mxu1 %v5938_v24 }
 0x21a   : > { %v5999_v51 = vpack.c.bf16 %v1509_v32, %v1501_v11 }
 0x21b   : > { %v6001_v19 = vpack.c.bf16 %v1510_v22, %v1502_v48  ;;  %v1274_v54 = vpop.f32.mrb[132].mxu1  ;;  %v3944_v55 = vpop.f32.mrb[132].mxu0 }
 0x21c   : > { %v1275_v1 = vadd.f32 %v1274_v54, %v5750_v23  ;;  %v1276_v49 = vpop.f32.mrb[133].mxu1  ;;  %v3945_v34 = vpop.f32.mrb[133].mxu0 }
 0x21d   : > { %v1277_v37 = vadd.f32 %v1276_v49, %v5753_v27  ;;  %v1278_v42 = vpop.f32.mrb[134].mxu1  ;;  %v6005_v60 = vadd.f32 %v3945_v34, %v3944_v55  ;;  %v3947_v30 = vpop.f32.mrb[134].mxu0 }
 0x21e   : > { %v1279_v39 = vadd.f32 %v1278_v42, %v5750_v23  ;;  %v1280_v38 = vpop.f32.mrb[135].mxu1  ;;  %v3948_v24 = vpop.f32.mrb[135].mxu0  ;;  %v1517_v53 = vmax.f32 %v1275_v1, 0.0 }
 0x21f   : > { %v1281_v18 = vadd.f32 %v1280_v38, %v5753_v27  ;;  %v6009_v28 = vadd.f32 %v3948_v24, %v3947_v30  ;;  %v1518_v61 = vmax.f32 %v1277_v37, 0.0 }
 0x220   : > { %v1525_v4 = vmax.f32 %v1279_v39, 0.0  ;;  %2786 = vmatmul.mubr.bf16.gmra.mrb[240].mxu1 %v5936_v62 }
 0x221   : > { %v1526_v35 = vmax.f32 %v1281_v18, 0.0  ;;  %2793 = vmatprep.mubr.bf16.mxu1 %v5954_v7 }
 0x222   : > { %v6013_v50 = vpack.c.bf16 %v1525_v4, %v1517_v53  ;;  %v4544_v53 = vld [vmem:[#allocation2 + $0x18] sm:$0xff]   ;;  %v6044_v4 = vld [vmem:[%s6461_s4] ss:$0 sm:$0xff] }
 0x223   : > { %v6015_v29 = vpack.c.bf16 %v1526_v35, %v1518_v61  ;;  %v1284_v31 = vpop.f32.mrb[136].mxu1  ;;  %v3950_v2 = vpop.f32.mrb[136].mxu0  ;;  %4376 = vmatprep.subr.bf16.mxu0 %v4544_v53 }
 0x224   : > { %v1285_v16 = vadd.f32 %v1284_v31, %v5750_v23  ;;  %v1286_v46 = vpop.f32.mrb[137].mxu1  ;;  %v3951_v21 = vpop.f32.mrb[137].mxu0  ;;  %4377 = vmatpush3.bf16.msra.mxu0 %v4544_v53 }
 0x225   : > { %v1287_v63 = vadd.f32 %v1286_v46, %v5753_v27  ;;  %v1288_v62 = vpop.f32.mrb[138].mxu1  ;;  %v6019_v17 = vadd.f32 %v3951_v21, %v3950_v2  ;;  %v3953_v59 = vpop.f32.mrb[138].mxu0  ;;  %v4545_v21 = vld [vmem:[#allocation2 + $0x20] sm:$0xff]  }
 0x226   : > { %v1289_v7 = vadd.f32 %v1288_v62, %v5750_v23  ;;  %v1290_v5 = vpop.f32.mrb[139].mxu1  ;;  %v3954_v9 = vpop.f32.mrb[139].mxu0  ;;  %v1533_v15 = vmax.f32 %v1285_v16, 0.0  ;;  %4378 = vmatprep.subr.bf16.mxu0 %v4545_v21 }
 0x227   : > { %v1291_v33 = vadd.f32 %v1290_v5, %v5753_v27  ;;  %v6023_v47 = vadd.f32 %v3954_v9, %v3953_v59  ;;  %v1534_v26 = vmax.f32 %v1287_v63, 0.0  ;;  %v2244_v59 = vadd.f32 %v5930_v58, %v6044_v4 }
 0x228   : > { %v1541_v56 = vmax.f32 %v1289_v7, 0.0  ;;  %2794 = vmatmul.mubr.bf16.gmra.mrb[244].mxu1 %v5952_v14  ;;  %4379 = vmatpush3.bf16.msra.mxu0 %v4545_v21  ;;  %v2249_v58 = vadd.f32 %v5942_v41, %v6044_v4 }
 0x229   : > { %v1542_v12 = vmax.f32 %v1291_v33, 0.0  ;;  %2801 = vmatprep.mubr.bf16.mxu1 %v5970_v8  ;;  %v4546_v33 = vld [vmem:[#allocation2 + $0x28] sm:$0xff]  }
 0x22a   : > { %v6027_v0 = vpack.c.bf16 %v1541_v56, %v1533_v15  ;;  %4380 = vmatprep.subr.bf16.mxu0 %v4546_v33 }
 0x22b   : > { %v6029_v20 = vpack.c.bf16 %v1542_v12, %v1534_v26  ;;  %v1294_v11 = vpop.f32.mrb[140].mxu1  ;;  %v3956_v32 = vpop.f32.mrb[140].mxu0 }
 0x22c   : > { %v1295_v48 = vadd.f32 %v1294_v11, %v5750_v23  ;;  %v1296_v22 = vpop.f32.mrb[141].mxu1  ;;  %v3957_v54 = vpop.f32.mrb[141].mxu0  ;;  %4381 = vmatpush3.bf16.msra.mxu0 %v4546_v33 }
 0x22d   : > { %v1297_v55 = vadd.f32 %v1296_v22, %v5753_v27  ;;  %v1298_v1 = vpop.f32.mrb[142].mxu1  ;;  %v6033_v49 = vadd.f32 %v3957_v54, %v3956_v32  ;;  %v3959_v14 = vpop.f32.mrb[142].mxu0  ;;  %v4547_v22 = vld [vmem:[#allocation2 + $0x30] sm:$0xff]  }
 0x22e   : > { %v1299_v34 = vadd.f32 %v1298_v1, %v5750_v23  ;;  %v1300_v37 = vpop.f32.mrb[143].mxu1  ;;  %v3960_v8 = vpop.f32.mrb[143].mxu0  ;;  %v1549_v39 = vmax.f32 %v1295_v48, 0.0  ;;  %4382 = vmatprep.subr.bf16.mxu0 %v4547_v22 }
 0x22f   : > { %v1301_v42 = vadd.f32 %v1300_v37, %v5753_v27  ;;  %v6037_v30 = vadd.f32 %v3960_v8, %v3959_v14  ;;  %v1550_v24 = vmax.f32 %v1297_v55, 0.0  ;;  %v4548_v37 = vld [vmem:[#allocation2 + $0x38] sm:$0xff]  }
 0x230   : > { %v1557_v38 = vmax.f32 %v1299_v34, 0.0  ;;  %2802 = vmatmul.mubr.bf16.gmra.mrb[248].mxu1 %v5968_v45  ;;  %v2241_v45 = vadd.f32 %v5926_v36, %v6044_v4  ;;  %4383 = vmatpush3.bf16.msra.mxu0 %v4547_v22 }
 0x231   : > { %v1558_v18 = vmax.f32 %v1301_v42, 0.0  ;;  %2809 = vmatprep.mubr.bf16.mxu1 %v5986_v40  ;;  %4384 = vmatprep.subr.bf16.mxu0 %v4548_v37 }
 0x232   : > { %v6046_v23 = vpack.c.bf16 %v1557_v38, %v1549_v39 }
 0x233   : > { %v6048_v61 = vpack.c.bf16 %v1558_v18, %v1550_v24  ;;  %v4026_v27 = vpop.f32.mrb[144].mxu1  ;;  %v3962_v35 = vpop.f32.mrb[144].mxu0 }
 0x234   : > { %v4027_v25 = vpop.f32.mrb[145].mxu1  ;;  %v3963_v31 = vpop.f32.mrb[145].mxu0  ;;  %4385 = vmatpush3.bf16.msra.mxu0 %v4548_v37 }
 0x235   : > { %v4028_v40 = vadd.f32 %v4027_v25, %v4026_v27  ;;  %v4029_v2 = vpop.f32.mrb[146].mxu1  ;;  %v6052_v16 = vadd.f32 %v3963_v31, %v3962_v35  ;;  %v3965_v46 = vpop.f32.mrb[146].mxu0 }
 0x236   : > { %v4030_v63 = vpop.f32.mrb[147].mxu1  ;;  %v3966_v62 = vpop.f32.mrb[147].mxu0 }
 0x237   : > { %v6056_v7 = vadd.f32 %v4028_v40, %v2241_v45  ;;  %v4031_v5 = vadd.f32 %v4030_v63, %v4029_v2  ;;  %v6058_v9 = vadd.f32 %v3966_v62, %v3965_v46  ;;  %v2265_v63 = vadd.f32 %v5974_v44, %v6044_v4 }
 0x238   : > { %2810 = vmatmul.mubr.bf16.gmra.mrb[252].mxu1 %v5984_v13 }
 0x239   : > { %v6061_v36 = vadd.f32 %v4031_v5, %v2244_v59  ;;  %2817 = vmatprep.mubr.bf16.mxu1 %v6001_v19  ;;  %v2252_v19 = vadd.f32 %v5946_v3, %v6044_v4  ;;  %v2257_v3 = vadd.f32 %v5958_v10, %v6044_v4 }
 0x23b   : > { %v4032_v15 = vpop.f32.mrb[148].mxu1  ;;  %v3968_v56 = vpop.f32.mrb[148].mxu0 }
 0x23c   : > { %v4033_v26 = vpop.f32.mrb[149].mxu1  ;;  %v3969_v12 = vpop.f32.mrb[149].mxu0 }
 0x23d   : > { %v4034_v11 = vadd.f32 %v4033_v26, %v4032_v15  ;;  %v4035_v32 = vpop.f32.mrb[150].mxu1  ;;  %v6066_v48 = vadd.f32 %v3969_v12, %v3968_v56  ;;  %v3971_v13 = vpop.f32.mrb[150].mxu0 }
 0x23e   : > { %v4036_v54 = vpop.f32.mrb[151].mxu1  ;;  %v3972_v55 = vpop.f32.mrb[151].mxu0 }
 0x23f   : > { %v6070_v1 = vadd.f32 %v4034_v11, %v2249_v58  ;;  %v4037_v14 = vadd.f32 %v4036_v54, %v4035_v32  ;;  %v6072_v34 = vadd.f32 %v3972_v55, %v3971_v13  ;;  %v2273_v13 = vadd.f32 %v5990_v43, %v6044_v4 }
 0x240   : > { %2818 = vmatmul.mubr.bf16.gmra.mrb[0].mxu1 %v5999_v51 }
 0x241   : > { %v6075_v41 = vadd.f32 %v4037_v14, %v2252_v19  ;;  %2825 = vmatprep.mubr.bf16.mxu1 %v6015_v29  ;;  %v2260_v29 = vadd.f32 %v5962_v57, %v6044_v4 }
 0x243   : > { %v4038_v8 = vpop.f32.mrb[152].mxu1  ;;  %v3974_v42 = vpop.f32.mrb[152].mxu0 }
 0x244   : > { %v4039_v39 = vpop.f32.mrb[153].mxu1  ;;  %v3975_v38 = vpop.f32.mrb[153].mxu0 }
 0x245   : > { %v4040_v24 = vadd.f32 %v4039_v39, %v4038_v8  ;;  %v4041_v18 = vpop.f32.mrb[154].mxu1  ;;  %v6080_v53 = vadd.f32 %v3975_v38, %v3974_v42  ;;  %v3977_v51 = vpop.f32.mrb[154].mxu0 }
 0x246   : > { %v4042_v27 = vpop.f32.mrb[155].mxu1  ;;  %v3978_v35 = vpop.f32.mrb[155].mxu0 }
 0x247   : > { %v6084_v25 = vadd.f32 %v4040_v24, %v2257_v3  ;;  %v4043_v31 = vadd.f32 %v4042_v27, %v4041_v18  ;;  %v6086_v45 = vadd.f32 %v3978_v35, %v3977_v51  ;;  %v2281_v24 = vadd.f32 %v6005_v60, %v6044_v4 }
 0x248   : > { %2826 = vmatmul.mubr.bf16.gmra.mrb[4].mxu1 %v6013_v50  ;;  %v2268_v50 = vadd.f32 %v5978_v52, %v6044_v4 }
 0x249   : > { %v6089_v40 = vadd.f32 %v4043_v31, %v2260_v29  ;;  %2833 = vmatprep.mubr.bf16.mxu1 %v6029_v20  ;;  %v2284_v31 = vadd.f32 %v6009_v28, %v6044_v4 }
 0x24b   : > { %v4044_v10 = vpop.f32.mrb[156].mxu1  ;;  %v3980_v2 = vpop.f32.mrb[156].mxu0 }
 0x24c   : > { %v4045_v46 = vpop.f32.mrb[157].mxu1  ;;  %v3981_v21 = vpop.f32.mrb[157].mxu0 }
 0x24d   : > { %v4046_v62 = vadd.f32 %v4045_v46, %v4044_v10  ;;  %v4047_v57 = vpop.f32.mrb[158].mxu1  ;;  %v6094_v59 = vadd.f32 %v3981_v21, %v3980_v2  ;;  %v3983_v5 = vpop.f32.mrb[158].mxu0 }
 0x24e   : > { %v4048_v33 = vpop.f32.mrb[159].mxu1  ;;  %v3984_v15 = vpop.f32.mrb[159].mxu0 }
 0x24f   : > { %v6098_v56 = vadd.f32 %v4046_v62, %v2265_v63  ;;  %v4049_v20 = vadd.f32 %v4048_v33, %v4047_v57  ;;  %v6100_v26 = vadd.f32 %v3984_v15, %v3983_v5  ;;  %v2289_v57 = vadd.f32 %v6019_v17, %v6044_v4 }
 0x250   : > { %2834 = vmatmul.mubr.bf16.gmra.mrb[8].mxu1 %v6027_v0  ;;  %v2276_v0 = vadd.f32 %v5994_v6, %v6044_v4 }
 0x251   : > { %v6103_v12 = vadd.f32 %v4049_v20, %v2268_v50  ;;  %2841 = vmatprep.mubr.bf16.mxu1 %v6048_v61 }
 0x253   : > { %v3986_v44 = vpop.f32.mrb[160].mxu0  ;;  %v4050_v58 = vpop.f32.mrb[160].mxu1 }
 0x254   : > { %v3987_v11 = vpop.f32.mrb[161].mxu0  ;;  %v4051_v32 = vpop.f32.mrb[161].mxu1 }
 0x255   : > { %v6108_v22 = vadd.f32 %v3987_v11, %v3986_v44  ;;  %v4052_v52 = vadd.f32 %v4051_v32, %v4050_v58  ;;  %v3989_v54 = vpop.f32.mrb[162].mxu0  ;;  %v4053_v55 = vpop.f32.mrb[162].mxu1  ;;  %v2292_v44 = vadd.f32 %v6023_v47, %v6044_v4 }
 0x256   : > { %v3990_v19 = vpop.f32.mrb[163].mxu0  ;;  %v4054_v14 = vpop.f32.mrb[163].mxu1 }
 0x257   : > { %v6112_v37 = vadd.f32 %v4052_v52, %v2273_v13  ;;  %v6114_v61 = vadd.f32 %v3990_v19, %v3989_v54  ;;  %v4055_v8 = vadd.f32 %v4054_v14, %v4053_v55  ;;  %v2297_v19 = vadd.f32 %v6033_v49, %v6044_v4 }
 0x258   : > { %2842 = vmatmul.mubr.bf16.gmra.mrb[12].mxu1 %v6046_v23 }
 0x259   : > { %v6117_v42 = vadd.f32 %v4055_v8, %v2276_v0 }
 0x25b   : > { %v3992_v43 = vpop.f32.mrb[164].mxu0  ;;  %v4056_v39 = vpop.f32.mrb[164].mxu1 }
 0x25c   : > { %v3993_v38 = vpop.f32.mrb[165].mxu0  ;;  %v4057_v3 = vpop.f32.mrb[165].mxu1 }
 0x25d   : > { %v6121_v18 = vadd.f32 %v3993_v38, %v3992_v43  ;;  %v4058_v51 = vadd.f32 %v4057_v3, %v4056_v39  ;;  %v3995_v6 = vpop.f32.mrb[166].mxu0  ;;  %v4059_v27 = vpop.f32.mrb[166].mxu1  ;;  %v2300_v38 = vadd.f32 %v6037_v30, %v6044_v4  ;;  %v2308_v30 = vadd.f32 %v6058_v9, %v6044_v4 }
 0x25e   : > { %v3996_v35 = vpop.f32.mrb[167].mxu0  ;;  %v4060_v29 = vpop.f32.mrb[167].mxu1  ;;  %v2313_v9 = vadd.f32 %v6066_v48, %v6044_v4 }
 0x25f   : > { %v6125_v23 = vadd.f32 %v4058_v51, %v2281_v24  ;;  %v6127_v10 = vadd.f32 %v3996_v35, %v3995_v6  ;;  %v4061_v2 = vadd.f32 %v4060_v29, %v4059_v27 }
 0x261   : > { %v6129_v46 = vadd.f32 %v4061_v2, %v2284_v31  ;;  %v2305_v31 = vadd.f32 %v6052_v16, %v6044_v4 }
 0x263   : > { %v3998_v21 = vpop.f32.mrb[168].mxu0  ;;  %v4062_v63 = vpop.f32.mrb[168].mxu1 }
 0x264   : > { %v3999_v60 = vpop.f32.mrb[169].mxu0  ;;  %v4063_v62 = vpop.f32.mrb[169].mxu1 }
 0x265   : > { %v6133_v5 = vadd.f32 %v3999_v60, %v3998_v21  ;;  %v4064_v33 = vadd.f32 %v4063_v62, %v4062_v63  ;;  %v4001_v15 = vpop.f32.mrb[170].mxu0  ;;  %v4065_v50 = vpop.f32.mrb[170].mxu1 }
 0x266   : > { %v4002_v28 = vpop.f32.mrb[171].mxu0  ;;  %v4066_v20 = vpop.f32.mrb[171].mxu1 }
 0x267   : > { %v6137_v58 = vadd.f32 %v4064_v33, %v2289_v57  ;;  %v6139_v11 = vadd.f32 %v4002_v28, %v4001_v15  ;;  %v4067_v32 = vadd.f32 %v4066_v20, %v4065_v50 }
 0x269   : > { %v6141_v13 = vadd.f32 %v4067_v32, %v2292_v44 }
 0x26b   : > { %v4004_v52 = vpop.f32.mrb[172].mxu0  ;;  %v4068_v54 = vpop.f32.mrb[172].mxu1 }
 0x26c   : > { %v4005_v17 = vpop.f32.mrb[173].mxu0  ;;  %v4069_v55 = vpop.f32.mrb[173].mxu1 }
 0x26d   : > { %v6145_v14 = vadd.f32 %v4005_v17, %v4004_v52  ;;  %v4070_v0 = vadd.f32 %v4069_v55, %v4068_v54  ;;  %v4007_v8 = vpop.f32.mrb[174].mxu0  ;;  %v4071_v43 = vpop.f32.mrb[174].mxu1 }
 0x26e   : > { %v4008_v47 = vpop.f32.mrb[175].mxu0  ;;  %v4072_v39 = vpop.f32.mrb[175].mxu1 }
 0x26f   : > { %v6149_v3 = vadd.f32 %v4070_v0, %v2297_v19  ;;  %v6151_v24 = vadd.f32 %v4008_v47, %v4007_v8  ;;  %v4073_v51 = vadd.f32 %v4072_v39, %v4071_v43 }
 0x271   : > { %v6153_v6 = vadd.f32 %v4073_v51, %v2300_v38 }
 0x273   : > { %v4074_v27 = vpop.f32.mrb[176].mxu1  ;;  %v4138_v35 = vpop.f32.mrb[176].mxu0 }
 0x274   : > { %v4075_v49 = vpop.f32.mrb[177].mxu1  ;;  %v4139_v29 = vpop.f32.mrb[177].mxu0 }
 0x275   : > { %v4076_v2 = vadd.f32 %v4075_v49, %v4074_v27  ;;  %v4140_v21 = vadd.f32 %v4139_v29, %v4138_v35  ;;  %v4077_v63 = vpop.f32.mrb[178].mxu1  ;;  %v4141_v60 = vpop.f32.mrb[178].mxu0 }
 0x276   : > { %v4078_v62 = vpop.f32.mrb[179].mxu1  ;;  %v4142_v57 = vpop.f32.mrb[179].mxu0 }
 0x277   : > { %v6159_v33 = vadd.f32 %v4076_v2, %v2305_v31  ;;  %v6162_v15 = vadd.f32 %v4140_v21, %v6056_v7  ;;  %v4079_v50 = vadd.f32 %v4078_v62, %v4077_v63  ;;  %v4143_v28 = vadd.f32 %v4142_v57, %v4141_v60 }
 0x278   : > { %v2316_v7 = vadd.f32 %v6072_v34, %v6044_v4  ;;  %v2321_v34 = vadd.f32 %v6080_v53, %v6044_v4 }
 0x279   : > { %v6164_v20 = vadd.f32 %v4079_v50, %v2308_v30  ;;  %v6167_v16 = vadd.f32 %v4143_v28, %v6061_v36 }
 0x27b   : > { %v4080_v44 = vpop.f32.mrb[180].mxu1  ;;  %v4144_v32 = vpop.f32.mrb[180].mxu0 }
 0x27c   : > { %v4081_v52 = vpop.f32.mrb[181].mxu1  ;;  %v4145_v54 = vpop.f32.mrb[181].mxu0 }
 0x27d   : > { %v4082_v17 = vadd.f32 %v4081_v52, %v4080_v44  ;;  %v4146_v55 = vadd.f32 %v4145_v54, %v4144_v32  ;;  %v4083_v19 = vpop.f32.mrb[182].mxu1  ;;  %v4147_v0 = vpop.f32.mrb[182].mxu0 }
 0x27e   : > { %v4084_v8 = vpop.f32.mrb[183].mxu1  ;;  %v4148_v43 = vpop.f32.mrb[183].mxu0 }
 0x27f   : > { %v6173_v47 = vadd.f32 %v4082_v17, %v2313_v9  ;;  %v6176_v36 = vadd.f32 %v4146_v55, %v6070_v1  ;;  %v4085_v39 = vadd.f32 %v4084_v8, %v4083_v19  ;;  %v4149_v38 = vadd.f32 %v4148_v43, %v4147_v0 }
 0x280   : > { %v2324_v1 = vadd.f32 %v6086_v45, %v6044_v4  ;;  %v2329_v45 = vadd.f32 %v6094_v59, %v6044_v4 }
 0x281   : > { %v6178_v51 = vadd.f32 %v4085_v39, %v2316_v7  ;;  %v6181_v48 = vadd.f32 %v4149_v38, %v6075_v41 }
 0x283   : > { %v4086_v27 = vpop.f32.mrb[184].mxu1  ;;  %v4150_v35 = vpop.f32.mrb[184].mxu0 }
 0x284   : > { %v4087_v49 = vpop.f32.mrb[185].mxu1  ;;  %v4151_v29 = vpop.f32.mrb[185].mxu0 }
 0x285   : > { %v4088_v31 = vadd.f32 %v4087_v49, %v4086_v27  ;;  %v4152_v2 = vadd.f32 %v4151_v29, %v4150_v35  ;;  %v4089_v21 = vpop.f32.mrb[186].mxu1  ;;  %v4153_v63 = vpop.f32.mrb[186].mxu0 }
 0x286   : > { %v4090_v60 = vpop.f32.mrb[187].mxu1  ;;  %v4154_v30 = vpop.f32.mrb[187].mxu0 }
 0x287   : > { %v6187_v62 = vadd.f32 %v4088_v31, %v2321_v34  ;;  %v6190_v41 = vadd.f32 %v4152_v2, %v6084_v25  ;;  %v4091_v57 = vadd.f32 %v4090_v60, %v4089_v21  ;;  %v4155_v50 = vadd.f32 %v4154_v30, %v4153_v63 }
 0x288   : > { %v2332_v25 = vadd.f32 %v6100_v26, %v6044_v4  ;;  %v2337_v26 = vadd.f32 %v6108_v22, %v6044_v4 }
 0x289   : > { %v6192_v28 = vadd.f32 %v4091_v57, %v2324_v1  ;;  %v6195_v53 = vadd.f32 %v4155_v50, %v6089_v40 }
 0x28b   : > { %v4092_v44 = vpop.f32.mrb[188].mxu1  ;;  %v4156_v32 = vpop.f32.mrb[188].mxu0 }
 0x28c   : > { %v4093_v52 = vpop.f32.mrb[189].mxu1  ;;  %v4157_v54 = vpop.f32.mrb[189].mxu0 }
 0x28d   : > { %v4094_v9 = vadd.f32 %v4093_v52, %v4092_v44  ;;  %v4158_v17 = vadd.f32 %v4157_v54, %v4156_v32  ;;  %v4095_v55 = vpop.f32.mrb[190].mxu1  ;;  %v4159_v19 = vpop.f32.mrb[190].mxu0 }
 0x28e   : > { %v4096_v0 = vpop.f32.mrb[191].mxu1  ;;  %v4160_v7 = vpop.f32.mrb[191].mxu0 }
 0x28f   : > { %v6201_v8 = vadd.f32 %v4094_v9, %v2329_v45  ;;  %v6204_v40 = vadd.f32 %v4158_v17, %v6098_v56  ;;  %v4097_v43 = vadd.f32 %v4096_v0, %v4095_v55  ;;  %v4161_v39 = vadd.f32 %v4160_v7, %v4159_v19 }
 0x290   : > { %v2340_v56 = vadd.f32 %v6114_v61, %v6044_v4  ;;  %v2345_v61 = vadd.f32 %v6121_v18, %v6044_v4 }
 0x291   : > { %v6206_v38 = vadd.f32 %v4097_v43, %v2332_v25  ;;  %v6209_v59 = vadd.f32 %v4161_v39, %v6103_v12 }
 0x293   : > { %v4098_v27 = vpop.f32.mrb[192].mxu1  ;;  %v4162_v35 = vpop.f32.mrb[192].mxu0 }
 0x294   : > { %v4099_v49 = vpop.f32.mrb[193].mxu1  ;;  %v4163_v29 = vpop.f32.mrb[193].mxu0 }
 0x295   : > { %v4100_v34 = vadd.f32 %v4099_v49, %v4098_v27  ;;  %v4164_v31 = vadd.f32 %v4163_v29, %v4162_v35  ;;  %v4101_v2 = vpop.f32.mrb[194].mxu1  ;;  %v4165_v21 = vpop.f32.mrb[194].mxu0 }
 0x296   : > { %v4102_v63 = vpop.f32.mrb[195].mxu1  ;;  %v4166_v1 = vpop.f32.mrb[195].mxu0 }
 0x297   : > { %v6215_v60 = vadd.f32 %v4100_v34, %v2337_v26  ;;  %v6218_v12 = vadd.f32 %v4164_v31, %v6112_v37  ;;  %v4103_v30 = vadd.f32 %v4102_v63, %v4101_v2  ;;  %v4167_v57 = vadd.f32 %v4166_v1, %v4165_v21 }
 0x298   : > { %v2348_v37 = vadd.f32 %v6127_v10, %v6044_v4  ;;  %v2353_v10 = vadd.f32 %v6133_v5, %v6044_v4 }
 0x299   : > { %v6220_v50 = vadd.f32 %v4103_v30, %v2340_v56  ;;  %v6223_v22 = vadd.f32 %v4167_v57, %v6117_v42 }
 0x29b   : > { %v4104_v44 = vpop.f32.mrb[196].mxu1  ;;  %v4168_v32 = vpop.f32.mrb[196].mxu0 }
 0x29c   : > { %v4105_v52 = vpop.f32.mrb[197].mxu1  ;;  %v4169_v54 = vpop.f32.mrb[197].mxu0 }
 0x29d   : > { %v4106_v45 = vadd.f32 %v4105_v52, %v4104_v44  ;;  %v4170_v9 = vadd.f32 %v4169_v54, %v4168_v32  ;;  %v4107_v17 = vpop.f32.mrb[198].mxu1  ;;  %v4171_v55 = vpop.f32.mrb[198].mxu0 }
 0x29e   : > { %v4108_v19 = vpop.f32.mrb[199].mxu1  ;;  %v4172_v25 = vpop.f32.mrb[199].mxu0 }
 0x29f   : > { %v6229_v0 = vadd.f32 %v4106_v45, %v2345_v61  ;;  %v6232_v42 = vadd.f32 %v4170_v9, %v6125_v23  ;;  %v4109_v7 = vadd.f32 %v4108_v19, %v4107_v17  ;;  %v4173_v43 = vadd.f32 %v4172_v25, %v4171_v55 }
 0x2a0   : > { %v2356_v23 = vadd.f32 %v6139_v11, %v6044_v4  ;;  %v2361_v11 = vadd.f32 %v6145_v14, %v6044_v4 }
 0x2a1   : > { %v6234_v39 = vadd.f32 %v4109_v7, %v2348_v37  ;;  %v6237_v18 = vadd.f32 %v4173_v43, %v6129_v46 }
 0x2a3   : > { %v4110_v27 = vpop.f32.mrb[200].mxu1  ;;  %v4174_v35 = vpop.f32.mrb[200].mxu0 }
 0x2a4   : > { %v4111_v49 = vpop.f32.mrb[201].mxu1  ;;  %v4175_v29 = vpop.f32.mrb[201].mxu0 }
 0x2a5   : > { %v4112_v26 = vadd.f32 %v4111_v49, %v4110_v27  ;;  %v4176_v34 = vadd.f32 %v4175_v29, %v4174_v35  ;;  %v4113_v31 = vpop.f32.mrb[202].mxu1  ;;  %v4177_v2 = vpop.f32.mrb[202].mxu0 }
 0x2a6   : > { %v4114_v21 = vpop.f32.mrb[203].mxu1  ;;  %v4178_v56 = vpop.f32.mrb[203].mxu0 }
 0x2a7   : > { %v6243_v63 = vadd.f32 %v4112_v26, %v2353_v10  ;;  %v6246_v46 = vadd.f32 %v4176_v34, %v6137_v58  ;;  %v4115_v1 = vadd.f32 %v4114_v21, %v4113_v31  ;;  %v4179_v30 = vadd.f32 %v4178_v56, %v4177_v2 }
 0x2a8   : > { %v2364_v58 = vadd.f32 %v6151_v24, %v6044_v4 }
 0x2a9   : > { %v6248_v57 = vadd.f32 %v4115_v1, %v2356_v23  ;;  %v6251_v5 = vadd.f32 %v4179_v30, %v6141_v13 }
 0x2ab   : > { %v4116_v44 = vpop.f32.mrb[204].mxu1  ;;  %v4180_v32 = vpop.f32.mrb[204].mxu0 }
 0x2ac   : > { %v4117_v52 = vpop.f32.mrb[205].mxu1  ;;  %v4181_v54 = vpop.f32.mrb[205].mxu0 }
 0x2ad   : > { %v4118_v61 = vadd.f32 %v4117_v52, %v4116_v44  ;;  %v4182_v45 = vadd.f32 %v4181_v54, %v4180_v32  ;;  %v4119_v9 = vpop.f32.mrb[206].mxu1  ;;  %v4183_v17 = vpop.f32.mrb[206].mxu0 }
 0x2ae   : > { %v4120_v55 = vpop.f32.mrb[207].mxu1  ;;  %v4184_v37 = vpop.f32.mrb[207].mxu0 }
 0x2af   : > { %v6257_v19 = vadd.f32 %v4118_v61, %v2361_v11  ;;  %v6260_v13 = vadd.f32 %v4182_v45, %v6149_v3  ;;  %v4121_v25 = vadd.f32 %v4120_v55, %v4119_v9  ;;  %v4185_v7 = vadd.f32 %v4184_v37, %v4183_v17 }
 0x2b1   : > { %v6262_v43 = vadd.f32 %v4121_v25, %v2364_v58  ;;  %v6265_v14 = vadd.f32 %v4185_v7, %v6153_v6 }
 0x2b3   : > { %v4186_v27 = vpop.f32.mrb[208].mxu0  ;;  %v4250_v35 = vpop.f32.mrb[208].mxu1 }
 0x2b4   : > { %v4187_v49 = vpop.f32.mrb[209].mxu0  ;;  %v4251_v29 = vpop.f32.mrb[209].mxu1 }
 0x2b5   : > { %v4188_v10 = vadd.f32 %v4187_v49, %v4186_v27  ;;  %v4252_v4 = vadd.f32 %v4251_v29, %v4250_v35  ;;  %v4189_v24 = vpop.f32.mrb[210].mxu0  ;;  %v4253_v26 = vpop.f32.mrb[210].mxu1 }
 0x2b6   : > { %v4190_v34 = vpop.f32.mrb[211].mxu0  ;;  %v4254_v31 = vpop.f32.mrb[211].mxu1 }
 0x2b7   : > { %v6268_v3 = vadd.f32 %v4188_v10, %v6159_v33  ;;  %v2724_v2 = vadd.f32 %v4252_v4, %v6162_v15  ;;  %v4191_v23 = vadd.f32 %v4190_v34, %v4189_v24  ;;  %v4255_v21 = vadd.f32 %v4254_v31, %v4253_v26 }
 0x2b9   : > { %v6272_v6 = vadd.f32 %v4191_v23, %v6164_v20  ;;  %v2727_v56 = vadd.f32 %v4255_v21, %v6167_v16  ;;  %v2850_v1 = vmax.f32 %v2724_v2, 0.0 }
 0x2bb   : > { %v2851_v30 = vmax.f32 %v2727_v56, 0.0  ;;  %v4192_v44 = vpop.f32.mrb[212].mxu0  ;;  %v4256_v32 = vpop.f32.mrb[212].mxu1 }
 0x2bc   : > { %v4193_v52 = vpop.f32.mrb[213].mxu0  ;;  %v4257_v54 = vpop.f32.mrb[213].mxu1 }
 0x2bd   : > { %v4194_v11 = vadd.f32 %v4193_v52, %v4192_v44  ;;  %v4258_v61 = vadd.f32 %v4257_v54, %v4256_v32  ;;  %v4195_v45 = vpop.f32.mrb[214].mxu0  ;;  %v4259_v33 = vpop.f32.mrb[214].mxu1  ;;  %v2882_v9 = vpack.c.bf16 %v2851_v30, %v2850_v1 }
 0x2be   : > { %v4196_v17 = vpop.f32.mrb[215].mxu0  ;;  %v4260_v15 = vpop.f32.mrb[215].mxu1 }
 0x2bf   : > { %v6276_v58 = vadd.f32 %v4194_v11, %v6173_v47  ;;  %v2732_v20 = vadd.f32 %v4258_v61, %v6176_v36  ;;  %v4197_v55 = vadd.f32 %v4196_v17, %v4195_v45  ;;  %v4261_v16 = vadd.f32 %v4260_v15, %v4259_v33  ;;  %4386 = vmatprep.mubr.bf16.mxu0 %v2882_v9 }
 0x2c1   : > { %v6280_v37 = vadd.f32 %v4197_v55, %v6178_v51  ;;  %v2735_v25 = vadd.f32 %v4261_v16, %v6181_v48  ;;  %v2852_v7 = vmax.f32 %v2732_v20, 0.0 }
 0x2c3   : > { %v2853_v27 = vmax.f32 %v2735_v25, 0.0  ;;  %v4198_v35 = vpop.f32.mrb[216].mxu0  ;;  %v4262_v49 = vpop.f32.mrb[216].mxu1 }
 0x2c4   : > { %v4199_v29 = vpop.f32.mrb[217].mxu0  ;;  %v4263_v10 = vpop.f32.mrb[217].mxu1 }
 0x2c5   : > { %v2883_v4 = vpack.c.bf16 %v2853_v27, %v2852_v7  ;;  %v4200_v24 = vadd.f32 %v4199_v29, %v4198_v35  ;;  %v4264_v47 = vadd.f32 %v4263_v10, %v4262_v49  ;;  %v4201_v26 = vpop.f32.mrb[218].mxu0  ;;  %v4265_v34 = vpop.f32.mrb[218].mxu1 }
 0x2c6   : > { %v4202_v36 = vpop.f32.mrb[219].mxu0  ;;  %v4266_v31 = vpop.f32.mrb[219].mxu1 }
 0x2c7   : > { %v6284_v2 = vadd.f32 %v4200_v24, %v6187_v62  ;;  %v2740_v51 = vadd.f32 %v4264_v47, %v6190_v41  ;;  %v4203_v23 = vadd.f32 %v4202_v36, %v4201_v26  ;;  %v4267_v48 = vadd.f32 %v4266_v31, %v4265_v34  ;;  %4387 = vmatmul.mubr.bf16.vlgmr.msra.gmra.mrb[240].mxu0 %v2883_v4 }
 0x2c9   : > { %v6288_v21 = vadd.f32 %v4203_v23, %v6192_v28  ;;  %v2743_v56 = vadd.f32 %v4267_v48, %v6195_v53  ;;  %v2854_v1 = vmax.f32 %v2740_v51, 0.0 }
 0x2cb   : > { %v2855_v30 = vmax.f32 %v2743_v56, 0.0  ;;  %v4204_v44 = vpop.f32.mrb[220].mxu0  ;;  %v4268_v32 = vpop.f32.mrb[220].mxu1 }
 0x2cc   : > { %v4205_v52 = vpop.f32.mrb[221].mxu0  ;;  %v4269_v54 = vpop.f32.mrb[221].mxu1 }
 0x2cd   : > { %v4206_v11 = vadd.f32 %v4205_v52, %v4204_v44  ;;  %v4270_v61 = vadd.f32 %v4269_v54, %v4268_v32  ;;  %v4207_v62 = vpop.f32.mrb[222].mxu0  ;;  %v4271_v45 = vpop.f32.mrb[222].mxu1  ;;  %v2884_v33 = vpack.c.bf16 %v2855_v30, %v2854_v1 }
 0x2ce   : > { %v4208_v41 = vpop.f32.mrb[223].mxu0  ;;  %v4272_v9 = vpop.f32.mrb[223].mxu1 }
 0x2cf   : > { %v6292_v17 = vadd.f32 %v4206_v11, %v6201_v8  ;;  %v2748_v28 = vadd.f32 %v4270_v61, %v6204_v40  ;;  %v4209_v15 = vadd.f32 %v4208_v41, %v4207_v62  ;;  %v4273_v53 = vadd.f32 %v4272_v9, %v4271_v45  ;;  %4390 = vmatprep.mubr.bf16.mxu0 %v2884_v33 }
 0x2d1   : > { %v6296_v20 = vadd.f32 %v4209_v15, %v6206_v38  ;;  %v2751_v55 = vadd.f32 %v4273_v53, %v6209_v59  ;;  %v2856_v16 = vmax.f32 %v2748_v28, 0.0 }
 0x2d3   : > { %v2857_v25 = vmax.f32 %v2751_v55, 0.0  ;;  %v4210_v7 = vpop.f32.mrb[224].mxu0  ;;  %v4274_v27 = vpop.f32.mrb[224].mxu1 }
 0x2d4   : > { %v4211_v35 = vpop.f32.mrb[225].mxu0  ;;  %v4275_v49 = vpop.f32.mrb[225].mxu1 }
 0x2d5   : > { %v4212_v29 = vadd.f32 %v4211_v35, %v4210_v7  ;;  %v4276_v10 = vadd.f32 %v4275_v49, %v4274_v27  ;;  %v4213_v8 = vpop.f32.mrb[226].mxu0  ;;  %v4277_v4 = vpop.f32.mrb[226].mxu1  ;;  %v2885_v24 = vpack.c.bf16 %v2857_v25, %v2856_v16 }
 0x2d6   : > { %v4214_v40 = vpop.f32.mrb[227].mxu0  ;;  %v4278_v47 = vpop.f32.mrb[227].mxu1 }
 0x2d7   : > { %v6300_v26 = vadd.f32 %v4212_v29, %v6215_v60  ;;  %v2756_v38 = vadd.f32 %v4276_v10, %v6218_v12  ;;  %v4215_v34 = vadd.f32 %v4214_v40, %v4213_v8  ;;  %v4279_v59 = vadd.f32 %v4278_v47, %v4277_v4  ;;  %4391 = vmatmul.mubr.bf16.gmra.mrb[244].mxu0 %v2885_v24 }
 0x2d9   : > { %v6304_v36 = vadd.f32 %v4215_v34, %v6220_v50  ;;  %v2759_v31 = vadd.f32 %v4279_v59, %v6223_v22  ;;  %v2858_v51 = vmax.f32 %v2756_v38, 0.0 }
 0x2db   : > { %v2859_v23 = vmax.f32 %v2759_v31, 0.0  ;;  %v4216_v48 = vpop.f32.mrb[228].mxu0  ;;  %v4280_v56 = vpop.f32.mrb[228].mxu1 }
 0x2dc   : > { %v4217_v1 = vpop.f32.mrb[229].mxu0  ;;  %v4281_v30 = vpop.f32.mrb[229].mxu1 }
 0x2dd   : > { %v4218_v44 = vadd.f32 %v4217_v1, %v4216_v48  ;;  %v4282_v32 = vadd.f32 %v4281_v30, %v4280_v56  ;;  %v4219_v60 = vpop.f32.mrb[230].mxu0  ;;  %v4283_v52 = vpop.f32.mrb[230].mxu1  ;;  %v2886_v54 = vpack.c.bf16 %v2859_v23, %v2858_v51 }
 0x2de   : > { %v4220_v12 = vpop.f32.mrb[231].mxu0  ;;  %v4284_v11 = vpop.f32.mrb[231].mxu1 }
 0x2df   : > { %v6308_v61 = vadd.f32 %v4218_v44, %v6229_v0  ;;  %v2764_v50 = vadd.f32 %v4282_v32, %v6232_v42  ;;  %v4221_v62 = vadd.f32 %v4220_v12, %v4219_v60  ;;  %v4285_v22 = vadd.f32 %v4284_v11, %v4283_v52  ;;  %4394 = vmatprep.mubr.bf16.mxu0 %v2886_v54 }
 0x2e1   : > { %v6312_v45 = vadd.f32 %v4221_v62, %v6234_v39  ;;  %v2767_v33 = vadd.f32 %v4285_v22, %v6237_v18  ;;  %v2860_v41 = vmax.f32 %v2764_v50, 0.0 }
 0x2e3   : > { %v2861_v9 = vmax.f32 %v2767_v33, 0.0  ;;  %v4222_v28 = vpop.f32.mrb[232].mxu0  ;;  %v4286_v15 = vpop.f32.mrb[232].mxu1 }
 0x2e4   : > { %v4223_v53 = vpop.f32.mrb[233].mxu0  ;;  %v4287_v55 = vpop.f32.mrb[233].mxu1 }
 0x2e5   : > { %v4224_v16 = vadd.f32 %v4223_v53, %v4222_v28  ;;  %v4288_v25 = vadd.f32 %v4287_v55, %v4286_v15  ;;  %v4225_v0 = vpop.f32.mrb[234].mxu0  ;;  %v4289_v7 = vpop.f32.mrb[234].mxu1  ;;  %v2887_v27 = vpack.c.bf16 %v2861_v9, %v2860_v41 }
 0x2e6   : > { %v4226_v42 = vpop.f32.mrb[235].mxu0  ;;  %v4290_v35 = vpop.f32.mrb[235].mxu1 }
 0x2e7   : > { %v6316_v49 = vadd.f32 %v4224_v16, %v6243_v63  ;;  %v2772_v39 = vadd.f32 %v4288_v25, %v6246_v46  ;;  %v4227_v29 = vadd.f32 %v4226_v42, %v4225_v0  ;;  %v4291_v18 = vadd.f32 %v4290_v35, %v4289_v7  ;;  %4395 = vmatmul.mubr.bf16.gmra.mrb[248].mxu0 %v2887_v27 }
 0x2e9   : > { %v6320_v10 = vadd.f32 %v4227_v29, %v6248_v57  ;;  %v2775_v8 = vadd.f32 %v4291_v18, %v6251_v5  ;;  %v2862_v4 = vmax.f32 %v2772_v39, 0.0 }
 0x2eb   : > { %v2863_v24 = vmax.f32 %v2775_v8, 0.0  ;;  %v4228_v40 = vpop.f32.mrb[236].mxu0  ;;  %v4292_v47 = vpop.f32.mrb[236].mxu1 }
 0x2ec   : > { %v4229_v38 = vpop.f32.mrb[237].mxu0  ;;  %v4293_v34 = vpop.f32.mrb[237].mxu1 }
 0x2ed   : > { %v4230_v59 = vadd.f32 %v4229_v38, %v4228_v40  ;;  %v4294_v31 = vadd.f32 %v4293_v34, %v4292_v47  ;;  %v4231_v63 = vpop.f32.mrb[238].mxu0  ;;  %v4295_v51 = vpop.f32.mrb[238].mxu1  ;;  %v2888_v23 = vpack.c.bf16 %v2863_v24, %v2862_v4 }
 0x2ee   : > { %v4232_v46 = vpop.f32.mrb[239].mxu0  ;;  %v4296_v48 = vpop.f32.mrb[239].mxu1 }
 0x2ef   : > { %v6324_v56 = vadd.f32 %v4230_v59, %v6257_v19  ;;  %v2780_v57 = vadd.f32 %v4294_v31, %v6260_v13  ;;  %v4233_v1 = vadd.f32 %v4232_v46, %v4231_v63  ;;  %v4297_v5 = vadd.f32 %v4296_v48, %v4295_v51  ;;  %4398 = vmatprep.mubr.bf16.mxu0 %v2888_v23 }
 0x2f1   : > { %v6328_v30 = vadd.f32 %v4233_v1, %v6262_v43  ;;  %v2783_v44 = vadd.f32 %v4297_v5, %v6265_v14  ;;  %v2864_v32 = vmax.f32 %v2780_v57, 0.0 }
 0x2f3   : > { %v2865_v60 = vmax.f32 %v2783_v44, 0.0  ;;  %v4298_v52 = vpop.f32.mrb[240].mxu1 }
 0x2f4   : > { %v4299_v54 = vpop.f32.mrb[241].mxu1 }
 0x2f5   : > { %v4300_v12 = vadd.f32 %v4299_v54, %v4298_v52  ;;  %v4301_v11 = vpop.f32.mrb[242].mxu1  ;;  %v2889_v50 = vpack.c.bf16 %v2865_v60, %v2864_v32 }
 0x2f6   : > { %v4302_v62 = vpop.f32.mrb[243].mxu1 }
 0x2f7   : > { %v2788_v19 = vadd.f32 %v4300_v12, %v6268_v3  ;;  %v4303_v22 = vadd.f32 %v4302_v62, %v4301_v11  ;;  %4399 = vmatmul.mubr.bf16.gmra.mrb[252].mxu0 %v2889_v50 }
 0x2f9   : > { %v2791_v13 = vadd.f32 %v4303_v22, %v6272_v6  ;;  %v2866_v33 = vmax.f32 %v2788_v19, 0.0 }
 0x2fb   : > { %v2867_v41 = vmax.f32 %v2791_v13, 0.0  ;;  %v4304_v43 = vpop.f32.mrb[244].mxu1 }
 0x2fc   : > { %v4305_v9 = vpop.f32.mrb[245].mxu1 }
 0x2fd   : > { %v4306_v28 = vadd.f32 %v4305_v9, %v4304_v43  ;;  %v4307_v14 = vpop.f32.mrb[246].mxu1  ;;  %v2890_v15 = vpack.c.bf16 %v2867_v41, %v2866_v33 }
 0x2fe   : > { %v4308_v53 = vpop.f32.mrb[247].mxu1 }
 0x2ff   : > { %v2796_v55 = vadd.f32 %v4306_v28, %v6276_v58  ;;  %v4309_v16 = vadd.f32 %v4308_v53, %v4307_v14  ;;  %4402 = vmatprep.mubr.bf16.mxu0 %v2890_v15 }
 0x301   : > { %v2799_v25 = vadd.f32 %v4309_v16, %v6280_v37  ;;  %v2868_v0 = vmax.f32 %v2796_v55, 0.0 }
 0x303   : > { %v2869_v3 = vmax.f32 %v2799_v25, 0.0  ;;  %v4310_v7 = vpop.f32.mrb[248].mxu1 }
 0x304   : > { %v4311_v27 = vpop.f32.mrb[249].mxu1 }
 0x305   : > { %v2891_v42 = vpack.c.bf16 %v2869_v3, %v2868_v0  ;;  %v4312_v6 = vadd.f32 %v4311_v27, %v4310_v7  ;;  %v4313_v35 = vpop.f32.mrb[250].mxu1 }
 0x306   : > { %v4314_v39 = vpop.f32.mrb[251].mxu1 }
 0x307   : > { %v2804_v29 = vadd.f32 %v4312_v6, %v6284_v2  ;;  %v4315_v18 = vadd.f32 %v4314_v39, %v4313_v35  ;;  %4403 = vmatmul.mubr.bf16.gmra.mrb[0].mxu0 %v2891_v42 }
 0x309   : > { %v2807_v8 = vadd.f32 %v4315_v18, %v6288_v21  ;;  %v2870_v4 = vmax.f32 %v2804_v29, 0.0 }
 0x30b   : > { %v2871_v58 = vmax.f32 %v2807_v8, 0.0  ;;  %v4316_v24 = vpop.f32.mrb[252].mxu1 }
 0x30c   : > { %v4317_v40 = vpop.f32.mrb[253].mxu1 }
 0x30d   : > { %v4318_v47 = vadd.f32 %v4317_v40, %v4316_v24  ;;  %v4319_v37 = vpop.f32.mrb[254].mxu1  ;;  %v2892_v38 = vpack.c.bf16 %v2871_v58, %v2870_v4 }
 0x30e   : > { %v4320_v34 = vpop.f32.mrb[255].mxu1 }
 0x30f   : > { %v2812_v59 = vadd.f32 %v4318_v47, %v6292_v17  ;;  %v4321_v31 = vadd.f32 %v4320_v34, %v4319_v37  ;;  %4406 = vmatprep.mubr.bf16.mxu0 %v2892_v38 }
 0x311   : > { %v2815_v63 = vadd.f32 %v4321_v31, %v6296_v20  ;;  %v2872_v51 = vmax.f32 %v2812_v59, 0.0 }
 0x313   : > { %v2873_v2 = vmax.f32 %v2815_v63, 0.0  ;;  %v4322_v23 = vpop.f32.mrb[0].mxu1 }
 0x314   : > { %v4323_v46 = vpop.f32.mrb[1].mxu1 }
 0x315   : > { %v2893_v48 = vpack.c.bf16 %v2873_v2, %v2872_v51  ;;  %v4324_v21 = vadd.f32 %v4323_v46, %v4322_v23  ;;  %v4325_v57 = vpop.f32.mrb[2].mxu1 }
 0x316   : > { %v4326_v1 = vpop.f32.mrb[3].mxu1 }
 0x317   : > { %v2820_v5 = vadd.f32 %v4324_v21, %v6300_v26  ;;  %v4327_v44 = vadd.f32 %v4326_v1, %v4325_v57  ;;  %4407 = vmatmul.mubr.bf16.gmra.mrb[4].mxu0 %v2893_v48 }
 0x319   : > { %v2823_v32 = vadd.f32 %v4327_v44, %v6304_v36  ;;  %v2874_v60 = vmax.f32 %v2820_v5, 0.0 }
 0x31b   : > { %v2875_v17 = vmax.f32 %v2823_v32, 0.0  ;;  %v4328_v52 = vpop.f32.mrb[4].mxu1 }
 0x31c   : > { %v4329_v54 = vpop.f32.mrb[5].mxu1 }
 0x31d   : > { %v4330_v12 = vadd.f32 %v4329_v54, %v4328_v52  ;;  %v4331_v20 = vpop.f32.mrb[6].mxu1  ;;  %v2894_v11 = vpack.c.bf16 %v2875_v17, %v2874_v60 }
 0x31e   : > { %v4332_v50 = vpop.f32.mrb[7].mxu1 }
 0x31f   : > { %v2828_v62 = vadd.f32 %v4330_v12, %v6308_v61  ;;  %v4333_v19 = vadd.f32 %v4332_v50, %v4331_v20  ;;  %4410 = vmatprep.mubr.bf16.mxu0 %v2894_v11 }
 0x321   : > { %v2831_v22 = vadd.f32 %v4333_v19, %v6312_v45  ;;  %v2876_v13 = vmax.f32 %v2828_v62, 0.0 }
 0x323   : > { %v2877_v26 = vmax.f32 %v2831_v22, 0.0  ;;  %v4334_v33 = vpop.f32.mrb[8].mxu1 }
 0x324   : > { %v4335_v41 = vpop.f32.mrb[9].mxu1 }
 0x325   : > { %v2895_v43 = vpack.c.bf16 %v2877_v26, %v2876_v13  ;;  %v4336_v36 = vadd.f32 %v4335_v41, %v4334_v33  ;;  %v4337_v9 = vpop.f32.mrb[10].mxu1 }
 0x326   : > { %v4338_v28 = vpop.f32.mrb[11].mxu1 }
 0x327   : > { %v2836_v14 = vadd.f32 %v4336_v36, %v6316_v49  ;;  %v4339_v15 = vadd.f32 %v4338_v28, %v4337_v9  ;;  %4411 = vmatmul.mubr.bf16.gmra.mrb[8].mxu0 %v2895_v43 }
 0x329   : > { %v2839_v53 = vadd.f32 %v4339_v15, %v6320_v10  ;;  %v2878_v55 = vmax.f32 %v2836_v14, 0.0  ;;  %v6350_v10 = vld [vmem:[%s6463_s6] ss:$0 sm:$0xff] }
 0x32b   : > { %v2879_v61 = vmax.f32 %v2839_v53, 0.0  ;;  %v4340_v16 = vpop.f32.mrb[12].mxu1 }
 0x32c   : > { %v4341_v25 = vpop.f32.mrb[13].mxu1 }
 0x32d   : > { %v4342_v0 = vadd.f32 %v4341_v25, %v4340_v16  ;;  %v4343_v45 = vpop.f32.mrb[14].mxu1  ;;  %v2896_v3 = vpack.c.bf16 %v2879_v61, %v2878_v55 }
 0x32e   : > { %v4344_v7 = vpop.f32.mrb[15].mxu1 }
 0x32f   : > { %v2844_v27 = vadd.f32 %v4342_v0, %v6324_v56  ;;  %v4345_v42 = vadd.f32 %v4344_v7, %v4343_v45  ;;  %4414 = vmatprep.mubr.bf16.mxu0 %v2896_v3 }
 0x331   : > { %v2847_v6 = vadd.f32 %v4345_v42, %v6328_v30  ;;  %v2880_v35 = vmax.f32 %v2844_v27, 0.0 }
 0x333   : > { %v2881_v49 = vmax.f32 %v2847_v6, 0.0 }
 0x335   : > { %v2897_v39 = vpack.c.bf16 %v2881_v49, %v2880_v35 }
 0x337   : > { %4415 = vmatmul.mubr.bf16.gmra.mrb[12].mxu0 %v2897_v39 }
 0x39a   : > { %v4388_v29 = vpop.f32.mrb[240].mxu0 }
 0x39b   : > { %v3012_v18 = vadd.f32 %v4388_v29, %v6350_v10  ;;  %v3003_v8 = vpop.f32.mrb[241].mxu0 }
 0x39c   : > { %v3004_v4 = vadd.f32 %v6350_v10, %v3003_v8  ;;  %v4389_v56 = vpop.f32.mrb[242].mxu0 }
 0x39d   : > { %v3132_v58 = vsub.f32 0.0, %v3012_v18  ;;  %v3015_v24 = vadd.f32 %v4389_v56, %v6350_v10  ;;  %v3006_v30 = vpop.f32.mrb[243].mxu0 }
 0x39e   : > { %v3130_v40 = vsub.f32 0.0, %v3004_v4  ;;  %v3007_v47 = vadd.f32 %v6350_v10, %v3006_v30 }
 0x39f   : > { %v3166_v37 = vmul.f32 1.442695, %v3132_v58  ;;  %v3133_v38 = vsub.f32 0.0, %v3015_v24 }
 0x3a0   : > { %v3162_v34 = vmul.f32 1.442695, %v3130_v40  ;;  %v3131_v59 = vsub.f32 0.0, %v3007_v47 }
 0x3a1   : > { %4549 = vpow2.f32 %v3166_v37  ;;  %v3168_v31 = vmul.f32 1.442695, %v3133_v38 }
 0x3a2   : > { %4551 = vpow2.f32 %v3162_v34  ;;  %v3164_v63 = vmul.f32 1.442695, %v3131_v59 }
 0x3a3   : > { %4553 = vpow2.f32 %v3168_v31 }
 0x3a4   : > { %4555 = vpow2.f32 %v3164_v63 }
 0x3aa   : > { %v4392_v51 = vpop.f32.mrb[244].mxu0 }
 0x3ab   : > { %v4550_v2 = vpop.eup %4549  ;;  %v3028_v23 = vadd.f32 %v4392_v51, %v6350_v10  ;;  %v3019_v46 = vpop.f32.mrb[245].mxu0 }
 0x3ac   : > { %v4552_v48 = vpop.eup %4551  ;;  %v3228_v21 = vadd.f32 1.0, %v4550_v2  ;;  %v3020_v57 = vadd.f32 %v6350_v10, %v3019_v46  ;;  %v4393_v1 = vpop.f32.mrb[246].mxu0 }
 0x3ad   : > { %v4554_v5 = vpop.eup %4553  ;;  %v3226_v44 = vadd.f32 1.0, %v4552_v48  ;;  %v3136_v32 = vsub.f32 0.0, %v3028_v23  ;;  %v3031_v60 = vadd.f32 %v4393_v1, %v6350_v10  ;;  %v3022_v17 = vpop.f32.mrb[247].mxu0 }
 0x3ae   : > { %v4556_v52 = vpop.eup %4555  ;;  %4557 = vrcp.f32 %v3228_v21  ;;  %v3229_v54 = vadd.f32 1.0, %v4554_v5  ;;  %v3134_v12 = vsub.f32 0.0, %v3020_v57  ;;  %v3023_v20 = vadd.f32 %v6350_v10, %v3022_v17 }
 0x3af   : > { %4559 = vrcp.f32 %v3226_v44  ;;  %v3227_v11 = vadd.f32 1.0, %v4556_v52  ;;  %v3174_v50 = vmul.f32 1.442695, %v3136_v32  ;;  %v3137_v62 = vsub.f32 0.0, %v3031_v60 }
 0x3b0   : > { %4561 = vrcp.f32 %v3229_v54  ;;  %v3170_v19 = vmul.f32 1.442695, %v3134_v12  ;;  %v3135_v22 = vsub.f32 0.0, %v3023_v20 }
 0x3b1   : > { %4563 = vrcp.f32 %v3227_v11  ;;  %v3176_v13 = vmul.f32 1.442695, %v3137_v62 }
 0x3b2   : > { %4565 = vpow2.f32 %v3174_v50  ;;  %v3172_v26 = vmul.f32 1.442695, %v3135_v22 }
 0x3b3   : > { %4567 = vpow2.f32 %v3170_v19 }
 0x3b4   : > { %4569 = vpow2.f32 %v3176_v13 }
 0x3b5   : > { %4571 = vpow2.f32 %v3172_v26 }
 0x3b8   : > { %v4558_v33 = vpop.eup %4557 }
 0x3b9   : > { %v4560_v41 = vpop.eup %4559 }
 0x3ba   : > { %v4562_v43 = vpop.eup %4561  ;;  %v4396_v36 = vpop.f32.mrb[248].mxu0 }
 0x3bb   : > { %v4564_v9 = vpop.eup %4563  ;;  %v3811_v28 = vpack.c.bf16 %v4562_v43, %v4558_v33  ;;  %v3044_v14 = vadd.f32 %v4396_v36, %v6350_v10  ;;  %v3035_v15 = vpop.f32.mrb[249].mxu0 }
 0x3bc   : > { %v4566_v53 = vpop.eup %4565  ;;  %v3806_v55 = vpack.c.bf16 %v4564_v9, %v4560_v41  ;;  %v3036_v61 = vadd.f32 %v6350_v10, %v3035_v15  ;;  %v4397_v16 = vpop.f32.mrb[250].mxu0 }
 0x3bd   : > { %v4568_v25 = vpop.eup %4567  ;;  %3883 = vst [vmem:[%s6365_s23 + $0x8] sm:$0xff] %v3811_v28   ;;  %v3232_v0 = vadd.f32 1.0, %v4566_v53  ;;  %v3140_v45 = vsub.f32 0.0, %v3044_v14  ;;  %v3047_v3 = vadd.f32 %v4397_v16, %v6350_v10  ;;  %v3038_v7 = vpop.f32.mrb[251].mxu0 }
 0x3be   : > { %v4570_v27 = vpop.eup %4569  ;;  %3807 = vst [vmem:[%s6365_s23] sm:$0xff] %v3806_v55   ;;  %v3230_v42 = vadd.f32 1.0, %v4568_v25  ;;  %v3138_v6 = vsub.f32 0.0, %v3036_v61  ;;  %v3039_v35 = vadd.f32 %v6350_v10, %v3038_v7 }
 0x3bf   : > { %v4572_v49 = vpop.eup %4571  ;;  %4573 = vrcp.f32 %v3232_v0  ;;  %v3233_v39 = vadd.f32 1.0, %v4570_v27  ;;  %v3182_v29 = vmul.f32 1.442695, %v3140_v45  ;;  %v3141_v18 = vsub.f32 0.0, %v3047_v3 }
 0x3c0   : > { %4575 = vrcp.f32 %v3230_v42  ;;  %v3231_v8 = vadd.f32 1.0, %v4572_v49  ;;  %v3178_v4 = vmul.f32 1.442695, %v3138_v6  ;;  %v3139_v56 = vsub.f32 0.0, %v3039_v35 }
 0x3c1   : > { %4577 = vrcp.f32 %v3233_v39  ;;  %v3184_v58 = vmul.f32 1.442695, %v3141_v18 }
 0x3c2   : > { %4579 = vrcp.f32 %v3231_v8  ;;  %v3180_v24 = vmul.f32 1.442695, %v3139_v56 }
 0x3c3   : > { %4581 = vpow2.f32 %v3182_v29 }
 0x3c4   : > { %4583 = vpow2.f32 %v3178_v4 }
 0x3c5   : > { %4585 = vpow2.f32 %v3184_v58 }
 0x3c6   : > { %4587 = vpow2.f32 %v3180_v24 }
 0x3c9   : > { %v4574_v30 = vpop.eup %4573 }
 0x3ca   : > { %v4576_v40 = vpop.eup %4575  ;;  %v4400_v47 = vpop.f32.mrb[252].mxu0 }
 0x3cb   : > { %v4578_v37 = vpop.eup %4577  ;;  %v3060_v38 = vadd.f32 %v4400_v47, %v6350_v10  ;;  %v3051_v34 = vpop.f32.mrb[253].mxu0 }
 0x3cc   : > { %v4580_v59 = vpop.eup %4579  ;;  %v3821_v31 = vpack.c.bf16 %v4578_v37, %v4574_v30  ;;  %v3052_v63 = vadd.f32 %v6350_v10, %v3051_v34  ;;  %v4401_v51 = vpop.f32.mrb[254].mxu0 }
 0x3cd   : > { %v4582_v2 = vpop.eup %4581  ;;  %v3816_v23 = vpack.c.bf16 %v4580_v59, %v4576_v40  ;;  %v3144_v46 = vsub.f32 0.0, %v3060_v38  ;;  %v3063_v48 = vadd.f32 %v4401_v51, %v6350_v10  ;;  %v3054_v21 = vpop.f32.mrb[255].mxu0 }
 0x3ce   : > { %v4584_v57 = vpop.eup %4583  ;;  %3885 = vst [vmem:[%s6365_s23 + $0x18] sm:$0xff] %v3821_v31   ;;  %v3236_v1 = vadd.f32 1.0, %v4582_v2  ;;  %v3142_v5 = vsub.f32 0.0, %v3052_v63  ;;  %v3055_v44 = vadd.f32 %v6350_v10, %v3054_v21 }
 0x3cf   : > { %v4586_v32 = vpop.eup %4585  ;;  %3884 = vst [vmem:[%s6365_s23 + $0x10] sm:$0xff] %v3816_v23   ;;  %v3234_v60 = vadd.f32 1.0, %v4584_v57  ;;  %v3145_v17 = vsub.f32 0.0, %v3063_v48  ;;  %v3190_v12 = vmul.f32 1.442695, %v3144_v46 }
 0x3d0   : > { %v4588_v52 = vpop.eup %4587  ;;  %4589 = vrcp.f32 %v3236_v1  ;;  %v3237_v54 = vadd.f32 1.0, %v4586_v32  ;;  %v3143_v20 = vsub.f32 0.0, %v3055_v44  ;;  %v3186_v50 = vmul.f32 1.442695, %v3142_v5 }
 0x3d1   : > { %4591 = vrcp.f32 %v3234_v60  ;;  %v3235_v11 = vadd.f32 1.0, %v4588_v52  ;;  %v3192_v62 = vmul.f32 1.442695, %v3145_v17 }
 0x3d2   : > { %4593 = vrcp.f32 %v3237_v54  ;;  %v3188_v19 = vmul.f32 1.442695, %v3143_v20 }
 0x3d3   : > { %4595 = vrcp.f32 %v3235_v11 }
 0x3d4   : > { %4597 = vpow2.f32 %v3190_v12 }
 0x3d5   : > { %4599 = vpow2.f32 %v3186_v50 }
 0x3d6   : > { %4601 = vpow2.f32 %v3192_v62 }
 0x3d7   : > { %4603 = vpow2.f32 %v3188_v19 }
 0x3da   : > { %v4590_v22 = vpop.eup %4589  ;;  %v4404_v13 = vpop.f32.mrb[0].mxu0 }
 0x3db   : > { %v4592_v26 = vpop.eup %4591  ;;  %v3076_v33 = vadd.f32 %v4404_v13, %v6350_v10  ;;  %v3067_v41 = vpop.f32.mrb[1].mxu0 }
 0x3dc   : > { %v4594_v43 = vpop.eup %4593  ;;  %v3068_v36 = vadd.f32 %v6350_v10, %v3067_v41  ;;  %v4405_v9 = vpop.f32.mrb[2].mxu0 }
 0x3dd   : > { %v4596_v28 = vpop.eup %4595  ;;  %v3831_v14 = vpack.c.bf16 %v4594_v43, %v4590_v22  ;;  %v3148_v15 = vsub.f32 0.0, %v3076_v33  ;;  %v3079_v53 = vadd.f32 %v4405_v9, %v6350_v10  ;;  %v3070_v55 = vpop.f32.mrb[3].mxu0 }
 0x3de   : > { %v4598_v61 = vpop.eup %4597  ;;  %v3826_v16 = vpack.c.bf16 %v4596_v28, %v4592_v26  ;;  %v3146_v25 = vsub.f32 0.0, %v3068_v36  ;;  %v3071_v0 = vadd.f32 %v6350_v10, %v3070_v55 }
 0x3df   : > { %v4600_v45 = vpop.eup %4599  ;;  %3887 = vst [vmem:[%s6365_s23 + $0x28] sm:$0xff] %v3831_v14   ;;  %v3240_v3 = vadd.f32 1.0, %v4598_v61  ;;  %v3149_v7 = vsub.f32 0.0, %v3079_v53  ;;  %v3198_v39 = vmul.f32 1.442695, %v3148_v15 }
 0x3e0   : > { %v4602_v27 = vpop.eup %4601  ;;  %3886 = vst [vmem:[%s6365_s23 + $0x20] sm:$0xff] %v3826_v16   ;;  %v3238_v42 = vadd.f32 1.0, %v4600_v45  ;;  %v3147_v6 = vsub.f32 0.0, %v3071_v0  ;;  %v3194_v18 = vmul.f32 1.442695, %v3146_v25 }
 0x3e1   : > { %v4604_v35 = vpop.eup %4603  ;;  %4605 = vrcp.f32 %v3240_v3  ;;  %v3241_v49 = vadd.f32 1.0, %v4602_v27  ;;  %v3200_v8 = vmul.f32 1.442695, %v3149_v7 }
 0x3e2   : > { %4607 = vrcp.f32 %v3238_v42  ;;  %v3239_v29 = vadd.f32 1.0, %v4604_v35  ;;  %v3196_v4 = vmul.f32 1.442695, %v3147_v6 }
 0x3e3   : > { %4609 = vrcp.f32 %v3241_v49 }
 0x3e4   : > { %4611 = vrcp.f32 %v3239_v29 }
 0x3e5   : > { %4613 = vpow2.f32 %v3198_v39 }
 0x3e6   : > { %4615 = vpow2.f32 %v3194_v18 }
 0x3e7   : > { %4617 = vpow2.f32 %v3200_v8 }
 0x3e8   : > { %4619 = vpow2.f32 %v3196_v4 }
 0x3ea   : > { %v4408_v56 = vpop.f32.mrb[4].mxu0 }
 0x3eb   : > { %v4606_v58 = vpop.eup %4605  ;;  %v3092_v24 = vadd.f32 %v4408_v56, %v6350_v10  ;;  %v3083_v30 = vpop.f32.mrb[5].mxu0 }
 0x3ec   : > { %v4608_v40 = vpop.eup %4607  ;;  %v3084_v47 = vadd.f32 %v6350_v10, %v3083_v30  ;;  %v4409_v37 = vpop.f32.mrb[6].mxu0 }
 0x3ed   : > { %v4610_v38 = vpop.eup %4609  ;;  %v3152_v34 = vsub.f32 0.0, %v3092_v24  ;;  %v3095_v59 = vadd.f32 %v4409_v37, %v6350_v10  ;;  %v3086_v31 = vpop.f32.mrb[7].mxu0 }
 0x3ee   : > { %v4612_v63 = vpop.eup %4611  ;;  %v3841_v51 = vpack.c.bf16 %v4610_v38, %v4606_v58  ;;  %v3150_v2 = vsub.f32 0.0, %v3084_v47  ;;  %v3087_v23 = vadd.f32 %v6350_v10, %v3086_v31 }
 0x3ef   : > { %v4614_v46 = vpop.eup %4613  ;;  %v3836_v48 = vpack.c.bf16 %v4612_v63, %v4608_v40  ;;  %v3206_v21 = vmul.f32 1.442695, %v3152_v34  ;;  %v3153_v57 = vsub.f32 0.0, %v3095_v59 }
 0x3f0   : > { %v4616_v1 = vpop.eup %4615  ;;  %3889 = vst [vmem:[%s6365_s23 + $0x38] sm:$0xff] %v3841_v51   ;;  %v3244_v5 = vadd.f32 1.0, %v4614_v46  ;;  %v3151_v44 = vsub.f32 0.0, %v3087_v23  ;;  %v3202_v54 = vmul.f32 1.442695, %v3150_v2 }
 0x3f1   : > { %v4618_v32 = vpop.eup %4617  ;;  %3888 = vst [vmem:[%s6365_s23 + $0x30] sm:$0xff] %v3836_v48   ;;  %v3242_v60 = vadd.f32 1.0, %v4616_v1  ;;  %4621 = vpow2.f32 %v3206_v21  ;;  %v3208_v20 = vmul.f32 1.442695, %v3153_v57 }
 0x3f2   : > { %v4620_v17 = vpop.eup %4619  ;;  %4623 = vrcp.f32 %v3244_v5  ;;  %v3245_v52 = vadd.f32 1.0, %v4618_v32  ;;  %v3204_v11 = vmul.f32 1.442695, %v3151_v44 }
 0x3f3   : > { %4625 = vrcp.f32 %v3242_v60  ;;  %v3243_v12 = vadd.f32 1.0, %v4620_v17 }
 0x3f4   : > { %4627 = vrcp.f32 %v3245_v52 }
 0x3f5   : > { %4629 = vrcp.f32 %v3243_v12 }
 0x3f6   : > { %4631 = vpow2.f32 %v3202_v54 }
 0x3f7   : > { %4633 = vpow2.f32 %v3208_v20 }
 0x3f8   : > { %4635 = vpow2.f32 %v3204_v11 }
 0x3fa   : > { %v4412_v50 = vpop.f32.mrb[8].mxu0 }
 0x3fb   : > { %v4622_v62 = vpop.eup %4621  ;;  %v3108_v19 = vadd.f32 %v4412_v50, %v6350_v10  ;;  %v3099_v22 = vpop.f32.mrb[9].mxu0 }
 0x3fc   : > { %v4624_v13 = vpop.eup %4623  ;;  %v3248_v26 = vadd.f32 1.0, %v4622_v62  ;;  %v3100_v33 = vadd.f32 %v6350_v10, %v3099_v22  ;;  %v4413_v41 = vpop.f32.mrb[10].mxu0 }
 0x3fd   : > { %v4626_v43 = vpop.eup %4625  ;;  %v3156_v36 = vsub.f32 0.0, %v3108_v19  ;;  %v3111_v9 = vadd.f32 %v4413_v41, %v6350_v10  ;;  %v3102_v28 = vpop.f32.mrb[11].mxu0 }
 0x3fe   : > { %v4628_v14 = vpop.eup %4627  ;;  %v3154_v15 = vsub.f32 0.0, %v3100_v33  ;;  %v3103_v53 = vadd.f32 %v6350_v10, %v3102_v28  ;;  %4637 = vrcp.f32 %v3248_v26 }
 0x3ff   : > { %v4630_v55 = vpop.eup %4629  ;;  %v3851_v61 = vpack.c.bf16 %v4628_v14, %v4624_v13  ;;  %v3214_v16 = vmul.f32 1.442695, %v3156_v36  ;;  %v3157_v25 = vsub.f32 0.0, %v3111_v9 }
 0x400   : > { %v4632_v0 = vpop.eup %4631  ;;  %v3846_v45 = vpack.c.bf16 %v4630_v55, %v4626_v43  ;;  %v3210_v3 = vmul.f32 1.442695, %v3154_v15  ;;  %v3155_v7 = vsub.f32 0.0, %v3103_v53 }
 0x401   : > { %v4634_v27 = vpop.eup %4633  ;;  %3891 = vst [vmem:[%s6365_s23 + $0x48] sm:$0xff] %v3851_v61   ;;  %v3246_v42 = vadd.f32 1.0, %v4632_v0  ;;  %4639 = vpow2.f32 %v3214_v16  ;;  %v3216_v49 = vmul.f32 1.442695, %v3157_v25 }
 0x402   : > { %v4636_v6 = vpop.eup %4635  ;;  %3890 = vst [vmem:[%s6365_s23 + $0x40] sm:$0xff] %v3846_v45   ;;  %v3249_v35 = vadd.f32 1.0, %v4634_v27  ;;  %4641 = vpow2.f32 %v3210_v3  ;;  %v3212_v29 = vmul.f32 1.442695, %v3155_v7 }
 0x403   : > { %4643 = vrcp.f32 %v3246_v42  ;;  %v3247_v39 = vadd.f32 1.0, %v4636_v6 }
 0x404   : > { %4645 = vrcp.f32 %v3249_v35 }
 0x405   : > { %4647 = vrcp.f32 %v3247_v39 }
 0x406   : > { %4649 = vpow2.f32 %v3216_v49 }
 0x407   : > { %4651 = vpow2.f32 %v3212_v29 }
 0x408   : > { %v4638_v18 = vpop.eup %4637 }
 0x40a   : > { %v4416_v8 = vpop.f32.mrb[12].mxu0 }
 0x40b   : > { %v4640_v4 = vpop.eup %4639  ;;  %v3124_v56 = vadd.f32 %v4416_v8, %v6350_v10  ;;  %v3115_v58 = vpop.f32.mrb[13].mxu0 }
 0x40c   : > { %v4642_v24 = vpop.eup %4641  ;;  %v3252_v30 = vadd.f32 1.0, %v4640_v4  ;;  %v3116_v40 = vadd.f32 %v6350_v10, %v3115_v58  ;;  %v4417_v47 = vpop.f32.mrb[14].mxu0 }
 0x40d   : > { %v4644_v37 = vpop.eup %4643  ;;  %v3250_v38 = vadd.f32 1.0, %v4642_v24  ;;  %v3160_v34 = vsub.f32 0.0, %v3124_v56  ;;  %v3127_v59 = vadd.f32 %v4417_v47, %v6350_v10  ;;  %v3118_v31 = vpop.f32.mrb[15].mxu0 }
 0x40e   : > { %v4646_v63 = vpop.eup %4645  ;;  %v3158_v51 = vsub.f32 0.0, %v3116_v40  ;;  %v3119_v2 = vadd.f32 %v6350_v10, %v3118_v31  ;;  %4653 = vrcp.f32 %v3252_v30 }
 0x40f   : > { %v4648_v23 = vpop.eup %4647  ;;  %v3861_v46 = vpack.c.bf16 %v4646_v63, %v4638_v18  ;;  %v3222_v48 = vmul.f32 1.442695, %v3160_v34  ;;  %v3161_v21 = vsub.f32 0.0, %v3127_v59  ;;  %4655 = vrcp.f32 %v3250_v38 }
 0x410   : > { %v4650_v57 = vpop.eup %4649  ;;  %v3856_v1 = vpack.c.bf16 %v4648_v23, %v4644_v37  ;;  %v3218_v5 = vmul.f32 1.442695, %v3158_v51  ;;  %v3159_v44 = vsub.f32 0.0, %v3119_v2 }
 0x411   : > { %v4652_v32 = vpop.eup %4651  ;;  %3893 = vst [vmem:[%s6365_s23 + $0x58] sm:$0xff] %v3861_v46   ;;  %v3253_v60 = vadd.f32 1.0, %v4650_v57  ;;  %4657 = vpow2.f32 %v3222_v48  ;;  %v3224_v17 = vmul.f32 1.442695, %v3161_v21 }
 0x412   : > { %3892 = vst [vmem:[%s6365_s23 + $0x50] sm:$0xff] %v3856_v1   ;;  %v3251_v52 = vadd.f32 1.0, %v4652_v32  ;;  %4659 = vpow2.f32 %v3218_v5  ;;  %v3220_v10 = vmul.f32 1.442695, %v3159_v44 }
 0x413   : > { %4661 = vrcp.f32 %v3253_v60 }
 0x414   : > { %4663 = vrcp.f32 %v3251_v52 }
 0x415   : > { %4665 = vpow2.f32 %v3224_v17 }
 0x416   : > { %4667 = vpow2.f32 %v3220_v10 }
 0x418   : > { %v4654_v54 = vpop.eup %4653 }
 0x419   : > { %v4656_v12 = vpop.eup %4655 }
 0x41b   : > { %v4658_v20 = vpop.eup %4657 }
 0x41c   : > { %v4660_v11 = vpop.eup %4659  ;;  %v3256_v50 = vadd.f32 1.0, %v4658_v20 }
 0x41d   : > { %v4662_v62 = vpop.eup %4661  ;;  %v3254_v19 = vadd.f32 1.0, %v4660_v11 }
 0x41e   : > { %v4664_v22 = vpop.eup %4663  ;;  %v3871_v13 = vpack.c.bf16 %v4662_v62, %v4654_v54  ;;  %4669 = vrcp.f32 %v3256_v50 }
 0x41f   : > { %v4666_v26 = vpop.eup %4665  ;;  %v3866_v33 = vpack.c.bf16 %v4664_v22, %v4656_v12  ;;  %4671 = vrcp.f32 %v3254_v19 }
 0x420   : > { %v4668_v41 = vpop.eup %4667  ;;  %3895 = vst [vmem:[%s6365_s23 + $0x68] sm:$0xff] %v3871_v13   ;;  %v3257_v43 = vadd.f32 1.0, %v4666_v26 }
 0x421   : > { %3894 = vst [vmem:[%s6365_s23 + $0x60] sm:$0xff] %v3866_v33   ;;  %v3255_v36 = vadd.f32 1.0, %v4668_v41 }
 0x422   : > { %4673 = vrcp.f32 %v3257_v43 }
 0x423   : > { %4675 = vrcp.f32 %v3255_v36 }
 0x428   : > { %v4670_v9 = vpop.eup %4669 }
 0x429   : > { %v4672_v28 = vpop.eup %4671 }
 0x42c   : > { %v4674_v14 = vpop.eup %4673 }
 0x42d   : > { %v4676_v15 = vpop.eup %4675  ;;  %v3881_v53 = vpack.c.bf16 %v4674_v14, %v4670_v9 }
 0x42e   : > { %v3876_v55 = vpack.c.bf16 %v4676_v15, %v4672_v28 }
 0x42f   : > { %3897 = vst [vmem:[%s6365_s23 + $0x78] sm:$0xff] %v3881_v53  }
 0x430   : > { %3896 = vst [vmem:[%s6365_s23 + $0x70] sm:$0xff] %v3876_v55  }
 0x431   : > { %4719 = shalt.err (!%p4716_p7)
}
 0x432   : > { %s4720_s8 = scalar_lea.hbm %s6408_s18, 2048  ;;  %s4724_s22 = scalar_lea.hbm %s6464_s7, 4096 }
 0x433   : > { %p4721_p8 = scmp.ne.s32.totalorder %s6408_s18, %s4720_s8  ;;  %p4725_p1 = scmp.lt.u32.totalorder %s6408_s18, %s6464_s7 }
 0x434   : > { %p4726_p0 = scmp.lt.u32.totalorder %s4724_s22, %s4720_s8  ;;  %p4728_p6 = scmp.lt.u32.totalorder %s4720_s8, %s6408_s18 }
 0x435   : > { %p4722_p11 = pnand %p4721_p8, %p6475_p9 }
 0x436   : > { %p4727_p5 = por %p4726_p0, %p4725_p1 }
 0x437   : > { %p4723_p13 = pneg %p4722_p11 }
 0x438   : > { %p4729_p10 = por %p4728_p6, %p4727_p5 }
 0x43a   : > { %p4730_p12 = pnand %p4729_p10, %p4723_p13 }
 0x43c   : > { %4733 = shalt.err (!%p4730_p12)
}
 0x43d   : > { %s4779_s14 = smov 64   ;;  %s4780_s17 = smov 4  }
 0x43e   : > { %4426 = dma.vmem_to_hbm [thread:$0]  (%p6475_p9), %s6410_s9, 2048, %s6408_s18, %s6416_s28, %s4779_s14, %s4779_s14, %s4780_s17  }
 0x43f PF: > { %p4438_p2 = scmp.ge.s32.totalorder %s4772_s27, 2  ;;  %s3511_s16 = sand.u32 1, %s4760_s24  }
 0x440   : > { %p6476_p3 = scmp.ne.s32.totalorder %s6469_s12, 0  ;;  %s3512_s15 = scalar_lea.sflag [#allocation4], %s3511_s16 }
 0x442   : > { %p4433_p4 = pnand %p4438_p2, %p6476_p3 }
 0x444   : > { %4755 = dma.done.wait (!%p4433_p4), %s3512_s15, 2048  }
 0x445   : > { %4757 = vsyncadd (!%p4433_p4), %s3512_s15, 4294965248  ;;  %p18_p7 = scmp.ge.s32.totalorder %s4846_s30, 4   ;;  %s6477_s24 = smov %s4764_s25 }
 0x446   : > { %s6478_s25 = smov %s4768_s26  ;;  %s6479_s26 = smov %s4857_s10 }
 0x447   : > { %s6480_s27 = smov %s4846_s30  ;;  %20 = sbr.rel (!%p18_p7) target bundleno = 4 (0x4), region = 88 }
 0x44e   :  { %3517 = vsyncpa [#allocation3], 1 }
 0x44f   :  { %3519 = vsyncpa [#allocation3 + $0x1], 1 }
 0x450   :  { %3520 = vsyncpa [#allocation4], 1 }
 0x451   :  { %3522 = vsyncpa [#allocation4 + $0x1], 1 }

// kernel: tpu_custom_call.1
= control target key start
LH: loop header
LB: loop body
LE: loop exit
PB: predicated region body
PF: predicated region fallthrough
CT: control target
= control target key end

     0   :  { %12 = vsyncpa [#allocation3], 0  ;;  %s6457_s0 = inlined_call_operand.vmem [shape: f32[512,32], index: 0, kind: input, shape index: {}]   ;;  %s6458_s1 = inlined_call_operand.vmem [shape: bf16[32,1024], index: 1, kind: input, shape index: {}]   ;;  %s6459_s2 = inlined_call_operand.vmem [shape: f32[1,1024], index: 2, kind: input, shape index: {}]   ;;  %s6460_s3 = inlined_call_operand.vmem [shape: bf16[1024,128], index: 3, kind: input, shape index: {}]   ;;  %s6461_s4 = inlined_call_operand.vmem [shape: f32[1,128], index: 4, kind: input, shape index: {}]   ;;  %s6462_s5 = inlined_call_operand.hbm [shape: bf16[128,128], index: 5, kind: input, shape index: {}]   ;;  %s6463_s6 = inlined_call_operand.vmem [shape: f32[1,128], index: 6, kind: input, shape index: {}]   ;;  %s6464_s7 = inlined_call_operand.hbm [shape: bf16[512,128], index: 7, kind: output, shape index: {}]  }
   0x1   :  { %13 = vsyncpa [#allocation4], 0 }
   0x2   :  { %15 = vsyncpa [#allocation4 + $0x1], 0  ;;  %s4821_s24 = smov 0   ;;  %s4823_s25 = smov 0  }
   0x3   :  { %s4825_s26 = smov 0   ;;  %s4827_s27 = smov 0  }
   0x4 LB: > { %s4842_s28 = sadd.s32 4294967295, %s4772_s27   ;;  %s3570_s29 = sadd.s32 4294967294, %s4772_s27   ;;  %s4772_s27 = sphi %s4827_s27, %s6480_s27   ;;  %s4768_s26 = sphi %s4825_s26, %s6479_s26   ;;  %s4764_s25 = sphi %s4823_s25, %s6478_s25   ;;  %s4760_s24 = sphi %s4821_s24, %s6477_s24  }
   0x5   : > { %s4846_s30 = sadd.s32 1, %s4772_s27   ;;  %s180_s8 = sadd.s32 1, %s4768_s26 }
   0x6   : > { %s177_s9 = ssub.s32 %s4772_s27, %s4846_s30  ;;  %p190_p0 = scmp.ne.s32.totalorder %s4768_s26, %s4764_s25 }
   0x7   : > { %p178_p1 = scmp.eq.s32.totalorder %s177_s9, 0  ;;  %p191_p2 = scmp.eq.s32.totalorder %s4842_s28, 1 }
   0x8   : > { %p196_p3 = scmp.ne.s32.totalorder %s4764_s25, %s4760_s24  ;;  %p197_p4 = scmp.eq.s32.totalorder %s3570_s29, 1 }
   0x9   : > { %s4857_s10 = scalar_select %p178_p1, %s4768_s26, %s180_s8  }
   0xa   : > { %p4859_p5 = por %p191_p2, %p190_p0  ;;  %p4863_p6 = por %p197_p4, %p196_p3 }
   0xb   : > { %p3571_p7 = scmp.ge.s32.totalorder %s4772_s27, 1  ;;  %p204_p8 = scmp.lt.s32.totalorder %s4772_s27, 3 }
   0xc   : > { %s6468_s11 = scalar_select %p4859_p5, 1, 0 }
   0xd   : > { %s6469_s12 = scalar_select %p4863_p6, 1, 0 }
   0xe   : > { %p6465_p9 = scmp.eq.s32.totalorder %s4842_s28, 0  ;;  %p4870_p10 = pnand %p3571_p7, %p204_p8 }
   0xf   : > { %s4774_s14 = smov [#allocation2]   ;;  %s4678_s19 = scalar_lea.hbm %s6462_s5, 1024 }
  0x10   : > { %s6470_s13 = scalar_select %p4870_p10, 1, 0 }
  0x11   : > { %s228_s15 = sshll.u32 %s4774_s14, 4  ;;  %p4428_p11 = pneg %p4870_p10  ;;  %s229_s15 = int_to_ptr.vmem [resolvable:$true] %s228_s15 }
  0x12   : > { %p4679_p13 = scmp.ne.s32.totalorder %s6462_s5, %s4678_s19  ;;  %p4685_p3 = scmp.lt.u32.totalorder %s4678_s19, %s6462_s5 }
  0x13   : > { %p4878_p12 = pnand %p6465_p9, %p4428_p11 }
  0x15   : > { %p4680_p0 = pneg %p4878_p12 }
  0x17   : > { %p4681_p1 = pnand %p4680_p0, %p4679_p13 }
  0x19   : > { %p4682_p2 = pneg %p4681_p1 }
  0x1b   : > { %p4687_p4 = pnand %p4685_p3, %p4682_p2 }
  0x1d   : > { %4690 = shalt.err (!%p4687_p4)
}
  0x1e   : > { %s4691_s29 = scalar_lea.vmem %s229_s15, 1024  ;;  %p4699_p9 = scmp.lt.s32.totalorder %s229_s15, %s229_s15 }
  0x1f   : > { %p4692_p7 = scmp.ne.s32.totalorder %s229_s15, %s4691_s29  ;;  %p4700_p6 = scmp.lt.s32.totalorder %s4691_s29, %s4691_s29 }
  0x21   : > { %p4694_p8 = pnand %p4692_p7, %p4680_p0  ;;  %p4701_p5 = por %p4700_p6, %p4699_p9 }
  0x23   : > { %p4695_p11 = pneg %p4694_p8 }
  0x25   : > { %p4702_p10 = pnand %p4701_p5, %p4695_p11 }
  0x27   : > { %4705 = shalt.err (!%p4702_p10)
}
  0x28   : > { %s4775_s8 = smov 64   ;;  %s4776_s9 = smov 4  }
  0x29   : > { %4431 = dma.hbm_to_vmem [thread:$0]  (!%p4878_p12), %s6462_s5, 1024, %s229_s15, [#allocation3], %s4775_s8, %s4775_s8, %s4776_s9  }
  0x2a   : > { %p6472_p13 = scmp.ne.s32.totalorder %s6470_s13, 0 }
  0x2b   : > { %p6473_p1 = scmp.eq.s32.totalorder (!%p6472_p13), %s4842_s28, 0 }
  0x2c   : > { %256 = sbr.rel (%p6472_p13) target bundleno = 1087 (0x43f), region = 48 }
  0x33   : > { %4751 = dma.done.wait (%p6473_p1), [#allocation3], 1024   ;;  %p6474_p0 = pmov %p6473_p1 }
  0x34   : > { %s3577_s18 = sshll.u32 %s4842_s28, 5  ;;  %v4777_v0 = vmov 0   ;;  %v344_v1 = vld [vmem:[%s6458_s1] sm:$0xff]  ;;  %v345_v8 = vld [vmem:[%s6458_s1 + $0x8] sm:$0xff]  ;;  %vm482_vm0 = vcmask 261120   ;;  %v4947_v22 = vld [vmem:[%s6458_s1 + $0x18] sm:$0xff] }
  0x35   : > { %4753 = vsyncadd (%p6474_p0), [#allocation3], 4294966272  ;;  %563 = vmatprep.mubr.bf16.mxu0 %v4777_v0  ;;  %683 = vmatprep.mubr.bf16.mxu1 %v4777_v0  ;;  %p289_p5 = scmp.lt.s32.totalorder %s3577_s18, 63  ;;  %v348_v2 = vld [vmem:[%s6458_s1 + $0x20] sm:$0xff]  ;;  %v349_v10 = vld [vmem:[%s6458_s1 + $0x28] sm:$0xff]  ;;  %s285_s21 = sand.u32 1, %s4764_s25  }
  0x36   : > { %v352_v3 = vld [vmem:[%s6458_s1 + $0x40] sm:$0xff]  ;;  %v3580_v4 = vcombine.high %v344_v1, %v348_v2  ;;  %v3579_v5 = vcombine.low %v344_v1, %v348_v2  ;;  %v3582_v15 = vcombine.high %v345_v8, %v349_v10  ;;  %v353_v16 = vld [vmem:[%s6458_s1 + $0x48] sm:$0xff]  ;;  %v3581_v20 = vcombine.low %v345_v8, %v349_v10  ;;  %v4952_v23 = vld [vmem:[%s6458_s1 + $0x38] sm:$0xff]  ;;  %s3576_s22 = sshll.u32 %s285_s21, 7  ;;  %s3802_s29 = sshll.u32 %s4842_s28, 11 }
  0x37   : > { %s6482_s18 = smov (!%p289_p5, %s3577_s18), 63  ;;  %v356_v6 = vld [vmem:[%s6458_s1 + $0x60] sm:$0xff]  ;;  %v357_v17 = vld [vmem:[%s6458_s1 + $0x68] sm:$0xff]  ;;  %v346_v25 = vld [vmem:[%s6458_s1 + $0x10] sm:$0xff]  ;;  %v3586_v33 = vcombine.high %v4947_v22, %v4952_v23  ;;  %v3585_v58 = vcombine.low %v4947_v22, %v4952_v23  ;;  %s6365_s23 = scalar_lea.vmem [#allocation5], %s3576_s22 }
  0x38   : > { %s3578_s16 = sshll.u32 %s6482_s18, 3  ;;  %v3588_v7 = vcombine.high %v352_v3, %v356_v6  ;;  %531 = vmatprep.subr.bf16.mxu0 %v3580_v4  ;;  %4418 = vmatprep.subr.bf16.mxu1 %v3580_v4  ;;  %v3587_v11 = vcombine.low %v352_v3, %v356_v6  ;;  %v3590_v21 = vcombine.high %v353_v16, %v357_v17  ;;  %v350_v26 = vld [vmem:[%s6458_s1 + $0x30] sm:$0xff]  ;;  %v4477_v54 = vld [vmem:[%s6460_s3 + $0x40] sm:$0xff]   ;;  %v355_v55 = vld [vmem:[%s6458_s1 + $0x58] sm:$0xff]  ;;  %s3496_s9 = sshll.u32 %s6365_s23, 4  ;;  %s6410_s9 = int_to_ptr.vmem [resolvable:$true] %s3496_s9 }
  0x39   : > { %s4919_s8 = scalar_lea.vmem %s6457_s0, %s3578_s16  ;;  %532 = vmatpush1.bf16.msra.mxu0 %v3579_v5  ;;  %4420 = vmatpush1.bf16.msra.mxu1 %v3579_v5  ;;  %v3589_v30 = vcombine.low %v353_v16, %v357_v17  ;;  %v3583_v31 = vcombine.low %v346_v25, %v350_v26  ;;  %v3584_v32 = vcombine.high %v346_v25, %v350_v26  ;;  %v354_v34 = vld [vmem:[%s6458_s1 + $0x50] sm:$0xff]  ;;  %v359_v56 = vld [vmem:[%s6458_s1 + $0x78] sm:$0xff]  ;;  %v4479_v62 = vld [vmem:[%s6460_s3 + $0xc0] sm:$0xff]   ;;  %s6408_s18 = scalar_lea.hbm %s6464_s7, %s3802_s29 }
  0x3a   : > { %v296_v9 = vld [vmem:[%s4919_s8] sm:$0xff]  ;;  %v297_v12 = vld [vmem:[%s4919_s8 + $0x8] sm:$0xff]  ;;  %533 = vmatprep.subr.bf16.mxu0 %v3588_v7  ;;  %4419 = vmatprep.subr.bf16.mxu1 %v3588_v7  ;;  %v298_v24 = vld [vmem:[%s4919_s8 + $0x10] sm:$0xff]  ;;  %v3594_v59 = vcombine.high %v355_v55, %v359_v56  ;;  %v3593_v63 = vcombine.low %v355_v55, %v359_v56  ;;  %s6416_s28 = scalar_lea.sflag [#allocation4], %s285_s21  ;;  %s4706_s16 = scalar_lea.vmem %s6410_s9, 2048 }
  0x3b   : > { %v320_v13 = vld [vmem:[%s4919_s8 + $0xc0] sm:$0xff]  ;;  %v321_v14 = vld [vmem:[%s4919_s8 + $0xc8] sm:$0xff]  ;;  %v4940_v18 = vpack.c.bf16 %v297_v12, %v296_v9  ;;  %v299_v27 = vld [vmem:[%s4919_s8 + $0x18] sm:$0xff]  ;;  %p4707_p6 = scmp.ne.s32.totalorder %s6410_s9, %s4706_s16  ;;  %p6475_p9 = scmp.ne.s32.totalorder %s6468_s11, 0 }
  0x3c   : > { %v4942_v19 = vpack.c.bf16 %v321_v14, %v320_v13  ;;  %v322_v28 = vld [vmem:[%s4919_s8 + $0xd0] sm:$0xff]  ;;  %v323_v29 = vld [vmem:[%s4919_s8 + $0xd8] sm:$0xff]  ;;  %v4975_v35 = vpack.c.bf16 %v299_v27, %v298_v24  ;;  %v300_v40 = vld [vmem:[%s4919_s8 + $0x20] sm:$0xff]  ;;  %s4778_s15 = smov [#allocation5]  }
  0x3d   : > { %534 = vmatpush1.bf16.msra.mxu0 %v3587_v11  ;;  %4421 = vmatpush1.bf16.msra.mxu1 %v3587_v11  ;;  %v4977_v36 = vpack.c.bf16 %v323_v29, %v322_v28  ;;  %v358_v37 = vld [vmem:[%s6458_s1 + $0x70] sm:$0xff]  ;;  %v301_v41 = vld [vmem:[%s4919_s8 + $0x28] sm:$0xff]  ;;  %v324_v42 = vld [vmem:[%s4919_s8 + $0xe0] sm:$0xff]  ;;  %p4708_p10 = pnand %p4707_p6, %p6475_p9  ;;  %s4710_s19 = sshll.u32 %s4778_s15, 4  ;;  %s4711_s19 = int_to_ptr.vmem [resolvable:$false] %s4710_s19 }
  0x3e   : > { %724 = vmatprep.subr.bf16.mxu1 %v3582_v15  ;;  %917 = vmatprep.subr.bf16.mxu0 %v3584_v32  ;;  %v3592_v38 = vcombine.high %v354_v34, %v358_v37  ;;  %v3591_v39 = vcombine.low %v354_v34, %v358_v37  ;;  %v325_v43 = vld [vmem:[%s4919_s8 + $0xe8] sm:$0xff]  ;;  %v4992_v44 = vpack.c.bf16 %v301_v41, %v300_v40  ;;  %v302_v46 = vld [vmem:[%s4919_s8 + $0x30] sm:$0xff]  ;;  %v303_v47 = vld [vmem:[%s4919_s8 + $0x38] sm:$0xff]  ;;  %s4712_s13 = scalar_lea.vmem %s4711_s19, 4096  ;;  %p4713_p2 = scmp.lt.s32.totalorder %s6410_s9, %s4711_s19 }
  0x3f   : > { %v4994_v45 = vpack.c.bf16 %v325_v43, %v324_v42  ;;  %v326_v48 = vld [vmem:[%s4919_s8 + $0xf0] sm:$0xff]  ;;  %v327_v49 = vld [vmem:[%s4919_s8 + $0xf8] sm:$0xff]  ;;  %v5006_v50 = vpack.c.bf16 %v303_v47, %v302_v46  ;;  %v304_v52 = vld [vmem:[%s4919_s8 + $0x40] sm:$0xff]  ;;  %p4709_p12 = pneg %p4708_p10  ;;  %p4714_p3 = scmp.lt.s32.totalorder %s4712_s13, %s4706_s16 }
  0x40   : > { %3595 = vmatmul.mubr.msk.bf16.vlgmr.msra.gmra.mrb[0].mxu0 %vm482_vm0, %v4940_v18  ;;  %3607 = vmatmul.mubr.msk.bf16.vlgmr.msra.gmra.mrb[0].mxu1 %vm482_vm0, %v4942_v19  ;;  %v5008_v51 = vpack.c.bf16 %v327_v49, %v326_v48  ;;  %v305_v53 = vld [vmem:[%s4919_s8 + $0x48] sm:$0xff]  ;;  %v306_v60 = vld [vmem:[%s4919_s8 + $0x50] sm:$0xff]  ;;  %v307_v61 = vld [vmem:[%s4919_s8 + $0x58] sm:$0xff] }
  0x41   : > { %725 = vmatpush1.bf16.msra.mxu1 %v3581_v20  ;;  %573 = vmatprep.mubr.bf16.mxu0 %v4777_v0  ;;  %v5027_v57 = vpack.c.bf16 %v305_v53, %v304_v52  ;;  %v5042_v1 = vpack.c.bf16 %v307_v61, %v306_v60  ;;  %v308_v2 = vld [vmem:[%s4919_s8 + $0x60] sm:$0xff]  ;;  %v309_v3 = vld [vmem:[%s4919_s8 + $0x68] sm:$0xff]  ;;  %v310_v5 = vld [vmem:[%s4919_s8 + $0x70] sm:$0xff]  ;;  %p4715_p4 = por %p4714_p3, %p4713_p2 }
  0x42   : > { %693 = vmatprep.mubr.bf16.mxu1 %v4777_v0  ;;  %726 = vmatprep.subr.bf16.mxu1 %v3590_v21  ;;  %v5052_v4 = vpack.c.bf16 %v309_v3, %v308_v2  ;;  %v311_v6 = vld [vmem:[%s4919_s8 + $0x78] sm:$0xff]  ;;  %v312_v8 = vld [vmem:[%s4919_s8 + $0x80] sm:$0xff]  ;;  %v313_v9 = vld [vmem:[%s4919_s8 + $0x88] sm:$0xff] }
  0x43   : > { %918 = vmatpush1.bf16.msra.mxu0 %v3583_v31  ;;  %v5062_v7 = vpack.c.bf16 %v311_v6, %v310_v5  ;;  %v5072_v10 = vpack.c.bf16 %v313_v9, %v312_v8  ;;  %v314_v11 = vld [vmem:[%s4919_s8 + $0x90] sm:$0xff]  ;;  %v315_v12 = vld [vmem:[%s4919_s8 + $0x98] sm:$0xff]  ;;  %v316_v14 = vld [vmem:[%s4919_s8 + $0xa0] sm:$0xff]  ;;  %p4716_p7 = pnand %p4715_p4, %p4709_p12 }
  0x44   : > { %919 = vmatprep.subr.bf16.mxu0 %v3592_v38  ;;  %v5082_v13 = vpack.c.bf16 %v315_v12, %v314_v11  ;;  %v317_v15 = vld [vmem:[%s4919_s8 + $0xa8] sm:$0xff]  ;;  %v318_v17 = vld [vmem:[%s4919_s8 + $0xb0] sm:$0xff]  ;;  %v319_v20 = vld [vmem:[%s4919_s8 + $0xb8] sm:$0xff] }
  0x45   : > { %727 = vmatpush1.bf16.msra.mxu1 %v3589_v30  ;;  %v5092_v16 = vpack.c.bf16 %v317_v15, %v316_v14  ;;  %v5102_v21 = vpack.c.bf16 %v319_v20, %v318_v17  ;;  %v4478_v22 = vld [vmem:[%s6460_s3] sm:$0xff]   ;;  %v4481_v23 = vld [vmem:[%s6460_s3 + $0x48] sm:$0xff]   ;;  %v4485_v25 = vld [vmem:[%s6460_s3 + $0x50] sm:$0xff]  }
  0x46   : > { %1110 = vmatprep.subr.bf16.mxu1 %v3586_v33  ;;  %v4482_v24 = vld [vmem:[%s6460_s3 + $0x8] sm:$0xff]   ;;  %v4486_v26 = vld [vmem:[%s6460_s3 + $0x10] sm:$0xff]   ;;  %v4489_v27 = vld [vmem:[%s6460_s3 + $0x58] sm:$0xff]  }
  0x47   : > { %920 = vmatpush1.bf16.msra.mxu0 %v3591_v39  ;;  %v4490_v28 = vld [vmem:[%s6460_s3 + $0x18] sm:$0xff]   ;;  %v4491_v29 = vld [vmem:[%s6460_s3 + $0x60] sm:$0xff]   ;;  %v4495_v31 = vld [vmem:[%s6460_s3 + $0x68] sm:$0xff]  }
  0x48   : > { %3596 = vmatmul.mubr.msk.bf16.gmra.mrb[4].mxu0 %vm482_vm0, %v4975_v35  ;;  %3608 = vmatmul.mubr.msk.bf16.gmra.mrb[4].mxu1 %vm482_vm0, %v4977_v36  ;;  %v4493_v30 = vld [vmem:[%s6460_s3 + $0x20] sm:$0xff]   ;;  %v4496_v32 = vld [vmem:[%s6460_s3 + $0x28] sm:$0xff]   ;;  %v4497_v33 = vld [vmem:[%s6460_s3 + $0x70] sm:$0xff]  }
  0x49   : > { %583 = vmatprep.mubr.bf16.mxu0 %v4777_v0  ;;  %703 = vmatprep.mubr.bf16.mxu1 %v4777_v0  ;;  %v4498_v34 = vld [vmem:[%s6460_s3 + $0x30] sm:$0xff]   ;;  %v4499_v37 = vld [vmem:[%s6460_s3 + $0x78] sm:$0xff]   ;;  %v4480_v39 = vld [vmem:[%s6460_s3 + $0x80] sm:$0xff]  }
  0x4a   : > { %3898 = vmatprep.subr.bf16.mxu0 %v4477_v54  ;;  %v4500_v38 = vld [vmem:[%s6460_s3 + $0x38] sm:$0xff]   ;;  %v4483_v40 = vld [vmem:[%s6460_s3 + $0xc8] sm:$0xff]   ;;  %v4487_v42 = vld [vmem:[%s6460_s3 + $0xd0] sm:$0xff]  }
  0x4b   : > { %v4484_v41 = vld [vmem:[%s6460_s3 + $0x88] sm:$0xff]   ;;  %v4509_v43 = vld [vmem:[%s6460_s3 + $0x140] sm:$0xff]   ;;  %v4492_v46 = vld [vmem:[%s6460_s3 + $0xd8] sm:$0xff]  }
  0x4c   : > { %v4494_v47 = vld [vmem:[%s6460_s3 + $0x98] sm:$0xff]   ;;  %v4501_v48 = vld [vmem:[%s6460_s3 + $0xe0] sm:$0xff]   ;;  %v4504_v52 = vld [vmem:[%s6460_s3 + $0xa8] sm:$0xff]  }
  0x4d   : > { %v4502_v49 = vld [vmem:[%s6460_s3 + $0xa0] sm:$0xff]   ;;  %v4505_v53 = vld [vmem:[%s6460_s3 + $0xf0] sm:$0xff]   ;;  %v4508_v55 = vld [vmem:[%s6460_s3 + $0xb8] sm:$0xff]  }
  0x4e   : > { %v4506_v54 = vld [vmem:[%s6460_s3 + $0xb0] sm:$0xff]   ;;  %v4511_v56 = vld [vmem:[%s6460_s3 + $0x1c0] sm:$0xff]  }
  0x50   : > { %3597 = vmatmul.mubr.msk.bf16.gmra.mrb[8].mxu0 %vm482_vm0, %v4992_v44  ;;  %3609 = vmatmul.mubr.msk.bf16.gmra.mrb[8].mxu1 %vm482_vm0, %v4994_v45 }
  0x51   : > { %593 = vmatprep.mubr.bf16.mxu0 %v4777_v0  ;;  %713 = vmatprep.mubr.bf16.mxu1 %v4777_v0 }
  0x58   : > { %3598 = vmatmul.mubr.msk.bf16.gmra.mrb[12].mxu0 %vm482_vm0, %v5006_v50  ;;  %3610 = vmatmul.mubr.msk.bf16.gmra.mrb[12].mxu1 %vm482_vm0, %v5008_v51 }
  0x59   : > { %603 = vmatprep.mubr.bf16.mxu0 %v4777_v0  ;;  %756 = vmatprep.mubr.bf16.mxu1 %v4777_v0 }
  0x60   : > { %3599 = vmatmul.mubr.msk.bf16.gmra.mrb[16].mxu0 %vm482_vm0, %v5027_v57  ;;  %3611 = vmatmul.mubr.msk.bf16.vlgmr.msra.gmra.mrb[16].mxu1 %vm482_vm0, %v4940_v18 }
  0x61   : > { %1111 = vmatpush1.bf16.msra.mxu1 %v3585_v58  ;;  %613 = vmatprep.mubr.bf16.mxu0 %v4777_v0 }
  0x62   : > { %766 = vmatprep.mubr.bf16.mxu1 %v4777_v0  ;;  %1112 = vmatprep.subr.bf16.mxu1 %v3594_v59 }
  0x65   : > { %1113 = vmatpush1.bf16.msra.mxu1 %v3593_v63 }
  0x66   : > { %4010 = vmatprep.subr.bf16.mxu1 %v4479_v62 }
  0x68   : > { %3600 = vmatmul.mubr.msk.bf16.gmra.mrb[20].mxu0 %vm482_vm0, %v5042_v1  ;;  %3612 = vmatmul.mubr.msk.bf16.gmra.mrb[20].mxu1 %vm482_vm0, %v4975_v35 }
  0x69   : > { %623 = vmatprep.mubr.bf16.mxu0 %v4777_v0  ;;  %776 = vmatprep.mubr.bf16.mxu1 %v4777_v0 }
  0x70   : > { %3601 = vmatmul.mubr.msk.bf16.gmra.mrb[24].mxu0 %vm482_vm0, %v5052_v4  ;;  %3613 = vmatmul.mubr.msk.bf16.gmra.mrb[24].mxu1 %vm482_vm0, %v4992_v44 }
  0x71   : > { %633 = vmatprep.mubr.bf16.mxu0 %v4777_v0  ;;  %786 = vmatprep.mubr.bf16.mxu1 %v4777_v0 }
  0x78   : > { %3602 = vmatmul.mubr.msk.bf16.gmra.mrb[28].mxu0 %vm482_vm0, %v5062_v7  ;;  %3614 = vmatmul.mubr.msk.bf16.gmra.mrb[28].mxu1 %vm482_vm0, %v5006_v50 }
  0x79   : > { %643 = vmatprep.mubr.bf16.mxu0 %v4777_v0  ;;  %796 = vmatprep.mubr.bf16.mxu1 %v4777_v0 }
  0x80   : > { %3603 = vmatmul.mubr.msk.bf16.gmra.mrb[32].mxu0 %vm482_vm0, %v5072_v10  ;;  %3615 = vmatmul.mubr.msk.bf16.gmra.mrb[32].mxu1 %vm482_vm0, %v5027_v57 }
  0x81   : > { %653 = vmatprep.mubr.bf16.mxu0 %v4777_v0  ;;  %806 = vmatprep.mubr.bf16.mxu1 %v4777_v0 }
  0x88   : > { %3604 = vmatmul.mubr.msk.bf16.gmra.mrb[36].mxu0 %vm482_vm0, %v5082_v13  ;;  %3616 = vmatmul.mubr.msk.bf16.gmra.mrb[36].mxu1 %vm482_vm0, %v5042_v1 }
  0x89   : > { %663 = vmatprep.mubr.bf16.mxu0 %v4777_v0  ;;  %816 = vmatprep.mubr.bf16.mxu1 %v4777_v0 }
  0x90   : > { %3605 = vmatmul.mubr.msk.bf16.gmra.mrb[40].mxu0 %vm482_vm0, %v5092_v16  ;;  %3617 = vmatmul.mubr.msk.bf16.gmra.mrb[40].mxu1 %vm482_vm0, %v5052_v4 }
  0x91   : > { %673 = vmatprep.mubr.bf16.mxu0 %v4777_v0  ;;  %826 = vmatprep.mubr.bf16.mxu1 %v4777_v0 }
  0x98   : > { %3606 = vmatmul.mubr.msk.bf16.gmra.mrb[44].mxu0 %vm482_vm0, %v5102_v21  ;;  %3618 = vmatmul.mubr.msk.bf16.gmra.mrb[44].mxu1 %vm482_vm0, %v5062_v7 }
  0x99   : > { %836 = vmatprep.mubr.bf16.mxu1 %v4777_v0  ;;  %949 = vmatprep.mubr.bf16.mxu0 %v4777_v0 }
  0xa0   : > { %3619 = vmatmul.mubr.msk.bf16.gmra.mrb[48].mxu1 %vm482_vm0, %v5072_v10  ;;  %3627 = vmatmul.mubr.msk.bf16.vlgmr.msra.gmra.mrb[48].mxu0 %vm482_vm0, %v4940_v18 }
  0xa1   : > { %846 = vmatprep.mubr.bf16.mxu1 %v4777_v0  ;;  %959 = vmatprep.mubr.bf16.mxu0 %v4777_v0 }
  0xa2   : > { %3899 = vmatpush3.bf16.msra.mxu0 %v4478_v22 }
  0xa3   : > { %3900 = vmatprep.subr.bf16.mxu0 %v4481_v23 }
  0xa6   : > { %3901 = vmatpush3.bf16.msra.mxu0 %v4482_v24 }
  0xa7   : > { %3902 = vmatprep.subr.bf16.mxu0 %v4485_v25 }
  0xa8   : > { %3620 = vmatmul.mubr.msk.bf16.gmra.mrb[52].mxu1 %vm482_vm0, %v5082_v13  ;;  %3628 = vmatmul.mubr.msk.bf16.gmra.mrb[52].mxu0 %vm482_vm0, %v4975_v35 }
  0xa9   : > { %856 = vmatprep.mubr.bf16.mxu1 %v4777_v0  ;;  %969 = vmatprep.mubr.bf16.mxu0 %v4777_v0 }
  0xaa   : > { %3903 = vmatpush3.bf16.msra.mxu0 %v4486_v26 }
  0xab   : > { %3904 = vmatprep.subr.bf16.mxu0 %v4489_v27 }
  0xae   : > { %3905 = vmatpush3.bf16.msra.mxu0 %v4490_v28 }
  0xaf   : > { %3906 = vmatprep.subr.bf16.mxu0 %v4491_v29 }
  0xb0   : > { %3621 = vmatmul.mubr.msk.bf16.gmra.mrb[56].mxu1 %vm482_vm0, %v5092_v16  ;;  %3629 = vmatmul.mubr.msk.bf16.gmra.mrb[56].mxu0 %vm482_vm0, %v4992_v44 }
  0xb1   : > { %866 = vmatprep.mubr.bf16.mxu1 %v4777_v0  ;;  %979 = vmatprep.mubr.bf16.mxu0 %v4777_v0 }
  0xb2   : > { %3907 = vmatpush3.bf16.msra.mxu0 %v4493_v30 }
  0xb3   : > { %3908 = vmatprep.subr.bf16.mxu0 %v4495_v31 }
  0xb6   : > { %3909 = vmatpush3.bf16.msra.mxu0 %v4496_v32 }
  0xb7   : > { %3910 = vmatprep.subr.bf16.mxu0 %v4497_v33 }
  0xb8   : > { %3622 = vmatmul.mubr.msk.bf16.gmra.mrb[60].mxu1 %vm482_vm0, %v5102_v21  ;;  %3630 = vmatmul.mubr.msk.bf16.gmra.mrb[60].mxu0 %vm482_vm0, %v5006_v50 }
  0xb9   : > { %876 = vmatprep.mubr.bf16.mxu1 %v4777_v0  ;;  %989 = vmatprep.mubr.bf16.mxu0 %v4777_v0 }
  0xba   : > { %3911 = vmatpush3.bf16.msra.mxu0 %v4498_v34 }
  0xbb   : > { %3912 = vmatprep.subr.bf16.mxu0 %v4499_v37 }
  0xbe   : > { %3913 = vmatpush3.bf16.msra.mxu0 %v4500_v38 }
  0xbf   : > { %4122 = vmatprep.subr.bf16.mxu0 %v4509_v43 }
  0xc0   : > { %3623 = vmatmul.mubr.msk.bf16.gmra.mrb[64].mxu1 %vm482_vm0, %v4942_v19  ;;  %3631 = vmatmul.mubr.msk.bf16.gmra.mrb[64].mxu0 %vm482_vm0, %v5027_v57 }
  0xc1   : > { %886 = vmatprep.mubr.bf16.mxu1 %v4777_v0  ;;  %999 = vmatprep.mubr.bf16.mxu0 %v4777_v0 }
  0xc8   : > { %3624 = vmatmul.mubr.msk.bf16.gmra.mrb[68].mxu1 %vm482_vm0, %v4977_v36  ;;  %3632 = vmatmul.mubr.msk.bf16.gmra.mrb[68].mxu0 %vm482_vm0, %v5042_v1 }
  0xc9   : > { %896 = vmatprep.mubr.bf16.mxu1 %v4777_v0  ;;  %1009 = vmatprep.mubr.bf16.mxu0 %v4777_v0 }
  0xd0   : > { %3625 = vmatmul.mubr.msk.bf16.gmra.mrb[72].mxu1 %vm482_vm0, %v4994_v45  ;;  %3633 = vmatmul.mubr.msk.bf16.gmra.mrb[72].mxu0 %vm482_vm0, %v5052_v4 }
  0xd1   : > { %906 = vmatprep.mubr.bf16.mxu1 %v4777_v0  ;;  %1019 = vmatprep.mubr.bf16.mxu0 %v4777_v0 }
  0xd8   : > { %3626 = vmatmul.mubr.msk.bf16.gmra.mrb[76].mxu1 %vm482_vm0, %v5008_v51  ;;  %3634 = vmatmul.mubr.msk.bf16.gmra.mrb[76].mxu0 %vm482_vm0, %v5062_v7 }
  0xd9   : > { %1029 = vmatprep.mubr.bf16.mxu0 %v4777_v0  ;;  %1142 = vmatprep.mubr.bf16.mxu1 %v4777_v0 }
  0xe0   : > { %3635 = vmatmul.mubr.msk.bf16.gmra.mrb[80].mxu0 %vm482_vm0, %v5072_v10  ;;  %3643 = vmatmul.mubr.msk.bf16.vlgmr.msra.gmra.mrb[80].mxu1 %vm482_vm0, %v4940_v18  ;;  %v4488_v18 = vld [vmem:[%s6460_s3 + $0x90] sm:$0xff]  }
  0xe1   : > { %4011 = vmatpush3.bf16.msra.mxu1 %v4480_v39  ;;  %1039 = vmatprep.mubr.bf16.mxu0 %v4777_v0 }
  0xe2   : > { %1152 = vmatprep.mubr.bf16.mxu1 %v4777_v0  ;;  %4012 = vmatprep.subr.bf16.mxu1 %v4483_v40 }
  0xe5   : > { %4013 = vmatpush3.bf16.msra.mxu1 %v4484_v41 }
  0xe6   : > { %4014 = vmatprep.subr.bf16.mxu1 %v4487_v42 }
  0xe8   : > { %3636 = vmatmul.mubr.msk.bf16.gmra.mrb[84].mxu0 %vm482_vm0, %v5082_v13  ;;  %3644 = vmatmul.mubr.msk.bf16.gmra.mrb[84].mxu1 %vm482_vm0, %v4975_v35  ;;  %v4503_v35 = vld [vmem:[%s6460_s3 + $0xe8] sm:$0xff]  }
  0xe9   : > { %1049 = vmatprep.mubr.bf16.mxu0 %v4777_v0  ;;  %1162 = vmatprep.mubr.bf16.mxu1 %v4777_v0 }
  0xea   : > { %4015 = vmatpush3.bf16.msra.mxu1 %v4488_v18 }
  0xeb   : > { %4016 = vmatprep.subr.bf16.mxu1 %v4492_v46 }
  0xee   : > { %4017 = vmatpush3.bf16.msra.mxu1 %v4494_v47  ;;  %v4510_v47 = vld [vmem:[%s6460_s3 + $0x100] sm:$0xff]  }
  0xef   : > { %4018 = vmatprep.subr.bf16.mxu1 %v4501_v48 }
  0xf0   : > { %3637 = vmatmul.mubr.msk.bf16.gmra.mrb[88].mxu0 %vm482_vm0, %v5092_v16  ;;  %3645 = vmatmul.mubr.msk.bf16.gmra.mrb[88].mxu1 %vm482_vm0, %v4992_v44  ;;  %v4507_v44 = vld [vmem:[%s6460_s3 + $0xf8] sm:$0xff]  }
  0xf1   : > { %1059 = vmatprep.mubr.bf16.mxu0 %v4777_v0  ;;  %1172 = vmatprep.mubr.bf16.mxu1 %v4777_v0 }
  0xf2   : > { %4019 = vmatpush3.bf16.msra.mxu1 %v4502_v49 }
  0xf3   : > { %4020 = vmatprep.subr.bf16.mxu1 %v4503_v35 }
  0xf6   : > { %4021 = vmatpush3.bf16.msra.mxu1 %v4504_v52 }
  0xf7   : > { %4022 = vmatprep.subr.bf16.mxu1 %v4505_v53 }
  0xf8   : > { %3638 = vmatmul.mubr.msk.bf16.gmra.mrb[92].mxu0 %vm482_vm0, %v5102_v21  ;;  %3646 = vmatmul.mubr.msk.bf16.gmra.mrb[92].mxu1 %vm482_vm0, %v5006_v50  ;;  %v362_v50 = vlaneseq }
  0xf9   : > { %1069 = vmatprep.mubr.bf16.mxu0 %v4777_v0  ;;  %1182 = vmatprep.mubr.bf16.mxu1 %v4777_v0 }
  0xfa   : > { %4023 = vmatpush3.bf16.msra.mxu1 %v4506_v54  ;;  %v5288_v58 = vshrl.u32 %v362_v50, 7  ;;  %v4513_v54 = vld [vmem:[%s6460_s3 + $0x148] sm:$0xff]  }
  0xfb   : > { %4024 = vmatprep.subr.bf16.mxu1 %v4507_v44 }
  0xfc   : > { %v364_v59 = vsub.s32 0, %v5288_v58  ;;  %v368_v60 = vsub.s32 1, %v5288_v58 }
  0xfe   : > { %4025 = vmatpush3.bf16.msra.mxu1 %v4508_v55 }
  0xff   : > { %4234 = vmatprep.subr.bf16.mxu1 %v4511_v56 }
 0x100   : > { %3639 = vmatmul.mubr.msk.bf16.gmra.mrb[96].mxu0 %vm482_vm0, %v4942_v19  ;;  %3647 = vmatmul.mubr.msk.bf16.gmra.mrb[96].mxu1 %vm482_vm0, %v5027_v57  ;;  %v5296_v57 = vld [vmem:[%s6459_s2] sm:$0xff] }
 0x101   : > { %1079 = vmatprep.mubr.bf16.mxu0 %v4777_v0  ;;  %1192 = vmatprep.mubr.bf16.mxu1 %v4777_v0  ;;  %v5304_v61 = vrot.slane %v5296_v57, %v364_v59  ;;  %v5307_v62 = vrot.slane %v5296_v57, %v368_v60 }
 0x108   : > { %3640 = vmatmul.mubr.msk.bf16.gmra.mrb[100].mxu0 %vm482_vm0, %v4977_v36  ;;  %3648 = vmatmul.mubr.msk.bf16.gmra.mrb[100].mxu1 %vm482_vm0, %v5042_v1 }
 0x109   : > { %1089 = vmatprep.mubr.bf16.mxu0 %v4777_v0  ;;  %1202 = vmatprep.mubr.bf16.mxu1 %v4777_v0 }
 0x110   : > { %3641 = vmatmul.mubr.msk.bf16.gmra.mrb[104].mxu0 %vm482_vm0, %v4994_v45  ;;  %3649 = vmatmul.mubr.msk.bf16.gmra.mrb[104].mxu1 %vm482_vm0, %v5052_v4 }
 0x111   : > { %1099 = vmatprep.mubr.bf16.mxu0 %v4777_v0  ;;  %1212 = vmatprep.mubr.bf16.mxu1 %v4777_v0 }
 0x113   : > { %v685_v63 = vpop.f32.mrb[0].mxu1  ;;  %v565_v1 = vpop.f32.mrb[0].mxu0 }
 0x114   : > { %v686_v2 = vadd.f32 %v685_v63, %v5304_v61  ;;  %v687_v3 = vpop.f32.mrb[1].mxu1  ;;  %v566_v5 = vadd.f32 %v565_v1, %v5304_v61  ;;  %v567_v6 = vpop.f32.mrb[1].mxu0 }
 0x115   : > { %v688_v4 = vadd.f32 %v687_v3, %v5307_v62  ;;  %v689_v8 = vpop.f32.mrb[2].mxu1  ;;  %v568_v9 = vadd.f32 %v567_v6, %v5307_v62  ;;  %v569_v11 = vpop.f32.mrb[2].mxu0  ;;  %v4514_v3 = vld [vmem:[%s6460_s3 + $0x108] sm:$0xff]   ;;  %v4517_v6 = vld [vmem:[%s6460_s3 + $0x150] sm:$0xff]  }
 0x116   : > { %v1303_v12 = vmax.f32 %v566_v5, 0.0  ;;  %v690_v14 = vadd.f32 %v689_v8, %v5304_v61  ;;  %v691_v15 = vpop.f32.mrb[3].mxu1  ;;  %v570_v17 = vadd.f32 %v569_v11, %v5304_v61  ;;  %v571_v20 = vpop.f32.mrb[3].mxu0  ;;  %v1495_v25 = vmax.f32 %v686_v2, 0.0 }
 0x117   : > { %v1304_v22 = vmax.f32 %v568_v9, 0.0  ;;  %v692_v23 = vadd.f32 %v691_v15, %v5307_v62  ;;  %v572_v24 = vadd.f32 %v571_v20, %v5307_v62  ;;  %v1496_v28 = vmax.f32 %v688_v4, 0.0 }
 0x118   : > { %v1503_v26 = vmax.f32 %v690_v14, 0.0  ;;  %v1311_v27 = vmax.f32 %v570_v17, 0.0  ;;  %3642 = vmatmul.mubr.msk.bf16.gmra.mrb[108].mxu0 %vm482_vm0, %v5008_v51  ;;  %3650 = vmatmul.mubr.msk.bf16.gmra.mrb[108].mxu1 %vm482_vm0, %v5062_v7 }
 0x119   : > { %v1504_v29 = vmax.f32 %v692_v23, 0.0  ;;  %v1312_v30 = vmax.f32 %v572_v24, 0.0  ;;  %1222 = vmatprep.mubr.bf16.mxu1 %v4777_v0 }
 0x11a   : > { %v1559_v31 = vpack.c.bf16 %v1311_v27, %v1303_v12  ;;  %v5324_v32 = vpack.c.bf16 %v1503_v26, %v1495_v25  ;;  %v4518_v25 = vld [vmem:[%s6460_s3 + $0x110] sm:$0xff]  }
 0x11b   : > { %v695_v33 = vpop.f32.mrb[4].mxu1  ;;  %v575_v34 = vpop.f32.mrb[4].mxu0  ;;  %v1560_v37 = vpack.c.bf16 %v1312_v30, %v1304_v22  ;;  %v5326_v38 = vpack.c.bf16 %v1504_v29, %v1496_v28 }
 0x11c   : > { %v696_v39 = vadd.f32 %v695_v33, %v5304_v61  ;;  %v697_v40 = vpop.f32.mrb[5].mxu1  ;;  %v576_v41 = vadd.f32 %v575_v34, %v5304_v61  ;;  %v577_v42 = vpop.f32.mrb[5].mxu0 }
 0x11d   : > { %v698_v7 = vadd.f32 %v697_v40, %v5307_v62  ;;  %v699_v43 = vpop.f32.mrb[6].mxu1  ;;  %v578_v18 = vadd.f32 %v577_v42, %v5307_v62  ;;  %v579_v46 = vpop.f32.mrb[6].mxu0  ;;  %2238 = vmatprep.mubr.bf16.mxu0 %v1560_v37 }
 0x11e   : > { %v1319_v48 = vmax.f32 %v576_v41, 0.0  ;;  %v700_v49 = vadd.f32 %v699_v43, %v5304_v61  ;;  %v701_v35 = vpop.f32.mrb[7].mxu1  ;;  %v580_v52 = vadd.f32 %v579_v46, %v5304_v61  ;;  %v581_v53 = vpop.f32.mrb[7].mxu0  ;;  %v1511_v50 = vmax.f32 %v696_v39, 0.0 }
 0x11f   : > { %v1320_v44 = vmax.f32 %v578_v18, 0.0  ;;  %v702_v55 = vadd.f32 %v701_v35, %v5307_v62  ;;  %v582_v56 = vadd.f32 %v581_v53, %v5307_v62  ;;  %v1512_v63 = vmax.f32 %v698_v7, 0.0  ;;  %v4522_v18 = vld [vmem:[%s6460_s3 + $0x118] sm:$0xff]  }
 0x120   : > { %v1519_v59 = vmax.f32 %v700_v49, 0.0  ;;  %v1327_v60 = vmax.f32 %v580_v52, 0.0  ;;  %3651 = vmatmul.mubr.msk.bf16.gmra.mrb[112].mxu1 %vm482_vm0, %v5072_v10  ;;  %2239 = vmatmul.mubr.bf16.vlgmr.msra.gmra.mrb[112].mxu0 %v1559_v31  ;;  %v4521_v31 = vld [vmem:[%s6460_s3 + $0x158] sm:$0xff]  }
 0x121   : > { %v1520_v1 = vmax.f32 %v702_v55, 0.0  ;;  %v1328_v2 = vmax.f32 %v582_v56, 0.0  ;;  %1232 = vmatprep.mubr.bf16.mxu1 %v4777_v0  ;;  %4123 = vmatpush3.bf16.msra.mxu0 %v4510_v47  ;;  %v372_v56 = vsub.s32 2, %v5288_v58 }
 0x122   : > { %v1567_v5 = vpack.c.bf16 %v1327_v60, %v1319_v48  ;;  %4124 = vmatprep.subr.bf16.mxu0 %v4513_v54  ;;  %v5351_v4 = vpack.c.bf16 %v1519_v59, %v1511_v50  ;;  %v4523_v48 = vld [vmem:[%s6460_s3 + $0x160] sm:$0xff]  }
 0x123   : > { %v705_v10 = vpop.f32.mrb[8].mxu1  ;;  %v585_v8 = vpop.f32.mrb[8].mxu0  ;;  %v1568_v9 = vpack.c.bf16 %v1328_v2, %v1320_v44  ;;  %v5353_v11 = vpack.c.bf16 %v1520_v1, %v1512_v63  ;;  %v376_v1 = vsub.s32 3, %v5288_v58  ;;  %v4525_v2 = vld [vmem:[%s6460_s3 + $0x120] sm:$0xff]  }
 0x124   : > { %v706_v12 = vadd.f32 %v705_v10, %v5304_v61  ;;  %v707_v14 = vpop.f32.mrb[9].mxu1  ;;  %v586_v15 = vadd.f32 %v585_v8, %v5304_v61  ;;  %v587_v17 = vpop.f32.mrb[9].mxu0 }
 0x125   : > { %v708_v20 = vadd.f32 %v707_v14, %v5307_v62  ;;  %v709_v22 = vpop.f32.mrb[10].mxu1  ;;  %v588_v23 = vadd.f32 %v587_v17, %v5307_v62  ;;  %v589_v24 = vpop.f32.mrb[10].mxu0  ;;  %2246 = vmatprep.mubr.bf16.mxu0 %v1568_v9  ;;  %4125 = vmatpush3.bf16.msra.mxu0 %v4514_v3  ;;  %v4527_v9 = vld [vmem:[%s6460_s3 + $0x168] sm:$0xff]  }
 0x126   : > { %v1335_v26 = vmax.f32 %v586_v15, 0.0  ;;  %v710_v27 = vadd.f32 %v709_v22, %v5304_v61  ;;  %v711_v28 = vpop.f32.mrb[11].mxu1  ;;  %v590_v29 = vadd.f32 %v589_v24, %v5304_v61  ;;  %v591_v30 = vpop.f32.mrb[11].mxu0  ;;  %4126 = vmatprep.subr.bf16.mxu0 %v4517_v6  ;;  %v1527_v39 = vmax.f32 %v706_v12, 0.0 }
 0x127   : > { %v1336_v33 = vmax.f32 %v588_v23, 0.0  ;;  %v712_v34 = vadd.f32 %v711_v28, %v5307_v62  ;;  %v592_v37 = vadd.f32 %v591_v30, %v5307_v62  ;;  %v1528_v42 = vmax.f32 %v708_v20, 0.0  ;;  %v4528_v28 = vld [vmem:[%s6460_s3 + $0x128] sm:$0xff]   ;;  %v4529_v30 = vld [vmem:[%s6460_s3 + $0x170] sm:$0xff]  }
 0x128   : > { %v1535_v40 = vmax.f32 %v710_v27, 0.0  ;;  %v1343_v41 = vmax.f32 %v590_v29, 0.0  ;;  %3652 = vmatmul.mubr.msk.bf16.gmra.mrb[116].mxu1 %vm482_vm0, %v5082_v13  ;;  %2247 = vmatmul.mubr.bf16.gmra.mrb[116].mxu0 %v1567_v5  ;;  %v5401_v23 = vrot.slane %v5296_v57, %v372_v56  ;;  %v5404_v27 = vrot.slane %v5296_v57, %v376_v1 }
 0x129   : > { %v1536_v7 = vmax.f32 %v712_v34, 0.0  ;;  %v1344_v43 = vmax.f32 %v592_v37, 0.0  ;;  %1242 = vmatprep.mubr.bf16.mxu1 %v4777_v0  ;;  %4127 = vmatpush3.bf16.msra.mxu0 %v4518_v25 }
 0x12a   : > { %v1575_v46 = vpack.c.bf16 %v1343_v41, %v1335_v26  ;;  %4128 = vmatprep.subr.bf16.mxu0 %v4521_v31  ;;  %v5375_v47 = vpack.c.bf16 %v1535_v40, %v1527_v39 }
 0x12b   : > { %v715_v13 = vpop.f32.mrb[12].mxu1  ;;  %v595_v49 = vpop.f32.mrb[12].mxu0  ;;  %v1576_v35 = vpack.c.bf16 %v1344_v43, %v1336_v33  ;;  %v5380_v52 = vpack.c.bf16 %v1536_v7, %v1528_v42 }
 0x12c   : > { %v716_v53 = vadd.f32 %v715_v13, %v5304_v61  ;;  %v717_v54 = vpop.f32.mrb[13].mxu1  ;;  %v596_v44 = vadd.f32 %v595_v49, %v5304_v61  ;;  %v597_v55 = vpop.f32.mrb[13].mxu0 }
 0x12d   : > { %v718_v50 = vadd.f32 %v717_v54, %v5307_v62  ;;  %v719_v59 = vpop.f32.mrb[14].mxu1  ;;  %v598_v60 = vadd.f32 %v597_v55, %v5307_v62  ;;  %v599_v63 = vpop.f32.mrb[14].mxu0  ;;  %2254 = vmatprep.mubr.bf16.mxu0 %v1576_v35  ;;  %4129 = vmatpush3.bf16.msra.mxu0 %v4522_v18 }
 0x12e   : > { %v1351_v3 = vmax.f32 %v596_v44, 0.0  ;;  %v720_v5 = vadd.f32 %v719_v59, %v5304_v61  ;;  %v721_v6 = vpop.f32.mrb[15].mxu1  ;;  %v600_v10 = vadd.f32 %v599_v63, %v5304_v61  ;;  %v601_v8 = vpop.f32.mrb[15].mxu0  ;;  %4130 = vmatprep.subr.bf16.mxu0 %v4523_v48  ;;  %v1543_v17 = vmax.f32 %v716_v53, 0.0  ;;  %v4530_v48 = vld [vmem:[%s6460_s3 + $0x130] sm:$0xff]   ;;  %v4531_v44 = vld [vmem:[%s6460_s3 + $0x178] sm:$0xff]  }
 0x12f   : > { %v1352_v12 = vmax.f32 %v598_v60, 0.0  ;;  %v722_v14 = vadd.f32 %v721_v6, %v5307_v62  ;;  %v602_v15 = vadd.f32 %v601_v8, %v5307_v62  ;;  %v1544_v24 = vmax.f32 %v718_v50, 0.0 }
 0x130   : > { %v1551_v20 = vmax.f32 %v720_v5, 0.0  ;;  %v1359_v22 = vmax.f32 %v600_v10, 0.0  ;;  %3653 = vmatmul.mubr.msk.bf16.gmra.mrb[120].mxu1 %vm482_vm0, %v5092_v16  ;;  %2255 = vmatmul.mubr.bf16.gmra.mrb[120].mxu0 %v1575_v46  ;;  %v4532_v5 = vld [vmem:[%s6460_s3 + $0x138] sm:$0xff]  }
 0x131   : > { %v1552_v25 = vmax.f32 %v722_v14, 0.0  ;;  %v1360_v26 = vmax.f32 %v602_v15, 0.0  ;;  %1252 = vmatprep.mubr.bf16.mxu1 %v4777_v0  ;;  %4131 = vmatpush3.bf16.msra.mxu0 %v4525_v2 }
 0x132   : > { %v1583_v29 = vpack.c.bf16 %v1359_v22, %v1351_v3  ;;  %4132 = vmatprep.subr.bf16.mxu0 %v4527_v9  ;;  %v5410_v16 = vpack.c.bf16 %v1551_v20, %v1543_v17 }
 0x133   : > { %v758_v31 = vpop.f32.mrb[16].mxu1  ;;  %v605_v33 = vpop.f32.mrb[16].mxu0  ;;  %v1584_v34 = vpack.c.bf16 %v1360_v26, %v1352_v12  ;;  %v5415_v37 = vpack.c.bf16 %v1552_v25, %v1544_v24 }
 0x134   : > { %v759_v39 = vadd.f32 %v758_v31, %v5401_v23  ;;  %v760_v40 = vpop.f32.mrb[17].mxu1  ;;  %v606_v41 = vadd.f32 %v605_v33, %v5304_v61  ;;  %v607_v42 = vpop.f32.mrb[17].mxu0 }
 0x135   : > { %v761_v7 = vadd.f32 %v760_v40, %v5404_v27  ;;  %v762_v43 = vpop.f32.mrb[18].mxu1  ;;  %v608_v18 = vadd.f32 %v607_v42, %v5307_v62  ;;  %v609_v46 = vpop.f32.mrb[18].mxu0  ;;  %2262 = vmatprep.mubr.bf16.mxu0 %v1584_v34  ;;  %4133 = vmatpush3.bf16.msra.mxu0 %v4528_v28 }
 0x136   : > { %v1367_v13 = vmax.f32 %v606_v41, 0.0  ;;  %v763_v49 = vadd.f32 %v762_v43, %v5401_v23  ;;  %v764_v35 = vpop.f32.mrb[19].mxu1  ;;  %v610_v53 = vadd.f32 %v609_v46, %v5304_v61  ;;  %v611_v54 = vpop.f32.mrb[19].mxu0  ;;  %4134 = vmatprep.subr.bf16.mxu0 %v4529_v30  ;;  %v1305_v59 = vmax.f32 %v759_v39, 0.0 }
 0x137   : > { %v1368_v55 = vmax.f32 %v608_v18, 0.0  ;;  %v765_v56 = vadd.f32 %v764_v35, %v5404_v27  ;;  %v612_v50 = vadd.f32 %v611_v54, %v5307_v62  ;;  %v1306_v1 = vmax.f32 %v761_v7, 0.0 }
 0x138   : > { %v1313_v60 = vmax.f32 %v763_v49, 0.0  ;;  %v1375_v63 = vmax.f32 %v610_v53, 0.0  ;;  %3654 = vmatmul.mubr.msk.bf16.gmra.mrb[124].mxu1 %vm482_vm0, %v5102_v21  ;;  %2263 = vmatmul.mubr.bf16.gmra.mrb[124].mxu0 %v1583_v29 }
 0x139   : > { %v1314_v2 = vmax.f32 %v765_v56, 0.0  ;;  %v1376_v3 = vmax.f32 %v612_v50, 0.0  ;;  %1262 = vmatprep.mubr.bf16.mxu1 %v4777_v0  ;;  %4135 = vmatpush3.bf16.msra.mxu0 %v4530_v48 }
 0x13a   : > { %v5437_v6 = vpack.c.bf16 %v1313_v60, %v1305_v59  ;;  %v1591_v10 = vpack.c.bf16 %v1375_v63, %v1367_v13  ;;  %4136 = vmatprep.subr.bf16.mxu0 %v4531_v44 }
 0x13b   : > { %v5439_v8 = vpack.c.bf16 %v1314_v2, %v1306_v1  ;;  %v1592_v9 = vpack.c.bf16 %v1376_v3, %v1368_v55  ;;  %v768_v12 = vpop.f32.mrb[20].mxu1  ;;  %v615_v21 = vpop.f32.mrb[20].mxu0 }
 0x13c   : > { %v769_v14 = vadd.f32 %v768_v12, %v5401_v23  ;;  %v770_v15 = vpop.f32.mrb[21].mxu1  ;;  %v616_v17 = vadd.f32 %v615_v21, %v5304_v61  ;;  %v617_v20 = vpop.f32.mrb[21].mxu0 }
 0x13d   : > { %v771_v22 = vadd.f32 %v770_v15, %v5404_v27  ;;  %v772_v24 = vpop.f32.mrb[22].mxu1  ;;  %v618_v25 = vadd.f32 %v617_v20, %v5307_v62  ;;  %v619_v26 = vpop.f32.mrb[22].mxu0  ;;  %2270 = vmatprep.mubr.bf16.mxu0 %v1592_v9  ;;  %4137 = vmatpush3.bf16.msra.mxu0 %v4532_v5 }
 0x13e   : > { %v1383_v28 = vmax.f32 %v616_v17, 0.0  ;;  %v773_v29 = vadd.f32 %v772_v24, %v5401_v23  ;;  %v774_v30 = vpop.f32.mrb[23].mxu1  ;;  %v620_v31 = vadd.f32 %v619_v26, %v5304_v61  ;;  %v621_v33 = vpop.f32.mrb[23].mxu0  ;;  %v1321_v41 = vmax.f32 %v769_v14, 0.0 }
 0x13f   : > { %v1384_v34 = vmax.f32 %v618_v25, 0.0  ;;  %v775_v39 = vadd.f32 %v774_v30, %v5404_v27  ;;  %v622_v40 = vadd.f32 %v621_v33, %v5307_v62  ;;  %v1322_v43 = vmax.f32 %v771_v22, 0.0 }
 0x140   : > { %v1329_v42 = vmax.f32 %v773_v29, 0.0  ;;  %v1391_v7 = vmax.f32 %v620_v31, 0.0  ;;  %3655 = vmatmul.mubr.msk.bf16.gmra.mrb[128].mxu1 %vm482_vm0, %v4942_v19  ;;  %2271 = vmatmul.mubr.bf16.gmra.mrb[128].mxu0 %v1591_v10 }
 0x141   : > { %v1330_v18 = vmax.f32 %v775_v39, 0.0  ;;  %v1392_v46 = vmax.f32 %v622_v40, 0.0  ;;  %1272 = vmatprep.mubr.bf16.mxu1 %v4777_v0 }
 0x142   : > { %v5452_v48 = vpack.c.bf16 %v1329_v42, %v1321_v41  ;;  %v1599_v13 = vpack.c.bf16 %v1391_v7, %v1383_v28 }
 0x143   : > { %v5454_v49 = vpack.c.bf16 %v1330_v18, %v1322_v43  ;;  %v1600_v35 = vpack.c.bf16 %v1392_v46, %v1384_v34  ;;  %v778_v53 = vpop.f32.mrb[24].mxu1  ;;  %v625_v54 = vpop.f32.mrb[24].mxu0 }
 0x144   : > { %v779_v44 = vadd.f32 %v778_v53, %v5401_v23  ;;  %v780_v55 = vpop.f32.mrb[25].mxu1  ;;  %v626_v56 = vadd.f32 %v625_v54, %v5304_v61  ;;  %v627_v19 = vpop.f32.mrb[25].mxu0 }
 0x145   : > { %v781_v50 = vadd.f32 %v780_v55, %v5404_v27  ;;  %v782_v59 = vpop.f32.mrb[26].mxu1  ;;  %v628_v60 = vadd.f32 %v627_v19, %v5307_v62  ;;  %v629_v63 = vpop.f32.mrb[26].mxu0  ;;  %2278 = vmatprep.mubr.bf16.mxu0 %v1600_v35 }
 0x146   : > { %v1399_v1 = vmax.f32 %v626_v56, 0.0  ;;  %v783_v2 = vadd.f32 %v782_v59, %v5401_v23  ;;  %v784_v3 = vpop.f32.mrb[27].mxu1  ;;  %v630_v5 = vadd.f32 %v629_v63, %v5304_v61  ;;  %v631_v10 = vpop.f32.mrb[27].mxu0  ;;  %v1337_v14 = vmax.f32 %v779_v44, 0.0 }
 0x147   : > { %v1400_v9 = vmax.f32 %v628_v60, 0.0  ;;  %v785_v12 = vadd.f32 %v784_v3, %v5404_v27  ;;  %v632_v21 = vadd.f32 %v631_v10, %v5307_v62  ;;  %v1338_v20 = vmax.f32 %v781_v50, 0.0 }
 0x148   : > { %v1345_v15 = vmax.f32 %v783_v2, 0.0  ;;  %v1407_v17 = vmax.f32 %v630_v5, 0.0  ;;  %3656 = vmatmul.mubr.msk.bf16.gmra.mrb[132].mxu1 %vm482_vm0, %v4977_v36  ;;  %2279 = vmatmul.mubr.bf16.gmra.mrb[132].mxu0 %v1599_v13 }
 0x149   : > { %v1346_v22 = vmax.f32 %v785_v12, 0.0  ;;  %v1408_v24 = vmax.f32 %v632_v21, 0.0  ;;  %1282 = vmatprep.mubr.bf16.mxu1 %v4777_v0 }
 0x14a   : > { %v5467_v25 = vpack.c.bf16 %v1345_v15, %v1337_v14  ;;  %v1607_v26 = vpack.c.bf16 %v1407_v17, %v1399_v1 }
 0x14b   : > { %v5469_v28 = vpack.c.bf16 %v1346_v22, %v1338_v20  ;;  %v1608_v29 = vpack.c.bf16 %v1408_v24, %v1400_v9  ;;  %v788_v30 = vpop.f32.mrb[28].mxu1  ;;  %v635_v31 = vpop.f32.mrb[28].mxu0 }
 0x14c   : > { %v789_v33 = vadd.f32 %v788_v30, %v5401_v23  ;;  %v790_v34 = vpop.f32.mrb[29].mxu1  ;;  %v636_v39 = vadd.f32 %v635_v31, %v5304_v61  ;;  %v637_v36 = vpop.f32.mrb[29].mxu0 }
 0x14d   : > { %v791_v40 = vadd.f32 %v790_v34, %v5404_v27  ;;  %v792_v41 = vpop.f32.mrb[30].mxu1  ;;  %v638_v42 = vadd.f32 %v637_v36, %v5307_v62  ;;  %v639_v7 = vpop.f32.mrb[30].mxu0  ;;  %2286 = vmatprep.mubr.bf16.mxu0 %v1608_v29 }
 0x14e   : > { %v1415_v43 = vmax.f32 %v636_v39, 0.0  ;;  %v793_v18 = vadd.f32 %v792_v41, %v5401_v23  ;;  %v794_v46 = vpop.f32.mrb[31].mxu1  ;;  %v640_v13 = vadd.f32 %v639_v7, %v5304_v61  ;;  %v641_v35 = vpop.f32.mrb[31].mxu0  ;;  %v1353_v55 = vmax.f32 %v789_v33, 0.0 }
 0x14f   : > { %v1416_v53 = vmax.f32 %v638_v42, 0.0  ;;  %v795_v54 = vadd.f32 %v794_v46, %v5404_v27  ;;  %v642_v44 = vadd.f32 %v641_v35, %v5307_v62  ;;  %v1354_v50 = vmax.f32 %v791_v40, 0.0 }
 0x150   : > { %v1361_v56 = vmax.f32 %v793_v18, 0.0  ;;  %v1423_v19 = vmax.f32 %v640_v13, 0.0  ;;  %3657 = vmatmul.mubr.msk.bf16.gmra.mrb[136].mxu1 %vm482_vm0, %v4994_v45  ;;  %2287 = vmatmul.mubr.bf16.gmra.mrb[136].mxu0 %v1607_v26 }
 0x151   : > { %v1362_v59 = vmax.f32 %v795_v54, 0.0  ;;  %v1424_v60 = vmax.f32 %v642_v44, 0.0  ;;  %1292 = vmatprep.mubr.bf16.mxu1 %v4777_v0 }
 0x152   : > { %v5482_v63 = vpack.c.bf16 %v1361_v56, %v1353_v55  ;;  %v1615_v1 = vpack.c.bf16 %v1423_v19, %v1415_v43 }
 0x153   : > { %v5484_v2 = vpack.c.bf16 %v1362_v59, %v1354_v50  ;;  %v1616_v3 = vpack.c.bf16 %v1424_v60, %v1416_v53  ;;  %v798_v5 = vpop.f32.mrb[32].mxu1  ;;  %v645_v10 = vpop.f32.mrb[32].mxu0  ;;  %v4512_v50 = vld [vmem:[%s6460_s3 + $0x180] sm:$0xff]  }
 0x154   : > { %v799_v9 = vadd.f32 %v798_v5, %v5401_v23  ;;  %v800_v12 = vpop.f32.mrb[33].mxu1  ;;  %v646_v21 = vadd.f32 %v645_v10, %v5304_v61  ;;  %v647_v45 = vpop.f32.mrb[33].mxu0  ;;  %v4515_v10 = vld [vmem:[%s6460_s3 + $0x1c8] sm:$0xff]  }
 0x155   : > { %v801_v14 = vadd.f32 %v800_v12, %v5404_v27  ;;  %v802_v15 = vpop.f32.mrb[34].mxu1  ;;  %v648_v17 = vadd.f32 %v647_v45, %v5307_v62  ;;  %v649_v0 = vpop.f32.mrb[34].mxu0  ;;  %2294 = vmatprep.mubr.bf16.mxu0 %v1616_v3 }
 0x156   : > { %v1431_v20 = vmax.f32 %v646_v21, 0.0  ;;  %v803_v22 = vadd.f32 %v802_v15, %v5401_v23  ;;  %v804_v24 = vpop.f32.mrb[35].mxu1  ;;  %v650_v26 = vadd.f32 %v649_v0, %v5304_v61  ;;  %v651_v29 = vpop.f32.mrb[35].mxu0  ;;  %v1369_v34 = vmax.f32 %v799_v9, 0.0 }
 0x157   : > { %v1432_v30 = vmax.f32 %v648_v17, 0.0  ;;  %v805_v31 = vadd.f32 %v804_v24, %v5404_v27  ;;  %v652_v33 = vadd.f32 %v651_v29, %v5307_v62  ;;  %v1370_v40 = vmax.f32 %v801_v14, 0.0  ;;  %v4519_v29 = vld [vmem:[%s6460_s3 + $0x1d0] sm:$0xff]  }
 0x158   : > { %v1377_v39 = vmax.f32 %v803_v22, 0.0  ;;  %v1439_v36 = vmax.f32 %v650_v26, 0.0  ;;  %3658 = vmatmul.mubr.msk.bf16.gmra.mrb[140].mxu1 %vm482_vm0, %v5008_v51  ;;  %2295 = vmatmul.mubr.bf16.gmra.mrb[140].mxu0 %v1615_v1  ;;  %v4516_v22 = vld [vmem:[%s6460_s3 + $0x188] sm:$0xff]  }
 0x159   : > { %v1378_v41 = vmax.f32 %v805_v31, 0.0  ;;  %v1440_v42 = vmax.f32 %v652_v33, 0.0  ;;  %2399 = vmatprep.mubr.bf16.mxu1 %v5439_v8 }
 0x15a   : > { %v5497_v7 = vpack.c.bf16 %v1377_v39, %v1369_v34  ;;  %v1623_v43 = vpack.c.bf16 %v1439_v36, %v1431_v20 }
 0x15b   : > { %v5499_v18 = vpack.c.bf16 %v1378_v41, %v1370_v40  ;;  %v1624_v46 = vpack.c.bf16 %v1440_v42, %v1432_v30  ;;  %v808_v13 = vpop.f32.mrb[36].mxu1  ;;  %v655_v35 = vpop.f32.mrb[36].mxu0 }
 0x15c   : > { %v809_v53 = vadd.f32 %v808_v13, %v5401_v23  ;;  %v810_v54 = vpop.f32.mrb[37].mxu1  ;;  %v656_v44 = vadd.f32 %v655_v35, %v5304_v61  ;;  %v657_v51 = vpop.f32.mrb[37].mxu0 }
 0x15d   : > { %v811_v55 = vadd.f32 %v810_v54, %v5404_v27  ;;  %v812_v56 = vpop.f32.mrb[38].mxu1  ;;  %v658_v19 = vadd.f32 %v657_v51, %v5307_v62  ;;  %v659_v8 = vpop.f32.mrb[38].mxu0  ;;  %2302 = vmatprep.mubr.bf16.mxu0 %v1624_v46  ;;  %v4520_v46 = vld [vmem:[%s6460_s3 + $0x190] sm:$0xff]   ;;  %v4524_v51 = vld [vmem:[%s6460_s3 + $0x1d8] sm:$0xff]  }
 0x15e   : > { %v1447_v59 = vmax.f32 %v656_v44, 0.0  ;;  %v813_v60 = vadd.f32 %v812_v56, %v5401_v23  ;;  %v814_v1 = vpop.f32.mrb[39].mxu1  ;;  %v660_v3 = vadd.f32 %v659_v8, %v5304_v61  ;;  %v661_v5 = vpop.f32.mrb[39].mxu0  ;;  %v1385_v45 = vmax.f32 %v809_v53, 0.0 }
 0x15f   : > { %v1448_v9 = vmax.f32 %v658_v19, 0.0  ;;  %v815_v12 = vadd.f32 %v814_v1, %v5404_v27  ;;  %v662_v21 = vadd.f32 %v661_v5, %v5307_v62  ;;  %v1386_v17 = vmax.f32 %v811_v55, 0.0  ;;  %v4526_v5 = vld [vmem:[%s6460_s3 + $0x198] sm:$0xff]  }
 0x160   : > { %v1393_v14 = vmax.f32 %v813_v60, 0.0  ;;  %v1455_v15 = vmax.f32 %v660_v3, 0.0  ;;  %2303 = vmatmul.mubr.bf16.gmra.mrb[144].mxu0 %v1623_v43  ;;  %2400 = vmatmul.mubr.bf16.vlgmr.msra.gmra.mrb[144].mxu1 %v5437_v6 }
 0x161   : > { %v1394_v0 = vmax.f32 %v815_v12, 0.0  ;;  %v1456_v20 = vmax.f32 %v662_v21, 0.0  ;;  %2407 = vmatprep.mubr.bf16.mxu1 %v5454_v49  ;;  %4235 = vmatpush3.bf16.msra.mxu1 %v4512_v50  ;;  %v4533_v12 = vld [vmem:[%s6460_s3 + $0x1e0] sm:$0xff]  }
 0x162   : > { %v5520_v24 = vpack.c.bf16 %v1393_v14, %v1385_v45  ;;  %v1631_v26 = vpack.c.bf16 %v1455_v15, %v1447_v59  ;;  %4236 = vmatprep.subr.bf16.mxu1 %v4515_v10 }
 0x163   : > { %v5525_v30 = vpack.c.bf16 %v1394_v0, %v1386_v17  ;;  %v1632_v6 = vpack.c.bf16 %v1456_v20, %v1448_v9  ;;  %v818_v31 = vpop.f32.mrb[40].mxu1  ;;  %v665_v33 = vpop.f32.mrb[40].mxu0  ;;  %v380_v20 = vsub.s32 4, %v5288_v58 }
 0x164   : > { %v819_v49 = vadd.f32 %v818_v31, %v5401_v23  ;;  %v820_v34 = vpop.f32.mrb[41].mxu1  ;;  %v666_v39 = vadd.f32 %v665_v33, %v5304_v61  ;;  %v667_v36 = vpop.f32.mrb[41].mxu0  ;;  %v384_v31 = vsub.s32 5, %v5288_v58  ;;  %v4534_v33 = vld [vmem:[%s6460_s3 + $0x1a0] sm:$0xff]  }
 0x165   : > { %v821_v40 = vadd.f32 %v820_v34, %v5404_v27  ;;  %v822_v41 = vpop.f32.mrb[42].mxu1  ;;  %v668_v42 = vadd.f32 %v667_v36, %v5307_v62  ;;  %v669_v43 = vpop.f32.mrb[42].mxu0  ;;  %2310 = vmatprep.mubr.bf16.mxu0 %v1632_v6  ;;  %4237 = vmatpush3.bf16.msra.mxu1 %v4516_v22 }
 0x166   : > { %v1463_v13 = vmax.f32 %v666_v39, 0.0  ;;  %v823_v35 = vadd.f32 %v822_v41, %v5401_v23  ;;  %v824_v53 = vpop.f32.mrb[43].mxu1  ;;  %v670_v54 = vadd.f32 %v669_v43, %v5304_v61  ;;  %v671_v44 = vpop.f32.mrb[43].mxu0  ;;  %4238 = vmatprep.subr.bf16.mxu1 %v4519_v29  ;;  %v1401_v8 = vmax.f32 %v819_v49, 0.0  ;;  %v4535_v41 = vld [vmem:[%s6460_s3 + $0x1e8] sm:$0xff]  }
 0x167   : > { %v1464_v55 = vmax.f32 %v668_v42, 0.0  ;;  %v825_v56 = vadd.f32 %v824_v53, %v5404_v27  ;;  %v672_v19 = vadd.f32 %v671_v44, %v5307_v62  ;;  %v1402_v60 = vmax.f32 %v821_v40, 0.0 }
 0x168   : > { %v1409_v50 = vmax.f32 %v823_v35, 0.0  ;;  %v1471_v59 = vmax.f32 %v670_v54, 0.0  ;;  %2311 = vmatmul.mubr.bf16.gmra.mrb[148].mxu0 %v1631_v26  ;;  %2408 = vmatmul.mubr.bf16.gmra.mrb[148].mxu1 %v5452_v48  ;;  %v5571_v54 = vrot.slane %v5296_v57, %v380_v20 }
 0x169   : > { %v1410_v1 = vmax.f32 %v825_v56, 0.0  ;;  %v1472_v3 = vmax.f32 %v672_v19, 0.0  ;;  %2415 = vmatprep.mubr.bf16.mxu1 %v5469_v28  ;;  %4239 = vmatpush3.bf16.msra.mxu1 %v4520_v46 }
 0x16a   : > { %v5546_v10 = vpack.c.bf16 %v1409_v50, %v1401_v8  ;;  %v1639_v9 = vpack.c.bf16 %v1471_v59, %v1463_v13  ;;  %4240 = vmatprep.subr.bf16.mxu1 %v4524_v51 }
 0x16b   : > { %v5551_v21 = vpack.c.bf16 %v1410_v1, %v1402_v60  ;;  %v1640_v48 = vpack.c.bf16 %v1472_v3, %v1464_v55  ;;  %v828_v45 = vpop.f32.mrb[44].mxu1  ;;  %v675_v14 = vpop.f32.mrb[44].mxu0  ;;  %v5575_v55 = vrot.slane %v5296_v57, %v384_v31 }
 0x16c   : > { %v829_v28 = vadd.f32 %v828_v45, %v5401_v23  ;;  %v830_v15 = vpop.f32.mrb[45].mxu1  ;;  %v676_v17 = vadd.f32 %v675_v14, %v5304_v61  ;;  %v677_v0 = vpop.f32.mrb[45].mxu0 }
 0x16d   : > { %v831_v22 = vadd.f32 %v830_v15, %v5404_v27  ;;  %v832_v26 = vpop.f32.mrb[46].mxu1  ;;  %v678_v29 = vadd.f32 %v677_v0, %v5307_v62  ;;  %v679_v6 = vpop.f32.mrb[46].mxu0  ;;  %2318 = vmatprep.mubr.bf16.mxu0 %v1640_v48  ;;  %4241 = vmatpush3.bf16.msra.mxu1 %v4526_v5  ;;  %v4538_v0 = vld [vmem:[%s6460_s3 + $0x1b0] sm:$0xff]  }
 0x16e   : > { %v1479_v49 = vmax.f32 %v676_v17, 0.0  ;;  %v833_v34 = vadd.f32 %v832_v26, %v5401_v23  ;;  %v834_v39 = vpop.f32.mrb[47].mxu1  ;;  %v680_v36 = vadd.f32 %v679_v6, %v5304_v61  ;;  %v681_v40 = vpop.f32.mrb[47].mxu0  ;;  %4242 = vmatprep.subr.bf16.mxu1 %v4533_v12  ;;  %v1417_v13 = vmax.f32 %v829_v28, 0.0 }
 0x16f   : > { %v1480_v42 = vmax.f32 %v678_v29, 0.0  ;;  %v835_v43 = vadd.f32 %v834_v39, %v5404_v27  ;;  %v682_v46 = vadd.f32 %v681_v40, %v5307_v62  ;;  %v1418_v61 = vmax.f32 %v831_v22, 0.0  ;;  %v4536_v62 = vld [vmem:[%s6460_s3 + $0x1a8] sm:$0xff]   ;;  %v4539_v29 = vld [vmem:[%s6460_s3 + $0x1f8] sm:$0xff]  }
 0x170   : > { %v1425_v35 = vmax.f32 %v833_v34, 0.0  ;;  %v1487_v53 = vmax.f32 %v680_v36, 0.0  ;;  %2319 = vmatmul.mubr.bf16.gmra.mrb[152].mxu0 %v1639_v9  ;;  %2416 = vmatmul.mubr.bf16.gmra.mrb[152].mxu1 %v5467_v25  ;;  %v4537_v25 = vld [vmem:[%s6460_s3 + $0x1f0] sm:$0xff]  }
 0x171   : > { %v1426_v44 = vmax.f32 %v835_v43, 0.0  ;;  %v1488_v51 = vmax.f32 %v682_v46, 0.0  ;;  %2423 = vmatprep.mubr.bf16.mxu1 %v5484_v2  ;;  %4243 = vmatpush3.bf16.msra.mxu1 %v4534_v33 }
 0x172   : > { %v5580_v56 = vpack.c.bf16 %v1425_v35, %v1417_v13  ;;  %v1647_v19 = vpack.c.bf16 %v1487_v53, %v1479_v49  ;;  %4244 = vmatprep.subr.bf16.mxu1 %v4535_v41  ;;  %v4540_v41 = vld [vmem:[%s6460_s3 + $0x1b8] sm:$0xff]  }
 0x173   : > { %v5585_v8 = vpack.c.bf16 %v1426_v44, %v1418_v61  ;;  %v1648_v50 = vpack.c.bf16 %v1488_v51, %v1480_v42  ;;  %v838_v2 = vpop.f32.mrb[48].mxu1  ;;  %v951_v59 = vpop.f32.mrb[48].mxu0 }
 0x174   : > { %v839_v57 = vadd.f32 %v838_v2, %v5401_v23  ;;  %v840_v60 = vpop.f32.mrb[49].mxu1  ;;  %v952_v1 = vadd.f32 %v951_v59, %v5571_v54  ;;  %v953_v3 = vpop.f32.mrb[49].mxu0 }
 0x175   : > { %v841_v5 = vadd.f32 %v840_v60, %v5404_v27  ;;  %v842_v9 = vpop.f32.mrb[50].mxu1  ;;  %2326 = vmatprep.mubr.bf16.mxu0 %v1648_v50  ;;  %v954_v12 = vadd.f32 %v953_v3, %v5575_v55  ;;  %v955_v48 = vpop.f32.mrb[50].mxu0  ;;  %4245 = vmatpush3.bf16.msra.mxu1 %v4536_v62 }
 0x176   : > { %v843_v45 = vadd.f32 %v842_v9, %v5401_v23  ;;  %v844_v14 = vpop.f32.mrb[51].mxu1  ;;  %v1307_v28 = vmax.f32 %v952_v1, 0.0  ;;  %v956_v15 = vadd.f32 %v955_v48, %v5571_v54  ;;  %v957_v17 = vpop.f32.mrb[51].mxu0  ;;  %4246 = vmatprep.subr.bf16.mxu1 %v4537_v25  ;;  %v1433_v6 = vmax.f32 %v839_v57, 0.0 }
 0x177   : > { %v845_v20 = vadd.f32 %v844_v14, %v5404_v27  ;;  %v1308_v22 = vmax.f32 %v954_v12, 0.0  ;;  %v958_v26 = vadd.f32 %v957_v17, %v5575_v55  ;;  %v1434_v49 = vmax.f32 %v841_v5, 0.0 }
 0x178   : > { %v1441_v31 = vmax.f32 %v843_v45, 0.0  ;;  %2327 = vmatmul.mubr.bf16.gmra.mrb[156].mxu0 %v1647_v19  ;;  %2424 = vmatmul.mubr.bf16.gmra.mrb[156].mxu1 %v5482_v63  ;;  %v1315_v33 = vmax.f32 %v956_v15, 0.0 }
 0x179   : > { %v1442_v34 = vmax.f32 %v845_v20, 0.0  ;;  %2334 = vmatprep.mubr.bf16.mxu0 %v5326_v38  ;;  %2431 = vmatprep.mubr.bf16.mxu1 %v5499_v18  ;;  %v1316_v39 = vmax.f32 %v958_v26, 0.0 }
 0x17a   : > { %v5604_v36 = vpack.c.bf16 %v1441_v31, %v1433_v6  ;;  %v5606_v40 = vpack.c.bf16 %v1315_v33, %v1307_v28  ;;  %4247 = vmatpush3.bf16.msra.mxu1 %v4538_v0 }
 0x17b   : > { %v5611_v42 = vpack.c.bf16 %v1442_v34, %v1434_v49  ;;  %v848_v63 = vpop.f32.mrb[52].mxu1  ;;  %v5613_v43 = vpack.c.bf16 %v1316_v39, %v1308_v22  ;;  %v961_v46 = vpop.f32.mrb[52].mxu0  ;;  %4248 = vmatprep.subr.bf16.mxu1 %v4539_v29 }
 0x17c   : > { %v849_v38 = vadd.f32 %v848_v63, %v5401_v23  ;;  %v850_v18 = vpop.f32.mrb[53].mxu1  ;;  %v962_v13 = vadd.f32 %v961_v46, %v5571_v54  ;;  %v963_v35 = vpop.f32.mrb[53].mxu0 }
 0x17d   : > { %v851_v53 = vadd.f32 %v850_v18, %v5404_v27  ;;  %v852_v61 = vpop.f32.mrb[54].mxu1  ;;  %v964_v44 = vadd.f32 %v963_v35, %v5575_v55  ;;  %v965_v51 = vpop.f32.mrb[54].mxu0 }
 0x17e   : > { %v853_v62 = vadd.f32 %v852_v61, %v5401_v23  ;;  %v854_v19 = vpop.f32.mrb[55].mxu1  ;;  %v1323_v25 = vmax.f32 %v962_v13, 0.0  ;;  %v966_v50 = vadd.f32 %v965_v51, %v5571_v54  ;;  %v967_v2 = vpop.f32.mrb[55].mxu0  ;;  %4249 = vmatpush3.bf16.msra.mxu1 %v4540_v41  ;;  %v1449_v1 = vmax.f32 %v849_v38, 0.0 }
 0x17f   : > { %v855_v59 = vadd.f32 %v854_v19, %v5404_v27  ;;  %v1324_v57 = vmax.f32 %v964_v44, 0.0  ;;  %v968_v60 = vadd.f32 %v967_v2, %v5575_v55  ;;  %v1450_v9 = vmax.f32 %v851_v53, 0.0 }
 0x180   : > { %v1457_v3 = vmax.f32 %v853_v62, 0.0  ;;  %2335 = vmatmul.mubr.bf16.gmra.mrb[160].mxu0 %v5324_v32  ;;  %2432 = vmatmul.mubr.bf16.gmra.mrb[160].mxu1 %v5497_v7  ;;  %v1331_v5 = vmax.f32 %v966_v50, 0.0 }
 0x181   : > { %v1458_v12 = vmax.f32 %v855_v59, 0.0  ;;  %2342 = vmatprep.mubr.bf16.mxu0 %v5353_v11  ;;  %2439 = vmatprep.mubr.bf16.mxu1 %v5525_v30  ;;  %v1332_v48 = vmax.f32 %v968_v60, 0.0 }
 0x182   : > { %v5627_v45 = vpack.c.bf16 %v1457_v3, %v1449_v1  ;;  %v5629_v14 = vpack.c.bf16 %v1331_v5, %v1323_v25 }
 0x183   : > { %v5631_v28 = vpack.c.bf16 %v1458_v12, %v1450_v9  ;;  %v858_v15 = vpop.f32.mrb[56].mxu1  ;;  %v5633_v17 = vpack.c.bf16 %v1332_v48, %v1324_v57  ;;  %v971_v32 = vpop.f32.mrb[56].mxu0 }
 0x184   : > { %v859_v7 = vadd.f32 %v858_v15, %v5401_v23  ;;  %v860_v0 = vpop.f32.mrb[57].mxu1  ;;  %v972_v20 = vadd.f32 %v971_v32, %v5571_v54  ;;  %v973_v22 = vpop.f32.mrb[57].mxu0 }
 0x185   : > { %v861_v11 = vadd.f32 %v860_v0, %v5404_v27  ;;  %v862_v30 = vpop.f32.mrb[58].mxu1  ;;  %v974_v26 = vadd.f32 %v973_v22, %v5575_v55  ;;  %v975_v29 = vpop.f32.mrb[58].mxu0 }
 0x186   : > { %v863_v6 = vadd.f32 %v862_v30, %v5401_v23  ;;  %v864_v31 = vpop.f32.mrb[59].mxu1  ;;  %v1339_v33 = vmax.f32 %v972_v20, 0.0  ;;  %v976_v49 = vadd.f32 %v975_v29, %v5571_v54  ;;  %v977_v34 = vpop.f32.mrb[59].mxu0  ;;  %v1465_v46 = vmax.f32 %v859_v7, 0.0 }
 0x187   : > { %v865_v39 = vadd.f32 %v864_v31, %v5404_v27  ;;  %v1340_v41 = vmax.f32 %v974_v26, 0.0  ;;  %v978_v63 = vadd.f32 %v977_v34, %v5575_v55  ;;  %v1466_v13 = vmax.f32 %v861_v11, 0.0 }
 0x188   : > { %v1473_v38 = vmax.f32 %v863_v6, 0.0  ;;  %2343 = vmatmul.mubr.bf16.gmra.mrb[164].mxu0 %v5351_v4  ;;  %2440 = vmatmul.mubr.bf16.gmra.mrb[164].mxu1 %v5520_v24  ;;  %v1347_v18 = vmax.f32 %v976_v49, 0.0 }
 0x189   : > { %v1474_v35 = vmax.f32 %v865_v39, 0.0  ;;  %2350 = vmatprep.mubr.bf16.mxu0 %v5380_v52  ;;  %2447 = vmatprep.mubr.bf16.mxu1 %v5551_v21  ;;  %v1348_v53 = vmax.f32 %v978_v63, 0.0 }
 0x18a   : > { %v5647_v61 = vpack.c.bf16 %v1473_v38, %v1465_v46  ;;  %v5649_v44 = vpack.c.bf16 %v1347_v18, %v1339_v33 }
 0x18b   : > { %v5651_v51 = vpack.c.bf16 %v1474_v35, %v1466_v13  ;;  %v868_v62 = vpop.f32.mrb[60].mxu1  ;;  %v5653_v19 = vpack.c.bf16 %v1348_v53, %v1340_v41  ;;  %v981_v4 = vpop.f32.mrb[60].mxu0 }
 0x18c   : > { %v869_v24 = vadd.f32 %v868_v62, %v5401_v23  ;;  %v870_v25 = vpop.f32.mrb[61].mxu1  ;;  %v982_v50 = vadd.f32 %v981_v4, %v5571_v54  ;;  %v983_v2 = vpop.f32.mrb[61].mxu0 }
 0x18d   : > { %v871_v52 = vadd.f32 %v870_v25, %v5404_v27  ;;  %v872_v21 = vpop.f32.mrb[62].mxu1  ;;  %v984_v59 = vadd.f32 %v983_v2, %v5575_v55  ;;  %v985_v57 = vpop.f32.mrb[62].mxu0 }
 0x18e   : > { %v873_v60 = vadd.f32 %v872_v21, %v5401_v23  ;;  %v874_v1 = vpop.f32.mrb[63].mxu1  ;;  %v1355_v3 = vmax.f32 %v982_v50, 0.0  ;;  %v986_v5 = vadd.f32 %v985_v57, %v5571_v54  ;;  %v987_v9 = vpop.f32.mrb[63].mxu0  ;;  %v1481_v32 = vmax.f32 %v869_v24, 0.0 }
 0x18f   : > { %v875_v12 = vadd.f32 %v874_v1, %v5404_v27  ;;  %v1356_v48 = vmax.f32 %v984_v59, 0.0  ;;  %v988_v15 = vadd.f32 %v987_v9, %v5575_v55  ;;  %v1482_v20 = vmax.f32 %v871_v52, 0.0 }
 0x190   : > { %v1489_v7 = vmax.f32 %v873_v60, 0.0  ;;  %2351 = vmatmul.mubr.bf16.gmra.mrb[168].mxu0 %v5375_v47  ;;  %2448 = vmatmul.mubr.bf16.gmra.mrb[168].mxu1 %v5546_v10  ;;  %v1363_v0 = vmax.f32 %v986_v5, 0.0 }
 0x191   : > { %v1490_v22 = vmax.f32 %v875_v12, 0.0  ;;  %2358 = vmatprep.mubr.bf16.mxu0 %v5415_v37  ;;  %2455 = vmatprep.mubr.bf16.mxu1 %v5585_v8  ;;  %v1364_v11 = vmax.f32 %v988_v15, 0.0 }
 0x192   : > { %v5667_v30 = vpack.c.bf16 %v1489_v7, %v1481_v32  ;;  %v5669_v26 = vpack.c.bf16 %v1363_v0, %v1355_v3 }
 0x193   : > { %v5671_v29 = vpack.c.bf16 %v1490_v22, %v1482_v20  ;;  %v878_v6 = vpop.f32.mrb[64].mxu1  ;;  %v5673_v31 = vpack.c.bf16 %v1364_v11, %v1356_v48  ;;  %v991_v47 = vpop.f32.mrb[64].mxu0 }
 0x194   : > { %v879_v10 = vadd.f32 %v878_v6, %v5401_v23  ;;  %v880_v33 = vpop.f32.mrb[65].mxu1  ;;  %v992_v49 = vadd.f32 %v991_v47, %v5571_v54  ;;  %v993_v34 = vpop.f32.mrb[65].mxu0 }
 0x195   : > { %v881_v37 = vadd.f32 %v880_v33, %v5404_v27  ;;  %v882_v8 = vpop.f32.mrb[66].mxu1  ;;  %v994_v39 = vadd.f32 %v993_v34, %v5575_v55  ;;  %v995_v41 = vpop.f32.mrb[66].mxu0 }
 0x196   : > { %v883_v63 = vadd.f32 %v882_v8, %v5401_v23  ;;  %v884_v46 = vpop.f32.mrb[67].mxu1  ;;  %v1371_v38 = vmax.f32 %v992_v49, 0.0  ;;  %v996_v18 = vadd.f32 %v995_v41, %v5571_v54  ;;  %v997_v13 = vpop.f32.mrb[67].mxu0  ;;  %v1497_v4 = vmax.f32 %v879_v10, 0.0 }
 0x197   : > { %v885_v35 = vadd.f32 %v884_v46, %v5404_v27  ;;  %v1372_v53 = vmax.f32 %v994_v39, 0.0  ;;  %v998_v62 = vadd.f32 %v997_v13, %v5575_v55  ;;  %v1498_v50 = vmax.f32 %v881_v37, 0.0 }
 0x198   : > { %v1505_v24 = vmax.f32 %v883_v63, 0.0  ;;  %2359 = vmatmul.mubr.bf16.gmra.mrb[172].mxu0 %v5410_v16  ;;  %2456 = vmatmul.mubr.bf16.gmra.mrb[172].mxu1 %v5580_v56  ;;  %v1379_v25 = vmax.f32 %v996_v18, 0.0 }
 0x199   : > { %v1506_v2 = vmax.f32 %v885_v35, 0.0  ;;  %2463 = vmatprep.mubr.bf16.mxu1 %v5611_v42  ;;  %2560 = vmatprep.mubr.bf16.mxu0 %v5613_v43  ;;  %v1380_v52 = vmax.f32 %v998_v62, 0.0 }
 0x19a   : > { %v5687_v21 = vpack.c.bf16 %v1505_v24, %v1497_v4  ;;  %v5689_v59 = vpack.c.bf16 %v1379_v25, %v1371_v38 }
 0x19b   : > { %v5691_v57 = vpack.c.bf16 %v1506_v2, %v1498_v50  ;;  %v888_v60 = vpop.f32.mrb[68].mxu1  ;;  %v5693_v1 = vpack.c.bf16 %v1380_v52, %v1372_v53  ;;  %v1001_v16 = vpop.f32.mrb[68].mxu0 }
 0x19c   : > { %v889_v56 = vadd.f32 %v888_v60, %v5401_v23  ;;  %v890_v3 = vpop.f32.mrb[69].mxu1  ;;  %v1002_v5 = vadd.f32 %v1001_v16, %v5571_v54  ;;  %v1003_v9 = vpop.f32.mrb[69].mxu0 }
 0x19d   : > { %v891_v42 = vadd.f32 %v890_v3, %v5404_v27  ;;  %v892_v43 = vpop.f32.mrb[70].mxu1  ;;  %v1004_v12 = vadd.f32 %v1003_v9, %v5575_v55  ;;  %v1005_v48 = vpop.f32.mrb[70].mxu0 }
 0x19e   : > { %v893_v15 = vadd.f32 %v892_v43, %v5401_v23  ;;  %v894_v32 = vpop.f32.mrb[71].mxu1  ;;  %v1387_v7 = vmax.f32 %v1002_v5, 0.0  ;;  %v1006_v0 = vadd.f32 %v1005_v48, %v5571_v54  ;;  %v1007_v20 = vpop.f32.mrb[71].mxu0  ;;  %v1513_v47 = vmax.f32 %v889_v56, 0.0 }
 0x19f   : > { %v895_v22 = vadd.f32 %v894_v32, %v5404_v27  ;;  %v1388_v11 = vmax.f32 %v1004_v12, 0.0  ;;  %v1008_v6 = vadd.f32 %v1007_v20, %v5575_v55  ;;  %v1514_v49 = vmax.f32 %v891_v42, 0.0 }
 0x1a0   : > { %v1521_v10 = vmax.f32 %v893_v15, 0.0  ;;  %2464 = vmatmul.mubr.bf16.gmra.mrb[176].mxu1 %v5604_v36  ;;  %2561 = vmatmul.mubr.bf16.vlgmr.msra.gmra.mrb[176].mxu0 %v5606_v40  ;;  %v1395_v33 = vmax.f32 %v1006_v0, 0.0  ;;  %v388_v0 = vsub.s32 6, %v5288_v58 }
 0x1a1   : > { %v1522_v34 = vmax.f32 %v895_v22, 0.0  ;;  %2471 = vmatprep.mubr.bf16.mxu1 %v5631_v28  ;;  %2568 = vmatprep.mubr.bf16.mxu0 %v5633_v17  ;;  %v1396_v37 = vmax.f32 %v1008_v6, 0.0 }
 0x1a2   : > { %v5707_v8 = vpack.c.bf16 %v1521_v10, %v1513_v47  ;;  %v5709_v39 = vpack.c.bf16 %v1395_v33, %v1387_v7 }
 0x1a3   : > { %v5711_v41 = vpack.c.bf16 %v1522_v34, %v1514_v49  ;;  %v898_v63 = vpop.f32.mrb[72].mxu1  ;;  %v5713_v46 = vpack.c.bf16 %v1396_v37, %v1388_v11  ;;  %v1011_v36 = vpop.f32.mrb[72].mxu0  ;;  %v392_v11 = vsub.s32 7, %v5288_v58  ;;  %v4677_v58 = vld [vmem:[%s6459_s2] sm:$0xff] }
 0x1a4   : > { %v899_v40 = vadd.f32 %v898_v63, %v5401_v23  ;;  %v900_v38 = vpop.f32.mrb[73].mxu1  ;;  %v1012_v18 = vadd.f32 %v1011_v36, %v5571_v54  ;;  %v1013_v13 = vpop.f32.mrb[73].mxu0 }
 0x1a5   : > { %v901_v28 = vadd.f32 %v900_v38, %v5404_v27  ;;  %v902_v17 = vpop.f32.mrb[74].mxu1  ;;  %v1014_v35 = vadd.f32 %v1013_v13, %v5575_v55  ;;  %v1015_v53 = vpop.f32.mrb[74].mxu0 }
 0x1a6   : > { %v903_v62 = vadd.f32 %v902_v17, %v5401_v23  ;;  %v904_v4 = vpop.f32.mrb[75].mxu1  ;;  %v1403_v24 = vmax.f32 %v1012_v18, 0.0  ;;  %v1016_v25 = vadd.f32 %v1015_v53, %v5571_v54  ;;  %v1017_v50 = vpop.f32.mrb[75].mxu0  ;;  %v1529_v16 = vmax.f32 %v899_v40, 0.0 }
 0x1a7   : > { %v905_v2 = vadd.f32 %v904_v4, %v5404_v27  ;;  %v1404_v52 = vmax.f32 %v1014_v35, 0.0  ;;  %v1018_v60 = vadd.f32 %v1017_v50, %v5575_v55  ;;  %v1530_v5 = vmax.f32 %v901_v28, 0.0 }
 0x1a8   : > { %v1537_v56 = vmax.f32 %v903_v62, 0.0  ;;  %2472 = vmatmul.mubr.bf16.gmra.mrb[180].mxu1 %v5627_v45  ;;  %2569 = vmatmul.mubr.bf16.gmra.mrb[180].mxu0 %v5629_v14  ;;  %v1411_v3 = vmax.f32 %v1016_v25, 0.0 }
 0x1a9   : > { %v1538_v9 = vmax.f32 %v905_v2, 0.0  ;;  %2479 = vmatprep.mubr.bf16.mxu1 %v5651_v51  ;;  %2576 = vmatprep.mubr.bf16.mxu0 %v5653_v19  ;;  %v1412_v42 = vmax.f32 %v1018_v60, 0.0 }
 0x1aa   : > { %v5727_v43 = vpack.c.bf16 %v1537_v56, %v1529_v16  ;;  %v5729_v12 = vpack.c.bf16 %v1411_v3, %v1403_v24 }
 0x1ab   : > { %v5731_v48 = vpack.c.bf16 %v1538_v9, %v1530_v5  ;;  %v908_v15 = vpop.f32.mrb[76].mxu1  ;;  %v5733_v32 = vpack.c.bf16 %v1412_v42, %v1404_v52  ;;  %v1021_v45 = vpop.f32.mrb[76].mxu0 }
 0x1ac   : > { %v909_v14 = vadd.f32 %v908_v15, %v5401_v23  ;;  %v910_v7 = vpop.f32.mrb[77].mxu1  ;;  %v1022_v51 = vadd.f32 %v1021_v45, %v5571_v54  ;;  %v1023_v20 = vpop.f32.mrb[77].mxu0 }
 0x1ad   : > { %v911_v19 = vadd.f32 %v910_v7, %v5404_v27  ;;  %v912_v22 = vpop.f32.mrb[78].mxu1  ;;  %v1024_v6 = vadd.f32 %v1023_v20, %v5575_v55  ;;  %v1025_v47 = vpop.f32.mrb[78].mxu0 }
 0x1ae   : > { %v913_v10 = vadd.f32 %v912_v22, %v5401_v23  ;;  %v914_v33 = vpop.f32.mrb[79].mxu1  ;;  %v1419_v49 = vmax.f32 %v1022_v51, 0.0  ;;  %v1026_v34 = vadd.f32 %v1025_v47, %v5571_v54  ;;  %v1027_v37 = vpop.f32.mrb[79].mxu0  ;;  %v1545_v38 = vmax.f32 %v909_v14, 0.0 }
 0x1af   : > { %v915_v63 = vadd.f32 %v914_v33, %v5404_v27  ;;  %v1420_v36 = vmax.f32 %v1024_v6, 0.0  ;;  %v1028_v40 = vadd.f32 %v1027_v37, %v5575_v55  ;;  %v5750_v23 = vrot.slane %v4677_v58, %v388_v0 }
 0x1b0   : > { %v1553_v18 = vmax.f32 %v913_v10, 0.0  ;;  %2480 = vmatmul.mubr.bf16.gmra.mrb[184].mxu1 %v5647_v61  ;;  %2577 = vmatmul.mubr.bf16.gmra.mrb[184].mxu0 %v5649_v44  ;;  %v1427_v13 = vmax.f32 %v1026_v34, 0.0  ;;  %v1546_v28 = vmax.f32 %v911_v19, 0.0  ;;  %v5753_v27 = vrot.slane %v4677_v58, %v392_v11 }
 0x1b1   : > { %v1554_v17 = vmax.f32 %v915_v63, 0.0  ;;  %2487 = vmatprep.mubr.bf16.mxu1 %v5671_v29  ;;  %2584 = vmatprep.mubr.bf16.mxu0 %v5673_v31  ;;  %v1428_v35 = vmax.f32 %v1028_v40, 0.0 }
 0x1b2   : > { %v5756_v53 = vpack.c.bf16 %v1553_v18, %v1545_v38  ;;  %v5758_v61 = vpack.c.bf16 %v1427_v13, %v1419_v49 }
 0x1b3   : > { %v5760_v44 = vpack.c.bf16 %v1554_v17, %v1546_v28  ;;  %v1144_v62 = vpop.f32.mrb[80].mxu1  ;;  %v5762_v4 = vpack.c.bf16 %v1428_v35, %v1420_v36  ;;  %v1031_v24 = vpop.f32.mrb[80].mxu0 }
 0x1b4   : > { %v1145_v25 = vadd.f32 %v1144_v62, %v5750_v23  ;;  %v1146_v50 = vpop.f32.mrb[81].mxu1  ;;  %v1032_v29 = vadd.f32 %v1031_v24, %v5571_v54  ;;  %v1033_v2 = vpop.f32.mrb[81].mxu0 }
 0x1b5   : > { %v1147_v52 = vadd.f32 %v1146_v50, %v5753_v27  ;;  %v1148_v31 = vpop.f32.mrb[82].mxu1  ;;  %v1034_v60 = vadd.f32 %v1033_v2, %v5575_v55  ;;  %v1035_v16 = vpop.f32.mrb[82].mxu0 }
 0x1b6   : > { %v1149_v56 = vadd.f32 %v1148_v31, %v5750_v23  ;;  %v1150_v3 = vpop.f32.mrb[83].mxu1  ;;  %v1435_v5 = vmax.f32 %v1032_v29, 0.0  ;;  %v1036_v9 = vadd.f32 %v1035_v16, %v5571_v54  ;;  %v1037_v42 = vpop.f32.mrb[83].mxu0  ;;  %v1309_v7 = vmax.f32 %v1145_v25, 0.0 }
 0x1b7   : > { %v1151_v15 = vadd.f32 %v1150_v3, %v5753_v27  ;;  %v1436_v45 = vmax.f32 %v1034_v60, 0.0  ;;  %v1038_v14 = vadd.f32 %v1037_v42, %v5575_v55  ;;  %v1310_v20 = vmax.f32 %v1147_v52, 0.0 }
 0x1b8   : > { %v1317_v0 = vmax.f32 %v1149_v56, 0.0  ;;  %2488 = vmatmul.mubr.bf16.gmra.mrb[188].mxu1 %v5667_v30  ;;  %2585 = vmatmul.mubr.bf16.gmra.mrb[188].mxu0 %v5669_v26  ;;  %v1443_v51 = vmax.f32 %v1036_v9, 0.0 }
 0x1b9   : > { %v1318_v19 = vmax.f32 %v1151_v15, 0.0  ;;  %2495 = vmatprep.mubr.bf16.mxu1 %v5691_v57  ;;  %2592 = vmatprep.mubr.bf16.mxu0 %v5693_v1  ;;  %v1444_v22 = vmax.f32 %v1038_v14, 0.0 }
 0x1ba   : > { %v5776_v11 = vpack.c.bf16 %v1317_v0, %v1309_v7  ;;  %v5778_v6 = vpack.c.bf16 %v1443_v51, %v1435_v5 }
 0x1bb   : > { %v5780_v47 = vpack.c.bf16 %v1318_v19, %v1310_v20  ;;  %v1154_v10 = vpop.f32.mrb[84].mxu1  ;;  %v5782_v33 = vpack.c.bf16 %v1444_v22, %v1436_v45  ;;  %v1041_v30 = vpop.f32.mrb[84].mxu0 }
 0x1bc   : > { %v1155_v26 = vadd.f32 %v1154_v10, %v5750_v23  ;;  %v1156_v49 = vpop.f32.mrb[85].mxu1  ;;  %v1042_v34 = vadd.f32 %v1041_v30, %v5571_v54  ;;  %v1043_v37 = vpop.f32.mrb[85].mxu0 }
 0x1bd   : > { %v1157_v57 = vadd.f32 %v1156_v49, %v5753_v27  ;;  %v1158_v1 = vpop.f32.mrb[86].mxu1  ;;  %v1044_v63 = vadd.f32 %v1043_v37, %v5575_v55  ;;  %v1045_v36 = vpop.f32.mrb[86].mxu0 }
 0x1be   : > { %v1159_v40 = vadd.f32 %v1158_v1, %v5750_v23  ;;  %v1160_v38 = vpop.f32.mrb[87].mxu1  ;;  %v1451_v18 = vmax.f32 %v1042_v34, 0.0  ;;  %v1046_v58 = vadd.f32 %v1045_v36, %v5571_v54  ;;  %v1047_v13 = vpop.f32.mrb[87].mxu0  ;;  %v1325_v62 = vmax.f32 %v1155_v26, 0.0 }
 0x1bf   : > { %v1161_v28 = vadd.f32 %v1160_v38, %v5753_v27  ;;  %v1452_v17 = vmax.f32 %v1044_v63, 0.0  ;;  %v1048_v35 = vadd.f32 %v1047_v13, %v5575_v55  ;;  %v1326_v50 = vmax.f32 %v1157_v57, 0.0 }
 0x1c0   : > { %v1333_v24 = vmax.f32 %v1159_v40, 0.0  ;;  %2496 = vmatmul.mubr.bf16.gmra.mrb[192].mxu1 %v5687_v21  ;;  %2593 = vmatmul.mubr.bf16.gmra.mrb[192].mxu0 %v5689_v59  ;;  %v1459_v25 = vmax.f32 %v1046_v58, 0.0 }
 0x1c1   : > { %v1334_v29 = vmax.f32 %v1161_v28, 0.0  ;;  %2503 = vmatprep.mubr.bf16.mxu1 %v5711_v41  ;;  %2600 = vmatprep.mubr.bf16.mxu0 %v5713_v46  ;;  %v1460_v2 = vmax.f32 %v1048_v35, 0.0 }
 0x1c2   : > { %v5796_v52 = vpack.c.bf16 %v1333_v24, %v1325_v62  ;;  %v5798_v31 = vpack.c.bf16 %v1459_v25, %v1451_v18 }
 0x1c3   : > { %v5800_v60 = vpack.c.bf16 %v1334_v29, %v1326_v50  ;;  %v1164_v16 = vpop.f32.mrb[88].mxu1  ;;  %v5802_v56 = vpack.c.bf16 %v1460_v2, %v1452_v17  ;;  %v1051_v21 = vpop.f32.mrb[88].mxu0 }
 0x1c4   : > { %v1165_v59 = vadd.f32 %v1164_v16, %v5750_v23  ;;  %v1166_v3 = vpop.f32.mrb[89].mxu1  ;;  %v1052_v5 = vadd.f32 %v1051_v21, %v5571_v54  ;;  %v1053_v9 = vpop.f32.mrb[89].mxu0 }
 0x1c5   : > { %v1167_v41 = vadd.f32 %v1166_v3, %v5753_v27  ;;  %v1168_v46 = vpop.f32.mrb[90].mxu1  ;;  %v1054_v42 = vadd.f32 %v1053_v9, %v5575_v55  ;;  %v1055_v15 = vpop.f32.mrb[90].mxu0 }
 0x1c6   : > { %v1169_v45 = vadd.f32 %v1168_v46, %v5750_v23  ;;  %v1170_v14 = vpop.f32.mrb[91].mxu1  ;;  %v1467_v7 = vmax.f32 %v1052_v5, 0.0  ;;  %v1056_v0 = vadd.f32 %v1055_v15, %v5571_v54  ;;  %v1057_v51 = vpop.f32.mrb[91].mxu0  ;;  %v1341_v10 = vmax.f32 %v1165_v59, 0.0 }
 0x1c7   : > { %v1171_v20 = vadd.f32 %v1170_v14, %v5753_v27  ;;  %v1468_v19 = vmax.f32 %v1054_v42, 0.0  ;;  %v1058_v22 = vadd.f32 %v1057_v51, %v5575_v55  ;;  %v1342_v49 = vmax.f32 %v1167_v41, 0.0 }
 0x1c8   : > { %v1349_v30 = vmax.f32 %v1169_v45, 0.0  ;;  %2504 = vmatmul.mubr.bf16.gmra.mrb[196].mxu1 %v5707_v8  ;;  %2601 = vmatmul.mubr.bf16.gmra.mrb[196].mxu0 %v5709_v39  ;;  %v1475_v26 = vmax.f32 %v1056_v0, 0.0 }
 0x1c9   : > { %v1350_v34 = vmax.f32 %v1171_v20, 0.0  ;;  %2511 = vmatprep.mubr.bf16.mxu1 %v5731_v48  ;;  %2608 = vmatprep.mubr.bf16.mxu0 %v5733_v32  ;;  %v1476_v37 = vmax.f32 %v1058_v22, 0.0 }
 0x1ca   : > { %v5816_v57 = vpack.c.bf16 %v1349_v30, %v1341_v10  ;;  %v5818_v1 = vpack.c.bf16 %v1475_v26, %v1467_v7 }
 0x1cb   : > { %v5820_v63 = vpack.c.bf16 %v1350_v34, %v1342_v49  ;;  %v1174_v36 = vpop.f32.mrb[92].mxu1  ;;  %v5822_v40 = vpack.c.bf16 %v1476_v37, %v1468_v19  ;;  %v1061_v8 = vpop.f32.mrb[92].mxu0 }
 0x1cc   : > { %v1175_v39 = vadd.f32 %v1174_v36, %v5750_v23  ;;  %v1176_v38 = vpop.f32.mrb[93].mxu1  ;;  %v1062_v18 = vadd.f32 %v1061_v8, %v5571_v54  ;;  %v1063_v58 = vpop.f32.mrb[93].mxu0 }
 0x1cd   : > { %v1177_v48 = vadd.f32 %v1176_v38, %v5753_v27  ;;  %v1178_v32 = vpop.f32.mrb[94].mxu1  ;;  %v1064_v13 = vadd.f32 %v1063_v58, %v5575_v55  ;;  %v1065_v28 = vpop.f32.mrb[94].mxu0 }
 0x1ce   : > { %v1179_v17 = vadd.f32 %v1178_v32, %v5750_v23  ;;  %v1180_v35 = vpop.f32.mrb[95].mxu1  ;;  %v1483_v62 = vmax.f32 %v1062_v18, 0.0  ;;  %v1066_v24 = vadd.f32 %v1065_v28, %v5571_v54  ;;  %v1067_v25 = vpop.f32.mrb[95].mxu0  ;;  %v1357_v16 = vmax.f32 %v1175_v39, 0.0 }
 0x1cf   : > { %v1181_v50 = vadd.f32 %v1180_v35, %v5753_v27  ;;  %v1484_v29 = vmax.f32 %v1064_v13, 0.0  ;;  %v1068_v2 = vadd.f32 %v1067_v25, %v5575_v55  ;;  %v1358_v3 = vmax.f32 %v1177_v48, 0.0 }
 0x1d0   : > { %v1365_v21 = vmax.f32 %v1179_v17, 0.0  ;;  %2512 = vmatmul.mubr.bf16.gmra.mrb[200].mxu1 %v5727_v43  ;;  %2609 = vmatmul.mubr.bf16.gmra.mrb[200].mxu0 %v5729_v12  ;;  %v1491_v59 = vmax.f32 %v1066_v24, 0.0 }
 0x1d1   : > { %v1366_v5 = vmax.f32 %v1181_v50, 0.0  ;;  %2519 = vmatprep.mubr.bf16.mxu1 %v5760_v44  ;;  %2616 = vmatprep.mubr.bf16.mxu0 %v5762_v4  ;;  %v1492_v9 = vmax.f32 %v1068_v2, 0.0 }
 0x1d2   : > { %v5836_v41 = vpack.c.bf16 %v1365_v21, %v1357_v16  ;;  %v5838_v46 = vpack.c.bf16 %v1491_v59, %v1483_v62 }
 0x1d3   : > { %v5840_v42 = vpack.c.bf16 %v1366_v5, %v1358_v3  ;;  %v1184_v15 = vpop.f32.mrb[96].mxu1  ;;  %v5842_v45 = vpack.c.bf16 %v1492_v9, %v1484_v29  ;;  %v1071_v43 = vpop.f32.mrb[96].mxu0 }
 0x1d4   : > { %v1185_v12 = vadd.f32 %v1184_v15, %v5750_v23  ;;  %v1186_v14 = vpop.f32.mrb[97].mxu1  ;;  %v1072_v7 = vadd.f32 %v1071_v43, %v5571_v54  ;;  %v1073_v0 = vpop.f32.mrb[97].mxu0 }
 0x1d5   : > { %v1187_v44 = vadd.f32 %v1186_v14, %v5753_v27  ;;  %v1188_v4 = vpop.f32.mrb[98].mxu1  ;;  %v1074_v51 = vadd.f32 %v1073_v0, %v5575_v55  ;;  %v1075_v20 = vpop.f32.mrb[98].mxu0 }
 0x1d6   : > { %v1189_v19 = vadd.f32 %v1188_v4, %v5750_v23  ;;  %v1190_v22 = vpop.f32.mrb[99].mxu1  ;;  %v1499_v10 = vmax.f32 %v1072_v7, 0.0  ;;  %v1076_v30 = vadd.f32 %v1075_v20, %v5571_v54  ;;  %v1077_v26 = vpop.f32.mrb[99].mxu0  ;;  %v1373_v36 = vmax.f32 %v1185_v12, 0.0 }
 0x1d7   : > { %v1191_v49 = vadd.f32 %v1190_v22, %v5753_v27  ;;  %v1500_v34 = vmax.f32 %v1074_v51, 0.0  ;;  %v1078_v37 = vadd.f32 %v1077_v26, %v5575_v55  ;;  %v1374_v38 = vmax.f32 %v1187_v44, 0.0 }
 0x1d8   : > { %v1381_v8 = vmax.f32 %v1189_v19, 0.0  ;;  %2520 = vmatmul.mubr.bf16.gmra.mrb[204].mxu1 %v5756_v53  ;;  %2617 = vmatmul.mubr.bf16.gmra.mrb[204].mxu0 %v5758_v61  ;;  %v1507_v39 = vmax.f32 %v1076_v30, 0.0 }
 0x1d9   : > { %v1382_v18 = vmax.f32 %v1191_v49, 0.0  ;;  %2721 = vmatprep.mubr.bf16.mxu1 %v5780_v47  ;;  %2624 = vmatprep.mubr.bf16.mxu0 %v5782_v33  ;;  %v1508_v58 = vmax.f32 %v1078_v37, 0.0 }
 0x1da   : > { %v5856_v48 = vpack.c.bf16 %v1381_v8, %v1373_v36  ;;  %v5858_v32 = vpack.c.bf16 %v1507_v39, %v1499_v10 }
 0x1db   : > { %v5860_v13 = vpack.c.bf16 %v1382_v18, %v1374_v38  ;;  %v1194_v28 = vpop.f32.mrb[100].mxu1  ;;  %v5862_v17 = vpack.c.bf16 %v1508_v58, %v1500_v34  ;;  %v1081_v53 = vpop.f32.mrb[100].mxu0 }
 0x1dc   : > { %v1195_v61 = vadd.f32 %v1194_v28, %v5750_v23  ;;  %v1196_v35 = vpop.f32.mrb[101].mxu1  ;;  %v1082_v62 = vadd.f32 %v1081_v53, %v5571_v54  ;;  %v1083_v24 = vpop.f32.mrb[101].mxu0 }
 0x1dd   : > { %v1197_v47 = vadd.f32 %v1196_v35, %v5753_v27  ;;  %v1198_v33 = vpop.f32.mrb[102].mxu1  ;;  %v1084_v25 = vadd.f32 %v1083_v24, %v5575_v55  ;;  %v1085_v50 = vpop.f32.mrb[102].mxu0 }
 0x1de   : > { %v1199_v29 = vadd.f32 %v1198_v33, %v5750_v23  ;;  %v1200_v2 = vpop.f32.mrb[103].mxu1  ;;  %v1515_v16 = vmax.f32 %v1082_v62, 0.0  ;;  %v1086_v21 = vadd.f32 %v1085_v50, %v5571_v54  ;;  %v1087_v59 = vpop.f32.mrb[103].mxu0  ;;  %v1389_v15 = vmax.f32 %v1195_v61, 0.0 }
 0x1df   : > { %v1201_v3 = vadd.f32 %v1200_v2, %v5753_v27  ;;  %v1516_v5 = vmax.f32 %v1084_v25, 0.0  ;;  %v1088_v9 = vadd.f32 %v1087_v59, %v5575_v55  ;;  %v1390_v14 = vmax.f32 %v1197_v47, 0.0 }
 0x1e0   : > { %v1397_v43 = vmax.f32 %v1199_v29, 0.0  ;;  %2625 = vmatmul.mubr.bf16.gmra.mrb[208].mxu0 %v5778_v6  ;;  %2722 = vmatmul.mubr.bf16.vlgmr.msra.gmra.mrb[208].mxu1 %v5776_v11  ;;  %v1523_v12 = vmax.f32 %v1086_v21, 0.0 }
 0x1e1   : > { %v1398_v7 = vmax.f32 %v1201_v3, 0.0  ;;  %2729 = vmatprep.mubr.bf16.mxu1 %v5800_v60  ;;  %2632 = vmatprep.mubr.bf16.mxu0 %v5802_v56  ;;  %v1524_v0 = vmax.f32 %v1088_v9, 0.0 }
 0x1e2   : > { %v5876_v44 = vpack.c.bf16 %v1397_v43, %v1389_v15  ;;  %v5878_v4 = vpack.c.bf16 %v1523_v12, %v1515_v16 }
 0x1e3   : > { %v5880_v51 = vpack.c.bf16 %v1398_v7, %v1390_v14  ;;  %v1204_v20 = vpop.f32.mrb[104].mxu1  ;;  %v5882_v19 = vpack.c.bf16 %v1524_v0, %v1516_v5  ;;  %v1091_v6 = vpop.f32.mrb[104].mxu0 }
 0x1e4   : > { %v1205_v11 = vadd.f32 %v1204_v20, %v5750_v23  ;;  %v1206_v22 = vpop.f32.mrb[105].mxu1  ;;  %v1092_v10 = vadd.f32 %v1091_v6, %v5571_v54  ;;  %v1093_v30 = vpop.f32.mrb[105].mxu0 }
 0x1e5   : > { %v1207_v60 = vadd.f32 %v1206_v22, %v5753_v27  ;;  %v1208_v56 = vpop.f32.mrb[106].mxu1  ;;  %v1094_v26 = vadd.f32 %v1093_v30, %v5575_v55  ;;  %v1095_v49 = vpop.f32.mrb[106].mxu0 }
 0x1e6   : > { %v1209_v34 = vadd.f32 %v1208_v56, %v5750_v23  ;;  %v1210_v37 = vpop.f32.mrb[107].mxu1  ;;  %v1531_v36 = vmax.f32 %v1092_v10, 0.0  ;;  %v1096_v8 = vadd.f32 %v1095_v49, %v5571_v54  ;;  %v1097_v39 = vpop.f32.mrb[107].mxu0  ;;  %v1405_v28 = vmax.f32 %v1205_v11, 0.0 }
 0x1e7   : > { %v1211_v38 = vadd.f32 %v1210_v37, %v5753_v27  ;;  %v1532_v18 = vmax.f32 %v1094_v26, 0.0  ;;  %v1098_v58 = vadd.f32 %v1097_v39, %v5575_v55  ;;  %v1406_v35 = vmax.f32 %v1207_v60, 0.0 }
 0x1e8   : > { %v1413_v53 = vmax.f32 %v1209_v34, 0.0  ;;  %2633 = vmatmul.mubr.bf16.gmra.mrb[212].mxu0 %v5798_v31  ;;  %2730 = vmatmul.mubr.bf16.gmra.mrb[212].mxu1 %v5796_v52  ;;  %v1539_v61 = vmax.f32 %v1096_v8, 0.0 }
 0x1e9   : > { %v1414_v62 = vmax.f32 %v1211_v38, 0.0  ;;  %2737 = vmatprep.mubr.bf16.mxu1 %v5820_v63  ;;  %2640 = vmatprep.mubr.bf16.mxu0 %v5822_v40  ;;  %v1540_v24 = vmax.f32 %v1098_v58, 0.0 }
 0x1ea   : > { %v5896_v47 = vpack.c.bf16 %v1413_v53, %v1405_v28  ;;  %v5898_v33 = vpack.c.bf16 %v1539_v61, %v1531_v36 }
 0x1eb   : > { %v5900_v25 = vpack.c.bf16 %v1414_v62, %v1406_v35  ;;  %v1214_v50 = vpop.f32.mrb[108].mxu1  ;;  %v5902_v29 = vpack.c.bf16 %v1540_v24, %v1532_v18  ;;  %v1101_v31 = vpop.f32.mrb[108].mxu0 }
 0x1ec   : > { %v1215_v52 = vadd.f32 %v1214_v50, %v5750_v23  ;;  %v1216_v2 = vpop.f32.mrb[109].mxu1  ;;  %v1102_v16 = vadd.f32 %v1101_v31, %v5571_v54  ;;  %v1103_v21 = vpop.f32.mrb[109].mxu0 }
 0x1ed   : > { %v1217_v63 = vadd.f32 %v1216_v2, %v5753_v27  ;;  %v1218_v40 = vpop.f32.mrb[110].mxu1  ;;  %v1104_v59 = vadd.f32 %v1103_v21, %v5575_v55  ;;  %v1105_v3 = vpop.f32.mrb[110].mxu0 }
 0x1ee   : > { %v1219_v5 = vadd.f32 %v1218_v40, %v5750_v23  ;;  %v1220_v9 = vpop.f32.mrb[111].mxu1  ;;  %v1547_v15 = vmax.f32 %v1102_v16, 0.0  ;;  %v1106_v43 = vadd.f32 %v1105_v3, %v5571_v54  ;;  %v1107_v12 = vpop.f32.mrb[111].mxu0  ;;  %v1421_v20 = vmax.f32 %v1215_v52, 0.0 }
 0x1ef   : > { %v1221_v14 = vadd.f32 %v1220_v9, %v5753_v27  ;;  %v1548_v7 = vmax.f32 %v1104_v59, 0.0  ;;  %v1108_v0 = vadd.f32 %v1107_v12, %v5575_v55  ;;  %v1422_v22 = vmax.f32 %v1217_v63, 0.0  ;;  %v4541_v12 = vld [vmem:[#allocation2] sm:$0xff]  }
 0x1f0   : > { %v1429_v6 = vmax.f32 %v1219_v5, 0.0  ;;  %2641 = vmatmul.mubr.bf16.gmra.mrb[216].mxu0 %v5818_v1  ;;  %2738 = vmatmul.mubr.bf16.gmra.mrb[216].mxu1 %v5816_v57  ;;  %v1555_v11 = vmax.f32 %v1106_v43, 0.0 }
 0x1f1   : > { %v1430_v10 = vmax.f32 %v1221_v14, 0.0  ;;  %2745 = vmatprep.mubr.bf16.mxu1 %v5840_v42  ;;  %2648 = vmatprep.mubr.bf16.mxu0 %v5842_v45  ;;  %v1556_v54 = vmax.f32 %v1108_v0, 0.0 }
 0x1f2   : > { %v5916_v30 = vpack.c.bf16 %v1429_v6, %v1421_v20  ;;  %v5918_v60 = vpack.c.bf16 %v1555_v11, %v1547_v15  ;;  %4370 = vmatprep.subr.bf16.mxu0 %v4541_v12 }
 0x1f3   : > { %v5920_v56 = vpack.c.bf16 %v1430_v10, %v1422_v22  ;;  %v1224_v55 = vpop.f32.mrb[112].mxu1  ;;  %v5922_v26 = vpack.c.bf16 %v1556_v54, %v1548_v7  ;;  %v3914_v1 = vpop.f32.mrb[112].mxu0  ;;  %4371 = vmatpush3.bf16.msra.mxu0 %v4541_v12 }
 0x1f4   : > { %v1225_v57 = vadd.f32 %v1224_v55, %v5750_v23  ;;  %v1226_v49 = vpop.f32.mrb[113].mxu1  ;;  %v3915_v34 = vpop.f32.mrb[113].mxu0 }
 0x1f5   : > { %v1227_v37 = vadd.f32 %v1226_v49, %v5753_v27  ;;  %v1228_v42 = vpop.f32.mrb[114].mxu1  ;;  %v5926_v36 = vadd.f32 %v3915_v34, %v3914_v1  ;;  %v3917_v45 = vpop.f32.mrb[114].mxu0 }
 0x1f6   : > { %v1229_v8 = vadd.f32 %v1228_v42, %v5750_v23  ;;  %v1230_v39 = vpop.f32.mrb[115].mxu1  ;;  %v3918_v38 = vpop.f32.mrb[115].mxu0  ;;  %v1437_v28 = vmax.f32 %v1225_v57, 0.0 }
 0x1f7   : > { %v1231_v18 = vadd.f32 %v1230_v39, %v5753_v27  ;;  %v5930_v58 = vadd.f32 %v3918_v38, %v3917_v45  ;;  %v1438_v61 = vmax.f32 %v1227_v37, 0.0 }
 0x1f8   : > { %v1445_v53 = vmax.f32 %v1229_v8, 0.0  ;;  %2649 = vmatmul.mubr.bf16.gmra.mrb[220].mxu0 %v5838_v46  ;;  %2746 = vmatmul.mubr.bf16.gmra.mrb[220].mxu1 %v5836_v41 }
 0x1f9   : > { %v1446_v35 = vmax.f32 %v1231_v18, 0.0  ;;  %2753 = vmatprep.mubr.bf16.mxu1 %v5860_v13  ;;  %2656 = vmatprep.mubr.bf16.mxu0 %v5862_v17 }
 0x1fa   : > { %v5936_v62 = vpack.c.bf16 %v1445_v53, %v1437_v28 }
 0x1fb   : > { %v5938_v24 = vpack.c.bf16 %v1446_v35, %v1438_v61  ;;  %v1234_v50 = vpop.f32.mrb[116].mxu1  ;;  %v3920_v31 = vpop.f32.mrb[116].mxu0 }
 0x1fc   : > { %v1235_v52 = vadd.f32 %v1234_v50, %v5750_v23  ;;  %v1236_v2 = vpop.f32.mrb[117].mxu1  ;;  %v3921_v16 = vpop.f32.mrb[117].mxu0 }
 0x1fd   : > { %v1237_v46 = vadd.f32 %v1236_v2, %v5753_v27  ;;  %v1238_v21 = vpop.f32.mrb[118].mxu1  ;;  %v5942_v41 = vadd.f32 %v3921_v16, %v3920_v31  ;;  %v3923_v63 = vpop.f32.mrb[118].mxu0 }
 0x1fe   : > { %v1239_v13 = vadd.f32 %v1238_v21, %v5750_v23  ;;  %v1240_v40 = vpop.f32.mrb[119].mxu1  ;;  %v3924_v17 = vpop.f32.mrb[119].mxu0  ;;  %v1453_v5 = vmax.f32 %v1235_v52, 0.0 }
 0x1ff   : > { %v1241_v59 = vadd.f32 %v1240_v40, %v5753_v27  ;;  %v5946_v3 = vadd.f32 %v3924_v17, %v3923_v63  ;;  %v1454_v15 = vmax.f32 %v1237_v46, 0.0  ;;  %v4542_v63 = vld [vmem:[#allocation2 + $0x8] sm:$0xff]  }
 0x200   : > { %v1461_v9 = vmax.f32 %v1239_v13, 0.0  ;;  %2657 = vmatmul.mubr.bf16.gmra.mrb[224].mxu0 %v5858_v32  ;;  %2754 = vmatmul.mubr.bf16.gmra.mrb[224].mxu1 %v5856_v48 }
 0x201   : > { %v1462_v43 = vmax.f32 %v1241_v59, 0.0  ;;  %2761 = vmatprep.mubr.bf16.mxu1 %v5880_v51  ;;  %2664 = vmatprep.mubr.bf16.mxu0 %v5882_v19 }
 0x202   : > { %v5952_v14 = vpack.c.bf16 %v1461_v9, %v1453_v5  ;;  %4372 = vmatprep.subr.bf16.mxu0 %v4542_v63 }
 0x203   : > { %v5954_v7 = vpack.c.bf16 %v1462_v43, %v1454_v15  ;;  %v1244_v0 = vpop.f32.mrb[120].mxu1  ;;  %v3926_v20 = vpop.f32.mrb[120].mxu0  ;;  %4373 = vmatpush3.bf16.msra.mxu0 %v4542_v63 }
 0x204   : > { %v1245_v6 = vadd.f32 %v1244_v0, %v5750_v23  ;;  %v1246_v11 = vpop.f32.mrb[121].mxu1  ;;  %v3927_v32 = vpop.f32.mrb[121].mxu0 }
 0x205   : > { %v1247_v48 = vadd.f32 %v1246_v11, %v5753_v27  ;;  %v1248_v22 = vpop.f32.mrb[122].mxu1  ;;  %v5958_v10 = vadd.f32 %v3927_v32, %v3926_v20  ;;  %v3929_v51 = vpop.f32.mrb[122].mxu0 }
 0x206   : > { %v1249_v19 = vadd.f32 %v1248_v22, %v5750_v23  ;;  %v1250_v54 = vpop.f32.mrb[123].mxu1  ;;  %v3930_v55 = vpop.f32.mrb[123].mxu0  ;;  %v1469_v49 = vmax.f32 %v1245_v6, 0.0 }
 0x207   : > { %v1251_v1 = vadd.f32 %v1250_v54, %v5753_v27  ;;  %v5962_v57 = vadd.f32 %v3930_v55, %v3929_v51  ;;  %v1470_v37 = vmax.f32 %v1247_v48, 0.0 }
 0x208   : > { %v1477_v34 = vmax.f32 %v1249_v19, 0.0  ;;  %2665 = vmatmul.mubr.bf16.gmra.mrb[228].mxu0 %v5878_v4  ;;  %2762 = vmatmul.mubr.bf16.gmra.mrb[228].mxu1 %v5876_v44 }
 0x209   : > { %v1478_v42 = vmax.f32 %v1251_v1, 0.0  ;;  %2769 = vmatprep.mubr.bf16.mxu1 %v5900_v25  ;;  %2672 = vmatprep.mubr.bf16.mxu0 %v5902_v29 }
 0x20a   : > { %v5968_v45 = vpack.c.bf16 %v1477_v34, %v1469_v49 }
 0x20b   : > { %v5970_v8 = vpack.c.bf16 %v1478_v42, %v1470_v37  ;;  %v1254_v39 = vpop.f32.mrb[124].mxu1  ;;  %v3932_v38 = vpop.f32.mrb[124].mxu0 }
 0x20c   : > { %v1255_v18 = vadd.f32 %v1254_v39, %v5750_v23  ;;  %v1256_v28 = vpop.f32.mrb[125].mxu1  ;;  %v3933_v53 = vpop.f32.mrb[125].mxu0 }
 0x20d   : > { %v1257_v4 = vadd.f32 %v1256_v28, %v5753_v27  ;;  %v1258_v61 = vpop.f32.mrb[126].mxu1  ;;  %v5974_v44 = vadd.f32 %v3933_v53, %v3932_v38  ;;  %v3935_v35 = vpop.f32.mrb[126].mxu0 }
 0x20e   : > { %v1259_v25 = vadd.f32 %v1258_v61, %v5750_v23  ;;  %v1260_v50 = vpop.f32.mrb[127].mxu1  ;;  %v3936_v29 = vpop.f32.mrb[127].mxu0  ;;  %v1485_v2 = vmax.f32 %v1255_v18, 0.0 }
 0x20f   : > { %v1261_v31 = vadd.f32 %v1260_v50, %v5753_v27  ;;  %v5978_v52 = vadd.f32 %v3936_v29, %v3935_v35  ;;  %v1486_v46 = vmax.f32 %v1257_v4, 0.0 }
 0x210   : > { %v1493_v16 = vmax.f32 %v1259_v25, 0.0  ;;  %2673 = vmatmul.mubr.bf16.gmra.mrb[232].mxu0 %v5898_v33  ;;  %2770 = vmatmul.mubr.bf16.gmra.mrb[232].mxu1 %v5896_v47  ;;  %v4543_v25 = vld [vmem:[#allocation2 + $0x10] sm:$0xff]  }
 0x211   : > { %v1494_v21 = vmax.f32 %v1261_v31, 0.0  ;;  %2777 = vmatprep.mubr.bf16.mxu1 %v5920_v56  ;;  %2680 = vmatprep.mubr.bf16.mxu0 %v5922_v26 }
 0x212   : > { %v5984_v13 = vpack.c.bf16 %v1493_v16, %v1485_v2  ;;  %4374 = vmatprep.subr.bf16.mxu0 %v4543_v25 }
 0x213   : > { %v5986_v40 = vpack.c.bf16 %v1494_v21, %v1486_v46  ;;  %v1264_v17 = vpop.f32.mrb[128].mxu1  ;;  %v3938_v59 = vpop.f32.mrb[128].mxu0  ;;  %4375 = vmatpush3.bf16.msra.mxu0 %v4543_v25 }
 0x214   : > { %v1265_v5 = vadd.f32 %v1264_v17, %v5750_v23  ;;  %v1266_v9 = vpop.f32.mrb[129].mxu1  ;;  %v3939_v33 = vpop.f32.mrb[129].mxu0 }
 0x215   : > { %v1267_v47 = vadd.f32 %v1266_v9, %v5753_v27  ;;  %v1268_v15 = vpop.f32.mrb[130].mxu1  ;;  %v5990_v43 = vadd.f32 %v3939_v33, %v3938_v59  ;;  %v3941_v56 = vpop.f32.mrb[130].mxu0 }
 0x216   : > { %v1269_v26 = vadd.f32 %v1268_v15, %v5750_v23  ;;  %v1270_v12 = vpop.f32.mrb[131].mxu1  ;;  %v3942_v0 = vpop.f32.mrb[131].mxu0  ;;  %v1501_v11 = vmax.f32 %v1265_v5, 0.0 }
 0x217   : > { %v1271_v20 = vadd.f32 %v1270_v12, %v5753_v27  ;;  %v5994_v6 = vadd.f32 %v3942_v0, %v3941_v56  ;;  %v1502_v48 = vmax.f32 %v1267_v47, 0.0 }
 0x218   : > { %v1509_v32 = vmax.f32 %v1269_v26, 0.0  ;;  %2681 = vmatmul.mubr.bf16.gmra.mrb[236].mxu0 %v5918_v60  ;;  %2778 = vmatmul.mubr.bf16.gmra.mrb[236].mxu1 %v5916_v30 }
 0x219   : > { %v1510_v22 = vmax.f32 %v1271_v20, 0.0  ;;  %2785 = vmatprep.mubr.bf16.mxu1 %v5938_v24 }
 0x21a   : > { %v5999_v51 = vpack.c.bf16 %v1509_v32, %v1501_v11 }
 0x21b   : > { %v6001_v19 = vpack.c.bf16 %v1510_v22, %v1502_v48  ;;  %v1274_v54 = vpop.f32.mrb[132].mxu1  ;;  %v3944_v55 = vpop.f32.mrb[132].mxu0 }
 0x21c   : > { %v1275_v1 = vadd.f32 %v1274_v54, %v5750_v23  ;;  %v1276_v49 = vpop.f32.mrb[133].mxu1  ;;  %v3945_v34 = vpop.f32.mrb[133].mxu0 }
 0x21d   : > { %v1277_v37 = vadd.f32 %v1276_v49, %v5753_v27  ;;  %v1278_v42 = vpop.f32.mrb[134].mxu1  ;;  %v6005_v60 = vadd.f32 %v3945_v34, %v3944_v55  ;;  %v3947_v30 = vpop.f32.mrb[134].mxu0 }
 0x21e   : > { %v1279_v39 = vadd.f32 %v1278_v42, %v5750_v23  ;;  %v1280_v38 = vpop.f32.mrb[135].mxu1  ;;  %v3948_v24 = vpop.f32.mrb[135].mxu0  ;;  %v1517_v53 = vmax.f32 %v1275_v1, 0.0 }
 0x21f   : > { %v1281_v18 = vadd.f32 %v1280_v38, %v5753_v27  ;;  %v6009_v28 = vadd.f32 %v3948_v24, %v3947_v30  ;;  %v1518_v61 = vmax.f32 %v1277_v37, 0.0 }
 0x220   : > { %v1525_v4 = vmax.f32 %v1279_v39, 0.0  ;;  %2786 = vmatmul.mubr.bf16.gmra.mrb[240].mxu1 %v5936_v62 }
 0x221   : > { %v1526_v35 = vmax.f32 %v1281_v18, 0.0  ;;  %2793 = vmatprep.mubr.bf16.mxu1 %v5954_v7 }
 0x222   : > { %v6013_v50 = vpack.c.bf16 %v1525_v4, %v1517_v53  ;;  %v4544_v53 = vld [vmem:[#allocation2 + $0x18] sm:$0xff]   ;;  %v6044_v4 = vld [vmem:[%s6461_s4] ss:$0 sm:$0xff] }
 0x223   : > { %v6015_v29 = vpack.c.bf16 %v1526_v35, %v1518_v61  ;;  %v1284_v31 = vpop.f32.mrb[136].mxu1  ;;  %v3950_v2 = vpop.f32.mrb[136].mxu0  ;;  %4376 = vmatprep.subr.bf16.mxu0 %v4544_v53 }
 0x224   : > { %v1285_v16 = vadd.f32 %v1284_v31, %v5750_v23  ;;  %v1286_v46 = vpop.f32.mrb[137].mxu1  ;;  %v3951_v21 = vpop.f32.mrb[137].mxu0  ;;  %4377 = vmatpush3.bf16.msra.mxu0 %v4544_v53 }
 0x225   : > { %v1287_v63 = vadd.f32 %v1286_v46, %v5753_v27  ;;  %v1288_v62 = vpop.f32.mrb[138].mxu1  ;;  %v6019_v17 = vadd.f32 %v3951_v21, %v3950_v2  ;;  %v3953_v59 = vpop.f32.mrb[138].mxu0  ;;  %v4545_v21 = vld [vmem:[#allocation2 + $0x20] sm:$0xff]  }
 0x226   : > { %v1289_v7 = vadd.f32 %v1288_v62, %v5750_v23  ;;  %v1290_v5 = vpop.f32.mrb[139].mxu1  ;;  %v3954_v9 = vpop.f32.mrb[139].mxu0  ;;  %v1533_v15 = vmax.f32 %v1285_v16, 0.0  ;;  %4378 = vmatprep.subr.bf16.mxu0 %v4545_v21 }
 0x227   : > { %v1291_v33 = vadd.f32 %v1290_v5, %v5753_v27  ;;  %v6023_v47 = vadd.f32 %v3954_v9, %v3953_v59  ;;  %v1534_v26 = vmax.f32 %v1287_v63, 0.0  ;;  %v2244_v59 = vadd.f32 %v5930_v58, %v6044_v4 }
 0x228   : > { %v1541_v56 = vmax.f32 %v1289_v7, 0.0  ;;  %2794 = vmatmul.mubr.bf16.gmra.mrb[244].mxu1 %v5952_v14  ;;  %4379 = vmatpush3.bf16.msra.mxu0 %v4545_v21  ;;  %v2249_v58 = vadd.f32 %v5942_v41, %v6044_v4 }
 0x229   : > { %v1542_v12 = vmax.f32 %v1291_v33, 0.0  ;;  %2801 = vmatprep.mubr.bf16.mxu1 %v5970_v8  ;;  %v4546_v33 = vld [vmem:[#allocation2 + $0x28] sm:$0xff]  }
 0x22a   : > { %v6027_v0 = vpack.c.bf16 %v1541_v56, %v1533_v15  ;;  %4380 = vmatprep.subr.bf16.mxu0 %v4546_v33 }
 0x22b   : > { %v6029_v20 = vpack.c.bf16 %v1542_v12, %v1534_v26  ;;  %v1294_v11 = vpop.f32.mrb[140].mxu1  ;;  %v3956_v32 = vpop.f32.mrb[140].mxu0 }
 0x22c   : > { %v1295_v48 = vadd.f32 %v1294_v11, %v5750_v23  ;;  %v1296_v22 = vpop.f32.mrb[141].mxu1  ;;  %v3957_v54 = vpop.f32.mrb[141].mxu0  ;;  %4381 = vmatpush3.bf16.msra.mxu0 %v4546_v33 }
 0x22d   : > { %v1297_v55 = vadd.f32 %v1296_v22, %v5753_v27  ;;  %v1298_v1 = vpop.f32.mrb[142].mxu1  ;;  %v6033_v49 = vadd.f32 %v3957_v54, %v3956_v32  ;;  %v3959_v14 = vpop.f32.mrb[142].mxu0  ;;  %v4547_v22 = vld [vmem:[#allocation2 + $0x30] sm:$0xff]  }
 0x22e   : > { %v1299_v34 = vadd.f32 %v1298_v1, %v5750_v23  ;;  %v1300_v37 = vpop.f32.mrb[143].mxu1  ;;  %v3960_v8 = vpop.f32.mrb[143].mxu0  ;;  %v1549_v39 = vmax.f32 %v1295_v48, 0.0  ;;  %4382 = vmatprep.subr.bf16.mxu0 %v4547_v22 }
 0x22f   : > { %v1301_v42 = vadd.f32 %v1300_v37, %v5753_v27  ;;  %v6037_v30 = vadd.f32 %v3960_v8, %v3959_v14  ;;  %v1550_v24 = vmax.f32 %v1297_v55, 0.0  ;;  %v4548_v37 = vld [vmem:[#allocation2 + $0x38] sm:$0xff]  }
 0x230   : > { %v1557_v38 = vmax.f32 %v1299_v34, 0.0  ;;  %2802 = vmatmul.mubr.bf16.gmra.mrb[248].mxu1 %v5968_v45  ;;  %v2241_v45 = vadd.f32 %v5926_v36, %v6044_v4  ;;  %4383 = vmatpush3.bf16.msra.mxu0 %v4547_v22 }
 0x231   : > { %v1558_v18 = vmax.f32 %v1301_v42, 0.0  ;;  %2809 = vmatprep.mubr.bf16.mxu1 %v5986_v40  ;;  %4384 = vmatprep.subr.bf16.mxu0 %v4548_v37 }
 0x232   : > { %v6046_v23 = vpack.c.bf16 %v1557_v38, %v1549_v39 }
 0x233   : > { %v6048_v61 = vpack.c.bf16 %v1558_v18, %v1550_v24  ;;  %v4026_v27 = vpop.f32.mrb[144].mxu1  ;;  %v3962_v35 = vpop.f32.mrb[144].mxu0 }
 0x234   : > { %v4027_v25 = vpop.f32.mrb[145].mxu1  ;;  %v3963_v31 = vpop.f32.mrb[145].mxu0  ;;  %4385 = vmatpush3.bf16.msra.mxu0 %v4548_v37 }
 0x235   : > { %v4028_v40 = vadd.f32 %v4027_v25, %v4026_v27  ;;  %v4029_v2 = vpop.f32.mrb[146].mxu1  ;;  %v6052_v16 = vadd.f32 %v3963_v31, %v3962_v35  ;;  %v3965_v46 = vpop.f32.mrb[146].mxu0 }
 0x236   : > { %v4030_v63 = vpop.f32.mrb[147].mxu1  ;;  %v3966_v62 = vpop.f32.mrb[147].mxu0 }
 0x237   : > { %v6056_v7 = vadd.f32 %v4028_v40, %v2241_v45  ;;  %v4031_v5 = vadd.f32 %v4030_v63, %v4029_v2  ;;  %v6058_v9 = vadd.f32 %v3966_v62, %v3965_v46  ;;  %v2265_v63 = vadd.f32 %v5974_v44, %v6044_v4 }
 0x238   : > { %2810 = vmatmul.mubr.bf16.gmra.mrb[252].mxu1 %v5984_v13 }
 0x239   : > { %v6061_v36 = vadd.f32 %v4031_v5, %v2244_v59  ;;  %2817 = vmatprep.mubr.bf16.mxu1 %v6001_v19  ;;  %v2252_v19 = vadd.f32 %v5946_v3, %v6044_v4  ;;  %v2257_v3 = vadd.f32 %v5958_v10, %v6044_v4 }
 0x23b   : > { %v4032_v15 = vpop.f32.mrb[148].mxu1  ;;  %v3968_v56 = vpop.f32.mrb[148].mxu0 }
 0x23c   : > { %v4033_v26 = vpop.f32.mrb[149].mxu1  ;;  %v3969_v12 = vpop.f32.mrb[149].mxu0 }
 0x23d   : > { %v4034_v11 = vadd.f32 %v4033_v26, %v4032_v15  ;;  %v4035_v32 = vpop.f32.mrb[150].mxu1  ;;  %v6066_v48 = vadd.f32 %v3969_v12, %v3968_v56  ;;  %v3971_v13 = vpop.f32.mrb[150].mxu0 }
 0x23e   : > { %v4036_v54 = vpop.f32.mrb[151].mxu1  ;;  %v3972_v55 = vpop.f32.mrb[151].mxu0 }
 0x23f   : > { %v6070_v1 = vadd.f32 %v4034_v11, %v2249_v58  ;;  %v4037_v14 = vadd.f32 %v4036_v54, %v4035_v32  ;;  %v6072_v34 = vadd.f32 %v3972_v55, %v3971_v13  ;;  %v2273_v13 = vadd.f32 %v5990_v43, %v6044_v4 }
 0x240   : > { %2818 = vmatmul.mubr.bf16.gmra.mrb[0].mxu1 %v5999_v51 }
 0x241   : > { %v6075_v41 = vadd.f32 %v4037_v14, %v2252_v19  ;;  %2825 = vmatprep.mubr.bf16.mxu1 %v6015_v29  ;;  %v2260_v29 = vadd.f32 %v5962_v57, %v6044_v4 }
 0x243   : > { %v4038_v8 = vpop.f32.mrb[152].mxu1  ;;  %v3974_v42 = vpop.f32.mrb[152].mxu0 }
 0x244   : > { %v4039_v39 = vpop.f32.mrb[153].mxu1  ;;  %v3975_v38 = vpop.f32.mrb[153].mxu0 }
 0x245   : > { %v4040_v24 = vadd.f32 %v4039_v39, %v4038_v8  ;;  %v4041_v18 = vpop.f32.mrb[154].mxu1  ;;  %v6080_v53 = vadd.f32 %v3975_v38, %v3974_v42  ;;  %v3977_v51 = vpop.f32.mrb[154].mxu0 }
 0x246   : > { %v4042_v27 = vpop.f32.mrb[155].mxu1  ;;  %v3978_v35 = vpop.f32.mrb[155].mxu0 }
 0x247   : > { %v6084_v25 = vadd.f32 %v4040_v24, %v2257_v3  ;;  %v4043_v31 = vadd.f32 %v4042_v27, %v4041_v18  ;;  %v6086_v45 = vadd.f32 %v3978_v35, %v3977_v51  ;;  %v2281_v24 = vadd.f32 %v6005_v60, %v6044_v4 }
 0x248   : > { %2826 = vmatmul.mubr.bf16.gmra.mrb[4].mxu1 %v6013_v50  ;;  %v2268_v50 = vadd.f32 %v5978_v52, %v6044_v4 }
 0x249   : > { %v6089_v40 = vadd.f32 %v4043_v31, %v2260_v29  ;;  %2833 = vmatprep.mubr.bf16.mxu1 %v6029_v20  ;;  %v2284_v31 = vadd.f32 %v6009_v28, %v6044_v4 }
 0x24b   : > { %v4044_v10 = vpop.f32.mrb[156].mxu1  ;;  %v3980_v2 = vpop.f32.mrb[156].mxu0 }
 0x24c   : > { %v4045_v46 = vpop.f32.mrb[157].mxu1  ;;  %v3981_v21 = vpop.f32.mrb[157].mxu0 }
 0x24d   : > { %v4046_v62 = vadd.f32 %v4045_v46, %v4044_v10  ;;  %v4047_v57 = vpop.f32.mrb[158].mxu1  ;;  %v6094_v59 = vadd.f32 %v3981_v21, %v3980_v2  ;;  %v3983_v5 = vpop.f32.mrb[158].mxu0 }
 0x24e   : > { %v4048_v33 = vpop.f32.mrb[159].mxu1  ;;  %v3984_v15 = vpop.f32.mrb[159].mxu0 }
 0x24f   : > { %v6098_v56 = vadd.f32 %v4046_v62, %v2265_v63  ;;  %v4049_v20 = vadd.f32 %v4048_v33, %v4047_v57  ;;  %v6100_v26 = vadd.f32 %v3984_v15, %v3983_v5  ;;  %v2289_v57 = vadd.f32 %v6019_v17, %v6044_v4 }
 0x250   : > { %2834 = vmatmul.mubr.bf16.gmra.mrb[8].mxu1 %v6027_v0  ;;  %v2276_v0 = vadd.f32 %v5994_v6, %v6044_v4 }
 0x251   : > { %v6103_v12 = vadd.f32 %v4049_v20, %v2268_v50  ;;  %2841 = vmatprep.mubr.bf16.mxu1 %v6048_v61 }
 0x253   : > { %v3986_v44 = vpop.f32.mrb[160].mxu0  ;;  %v4050_v58 = vpop.f32.mrb[160].mxu1 }
 0x254   : > { %v3987_v11 = vpop.f32.mrb[161].mxu0  ;;  %v4051_v32 = vpop.f32.mrb[161].mxu1 }
 0x255   : > { %v6108_v22 = vadd.f32 %v3987_v11, %v3986_v44  ;;  %v4052_v52 = vadd.f32 %v4051_v32, %v4050_v58  ;;  %v3989_v54 = vpop.f32.mrb[162].mxu0  ;;  %v4053_v55 = vpop.f32.mrb[162].mxu1  ;;  %v2292_v44 = vadd.f32 %v6023_v47, %v6044_v4 }
 0x256   : > { %v3990_v19 = vpop.f32.mrb[163].mxu0  ;;  %v4054_v14 = vpop.f32.mrb[163].mxu1 }
 0x257   : > { %v6112_v37 = vadd.f32 %v4052_v52, %v2273_v13  ;;  %v6114_v61 = vadd.f32 %v3990_v19, %v3989_v54  ;;  %v4055_v8 = vadd.f32 %v4054_v14, %v4053_v55  ;;  %v2297_v19 = vadd.f32 %v6033_v49, %v6044_v4 }
 0x258   : > { %2842 = vmatmul.mubr.bf16.gmra.mrb[12].mxu1 %v6046_v23 }
 0x259   : > { %v6117_v42 = vadd.f32 %v4055_v8, %v2276_v0 }
 0x25b   : > { %v3992_v43 = vpop.f32.mrb[164].mxu0  ;;  %v4056_v39 = vpop.f32.mrb[164].mxu1 }
 0x25c   : > { %v3993_v38 = vpop.f32.mrb[165].mxu0  ;;  %v4057_v3 = vpop.f32.mrb[165].mxu1 }
 0x25d   : > { %v6121_v18 = vadd.f32 %v3993_v38, %v3992_v43  ;;  %v4058_v51 = vadd.f32 %v4057_v3, %v4056_v39  ;;  %v3995_v6 = vpop.f32.mrb[166].mxu0  ;;  %v4059_v27 = vpop.f32.mrb[166].mxu1  ;;  %v2300_v38 = vadd.f32 %v6037_v30, %v6044_v4  ;;  %v2308_v30 = vadd.f32 %v6058_v9, %v6044_v4 }
 0x25e   : > { %v3996_v35 = vpop.f32.mrb[167].mxu0  ;;  %v4060_v29 = vpop.f32.mrb[167].mxu1  ;;  %v2313_v9 = vadd.f32 %v6066_v48, %v6044_v4 }
 0x25f   : > { %v6125_v23 = vadd.f32 %v4058_v51, %v2281_v24  ;;  %v6127_v10 = vadd.f32 %v3996_v35, %v3995_v6  ;;  %v4061_v2 = vadd.f32 %v4060_v29, %v4059_v27 }
 0x261   : > { %v6129_v46 = vadd.f32 %v4061_v2, %v2284_v31  ;;  %v2305_v31 = vadd.f32 %v6052_v16, %v6044_v4 }
 0x263   : > { %v3998_v21 = vpop.f32.mrb[168].mxu0  ;;  %v4062_v63 = vpop.f32.mrb[168].mxu1 }
 0x264   : > { %v3999_v60 = vpop.f32.mrb[169].mxu0  ;;  %v4063_v62 = vpop.f32.mrb[169].mxu1 }
 0x265   : > { %v6133_v5 = vadd.f32 %v3999_v60, %v3998_v21  ;;  %v4064_v33 = vadd.f32 %v4063_v62, %v4062_v63  ;;  %v4001_v15 = vpop.f32.mrb[170].mxu0  ;;  %v4065_v50 = vpop.f32.mrb[170].mxu1 }
 0x266   : > { %v4002_v28 = vpop.f32.mrb[171].mxu0  ;;  %v4066_v20 = vpop.f32.mrb[171].mxu1 }
 0x267   : > { %v6137_v58 = vadd.f32 %v4064_v33, %v2289_v57  ;;  %v6139_v11 = vadd.f32 %v4002_v28, %v4001_v15  ;;  %v4067_v32 = vadd.f32 %v4066_v20, %v4065_v50 }
 0x269   : > { %v6141_v13 = vadd.f32 %v4067_v32, %v2292_v44 }
 0x26b   : > { %v4004_v52 = vpop.f32.mrb[172].mxu0  ;;  %v4068_v54 = vpop.f32.mrb[172].mxu1 }
 0x26c   : > { %v4005_v17 = vpop.f32.mrb[173].mxu0  ;;  %v4069_v55 = vpop.f32.mrb[173].mxu1 }
 0x26d   : > { %v6145_v14 = vadd.f32 %v4005_v17, %v4004_v52  ;;  %v4070_v0 = vadd.f32 %v4069_v55, %v4068_v54  ;;  %v4007_v8 = vpop.f32.mrb[174].mxu0  ;;  %v4071_v43 = vpop.f32.mrb[174].mxu1 }
 0x26e   : > { %v4008_v47 = vpop.f32.mrb[175].mxu0  ;;  %v4072_v39 = vpop.f32.mrb[175].mxu1 }
 0x26f   : > { %v6149_v3 = vadd.f32 %v4070_v0, %v2297_v19  ;;  %v6151_v24 = vadd.f32 %v4008_v47, %v4007_v8  ;;  %v4073_v51 = vadd.f32 %v4072_v39, %v4071_v43 }
 0x271   : > { %v6153_v6 = vadd.f32 %v4073_v51, %v2300_v38 }
 0x273   : > { %v4074_v27 = vpop.f32.mrb[176].mxu1  ;;  %v4138_v35 = vpop.f32.mrb[176].mxu0 }
 0x274   : > { %v4075_v49 = vpop.f32.mrb[177].mxu1  ;;  %v4139_v29 = vpop.f32.mrb[177].mxu0 }
 0x275   : > { %v4076_v2 = vadd.f32 %v4075_v49, %v4074_v27  ;;  %v4140_v21 = vadd.f32 %v4139_v29, %v4138_v35  ;;  %v4077_v63 = vpop.f32.mrb[178].mxu1  ;;  %v4141_v60 = vpop.f32.mrb[178].mxu0 }
 0x276   : > { %v4078_v62 = vpop.f32.mrb[179].mxu1  ;;  %v4142_v57 = vpop.f32.mrb[179].mxu0 }
 0x277   : > { %v6159_v33 = vadd.f32 %v4076_v2, %v2305_v31  ;;  %v6162_v15 = vadd.f32 %v4140_v21, %v6056_v7  ;;  %v4079_v50 = vadd.f32 %v4078_v62, %v4077_v63  ;;  %v4143_v28 = vadd.f32 %v4142_v57, %v4141_v60 }
 0x278   : > { %v2316_v7 = vadd.f32 %v6072_v34, %v6044_v4  ;;  %v2321_v34 = vadd.f32 %v6080_v53, %v6044_v4 }
 0x279   : > { %v6164_v20 = vadd.f32 %v4079_v50, %v2308_v30  ;;  %v6167_v16 = vadd.f32 %v4143_v28, %v6061_v36 }
 0x27b   : > { %v4080_v44 = vpop.f32.mrb[180].mxu1  ;;  %v4144_v32 = vpop.f32.mrb[180].mxu0 }
 0x27c   : > { %v4081_v52 = vpop.f32.mrb[181].mxu1  ;;  %v4145_v54 = vpop.f32.mrb[181].mxu0 }
 0x27d   : > { %v4082_v17 = vadd.f32 %v4081_v52, %v4080_v44  ;;  %v4146_v55 = vadd.f32 %v4145_v54, %v4144_v32  ;;  %v4083_v19 = vpop.f32.mrb[182].mxu1  ;;  %v4147_v0 = vpop.f32.mrb[182].mxu0 }
 0x27e   : > { %v4084_v8 = vpop.f32.mrb[183].mxu1  ;;  %v4148_v43 = vpop.f32.mrb[183].mxu0 }
 0x27f   : > { %v6173_v47 = vadd.f32 %v4082_v17, %v2313_v9  ;;  %v6176_v36 = vadd.f32 %v4146_v55, %v6070_v1  ;;  %v4085_v39 = vadd.f32 %v4084_v8, %v4083_v19  ;;  %v4149_v38 = vadd.f32 %v4148_v43, %v4147_v0 }
 0x280   : > { %v2324_v1 = vadd.f32 %v6086_v45, %v6044_v4  ;;  %v2329_v45 = vadd.f32 %v6094_v59, %v6044_v4 }
 0x281   : > { %v6178_v51 = vadd.f32 %v4085_v39, %v2316_v7  ;;  %v6181_v48 = vadd.f32 %v4149_v38, %v6075_v41 }
 0x283   : > { %v4086_v27 = vpop.f32.mrb[184].mxu1  ;;  %v4150_v35 = vpop.f32.mrb[184].mxu0 }
 0x284   : > { %v4087_v49 = vpop.f32.mrb[185].mxu1  ;;  %v4151_v29 = vpop.f32.mrb[185].mxu0 }
 0x285   : > { %v4088_v31 = vadd.f32 %v4087_v49, %v4086_v27  ;;  %v4152_v2 = vadd.f32 %v4151_v29, %v4150_v35  ;;  %v4089_v21 = vpop.f32.mrb[186].mxu1  ;;  %v4153_v63 = vpop.f32.mrb[186].mxu0 }
 0x286   : > { %v4090_v60 = vpop.f32.mrb[187].mxu1  ;;  %v4154_v30 = vpop.f32.mrb[187].mxu0 }
 0x287   : > { %v6187_v62 = vadd.f32 %v4088_v31, %v2321_v34  ;;  %v6190_v41 = vadd.f32 %v4152_v2, %v6084_v25  ;;  %v4091_v57 = vadd.f32 %v4090_v60, %v4089_v21  ;;  %v4155_v50 = vadd.f32 %v4154_v30, %v4153_v63 }
 0x288   : > { %v2332_v25 = vadd.f32 %v6100_v26, %v6044_v4  ;;  %v2337_v26 = vadd.f32 %v6108_v22, %v6044_v4 }
 0x289   : > { %v6192_v28 = vadd.f32 %v4091_v57, %v2324_v1  ;;  %v6195_v53 = vadd.f32 %v4155_v50, %v6089_v40 }
 0x28b   : > { %v4092_v44 = vpop.f32.mrb[188].mxu1  ;;  %v4156_v32 = vpop.f32.mrb[188].mxu0 }
 0x28c   : > { %v4093_v52 = vpop.f32.mrb[189].mxu1  ;;  %v4157_v54 = vpop.f32.mrb[189].mxu0 }
 0x28d   : > { %v4094_v9 = vadd.f32 %v4093_v52, %v4092_v44  ;;  %v4158_v17 = vadd.f32 %v4157_v54, %v4156_v32  ;;  %v4095_v55 = vpop.f32.mrb[190].mxu1  ;;  %v4159_v19 = vpop.f32.mrb[190].mxu0 }
 0x28e   : > { %v4096_v0 = vpop.f32.mrb[191].mxu1  ;;  %v4160_v7 = vpop.f32.mrb[191].mxu0 }
 0x28f   : > { %v6201_v8 = vadd.f32 %v4094_v9, %v2329_v45  ;;  %v6204_v40 = vadd.f32 %v4158_v17, %v6098_v56  ;;  %v4097_v43 = vadd.f32 %v4096_v0, %v4095_v55  ;;  %v4161_v39 = vadd.f32 %v4160_v7, %v4159_v19 }
 0x290   : > { %v2340_v56 = vadd.f32 %v6114_v61, %v6044_v4  ;;  %v2345_v61 = vadd.f32 %v6121_v18, %v6044_v4 }
 0x291   : > { %v6206_v38 = vadd.f32 %v4097_v43, %v2332_v25  ;;  %v6209_v59 = vadd.f32 %v4161_v39, %v6103_v12 }
 0x293   : > { %v4098_v27 = vpop.f32.mrb[192].mxu1  ;;  %v4162_v35 = vpop.f32.mrb[192].mxu0 }
 0x294   : > { %v4099_v49 = vpop.f32.mrb[193].mxu1  ;;  %v4163_v29 = vpop.f32.mrb[193].mxu0 }
 0x295   : > { %v4100_v34 = vadd.f32 %v4099_v49, %v4098_v27  ;;  %v4164_v31 = vadd.f32 %v4163_v29, %v4162_v35  ;;  %v4101_v2 = vpop.f32.mrb[194].mxu1  ;;  %v4165_v21 = vpop.f32.mrb[194].mxu0 }
 0x296   : > { %v4102_v63 = vpop.f32.mrb[195].mxu1  ;;  %v4166_v1 = vpop.f32.mrb[195].mxu0 }
 0x297   : > { %v6215_v60 = vadd.f32 %v4100_v34, %v2337_v26  ;;  %v6218_v12 = vadd.f32 %v4164_v31, %v6112_v37  ;;  %v4103_v30 = vadd.f32 %v4102_v63, %v4101_v2  ;;  %v4167_v57 = vadd.f32 %v4166_v1, %v4165_v21 }
 0x298   : > { %v2348_v37 = vadd.f32 %v6127_v10, %v6044_v4  ;;  %v2353_v10 = vadd.f32 %v6133_v5, %v6044_v4 }
 0x299   : > { %v6220_v50 = vadd.f32 %v4103_v30, %v2340_v56  ;;  %v6223_v22 = vadd.f32 %v4167_v57, %v6117_v42 }
 0x29b   : > { %v4104_v44 = vpop.f32.mrb[196].mxu1  ;;  %v4168_v32 = vpop.f32.mrb[196].mxu0 }
 0x29c   : > { %v4105_v52 = vpop.f32.mrb[197].mxu1  ;;  %v4169_v54 = vpop.f32.mrb[197].mxu0 }
 0x29d   : > { %v4106_v45 = vadd.f32 %v4105_v52, %v4104_v44  ;;  %v4170_v9 = vadd.f32 %v4169_v54, %v4168_v32  ;;  %v4107_v17 = vpop.f32.mrb[198].mxu1  ;;  %v4171_v55 = vpop.f32.mrb[198].mxu0 }
 0x29e   : > { %v4108_v19 = vpop.f32.mrb[199].mxu1  ;;  %v4172_v25 = vpop.f32.mrb[199].mxu0 }
 0x29f   : > { %v6229_v0 = vadd.f32 %v4106_v45, %v2345_v61  ;;  %v6232_v42 = vadd.f32 %v4170_v9, %v6125_v23  ;;  %v4109_v7 = vadd.f32 %v4108_v19, %v4107_v17  ;;  %v4173_v43 = vadd.f32 %v4172_v25, %v4171_v55 }
 0x2a0   : > { %v2356_v23 = vadd.f32 %v6139_v11, %v6044_v4  ;;  %v2361_v11 = vadd.f32 %v6145_v14, %v6044_v4 }
 0x2a1   : > { %v6234_v39 = vadd.f32 %v4109_v7, %v2348_v37  ;;  %v6237_v18 = vadd.f32 %v4173_v43, %v6129_v46 }
 0x2a3   : > { %v4110_v27 = vpop.f32.mrb[200].mxu1  ;;  %v4174_v35 = vpop.f32.mrb[200].mxu0 }
 0x2a4   : > { %v4111_v49 = vpop.f32.mrb[201].mxu1  ;;  %v4175_v29 = vpop.f32.mrb[201].mxu0 }
 0x2a5   : > { %v4112_v26 = vadd.f32 %v4111_v49, %v4110_v27  ;;  %v4176_v34 = vadd.f32 %v4175_v29, %v4174_v35  ;;  %v4113_v31 = vpop.f32.mrb[202].mxu1  ;;  %v4177_v2 = vpop.f32.mrb[202].mxu0 }
 0x2a6   : > { %v4114_v21 = vpop.f32.mrb[203].mxu1  ;;  %v4178_v56 = vpop.f32.mrb[203].mxu0 }
 0x2a7   : > { %v6243_v63 = vadd.f32 %v4112_v26, %v2353_v10  ;;  %v6246_v46 = vadd.f32 %v4176_v34, %v6137_v58  ;;  %v4115_v1 = vadd.f32 %v4114_v21, %v4113_v31  ;;  %v4179_v30 = vadd.f32 %v4178_v56, %v4177_v2 }
 0x2a8   : > { %v2364_v58 = vadd.f32 %v6151_v24, %v6044_v4 }
 0x2a9   : > { %v6248_v57 = vadd.f32 %v4115_v1, %v2356_v23  ;;  %v6251_v5 = vadd.f32 %v4179_v30, %v6141_v13 }
 0x2ab   : > { %v4116_v44 = vpop.f32.mrb[204].mxu1  ;;  %v4180_v32 = vpop.f32.mrb[204].mxu0 }
 0x2ac   : > { %v4117_v52 = vpop.f32.mrb[205].mxu1  ;;  %v4181_v54 = vpop.f32.mrb[205].mxu0 }
 0x2ad   : > { %v4118_v61 = vadd.f32 %v4117_v52, %v4116_v44  ;;  %v4182_v45 = vadd.f32 %v4181_v54, %v4180_v32  ;;  %v4119_v9 = vpop.f32.mrb[206].mxu1  ;;  %v4183_v17 = vpop.f32.mrb[206].mxu0 }
 0x2ae   : > { %v4120_v55 = vpop.f32.mrb[207].mxu1  ;;  %v4184_v37 = vpop.f32.mrb[207].mxu0 }
 0x2af   : > { %v6257_v19 = vadd.f32 %v4118_v61, %v2361_v11  ;;  %v6260_v13 = vadd.f32 %v4182_v45, %v6149_v3  ;;  %v4121_v25 = vadd.f32 %v4120_v55, %v4119_v9  ;;  %v4185_v7 = vadd.f32 %v4184_v37, %v4183_v17 }
 0x2b1   : > { %v6262_v43 = vadd.f32 %v4121_v25, %v2364_v58  ;;  %v6265_v14 = vadd.f32 %v4185_v7, %v6153_v6 }
 0x2b3   : > { %v4186_v27 = vpop.f32.mrb[208].mxu0  ;;  %v4250_v35 = vpop.f32.mrb[208].mxu1 }
 0x2b4   : > { %v4187_v49 = vpop.f32.mrb[209].mxu0  ;;  %v4251_v29 = vpop.f32.mrb[209].mxu1 }
 0x2b5   : > { %v4188_v10 = vadd.f32 %v4187_v49, %v4186_v27  ;;  %v4252_v4 = vadd.f32 %v4251_v29, %v4250_v35  ;;  %v4189_v24 = vpop.f32.mrb[210].mxu0  ;;  %v4253_v26 = vpop.f32.mrb[210].mxu1 }
 0x2b6   : > { %v4190_v34 = vpop.f32.mrb[211].mxu0  ;;  %v4254_v31 = vpop.f32.mrb[211].mxu1 }
 0x2b7   : > { %v6268_v3 = vadd.f32 %v4188_v10, %v6159_v33  ;;  %v2724_v2 = vadd.f32 %v4252_v4, %v6162_v15  ;;  %v4191_v23 = vadd.f32 %v4190_v34, %v4189_v24  ;;  %v4255_v21 = vadd.f32 %v4254_v31, %v4253_v26 }
 0x2b9   : > { %v6272_v6 = vadd.f32 %v4191_v23, %v6164_v20  ;;  %v2727_v56 = vadd.f32 %v4255_v21, %v6167_v16  ;;  %v2850_v1 = vmax.f32 %v2724_v2, 0.0 }
 0x2bb   : > { %v2851_v30 = vmax.f32 %v2727_v56, 0.0  ;;  %v4192_v44 = vpop.f32.mrb[212].mxu0  ;;  %v4256_v32 = vpop.f32.mrb[212].mxu1 }
 0x2bc   : > { %v4193_v52 = vpop.f32.mrb[213].mxu0  ;;  %v4257_v54 = vpop.f32.mrb[213].mxu1 }
 0x2bd   : > { %v4194_v11 = vadd.f32 %v4193_v52, %v4192_v44  ;;  %v4258_v61 = vadd.f32 %v4257_v54, %v4256_v32  ;;  %v4195_v45 = vpop.f32.mrb[214].mxu0  ;;  %v4259_v33 = vpop.f32.mrb[214].mxu1  ;;  %v2882_v9 = vpack.c.bf16 %v2851_v30, %v2850_v1 }
 0x2be   : > { %v4196_v17 = vpop.f32.mrb[215].mxu0  ;;  %v4260_v15 = vpop.f32.mrb[215].mxu1 }
 0x2bf   : > { %v6276_v58 = vadd.f32 %v4194_v11, %v6173_v47  ;;  %v2732_v20 = vadd.f32 %v4258_v61, %v6176_v36  ;;  %v4197_v55 = vadd.f32 %v4196_v17, %v4195_v45  ;;  %v4261_v16 = vadd.f32 %v4260_v15, %v4259_v33  ;;  %4386 = vmatprep.mubr.bf16.mxu0 %v2882_v9 }
 0x2c1   : > { %v6280_v37 = vadd.f32 %v4197_v55, %v6178_v51  ;;  %v2735_v25 = vadd.f32 %v4261_v16, %v6181_v48  ;;  %v2852_v7 = vmax.f32 %v2732_v20, 0.0 }
 0x2c3   : > { %v2853_v27 = vmax.f32 %v2735_v25, 0.0  ;;  %v4198_v35 = vpop.f32.mrb[216].mxu0  ;;  %v4262_v49 = vpop.f32.mrb[216].mxu1 }
 0x2c4   : > { %v4199_v29 = vpop.f32.mrb[217].mxu0  ;;  %v4263_v10 = vpop.f32.mrb[217].mxu1 }
 0x2c5   : > { %v2883_v4 = vpack.c.bf16 %v2853_v27, %v2852_v7  ;;  %v4200_v24 = vadd.f32 %v4199_v29, %v4198_v35  ;;  %v4264_v47 = vadd.f32 %v4263_v10, %v4262_v49  ;;  %v4201_v26 = vpop.f32.mrb[218].mxu0  ;;  %v4265_v34 = vpop.f32.mrb[218].mxu1 }
 0x2c6   : > { %v4202_v36 = vpop.f32.mrb[219].mxu0  ;;  %v4266_v31 = vpop.f32.mrb[219].mxu1 }
 0x2c7   : > { %v6284_v2 = vadd.f32 %v4200_v24, %v6187_v62  ;;  %v2740_v51 = vadd.f32 %v4264_v47, %v6190_v41  ;;  %v4203_v23 = vadd.f32 %v4202_v36, %v4201_v26  ;;  %v4267_v48 = vadd.f32 %v4266_v31, %v4265_v34  ;;  %4387 = vmatmul.mubr.bf16.vlgmr.msra.gmra.mrb[240].mxu0 %v2883_v4 }
 0x2c9   : > { %v6288_v21 = vadd.f32 %v4203_v23, %v6192_v28  ;;  %v2743_v56 = vadd.f32 %v4267_v48, %v6195_v53  ;;  %v2854_v1 = vmax.f32 %v2740_v51, 0.0 }
 0x2cb   : > { %v2855_v30 = vmax.f32 %v2743_v56, 0.0  ;;  %v4204_v44 = vpop.f32.mrb[220].mxu0  ;;  %v4268_v32 = vpop.f32.mrb[220].mxu1 }
 0x2cc   : > { %v4205_v52 = vpop.f32.mrb[221].mxu0  ;;  %v4269_v54 = vpop.f32.mrb[221].mxu1 }
 0x2cd   : > { %v4206_v11 = vadd.f32 %v4205_v52, %v4204_v44  ;;  %v4270_v61 = vadd.f32 %v4269_v54, %v4268_v32  ;;  %v4207_v62 = vpop.f32.mrb[222].mxu0  ;;  %v4271_v45 = vpop.f32.mrb[222].mxu1  ;;  %v2884_v33 = vpack.c.bf16 %v2855_v30, %v2854_v1 }
 0x2ce   : > { %v4208_v41 = vpop.f32.mrb[223].mxu0  ;;  %v4272_v9 = vpop.f32.mrb[223].mxu1 }
 0x2cf   : > { %v6292_v17 = vadd.f32 %v4206_v11, %v6201_v8  ;;  %v2748_v28 = vadd.f32 %v4270_v61, %v6204_v40  ;;  %v4209_v15 = vadd.f32 %v4208_v41, %v4207_v62  ;;  %v4273_v53 = vadd.f32 %v4272_v9, %v4271_v45  ;;  %4390 = vmatprep.mubr.bf16.mxu0 %v2884_v33 }
 0x2d1   : > { %v6296_v20 = vadd.f32 %v4209_v15, %v6206_v38  ;;  %v2751_v55 = vadd.f32 %v4273_v53, %v6209_v59  ;;  %v2856_v16 = vmax.f32 %v2748_v28, 0.0 }
 0x2d3   : > { %v2857_v25 = vmax.f32 %v2751_v55, 0.0  ;;  %v4210_v7 = vpop.f32.mrb[224].mxu0  ;;  %v4274_v27 = vpop.f32.mrb[224].mxu1 }
 0x2d4   : > { %v4211_v35 = vpop.f32.mrb[225].mxu0  ;;  %v4275_v49 = vpop.f32.mrb[225].mxu1 }
 0x2d5   : > { %v4212_v29 = vadd.f32 %v4211_v35, %v4210_v7  ;;  %v4276_v10 = vadd.f32 %v4275_v49, %v4274_v27  ;;  %v4213_v8 = vpop.f32.mrb[226].mxu0  ;;  %v4277_v4 = vpop.f32.mrb[226].mxu1  ;;  %v2885_v24 = vpack.c.bf16 %v2857_v25, %v2856_v16 }
 0x2d6   : > { %v4214_v40 = vpop.f32.mrb[227].mxu0  ;;  %v4278_v47 = vpop.f32.mrb[227].mxu1 }
 0x2d7   : > { %v6300_v26 = vadd.f32 %v4212_v29, %v6215_v60  ;;  %v2756_v38 = vadd.f32 %v4276_v10, %v6218_v12  ;;  %v4215_v34 = vadd.f32 %v4214_v40, %v4213_v8  ;;  %v4279_v59 = vadd.f32 %v4278_v47, %v4277_v4  ;;  %4391 = vmatmul.mubr.bf16.gmra.mrb[244].mxu0 %v2885_v24 }
 0x2d9   : > { %v6304_v36 = vadd.f32 %v4215_v34, %v6220_v50  ;;  %v2759_v31 = vadd.f32 %v4279_v59, %v6223_v22  ;;  %v2858_v51 = vmax.f32 %v2756_v38, 0.0 }
 0x2db   : > { %v2859_v23 = vmax.f32 %v2759_v31, 0.0  ;;  %v4216_v48 = vpop.f32.mrb[228].mxu0  ;;  %v4280_v56 = vpop.f32.mrb[228].mxu1 }
 0x2dc   : > { %v4217_v1 = vpop.f32.mrb[229].mxu0  ;;  %v4281_v30 = vpop.f32.mrb[229].mxu1 }
 0x2dd   : > { %v4218_v44 = vadd.f32 %v4217_v1, %v4216_v48  ;;  %v4282_v32 = vadd.f32 %v4281_v30, %v4280_v56  ;;  %v4219_v60 = vpop.f32.mrb[230].mxu0  ;;  %v4283_v52 = vpop.f32.mrb[230].mxu1  ;;  %v2886_v54 = vpack.c.bf16 %v2859_v23, %v2858_v51 }
 0x2de   : > { %v4220_v12 = vpop.f32.mrb[231].mxu0  ;;  %v4284_v11 = vpop.f32.mrb[231].mxu1 }
 0x2df   : > { %v6308_v61 = vadd.f32 %v4218_v44, %v6229_v0  ;;  %v2764_v50 = vadd.f32 %v4282_v32, %v6232_v42  ;;  %v4221_v62 = vadd.f32 %v4220_v12, %v4219_v60  ;;  %v4285_v22 = vadd.f32 %v4284_v11, %v4283_v52  ;;  %4394 = vmatprep.mubr.bf16.mxu0 %v2886_v54 }
 0x2e1   : > { %v6312_v45 = vadd.f32 %v4221_v62, %v6234_v39  ;;  %v2767_v33 = vadd.f32 %v4285_v22, %v6237_v18  ;;  %v2860_v41 = vmax.f32 %v2764_v50, 0.0 }
 0x2e3   : > { %v2861_v9 = vmax.f32 %v2767_v33, 0.0  ;;  %v4222_v28 = vpop.f32.mrb[232].mxu0  ;;  %v4286_v15 = vpop.f32.mrb[232].mxu1 }
 0x2e4   : > { %v4223_v53 = vpop.f32.mrb[233].mxu0  ;;  %v4287_v55 = vpop.f32.mrb[233].mxu1 }
 0x2e5   : > { %v4224_v16 = vadd.f32 %v4223_v53, %v4222_v28  ;;  %v4288_v25 = vadd.f32 %v4287_v55, %v4286_v15  ;;  %v4225_v0 = vpop.f32.mrb[234].mxu0  ;;  %v4289_v7 = vpop.f32.mrb[234].mxu1  ;;  %v2887_v27 = vpack.c.bf16 %v2861_v9, %v2860_v41 }
 0x2e6   : > { %v4226_v42 = vpop.f32.mrb[235].mxu0  ;;  %v4290_v35 = vpop.f32.mrb[235].mxu1 }
 0x2e7   : > { %v6316_v49 = vadd.f32 %v4224_v16, %v6243_v63  ;;  %v2772_v39 = vadd.f32 %v4288_v25, %v6246_v46  ;;  %v4227_v29 = vadd.f32 %v4226_v42, %v4225_v0  ;;  %v4291_v18 = vadd.f32 %v4290_v35, %v4289_v7  ;;  %4395 = vmatmul.mubr.bf16.gmra.mrb[248].mxu0 %v2887_v27 }
 0x2e9   : > { %v6320_v10 = vadd.f32 %v4227_v29, %v6248_v57  ;;  %v2775_v8 = vadd.f32 %v4291_v18, %v6251_v5  ;;  %v2862_v4 = vmax.f32 %v2772_v39, 0.0 }
 0x2eb   : > { %v2863_v24 = vmax.f32 %v2775_v8, 0.0  ;;  %v4228_v40 = vpop.f32.mrb[236].mxu0  ;;  %v4292_v47 = vpop.f32.mrb[236].mxu1 }
 0x2ec   : > { %v4229_v38 = vpop.f32.mrb[237].mxu0  ;;  %v4293_v34 = vpop.f32.mrb[237].mxu1 }
 0x2ed   : > { %v4230_v59 = vadd.f32 %v4229_v38, %v4228_v40  ;;  %v4294_v31 = vadd.f32 %v4293_v34, %v4292_v47  ;;  %v4231_v63 = vpop.f32.mrb[238].mxu0  ;;  %v4295_v51 = vpop.f32.mrb[238].mxu1  ;;  %v2888_v23 = vpack.c.bf16 %v2863_v24, %v2862_v4 }
 0x2ee   : > { %v4232_v46 = vpop.f32.mrb[239].mxu0  ;;  %v4296_v48 = vpop.f32.mrb[239].mxu1 }
 0x2ef   : > { %v6324_v56 = vadd.f32 %v4230_v59, %v6257_v19  ;;  %v2780_v57 = vadd.f32 %v4294_v31, %v6260_v13  ;;  %v4233_v1 = vadd.f32 %v4232_v46, %v4231_v63  ;;  %v4297_v5 = vadd.f32 %v4296_v48, %v4295_v51  ;;  %4398 = vmatprep.mubr.bf16.mxu0 %v2888_v23 }
 0x2f1   : > { %v6328_v30 = vadd.f32 %v4233_v1, %v6262_v43  ;;  %v2783_v44 = vadd.f32 %v4297_v5, %v6265_v14  ;;  %v2864_v32 = vmax.f32 %v2780_v57, 0.0 }
 0x2f3   : > { %v2865_v60 = vmax.f32 %v2783_v44, 0.0  ;;  %v4298_v52 = vpop.f32.mrb[240].mxu1 }
 0x2f4   : > { %v4299_v54 = vpop.f32.mrb[241].mxu1 }
 0x2f5   : > { %v4300_v12 = vadd.f32 %v4299_v54, %v4298_v52  ;;  %v4301_v11 = vpop.f32.mrb[242].mxu1  ;;  %v2889_v50 = vpack.c.bf16 %v2865_v60, %v2864_v32 }
 0x2f6   : > { %v4302_v62 = vpop.f32.mrb[243].mxu1 }
 0x2f7   : > { %v2788_v19 = vadd.f32 %v4300_v12, %v6268_v3  ;;  %v4303_v22 = vadd.f32 %v4302_v62, %v4301_v11  ;;  %4399 = vmatmul.mubr.bf16.gmra.mrb[252].mxu0 %v2889_v50 }
 0x2f9   : > { %v2791_v13 = vadd.f32 %v4303_v22, %v6272_v6  ;;  %v2866_v33 = vmax.f32 %v2788_v19, 0.0 }
 0x2fb   : > { %v2867_v41 = vmax.f32 %v2791_v13, 0.0  ;;  %v4304_v43 = vpop.f32.mrb[244].mxu1 }
 0x2fc   : > { %v4305_v9 = vpop.f32.mrb[245].mxu1 }
 0x2fd   : > { %v4306_v28 = vadd.f32 %v4305_v9, %v4304_v43  ;;  %v4307_v14 = vpop.f32.mrb[246].mxu1  ;;  %v2890_v15 = vpack.c.bf16 %v2867_v41, %v2866_v33 }
 0x2fe   : > { %v4308_v53 = vpop.f32.mrb[247].mxu1 }
 0x2ff   : > { %v2796_v55 = vadd.f32 %v4306_v28, %v6276_v58  ;;  %v4309_v16 = vadd.f32 %v4308_v53, %v4307_v14  ;;  %4402 = vmatprep.mubr.bf16.mxu0 %v2890_v15 }
 0x301   : > { %v2799_v25 = vadd.f32 %v4309_v16, %v6280_v37  ;;  %v2868_v0 = vmax.f32 %v2796_v55, 0.0 }
 0x303   : > { %v2869_v3 = vmax.f32 %v2799_v25, 0.0  ;;  %v4310_v7 = vpop.f32.mrb[248].mxu1 }
 0x304   : > { %v4311_v27 = vpop.f32.mrb[249].mxu1 }
 0x305   : > { %v2891_v42 = vpack.c.bf16 %v2869_v3, %v2868_v0  ;;  %v4312_v6 = vadd.f32 %v4311_v27, %v4310_v7  ;;  %v4313_v35 = vpop.f32.mrb[250].mxu1 }
 0x306   : > { %v4314_v39 = vpop.f32.mrb[251].mxu1 }
 0x307   : > { %v2804_v29 = vadd.f32 %v4312_v6, %v6284_v2  ;;  %v4315_v18 = vadd.f32 %v4314_v39, %v4313_v35  ;;  %4403 = vmatmul.mubr.bf16.gmra.mrb[0].mxu0 %v2891_v42 }
 0x309   : > { %v2807_v8 = vadd.f32 %v4315_v18, %v6288_v21  ;;  %v2870_v4 = vmax.f32 %v2804_v29, 0.0 }
 0x30b   : > { %v2871_v58 = vmax.f32 %v2807_v8, 0.0  ;;  %v4316_v24 = vpop.f32.mrb[252].mxu1 }
 0x30c   : > { %v4317_v40 = vpop.f32.mrb[253].mxu1 }
 0x30d   : > { %v4318_v47 = vadd.f32 %v4317_v40, %v4316_v24  ;;  %v4319_v37 = vpop.f32.mrb[254].mxu1  ;;  %v2892_v38 = vpack.c.bf16 %v2871_v58, %v2870_v4 }
 0x30e   : > { %v4320_v34 = vpop.f32.mrb[255].mxu1 }
 0x30f   : > { %v2812_v59 = vadd.f32 %v4318_v47, %v6292_v17  ;;  %v4321_v31 = vadd.f32 %v4320_v34, %v4319_v37  ;;  %4406 = vmatprep.mubr.bf16.mxu0 %v2892_v38 }
 0x311   : > { %v2815_v63 = vadd.f32 %v4321_v31, %v6296_v20  ;;  %v2872_v51 = vmax.f32 %v2812_v59, 0.0 }
 0x313   : > { %v2873_v2 = vmax.f32 %v2815_v63, 0.0  ;;  %v4322_v23 = vpop.f32.mrb[0].mxu1 }
 0x314   : > { %v4323_v46 = vpop.f32.mrb[1].mxu1 }
 0x315   : > { %v2893_v48 = vpack.c.bf16 %v2873_v2, %v2872_v51  ;;  %v4324_v21 = vadd.f32 %v4323_v46, %v4322_v23  ;;  %v4325_v57 = vpop.f32.mrb[2].mxu1 }
 0x316   : > { %v4326_v1 = vpop.f32.mrb[3].mxu1 }
 0x317   : > { %v2820_v5 = vadd.f32 %v4324_v21, %v6300_v26  ;;  %v4327_v44 = vadd.f32 %v4326_v1, %v4325_v57  ;;  %4407 = vmatmul.mubr.bf16.gmra.mrb[4].mxu0 %v2893_v48 }
 0x319   : > { %v2823_v32 = vadd.f32 %v4327_v44, %v6304_v36  ;;  %v2874_v60 = vmax.f32 %v2820_v5, 0.0 }
 0x31b   : > { %v2875_v17 = vmax.f32 %v2823_v32, 0.0  ;;  %v4328_v52 = vpop.f32.mrb[4].mxu1 }
 0x31c   : > { %v4329_v54 = vpop.f32.mrb[5].mxu1 }
 0x31d   : > { %v4330_v12 = vadd.f32 %v4329_v54, %v4328_v52  ;;  %v4331_v20 = vpop.f32.mrb[6].mxu1  ;;  %v2894_v11 = vpack.c.bf16 %v2875_v17, %v2874_v60 }
 0x31e   : > { %v4332_v50 = vpop.f32.mrb[7].mxu1 }
 0x31f   : > { %v2828_v62 = vadd.f32 %v4330_v12, %v6308_v61  ;;  %v4333_v19 = vadd.f32 %v4332_v50, %v4331_v20  ;;  %4410 = vmatprep.mubr.bf16.mxu0 %v2894_v11 }
 0x321   : > { %v2831_v22 = vadd.f32 %v4333_v19, %v6312_v45  ;;  %v2876_v13 = vmax.f32 %v2828_v62, 0.0 }
 0x323   : > { %v2877_v26 = vmax.f32 %v2831_v22, 0.0  ;;  %v4334_v33 = vpop.f32.mrb[8].mxu1 }
 0x324   : > { %v4335_v41 = vpop.f32.mrb[9].mxu1 }
 0x325   : > { %v2895_v43 = vpack.c.bf16 %v2877_v26, %v2876_v13  ;;  %v4336_v36 = vadd.f32 %v4335_v41, %v4334_v33  ;;  %v4337_v9 = vpop.f32.mrb[10].mxu1 }
 0x326   : > { %v4338_v28 = vpop.f32.mrb[11].mxu1 }
 0x327   : > { %v2836_v14 = vadd.f32 %v4336_v36, %v6316_v49  ;;  %v4339_v15 = vadd.f32 %v4338_v28, %v4337_v9  ;;  %4411 = vmatmul.mubr.bf16.gmra.mrb[8].mxu0 %v2895_v43 }
 0x329   : > { %v2839_v53 = vadd.f32 %v4339_v15, %v6320_v10  ;;  %v2878_v55 = vmax.f32 %v2836_v14, 0.0  ;;  %v6350_v10 = vld [vmem:[%s6463_s6] ss:$0 sm:$0xff] }
 0x32b   : > { %v2879_v61 = vmax.f32 %v2839_v53, 0.0  ;;  %v4340_v16 = vpop.f32.mrb[12].mxu1 }
 0x32c   : > { %v4341_v25 = vpop.f32.mrb[13].mxu1 }
 0x32d   : > { %v4342_v0 = vadd.f32 %v4341_v25, %v4340_v16  ;;  %v4343_v45 = vpop.f32.mrb[14].mxu1  ;;  %v2896_v3 = vpack.c.bf16 %v2879_v61, %v2878_v55 }
 0x32e   : > { %v4344_v7 = vpop.f32.mrb[15].mxu1 }
 0x32f   : > { %v2844_v27 = vadd.f32 %v4342_v0, %v6324_v56  ;;  %v4345_v42 = vadd.f32 %v4344_v7, %v4343_v45  ;;  %4414 = vmatprep.mubr.bf16.mxu0 %v2896_v3 }
 0x331   : > { %v2847_v6 = vadd.f32 %v4345_v42, %v6328_v30  ;;  %v2880_v35 = vmax.f32 %v2844_v27, 0.0 }
 0x333   : > { %v2881_v49 = vmax.f32 %v2847_v6, 0.0 }
 0x335   : > { %v2897_v39 = vpack.c.bf16 %v2881_v49, %v2880_v35 }
 0x337   : > { %4415 = vmatmul.mubr.bf16.gmra.mrb[12].mxu0 %v2897_v39 }
 0x39a   : > { %v4388_v29 = vpop.f32.mrb[240].mxu0 }
 0x39b   : > { %v3012_v18 = vadd.f32 %v4388_v29, %v6350_v10  ;;  %v3003_v8 = vpop.f32.mrb[241].mxu0 }
 0x39c   : > { %v3004_v4 = vadd.f32 %v6350_v10, %v3003_v8  ;;  %v4389_v56 = vpop.f32.mrb[242].mxu0 }
 0x39d   : > { %v3132_v58 = vsub.f32 0.0, %v3012_v18  ;;  %v3015_v24 = vadd.f32 %v4389_v56, %v6350_v10  ;;  %v3006_v30 = vpop.f32.mrb[243].mxu0 }
 0x39e   : > { %v3130_v40 = vsub.f32 0.0, %v3004_v4  ;;  %v3007_v47 = vadd.f32 %v6350_v10, %v3006_v30 }
 0x39f   : > { %v3166_v37 = vmul.f32 1.442695, %v3132_v58  ;;  %v3133_v38 = vsub.f32 0.0, %v3015_v24 }
 0x3a0   : > { %v3162_v34 = vmul.f32 1.442695, %v3130_v40  ;;  %v3131_v59 = vsub.f32 0.0, %v3007_v47 }
 0x3a1   : > { %4549 = vpow2.f32 %v3166_v37  ;;  %v3168_v31 = vmul.f32 1.442695, %v3133_v38 }
 0x3a2   : > { %4551 = vpow2.f32 %v3162_v34  ;;  %v3164_v63 = vmul.f32 1.442695, %v3131_v59 }
 0x3a3   : > { %4553 = vpow2.f32 %v3168_v31 }
 0x3a4   : > { %4555 = vpow2.f32 %v3164_v63 }
 0x3aa   : > { %v4392_v51 = vpop.f32.mrb[244].mxu0 }
 0x3ab   : > { %v4550_v2 = vpop.eup %4549  ;;  %v3028_v23 = vadd.f32 %v4392_v51, %v6350_v10  ;;  %v3019_v46 = vpop.f32.mrb[245].mxu0 }
 0x3ac   : > { %v4552_v48 = vpop.eup %4551  ;;  %v3228_v21 = vadd.f32 1.0, %v4550_v2  ;;  %v3020_v57 = vadd.f32 %v6350_v10, %v3019_v46  ;;  %v4393_v1 = vpop.f32.mrb[246].mxu0 }
 0x3ad   : > { %v4554_v5 = vpop.eup %4553  ;;  %v3226_v44 = vadd.f32 1.0, %v4552_v48  ;;  %v3136_v32 = vsub.f32 0.0, %v3028_v23  ;;  %v3031_v60 = vadd.f32 %v4393_v1, %v6350_v10  ;;  %v3022_v17 = vpop.f32.mrb[247].mxu0 }
 0x3ae   : > { %v4556_v52 = vpop.eup %4555  ;;  %4557 = vrcp.f32 %v3228_v21  ;;  %v3229_v54 = vadd.f32 1.0, %v4554_v5  ;;  %v3134_v12 = vsub.f32 0.0, %v3020_v57  ;;  %v3023_v20 = vadd.f32 %v6350_v10, %v3022_v17 }
 0x3af   : > { %4559 = vrcp.f32 %v3226_v44  ;;  %v3227_v11 = vadd.f32 1.0, %v4556_v52  ;;  %v3174_v50 = vmul.f32 1.442695, %v3136_v32  ;;  %v3137_v62 = vsub.f32 0.0, %v3031_v60 }
 0x3b0   : > { %4561 = vrcp.f32 %v3229_v54  ;;  %v3170_v19 = vmul.f32 1.442695, %v3134_v12  ;;  %v3135_v22 = vsub.f32 0.0, %v3023_v20 }
 0x3b1   : > { %4563 = vrcp.f32 %v3227_v11  ;;  %v3176_v13 = vmul.f32 1.442695, %v3137_v62 }
 0x3b2   : > { %4565 = vpow2.f32 %v3174_v50  ;;  %v3172_v26 = vmul.f32 1.442695, %v3135_v22 }
 0x3b3   : > { %4567 = vpow2.f32 %v3170_v19 }
 0x3b4   : > { %4569 = vpow2.f32 %v3176_v13 }
 0x3b5   : > { %4571 = vpow2.f32 %v3172_v26 }
 0x3b8   : > { %v4558_v33 = vpop.eup %4557 }
 0x3b9   : > { %v4560_v41 = vpop.eup %4559 }
 0x3ba   : > { %v4562_v43 = vpop.eup %4561  ;;  %v4396_v36 = vpop.f32.mrb[248].mxu0 }
 0x3bb   : > { %v4564_v9 = vpop.eup %4563  ;;  %v3811_v28 = vpack.c.bf16 %v4562_v43, %v4558_v33  ;;  %v3044_v14 = vadd.f32 %v4396_v36, %v6350_v10  ;;  %v3035_v15 = vpop.f32.mrb[249].mxu0 }
 0x3bc   : > { %v4566_v53 = vpop.eup %4565  ;;  %v3806_v55 = vpack.c.bf16 %v4564_v9, %v4560_v41  ;;  %v3036_v61 = vadd.f32 %v6350_v10, %v3035_v15  ;;  %v4397_v16 = vpop.f32.mrb[250].mxu0 }
 0x3bd   : > { %v4568_v25 = vpop.eup %4567  ;;  %3883 = vst [vmem:[%s6365_s23 + $0x8] sm:$0xff] %v3811_v28   ;;  %v3232_v0 = vadd.f32 1.0, %v4566_v53  ;;  %v3140_v45 = vsub.f32 0.0, %v3044_v14  ;;  %v3047_v3 = vadd.f32 %v4397_v16, %v6350_v10  ;;  %v3038_v7 = vpop.f32.mrb[251].mxu0 }
 0x3be   : > { %v4570_v27 = vpop.eup %4569  ;;  %3807 = vst [vmem:[%s6365_s23] sm:$0xff] %v3806_v55   ;;  %v3230_v42 = vadd.f32 1.0, %v4568_v25  ;;  %v3138_v6 = vsub.f32 0.0, %v3036_v61  ;;  %v3039_v35 = vadd.f32 %v6350_v10, %v3038_v7 }
 0x3bf   : > { %v4572_v49 = vpop.eup %4571  ;;  %4573 = vrcp.f32 %v3232_v0  ;;  %v3233_v39 = vadd.f32 1.0, %v4570_v27  ;;  %v3182_v29 = vmul.f32 1.442695, %v3140_v45  ;;  %v3141_v18 = vsub.f32 0.0, %v3047_v3 }
 0x3c0   : > { %4575 = vrcp.f32 %v3230_v42  ;;  %v3231_v8 = vadd.f32 1.0, %v4572_v49  ;;  %v3178_v4 = vmul.f32 1.442695, %v3138_v6  ;;  %v3139_v56 = vsub.f32 0.0, %v3039_v35 }
 0x3c1   : > { %4577 = vrcp.f32 %v3233_v39  ;;  %v3184_v58 = vmul.f32 1.442695, %v3141_v18 }
 0x3c2   : > { %4579 = vrcp.f32 %v3231_v8  ;;  %v3180_v24 = vmul.f32 1.442695, %v3139_v56 }
 0x3c3   : > { %4581 = vpow2.f32 %v3182_v29 }
 0x3c4   : > { %4583 = vpow2.f32 %v3178_v4 }
 0x3c5   : > { %4585 = vpow2.f32 %v3184_v58 }
 0x3c6   : > { %4587 = vpow2.f32 %v3180_v24 }
 0x3c9   : > { %v4574_v30 = vpop.eup %4573 }
 0x3ca   : > { %v4576_v40 = vpop.eup %4575  ;;  %v4400_v47 = vpop.f32.mrb[252].mxu0 }
 0x3cb   : > { %v4578_v37 = vpop.eup %4577  ;;  %v3060_v38 = vadd.f32 %v4400_v47, %v6350_v10  ;;  %v3051_v34 = vpop.f32.mrb[253].mxu0 }
 0x3cc   : > { %v4580_v59 = vpop.eup %4579  ;;  %v3821_v31 = vpack.c.bf16 %v4578_v37, %v4574_v30  ;;  %v3052_v63 = vadd.f32 %v6350_v10, %v3051_v34  ;;  %v4401_v51 = vpop.f32.mrb[254].mxu0 }
 0x3cd   : > { %v4582_v2 = vpop.eup %4581  ;;  %v3816_v23 = vpack.c.bf16 %v4580_v59, %v4576_v40  ;;  %v3144_v46 = vsub.f32 0.0, %v3060_v38  ;;  %v3063_v48 = vadd.f32 %v4401_v51, %v6350_v10  ;;  %v3054_v21 = vpop.f32.mrb[255].mxu0 }
 0x3ce   : > { %v4584_v57 = vpop.eup %4583  ;;  %3885 = vst [vmem:[%s6365_s23 + $0x18] sm:$0xff] %v3821_v31   ;;  %v3236_v1 = vadd.f32 1.0, %v4582_v2  ;;  %v3142_v5 = vsub.f32 0.0, %v3052_v63  ;;  %v3055_v44 = vadd.f32 %v6350_v10, %v3054_v21 }
 0x3cf   : > { %v4586_v32 = vpop.eup %4585  ;;  %3884 = vst [vmem:[%s6365_s23 + $0x10] sm:$0xff] %v3816_v23   ;;  %v3234_v60 = vadd.f32 1.0, %v4584_v57  ;;  %v3145_v17 = vsub.f32 0.0, %v3063_v48  ;;  %v3190_v12 = vmul.f32 1.442695, %v3144_v46 }
 0x3d0   : > { %v4588_v52 = vpop.eup %4587  ;;  %4589 = vrcp.f32 %v3236_v1  ;;  %v3237_v54 = vadd.f32 1.0, %v4586_v32  ;;  %v3143_v20 = vsub.f32 0.0, %v3055_v44  ;;  %v3186_v50 = vmul.f32 1.442695, %v3142_v5 }
 0x3d1   : > { %4591 = vrcp.f32 %v3234_v60  ;;  %v3235_v11 = vadd.f32 1.0, %v4588_v52  ;;  %v3192_v62 = vmul.f32 1.442695, %v3145_v17 }
 0x3d2   : > { %4593 = vrcp.f32 %v3237_v54  ;;  %v3188_v19 = vmul.f32 1.442695, %v3143_v20 }
 0x3d3   : > { %4595 = vrcp.f32 %v3235_v11 }
 0x3d4   : > { %4597 = vpow2.f32 %v3190_v12 }
 0x3d5   : > { %4599 = vpow2.f32 %v3186_v50 }
 0x3d6   : > { %4601 = vpow2.f32 %v3192_v62 }
 0x3d7   : > { %4603 = vpow2.f32 %v3188_v19 }
 0x3da   : > { %v4590_v22 = vpop.eup %4589  ;;  %v4404_v13 = vpop.f32.mrb[0].mxu0 }
 0x3db   : > { %v4592_v26 = vpop.eup %4591  ;;  %v3076_v33 = vadd.f32 %v4404_v13, %v6350_v10  ;;  %v3067_v41 = vpop.f32.mrb[1].mxu0 }
 0x3dc   : > { %v4594_v43 = vpop.eup %4593  ;;  %v3068_v36 = vadd.f32 %v6350_v10, %v3067_v41  ;;  %v4405_v9 = vpop.f32.mrb[2].mxu0 }
 0x3dd   : > { %v4596_v28 = vpop.eup %4595  ;;  %v3831_v14 = vpack.c.bf16 %v4594_v43, %v4590_v22  ;;  %v3148_v15 = vsub.f32 0.0, %v3076_v33  ;;  %v3079_v53 = vadd.f32 %v4405_v9, %v6350_v10  ;;  %v3070_v55 = vpop.f32.mrb[3].mxu0 }
 0x3de   : > { %v4598_v61 = vpop.eup %4597  ;;  %v3826_v16 = vpack.c.bf16 %v4596_v28, %v4592_v26  ;;  %v3146_v25 = vsub.f32 0.0, %v3068_v36  ;;  %v3071_v0 = vadd.f32 %v6350_v10, %v3070_v55 }
 0x3df   : > { %v4600_v45 = vpop.eup %4599  ;;  %3887 = vst [vmem:[%s6365_s23 + $0x28] sm:$0xff] %v3831_v14   ;;  %v3240_v3 = vadd.f32 1.0, %v4598_v61  ;;  %v3149_v7 = vsub.f32 0.0, %v3079_v53  ;;  %v3198_v39 = vmul.f32 1.442695, %v3148_v15 }
 0x3e0   : > { %v4602_v27 = vpop.eup %4601  ;;  %3886 = vst [vmem:[%s6365_s23 + $0x20] sm:$0xff] %v3826_v16   ;;  %v3238_v42 = vadd.f32 1.0, %v4600_v45  ;;  %v3147_v6 = vsub.f32 0.0, %v3071_v0  ;;  %v3194_v18 = vmul.f32 1.442695, %v3146_v25 }
 0x3e1   : > { %v4604_v35 = vpop.eup %4603  ;;  %4605 = vrcp.f32 %v3240_v3  ;;  %v3241_v49 = vadd.f32 1.0, %v4602_v27  ;;  %v3200_v8 = vmul.f32 1.442695, %v3149_v7 }
 0x3e2   : > { %4607 = vrcp.f32 %v3238_v42  ;;  %v3239_v29 = vadd.f32 1.0, %v4604_v35  ;;  %v3196_v4 = vmul.f32 1.442695, %v3147_v6 }
 0x3e3   : > { %4609 = vrcp.f32 %v3241_v49 }
 0x3e4   : > { %4611 = vrcp.f32 %v3239_v29 }
 0x3e5   : > { %4613 = vpow2.f32 %v3198_v39 }
 0x3e6   : > { %4615 = vpow2.f32 %v3194_v18 }
 0x3e7   : > { %4617 = vpow2.f32 %v3200_v8 }
 0x3e8   : > { %4619 = vpow2.f32 %v3196_v4 }
 0x3ea   : > { %v4408_v56 = vpop.f32.mrb[4].mxu0 }
 0x3eb   : > { %v4606_v58 = vpop.eup %4605  ;;  %v3092_v24 = vadd.f32 %v4408_v56, %v6350_v10  ;;  %v3083_v30 = vpop.f32.mrb[5].mxu0 }
 0x3ec   : > { %v4608_v40 = vpop.eup %4607  ;;  %v3084_v47 = vadd.f32 %v6350_v10, %v3083_v30  ;;  %v4409_v37 = vpop.f32.mrb[6].mxu0 }
 0x3ed   : > { %v4610_v38 = vpop.eup %4609  ;;  %v3152_v34 = vsub.f32 0.0, %v3092_v24  ;;  %v3095_v59 = vadd.f32 %v4409_v37, %v6350_v10  ;;  %v3086_v31 = vpop.f32.mrb[7].mxu0 }
 0x3ee   : > { %v4612_v63 = vpop.eup %4611  ;;  %v3841_v51 = vpack.c.bf16 %v4610_v38, %v4606_v58  ;;  %v3150_v2 = vsub.f32 0.0, %v3084_v47  ;;  %v3087_v23 = vadd.f32 %v6350_v10, %v3086_v31 }
 0x3ef   : > { %v4614_v46 = vpop.eup %4613  ;;  %v3836_v48 = vpack.c.bf16 %v4612_v63, %v4608_v40  ;;  %v3206_v21 = vmul.f32 1.442695, %v3152_v34  ;;  %v3153_v57 = vsub.f32 0.0, %v3095_v59 }
 0x3f0   : > { %v4616_v1 = vpop.eup %4615  ;;  %3889 = vst [vmem:[%s6365_s23 + $0x38] sm:$0xff] %v3841_v51   ;;  %v3244_v5 = vadd.f32 1.0, %v4614_v46  ;;  %v3151_v44 = vsub.f32 0.0, %v3087_v23  ;;  %v3202_v54 = vmul.f32 1.442695, %v3150_v2 }
 0x3f1   : > { %v4618_v32 = vpop.eup %4617  ;;  %3888 = vst [vmem:[%s6365_s23 + $0x30] sm:$0xff] %v3836_v48   ;;  %v3242_v60 = vadd.f32 1.0, %v4616_v1  ;;  %4621 = vpow2.f32 %v3206_v21  ;;  %v3208_v20 = vmul.f32 1.442695, %v3153_v57 }
 0x3f2   : > { %v4620_v17 = vpop.eup %4619  ;;  %4623 = vrcp.f32 %v3244_v5  ;;  %v3245_v52 = vadd.f32 1.0, %v4618_v32  ;;  %v3204_v11 = vmul.f32 1.442695, %v3151_v44 }
 0x3f3   : > { %4625 = vrcp.f32 %v3242_v60  ;;  %v3243_v12 = vadd.f32 1.0, %v4620_v17 }
 0x3f4   : > { %4627 = vrcp.f32 %v3245_v52 }
 0x3f5   : > { %4629 = vrcp.f32 %v3243_v12 }
 0x3f6   : > { %4631 = vpow2.f32 %v3202_v54 }
 0x3f7   : > { %4633 = vpow2.f32 %v3208_v20 }
 0x3f8   : > { %4635 = vpow2.f32 %v3204_v11 }
 0x3fa   : > { %v4412_v50 = vpop.f32.mrb[8].mxu0 }
 0x3fb   : > { %v4622_v62 = vpop.eup %4621  ;;  %v3108_v19 = vadd.f32 %v4412_v50, %v6350_v10  ;;  %v3099_v22 = vpop.f32.mrb[9].mxu0 }
 0x3fc   : > { %v4624_v13 = vpop.eup %4623  ;;  %v3248_v26 = vadd.f32 1.0, %v4622_v62  ;;  %v3100_v33 = vadd.f32 %v6350_v10, %v3099_v22  ;;  %v4413_v41 = vpop.f32.mrb[10].mxu0 }
 0x3fd   : > { %v4626_v43 = vpop.eup %4625  ;;  %v3156_v36 = vsub.f32 0.0, %v3108_v19  ;;  %v3111_v9 = vadd.f32 %v4413_v41, %v6350_v10  ;;  %v3102_v28 = vpop.f32.mrb[11].mxu0 }
 0x3fe   : > { %v4628_v14 = vpop.eup %4627  ;;  %v3154_v15 = vsub.f32 0.0, %v3100_v33  ;;  %v3103_v53 = vadd.f32 %v6350_v10, %v3102_v28  ;;  %4637 = vrcp.f32 %v3248_v26 }
 0x3ff   : > { %v4630_v55 = vpop.eup %4629  ;;  %v3851_v61 = vpack.c.bf16 %v4628_v14, %v4624_v13  ;;  %v3214_v16 = vmul.f32 1.442695, %v3156_v36  ;;  %v3157_v25 = vsub.f32 0.0, %v3111_v9 }
 0x400   : > { %v4632_v0 = vpop.eup %4631  ;;  %v3846_v45 = vpack.c.bf16 %v4630_v55, %v4626_v43  ;;  %v3210_v3 = vmul.f32 1.442695, %v3154_v15  ;;  %v3155_v7 = vsub.f32 0.0, %v3103_v53 }
 0x401   : > { %v4634_v27 = vpop.eup %4633  ;;  %3891 = vst [vmem:[%s6365_s23 + $0x48] sm:$0xff] %v3851_v61   ;;  %v3246_v42 = vadd.f32 1.0, %v4632_v0  ;;  %4639 = vpow2.f32 %v3214_v16  ;;  %v3216_v49 = vmul.f32 1.442695, %v3157_v25 }
 0x402   : > { %v4636_v6 = vpop.eup %4635  ;;  %3890 = vst [vmem:[%s6365_s23 + $0x40] sm:$0xff] %v3846_v45   ;;  %v3249_v35 = vadd.f32 1.0, %v4634_v27  ;;  %4641 = vpow2.f32 %v3210_v3  ;;  %v3212_v29 = vmul.f32 1.442695, %v3155_v7 }
 0x403   : > { %4643 = vrcp.f32 %v3246_v42  ;;  %v3247_v39 = vadd.f32 1.0, %v4636_v6 }
 0x404   : > { %4645 = vrcp.f32 %v3249_v35 }
 0x405   : > { %4647 = vrcp.f32 %v3247_v39 }
 0x406   : > { %4649 = vpow2.f32 %v3216_v49 }
 0x407   : > { %4651 = vpow2.f32 %v3212_v29 }
 0x408   : > { %v4638_v18 = vpop.eup %4637 }
 0x40a   : > { %v4416_v8 = vpop.f32.mrb[12].mxu0 }
 0x40b   : > { %v4640_v4 = vpop.eup %4639  ;;  %v3124_v56 = vadd.f32 %v4416_v8, %v6350_v10  ;;  %v3115_v58 = vpop.f32.mrb[13].mxu0 }
 0x40c   : > { %v4642_v24 = vpop.eup %4641  ;;  %v3252_v30 = vadd.f32 1.0, %v4640_v4  ;;  %v3116_v40 = vadd.f32 %v6350_v10, %v3115_v58  ;;  %v4417_v47 = vpop.f32.mrb[14].mxu0 }
 0x40d   : > { %v4644_v37 = vpop.eup %4643  ;;  %v3250_v38 = vadd.f32 1.0, %v4642_v24  ;;  %v3160_v34 = vsub.f32 0.0, %v3124_v56  ;;  %v3127_v59 = vadd.f32 %v4417_v47, %v6350_v10  ;;  %v3118_v31 = vpop.f32.mrb[15].mxu0 }
 0x40e   : > { %v4646_v63 = vpop.eup %4645  ;;  %v3158_v51 = vsub.f32 0.0, %v3116_v40  ;;  %v3119_v2 = vadd.f32 %v6350_v10, %v3118_v31  ;;  %4653 = vrcp.f32 %v3252_v30 }
 0x40f   : > { %v4648_v23 = vpop.eup %4647  ;;  %v3861_v46 = vpack.c.bf16 %v4646_v63, %v4638_v18  ;;  %v3222_v48 = vmul.f32 1.442695, %v3160_v34  ;;  %v3161_v21 = vsub.f32 0.0, %v3127_v59  ;;  %4655 = vrcp.f32 %v3250_v38 }
 0x410   : > { %v4650_v57 = vpop.eup %4649  ;;  %v3856_v1 = vpack.c.bf16 %v4648_v23, %v4644_v37  ;;  %v3218_v5 = vmul.f32 1.442695, %v3158_v51  ;;  %v3159_v44 = vsub.f32 0.0, %v3119_v2 }
 0x411   : > { %v4652_v32 = vpop.eup %4651  ;;  %3893 = vst [vmem:[%s6365_s23 + $0x58] sm:$0xff] %v3861_v46   ;;  %v3253_v60 = vadd.f32 1.0, %v4650_v57  ;;  %4657 = vpow2.f32 %v3222_v48  ;;  %v3224_v17 = vmul.f32 1.442695, %v3161_v21 }
 0x412   : > { %3892 = vst [vmem:[%s6365_s23 + $0x50] sm:$0xff] %v3856_v1   ;;  %v3251_v52 = vadd.f32 1.0, %v4652_v32  ;;  %4659 = vpow2.f32 %v3218_v5  ;;  %v3220_v10 = vmul.f32 1.442695, %v3159_v44 }
 0x413   : > { %4661 = vrcp.f32 %v3253_v60 }
 0x414   : > { %4663 = vrcp.f32 %v3251_v52 }
 0x415   : > { %4665 = vpow2.f32 %v3224_v17 }
 0x416   : > { %4667 = vpow2.f32 %v3220_v10 }
 0x418   : > { %v4654_v54 = vpop.eup %4653 }
 0x419   : > { %v4656_v12 = vpop.eup %4655 }
 0x41b   : > { %v4658_v20 = vpop.eup %4657 }
 0x41c   : > { %v4660_v11 = vpop.eup %4659  ;;  %v3256_v50 = vadd.f32 1.0, %v4658_v20 }
 0x41d   : > { %v4662_v62 = vpop.eup %4661  ;;  %v3254_v19 = vadd.f32 1.0, %v4660_v11 }
 0x41e   : > { %v4664_v22 = vpop.eup %4663  ;;  %v3871_v13 = vpack.c.bf16 %v4662_v62, %v4654_v54  ;;  %4669 = vrcp.f32 %v3256_v50 }
 0x41f   : > { %v4666_v26 = vpop.eup %4665  ;;  %v3866_v33 = vpack.c.bf16 %v4664_v22, %v4656_v12  ;;  %4671 = vrcp.f32 %v3254_v19 }
 0x420   : > { %v4668_v41 = vpop.eup %4667  ;;  %3895 = vst [vmem:[%s6365_s23 + $0x68] sm:$0xff] %v3871_v13   ;;  %v3257_v43 = vadd.f32 1.0, %v4666_v26 }
 0x421   : > { %3894 = vst [vmem:[%s6365_s23 + $0x60] sm:$0xff] %v3866_v33   ;;  %v3255_v36 = vadd.f32 1.0, %v4668_v41 }
 0x422   : > { %4673 = vrcp.f32 %v3257_v43 }
 0x423   : > { %4675 = vrcp.f32 %v3255_v36 }
 0x428   : > { %v4670_v9 = vpop.eup %4669 }
 0x429   : > { %v4672_v28 = vpop.eup %4671 }
 0x42c   : > { %v4674_v14 = vpop.eup %4673 }
 0x42d   : > { %v4676_v15 = vpop.eup %4675  ;;  %v3881_v53 = vpack.c.bf16 %v4674_v14, %v4670_v9 }
 0x42e   : > { %v3876_v55 = vpack.c.bf16 %v4676_v15, %v4672_v28 }
 0x42f   : > { %3897 = vst [vmem:[%s6365_s23 + $0x78] sm:$0xff] %v3881_v53  }
 0x430   : > { %3896 = vst [vmem:[%s6365_s23 + $0x70] sm:$0xff] %v3876_v55  }
 0x431   : > { %4719 = shalt.err (!%p4716_p7)
}
 0x432   : > { %s4720_s8 = scalar_lea.hbm %s6408_s18, 2048  ;;  %s4724_s22 = scalar_lea.hbm %s6464_s7, 4096 }
 0x433   : > { %p4721_p8 = scmp.ne.s32.totalorder %s6408_s18, %s4720_s8  ;;  %p4725_p1 = scmp.lt.u32.totalorder %s6408_s18, %s6464_s7 }
 0x434   : > { %p4726_p0 = scmp.lt.u32.totalorder %s4724_s22, %s4720_s8  ;;  %p4728_p6 = scmp.lt.u32.totalorder %s4720_s8, %s6408_s18 }
 0x435   : > { %p4722_p11 = pnand %p4721_p8, %p6475_p9 }
 0x436   : > { %p4727_p5 = por %p4726_p0, %p4725_p1 }
 0x437   : > { %p4723_p13 = pneg %p4722_p11 }
 0x438   : > { %p4729_p10 = por %p4728_p6, %p4727_p5 }
 0x43a   : > { %p4730_p12 = pnand %p4729_p10, %p4723_p13 }
 0x43c   : > { %4733 = shalt.err (!%p4730_p12)
}
 0x43d   : > { %s4779_s14 = smov 64   ;;  %s4780_s17 = smov 4  }
 0x43e   : > { %4426 = dma.vmem_to_hbm [thread:$0]  (%p6475_p9), %s6410_s9, 2048, %s6408_s18, %s6416_s28, %s4779_s14, %s4779_s14, %s4780_s17  }
 0x43f PF: > { %p4438_p2 = scmp.ge.s32.totalorder %s4772_s27, 2  ;;  %s3511_s16 = sand.u32 1, %s4760_s24  }
 0x440   : > { %p6476_p3 = scmp.ne.s32.totalorder %s6469_s12, 0  ;;  %s3512_s15 = scalar_lea.sflag [#allocation4], %s3511_s16 }
 0x442   : > { %p4433_p4 = pnand %p4438_p2, %p6476_p3 }
 0x444   : > { %4755 = dma.done.wait (!%p4433_p4), %s3512_s15, 2048  }
 0x445   : > { %4757 = vsyncadd (!%p4433_p4), %s3512_s15, 4294965248  ;;  %p18_p7 = scmp.ge.s32.totalorder %s4846_s30, 4   ;;  %s6477_s24 = smov %s4764_s25 }
 0x446   : > { %s6478_s25 = smov %s4768_s26  ;;  %s6479_s26 = smov %s4857_s10 }
 0x447   : > { %s6480_s27 = smov %s4846_s30  ;;  %20 = sbr.rel (!%p18_p7) target bundleno = 4 (0x4), region = 88 }
 0x44e   :  { %3517 = vsyncpa [#allocation3], 1 }
 0x44f   :  { %3519 = vsyncpa [#allocation3 + $0x1], 1 }
 0x450   :  { %3520 = vsyncpa [#allocation4], 1 }
 0x451   :  { %3522 = vsyncpa [#allocation4 + $0x1], 1 }

</bundles_post_ra>
